<compile_context>
chip_gen: v7x
topology: tpu7x:2x2x1
jax: 0.10.0
libtpu: 0.0.40
codegen_flags: <defaults>
</compile_context>

<pallas_src>
import functools
import math

import jax
import jax.numpy as jnp
from jax import lax
from jax.experimental import pallas as pl
from jax.experimental.pallas import tpu as pltpu

KSIZE = 7
PAD = 3
EPS = 1e-6
LANE = 128
_INV_SQRT2 = 1.0 / math.sqrt(2.0)
_VMEM_TILE_BUDGET = 16 * 1024 * 1024   # soft budget for the per-tile working set


def _gelu(x, approx):
    if approx:
        # tanh approximation -> transcendental goes to the EUP slot (off the VALU path)
        c = math.sqrt(2.0 / math.pi)
        return 0.5 * x * (1.0 + jnp.tanh(c * (x + 0.044715 * x * x * x)))
    return 0.5 * x * (1.0 + lax.erf(x * _INV_SQRT2))        # nn.GELU default (exact erf)


def _round_up(v, m):
    return ((v + m - 1) // m) * m


def _pick_row_tile(H, W, target_rows, min_tiles, pix_bytes, budget_bytes):
    """Smallest divisor th of H with th*W >= target_rows, th*W % 8 == 0 (or th == H),
    at least `min_tiles` tiles when possible, and a bounded per-tile working set."""
    cands = [th for th in range(1, H + 1)
             if H % th == 0 and ((th * W) % 8 == 0 or th == H)]
    def fits(th):
        return th * W * pix_bytes <= budget_bytes
    for tiles_req in (min_tiles, 1):
        for th in cands:
            if th * W >= target_rows and H // th >= tiles_req and fits(th):
                return th
    fitting = [th for th in cands if fits(th)]
    return fitting[-1] if fitting else cands[0]


def _pick_hidden_tile(C4p, cap):
    """Hidden-dim chunk: full if small, else the largest multiple of 128 dividing C4p."""
    cap = max(LANE, (cap // LANE) * LANE)
    if C4p <= cap:
        return C4p
    d = cap
    while d >= LANE:
        if C4p % d == 0:
            return d
        d -= LANE
    return C4p


# ----------------------------------------------------------------------------------------
# Fused kernel.  Grid = (N, n_h, n_k); the hidden-chunk axis k (last) is the reduction axis.
#   xp_hbm : (N, H+6, W+6, Cp)  padded NHWC input, left in HBM (pl.ANY); halo strip DMA'd
#   wdw    : (7, 7, Cp)   depthwise weights        bdw : (1, Cp)
#   lnw/lnb: (1, Cp)      LayerNorm affine
#   w1     : (Cp, tk)     chunk of pwconv1         b1  : (1, tk)
#   w2     : (tk, Cp)     chunk of pwconv2         b2  : (1, Cp)
#   g      : (1, Cp)      layer-scale gamma
#   o_ref  : (1, th*W, Cp)  flat, lane/sublane-dense output block
#   strip_sc : (th+6, W+6, Cp)  halo strip (input dtype)       [VMEM scratch]
#   dw_sc    : (th, W, Cp)      f32 dwconv accumulator         [VMEM scratch]
#   xn_sc    : (th*W, Cp)       LayerNormed rows (MXU dtype)   [VMEM scratch]
#   acc_sc   : (th*W, Cp)       f32 MLP accumulator            [VMEM scratch]
# ----------------------------------------------------------------------------------------
def _convnext_kernel(xp_hbm, wdw_ref, bdw_ref, lnw_ref, lnb_ref,
                     w1_ref, b1_ref, w2_ref, b2_ref, g_ref,
                     o_ref, strip_sc, dw_sc, xn_sc, acc_sc, dma_sem,
                     *, c_true, approx_gelu):
    th = strip_sc.shape[0] - 2 * PAD
    Wt = strip_sc.shape[1] - 2 * PAD
    rows, Cp = acc_sc.shape
    n = pl.program_id(0)
    t = pl.program_id(1)
    k = pl.program_id(2)

    # ---- phase 1 (k == 0): halo-strip DMA + depthwise 7x7 conv + LayerNorm --------------
    @pl.when(k == 0)
    def _dwconv_and_norm():
        row0 = t * th                                        # first padded row of this tile
        cp_ = pltpu.make_async_copy(
            xp_hbm.at[n, pl.ds(row0, th + 2 * PAD)], strip_sc, dma_sem)
        cp_.start()
        cp_.wait()

        # Explicit f32 scratch accumulator: one RMW pass per row offset i bounds the live
        # range instead of carrying a (th, W, Cp) f32 value across all 49 taps.
        dw_sc[...] = (jnp.zeros((th, Wt, Cp), jnp.float32)
                      + bdw_ref[...].astype(jnp.float32))
        for i in range(KSIZE):
            strip = strip_sc[i:i + th].astype(jnp.float32)   # (th, W+6, Cp); major-axis slice
            part = strip[:, 0:Wt, :] * wdw_ref[i, 0, :].astype(jnp.float32)
            for j in range(1, KSIZE):
                # NOTE: sublane-offset width shifts; if the bundle dump shows relayouts,
                # switch these to pltpu.roll on the (W+6) axis (XLU slot).
                part = part + strip[:, j:j + Wt, :] * wdw_ref[i, j, :].astype(jnp.float32)
            dw_sc[...] = dw_sc[...] + part

        y = dw_sc[...].reshape(rows, Cp)
        inv_c = 1.0 / c_true
        u = jnp.sum(y, axis=-1, keepdims=True) * inv_c       # padded lanes of y are exactly 0
        d = y - u
        if c_true != Cp:
            lane = lax.broadcasted_iota(jnp.int32, (1, Cp), 1)
            d = jnp.where(lane < c_true, d, 0.0)             # keep padded lanes out of var
        var = jnp.sum(d * d, axis=-1, keepdims=True) * inv_c
        xn = d * lax.rsqrt(var + EPS)
        xn = xn * lnw_ref[...].astype(jnp.float32) + lnb_ref[...].astype(jnp.float32)
        xn_sc[...] = xn.astype(xn_sc.dtype)                  # MXU operand dtype (bf16-ready)

    # ---- phase 2 (every k): one hidden chunk of Linear -> GELU -> Linear ------------------
    h = jnp.dot(xn_sc[...], w1_ref[...], preferred_element_type=jnp.float32)
    h = h + b1_ref[...].astype(jnp.float32)
    h = _gelu(h, approx_gelu)
    z = jnp.dot(h.astype(w2_ref.dtype), w2_ref[...], preferred_element_type=jnp.float32)

    @pl.when(k == 0)
    def _init_acc():
        acc_sc[...] = z

    @pl.when(k > 0)
    def _accumulate():
        acc_sc[...] = acc_sc[...] + z

    # ---- phase 3 (last k): residual + bias + layer-scale, single lane-dense store ---------
    @pl.when(k == pl.num_programs(2) - 1)
    def _store():
        res = strip_sc[PAD:PAD + th, PAD:PAD + Wt, :].astype(jnp.float32).reshape(rows, Cp)
        out = res + g_ref[...].astype(jnp.float32) * (acc_sc[...]
                                                      + b2_ref[...].astype(jnp.float32))
        o_ref[...] = out.reshape(o_ref.shape).astype(o_ref.dtype)


# ----------------------------------------------------------------------------------------
# Wrapper: NCHW in / NCHW out (PyTorch convention).
# ----------------------------------------------------------------------------------------
def convnext_block(x_nchw, params, *, target_rows=512, hidden_tile=1024, approx_gelu=False):
    N, C, H, W = x_nchw.shape
    C4 = params["w1"].shape[1]
    Cp = _round_up(C, LANE)
    C4p = _round_up(C4, LANE)
    compute_dtype = params["w1"].dtype
    xbytes = jnp.dtype(x_nchw.dtype).itemsize
    cbytes = jnp.dtype(compute_dtype).itemsize

    # --- layout: NHWC + spatial halo pad + zero-pad channels to 128 lanes ------------------
    x_nhwc = jnp.transpose(x_nchw, (0, 2, 3, 1))
    xp = jnp.pad(x_nhwc, ((0, 0), (PAD, PAD), (PAD, PAD), (0, Cp - C)))

    def pad_last(a, tgt):
        return jnp.pad(a, [(0, 0)] * (a.ndim - 1) + [(0, tgt - a.shape[-1])])

    w_dw = pad_last(params["w_dw"], Cp)
    b_dw = pad_last(params["b_dw"], Cp)
    ln_w = pad_last(params["ln_w"], Cp)
    ln_b = pad_last(params["ln_b"], Cp)
    b2 = pad_last(params["b2"], Cp)
    gamma = pad_last(params["gamma"], Cp)
    w1 = jnp.pad(params["w1"], ((0, Cp - C), (0, C4p - C4)))
    b1 = pad_last(params["b1"], C4p)
    w2 = jnp.pad(params["w2"], ((0, C4p - C4), (0, Cp - C)))

    # --- tiling -----------------------------------------------------------------------------
    pix_bytes = Cp * (xbytes + 4 + cbytes + 4 + 2 * xbytes)   # strip + dw + xn + acc + 2x out
    min_tiles = 2 if N == 1 else 1                            # keep both v7x cores busy
    th = _pick_row_tile(H, W, target_rows, min_tiles, pix_bytes, _VMEM_TILE_BUDGET)
    tk = _pick_hidden_tile(C4p, hidden_tile)
    rows = th * W
    n_h = H // th
    n_k = C4p // tk

    # --- explicit VMEM limit, sized from the actual buffers ---------------------------------
    scratch_bytes = ((th + 2 * PAD) * (W + 2 * PAD) * Cp * xbytes   # halo strip
                     + th * W * Cp * 4                               # dwconv f32 scratch
                     + rows * Cp * cbytes                            # xn
                     + rows * Cp * 4)                                # acc
    stream_bytes = 2 * (rows * Cp * xbytes                           # out block (double buf)
                        + (Cp * tk + tk * Cp + tk
                           + (KSIZE * KSIZE + 6) * Cp) * cbytes)     # weight/vector blocks
    vmem_limit = int(min(max(2 * (scratch_bytes + stream_bytes), 32 * 1024 * 1024),
                         64 * 1024 * 1024))

    kernel = functools.partial(_convnext_kernel, c_true=C, approx_gelu=approx_gelu)

    out_flat = pl.pallas_call(
        kernel,
        out_shape=jax.ShapeDtypeStruct((N, H * W, Cp), x_nchw.dtype),
        grid_spec=pltpu.PrefetchScalarGridSpec(
            num_scalar_prefetch=0,
            grid=(N, n_h, n_k),
            in_specs=[
                # padded image stays in HBM; only a halo strip is DMA'd per row tile
                pl.BlockSpec(memory_space=pl.ANY),
                pl.BlockSpec((KSIZE, KSIZE, Cp), lambda n, t, k: (0, 0, 0)),
                pl.BlockSpec((1, Cp), lambda n, t, k: (0, 0)),
                pl.BlockSpec((1, Cp), lambda n, t, k: (0, 0)),
                pl.BlockSpec((1, Cp), lambda n, t, k: (0, 0)),
                pl.BlockSpec((Cp, tk), lambda n, t, k: (0, k)),      # pwconv1 chunk
                pl.BlockSpec((1, tk), lambda n, t, k: (0, k)),
                pl.BlockSpec((tk, Cp), lambda n, t, k: (k, 0)),      # pwconv2 chunk
                pl.BlockSpec((1, Cp), lambda n, t, k: (0, 0)),
                pl.BlockSpec((1, Cp), lambda n, t, k: (0, 0)),
            ],
            out_specs=pl.BlockSpec((1, rows, Cp), lambda n, t, k: (n, t, 0)),
            scratch_shapes=[
                pltpu.VMEM((th + 2 * PAD, W + 2 * PAD, Cp), x_nchw.dtype),  # halo strip
                pltpu.VMEM((th, W, Cp), jnp.float32),                       # dwconv acc
                pltpu.VMEM((rows, Cp), compute_dtype),                      # LN rows (MXU in)
                pltpu.VMEM((rows, Cp), jnp.float32),                        # MLP accumulator
                pltpu.SemaphoreType.DMA(()),
            ],
        ),
        compiler_params=pltpu.CompilerParams(
            dimension_semantics=("parallel", "parallel", "arbitrary"),
            vmem_limit_bytes=vmem_limit),
    )(xp, w_dw, b_dw, ln_w, ln_b, w1, b1, w2, b2, gamma)

    out = out_flat.reshape(N, H, W, Cp)[..., :C]
    return jnp.transpose(out, (0, 3, 1, 2))                  # -> NCHW


# ----------------------------------------------------------------------------------------
# Pure-JAX reference (correctness check; exact erf GELU, f32, HIGHEST matmul precision).
# ----------------------------------------------------------------------------------------
def convnext_block_ref(x_nchw, params):
    N, C, H, W = x_nchw.shape
    x = jnp.transpose(x_nchw, (0, 2, 3, 1)).astype(jnp.float32)
    xp = jnp.pad(x, ((0, 0), (PAD, PAD), (PAD, PAD), (0, 0)))
    y = jnp.zeros_like(x) + params["b_dw"][0]
    for i in range(KSIZE):
        for j in range(KSIZE):
            y = y + xp[:, i:i + H, j:j + W, :] * params["w_dw"][i, j, :]
    u = jnp.mean(y, axis=-1, keepdims=True)
    d = y - u
    var = jnp.mean(d * d, axis=-1, keepdims=True)
    xn = d * lax.rsqrt(var + EPS) * params["ln_w"][0] + params["ln_b"][0]
    h = jnp.dot(xn.reshape(-1, C), params["w1"],
                precision=lax.Precision.HIGHEST) + params["b1"][0]
    h = _gelu(h, approx=False)
    z = jnp.dot(h, params["w2"], precision=lax.Precision.HIGHEST) + params["b2"][0]
    z = (z * params["gamma"][0]).reshape(N, H, W, C)
    return jnp.transpose(x + z, (0, 3, 1, 2))


def _make_params(key, C, dtype=jnp.float32):
    C4 = 4 * C
    ks = jax.random.split(key, 10)
    p = {
        # depthwise conv: PyTorch weight (C,1,7,7) stored here as (7,7,C)
        "w_dw": 0.1 * jax.random.normal(ks[0], (KSIZE, KSIZE, C), jnp.float32),
        "b_dw": 0.1 * jax.random.normal(ks[1], (1, C), jnp.float32),
        "ln_w": 1.0 + 0.1 * jax.random.normal(ks[2], (1, C), jnp.float32),
        "ln_b": 0.1 * jax.random.normal(ks[3], (1, C), jnp.float32),
        # Linear weights stored pre-transposed: y = x @ w + b
        "w1": 0.1 * jax.random.normal(ks[4], (C, C4), jnp.float32),
        "b1": 0.1 * jax.random.normal(ks[5], (1, C4), jnp.float32),
        "w2": 0.1 * jax.random.normal(ks[6], (C4, C), jnp.float32),
        "b2": 0.1 * jax.random.normal(ks[7], (1, C), jnp.float32),
        # PyTorch init is 1e-6; larger gamma so the test exercises the MLP branch.
        "gamma": 0.25 + 0.05 * jax.random.normal(ks[8], (1, C), jnp.float32),
    }
    return jax.tree_util.tree_map(lambda a: a.astype(dtype), p)
    # drop_path = 0.0 -> Identity; nothing to compute.


# ----------------------------------------------------------------------------------------
# Main
# ----------------------------------------------------------------------------------------
if __name__ == "__main__":
    key = jax.random.PRNGKey(0)
    k_x1, k_p1, k_x2, k_p2 = jax.random.split(key, 4)

    # --- test 1: f32 params, 2 samples, 2 row tiles per sample (halo logic), C=4 -----------
    N, C, H, W = 2, 4, 16, 16
    x1 = jax.random.normal(k_x1, (N, C, H, W), jnp.float32)
    p1 = _make_params(k_p1, C, jnp.float32)
    fn1 = jax.jit(lambda xx, pp: convnext_block(xx, pp, target_rows=128))
    out1 = jax.block_until_ready(fn1(x1, p1))
    ref1 = jax.block_until_ready(convnext_block_ref(x1, p1))
    assert out1.shape == (N, C, H, W)
    assert jnp.allclose(out1, ref1, atol=2e-3, rtol=2e-3), \
        f"f32 mismatch: {float(jnp.max(jnp.abs(out1 - ref1)))}"

    # --- test 2: bf16 params (bf16 MXU matmuls, f32 elementwise), tanh-approx GELU ----------
    p1_bf16 = jax.tree_util.tree_map(lambda a: a.astype(jnp.bfloat16), p1)
    fn2 = jax.jit(lambda xx, pp: convnext_block(xx, pp, target_rows=128, approx_gelu=True))
    out2 = jax.block_until_ready(fn2(x1, p1_bf16))
    assert out2.shape == (N, C, H, W)
    assert jnp.allclose(out2.astype(jnp.float32), ref1, atol=5e-2, rtol=5e-2), \
        f"bf16 mismatch: {float(jnp.max(jnp.abs(out2.astype(jnp.float32) - ref1)))}"

    # --- test 3: N=1 (forces >=2 row tiles for megacore), C=64 -> 2 hidden chunks (k>0 path)
    N3, C3, H3, W3 = 1, 64, 8, 8
    x3 = jax.random.normal(k_x2, (N3, C3, H3, W3), jnp.float32)
    p3 = _make_params(k_p2, C3, jnp.float32)
    fn3 = jax.jit(lambda xx, pp: convnext_block(xx, pp, target_rows=32, hidden_tile=128))
    out3 = jax.block_until_ready(fn3(x3, p3))
    ref3 = jax.block_until_ready(convnext_block_ref(x3, p3))
    assert out3.shape == (N3, C3, H3, W3)
    assert jnp.allclose(out3, ref3, atol=2e-2, rtol=2e-2), \
        f"multi-chunk mismatch: {float(jnp.max(jnp.abs(out3 - ref3)))}"

    print("KERNEL_OK")
</pallas_src>

<mosaic_0001>
module attributes {stable_mosaic.version = 11 : i64} {
  func.func @_convnext_kernel(%arg0: i32, %arg1: i32, %arg2: i32, %arg3: memref<2x22x22x128xf32, #tpu.memory_space<any>>, %arg4: memref<7x7x128xf32, #tpu.memory_space<vmem>>, %arg5: memref<1x128xf32, #tpu.memory_space<vmem>>, %arg6: memref<1x128xf32, #tpu.memory_space<vmem>>, %arg7: memref<1x128xf32, #tpu.memory_space<vmem>>, %arg8: memref<128x128xf32, #tpu.memory_space<vmem>>, %arg9: memref<1x128xf32, #tpu.memory_space<vmem>>, %arg10: memref<128x128xf32, #tpu.memory_space<vmem>>, %arg11: memref<1x128xf32, #tpu.memory_space<vmem>>, %arg12: memref<1x128xf32, #tpu.memory_space<vmem>>, %arg13: memref<1x128x128xf32, #tpu.memory_space<vmem>>, %arg14: memref<14x22x128xf32, #tpu.memory_space<vmem>>, %arg15: memref<8x16x128xf32, #tpu.memory_space<vmem>>, %arg16: memref<128x128xf32, #tpu.memory_space<vmem>>, %arg17: memref<128x128xf32, #tpu.memory_space<vmem>>, %arg18: memref<!tpu.dma_semaphore, #tpu.memory_space<semaphore_mem>>) attributes {dimension_semantics = [#tpu.dimension_semantics<parallel>, #tpu.dimension_semantics<parallel>, #tpu.dimension_semantics<arbitrary>], iteration_bounds = array<i64: 2, 2, 1>, scalar_prefetch = 0 : i64, scratch_operands = 5 : i64, tpu.core_type = #tpu.core_type<tc>, window_params = [{}, {pipeline_mode = #tpu.pipeline_mode<synchronous>, transform_indices = @transform_1, window_bounds = array<i64: 7, 7, 128>}, {pipeline_mode = #tpu.pipeline_mode<synchronous>, transform_indices = @transform_2, window_bounds = array<i64: 1, 128>}, {pipeline_mode = #tpu.pipeline_mode<synchronous>, transform_indices = @transform_3, window_bounds = array<i64: 1, 128>}, {pipeline_mode = #tpu.pipeline_mode<synchronous>, transform_indices = @transform_4, window_bounds = array<i64: 1, 128>}, {transform_indices = @transform_5, window_bounds = array<i64: 128, 128>}, {transform_indices = @transform_6, window_bounds = array<i64: 1, 128>}, {transform_indices = @transform_7, window_bounds = array<i64: 128, 128>}, {pipeline_mode = #tpu.pipeline_mode<synchronous>, transform_indices = @transform_8, window_bounds = array<i64: 1, 128>}, {pipeline_mode = #tpu.pipeline_mode<synchronous>, transform_indices = @transform_9, window_bounds = array<i64: 1, 128>}, {transform_indices = @transform_10, window_bounds = array<i64: 1, 128, 128>}]} {
    %c0_i32 = arith.constant 0 : i32
    %0 = arith.cmpi eq, %arg2, %c0_i32 : i32
    %1 = arith.extui %0 : i1 to i32
    %c0_i32_0 = arith.constant 0 : i32
    %2 = arith.cmpi ne, %1, %c0_i32_0 : i32
    scf.if %2 {
      %c8_i32 = arith.constant 8 : i32
      %28 = arith.muli %arg1, %c8_i32 : i32
      %c0_i32_18 = arith.constant 0 : i32
      %c0_i32_19 = arith.constant 0 : i32
      %29 = tpu.memref_slice %arg3[%arg0, %28, %c0_i32_18, %c0_i32_19] : memref<2x22x22x128xf32, #tpu.memory_space<any>> -> memref<1x14x22x128xf32, #tpu.memory_space<any>>
      %30 = tpu.memref_squeeze %29 : memref<1x14x22x128xf32, #tpu.memory_space<any>> -> memref<14x22x128xf32, #tpu.memory_space<any>>
      tpu.enqueue_dma source(%30 : memref<14x22x128xf32, #tpu.memory_space<any>>) target(%arg14 : memref<14x22x128xf32, #tpu.memory_space<vmem>>) target_semaphore(%arg18 : memref<!tpu.dma_semaphore, #tpu.memory_space<semaphore_mem>>)
      %c0_i32_20 = arith.constant 0 : i32
      %c0_i32_21 = arith.constant 0 : i32
      %31 = tpu.memref_slice %arg3[%arg0, %28, %c0_i32_20, %c0_i32_21] : memref<2x22x22x128xf32, #tpu.memory_space<any>> -> memref<1x14x22x128xf32, #tpu.memory_space<any>>
      %32 = tpu.memref_squeeze %31 : memref<1x14x22x128xf32, #tpu.memory_space<any>> -> memref<14x22x128xf32, #tpu.memory_space<any>>
      tpu.wait_dma2 semaphore(%arg18 : memref<!tpu.dma_semaphore, #tpu.memory_space<semaphore_mem>>) src(%32 : memref<14x22x128xf32, #tpu.memory_space<any>>) dst(%arg14 : memref<14x22x128xf32, #tpu.memory_space<vmem>>)
      %cst_22 = arith.constant 0.000000e+00 : f32
      %33 = vector.broadcast %cst_22 : f32 to vector<8x16x128xf32>
      %c0_23 = arith.constant 0 : index
      %c0_24 = arith.constant 0 : index
      %34 = vector.load %arg5[%c0_23, %c0_24] : memref<1x128xf32, #tpu.memory_space<vmem>>, vector<1x128xf32>
      %35 = vector.shape_cast %34 : vector<1x128xf32> to vector<1x1x128xf32>
      %36 = vector.broadcast %35 : vector<1x1x128xf32> to vector<8x16x128xf32>
      %37 = arith.addf %33, %36 : vector<8x16x128xf32>
      %c0_25 = arith.constant 0 : index
      %c0_26 = arith.constant 0 : index
      %c0_27 = arith.constant 0 : index
      %38 = vector.load %arg15[%c0_25, %c0_26, %c0_27] : memref<8x16x128xf32, #tpu.memory_space<vmem>>, vector<8x16x128xf32>
      tpu.vector_store %arg15[%c0_25, %c0_26, %c0_27], %37 {strides = array<i32>} : memref<8x16x128xf32, #tpu.memory_space<vmem>>, vector<8x16x128xf32>,
      %c0_28 = arith.constant 0 : index
      %c0_29 = arith.constant 0 : index
      %c0_30 = arith.constant 0 : index
      %39 = vector.load %arg14[%c0_28, %c0_29, %c0_30] : memref<14x22x128xf32, #tpu.memory_space<vmem>>, vector<8x22x128xf32>
      %40 = vector.extract_strided_slice %39 {offsets = [0, 0, 0], sizes = [8, 16, 128], strides = [1, 1, 1]} : vector<8x22x128xf32> to vector<8x16x128xf32>
      %c0_31 = arith.constant 0 : index
      %c0_32 = arith.constant 0 : index
      %c0_33 = arith.constant 0 : index
      %41 = vector.load %arg4[%c0_31, %c0_32, %c0_33] : memref<7x7x128xf32, #tpu.memory_space<vmem>>, vector<1x1x128xf32>
      %42 = vector.shape_cast %41 : vector<1x1x128xf32> to vector<128xf32>
      %43 = vector.shape_cast %42 : vector<128xf32> to vector<1x1x128xf32>
      %44 = vector.broadcast %43 : vector<1x1x128xf32> to vector<8x16x128xf32>
      %45 = arith.mulf %40, %44 : vector<8x16x128xf32>
      %46 = vector.extract_strided_slice %39 {offsets = [0, 1, 0], sizes = [8, 16, 128], strides = [1, 1, 1]} : vector<8x22x128xf32> to vector<8x16x128xf32>
      %c0_34 = arith.constant 0 : index
      %c1 = arith.constant 1 : index
      %c0_35 = arith.constant 0 : index
      %47 = vector.load %arg4[%c0_34, %c1, %c0_35] : memref<7x7x128xf32, #tpu.memory_space<vmem>>, vector<1x1x128xf32>
      %48 = vector.shape_cast %47 : vector<1x1x128xf32> to vector<128xf32>
      %49 = vector.shape_cast %48 : vector<128xf32> to vector<1x1x128xf32>
      %50 = vector.broadcast %49 : vector<1x1x128xf32> to vector<8x16x128xf32>
      %51 = arith.mulf %46, %50 : vector<8x16x128xf32>
      %52 = arith.addf %45, %51 : vector<8x16x128xf32>
      %53 = vector.extract_strided_slice %39 {offsets = [0, 2, 0], sizes = [8, 16, 128], strides = [1, 1, 1]} : vector<8x22x128xf32> to vector<8x16x128xf32>
      %c0_36 = arith.constant 0 : index
      %c2 = arith.constant 2 : index
      %c0_37 = arith.constant 0 : index
      %54 = vector.load %arg4[%c0_36, %c2, %c0_37] : memref<7x7x128xf32, #tpu.memory_space<vmem>>, vector<1x1x128xf32>
      %55 = vector.shape_cast %54 : vector<1x1x128xf32> to vector<128xf32>
      %56 = vector.shape_cast %55 : vector<128xf32> to vector<1x1x128xf32>
      %57 = vector.broadcast %56 : vector<1x1x128xf32> to vector<8x16x128xf32>
      %58 = arith.mulf %53, %57 : vector<8x16x128xf32>
      %59 = arith.addf %52, %58 : vector<8x16x128xf32>
      %60 = vector.extract_strided_slice %39 {offsets = [0, 3, 0], sizes = [8, 16, 128], strides = [1, 1, 1]} : vector<8x22x128xf32> to vector<8x16x128xf32>
      %c0_38 = arith.constant 0 : index
      %c3 = arith.constant 3 : index
      %c0_39 = arith.constant 0 : index
      %61 = vector.load %arg4[%c0_38, %c3, %c0_39] : memref<7x7x128xf32, #tpu.memory_space<vmem>>, vector<1x1x128xf32>
      %62 = vector.shape_cast %61 : vector<1x1x128xf32> to vector<128xf32>
      %63 = vector.shape_cast %62 : vector<128xf32> to vector<1x1x128xf32>
      %64 = vector.broadcast %63 : vector<1x1x128xf32> to vector<8x16x128xf32>
      %65 = arith.mulf %60, %64 : vector<8x16x128xf32>
      %66 = arith.addf %59, %65 : vector<8x16x128xf32>
      %67 = vector.extract_strided_slice %39 {offsets = [0, 4, 0], sizes = [8, 16, 128], strides = [1, 1, 1]} : vector<8x22x128xf32> to vector<8x16x128xf32>
      %c0_40 = arith.constant 0 : index
      %c4 = arith.constant 4 : index
      %c0_41 = arith.constant 0 : index
      %68 = vector.load %arg4[%c0_40, %c4, %c0_41] : memref<7x7x128xf32, #tpu.memory_space<vmem>>, vector<1x1x128xf32>
      %69 = vector.shape_cast %68 : vector<1x1x128xf32> to vector<128xf32>
      %70 = vector.shape_cast %69 : vector<128xf32> to vector<1x1x128xf32>
      %71 = vector.broadcast %70 : vector<1x1x128xf32> to vector<8x16x128xf32>
      %72 = arith.mulf %67, %71 : vector<8x16x128xf32>
      %73 = arith.addf %66, %72 : vector<8x16x128xf32>
      %74 = vector.extract_strided_slice %39 {offsets = [0, 5, 0], sizes = [8, 16, 128], strides = [1, 1, 1]} : vector<8x22x128xf32> to vector<8x16x128xf32>
      %c0_42 = arith.constant 0 : index
      %c5 = arith.constant 5 : index
      %c0_43 = arith.constant 0 : index
      %75 = vector.load %arg4[%c0_42, %c5, %c0_43] : memref<7x7x128xf32, #tpu.memory_space<vmem>>, vector<1x1x128xf32>
      %76 = vector.shape_cast %75 : vector<1x1x128xf32> to vector<128xf32>
      %77 = vector.shape_cast %76 : vector<128xf32> to vector<1x1x128xf32>
      %78 = vector.broadcast %77 : vector<1x1x128xf32> to vector<8x16x128xf32>
      %79 = arith.mulf %74, %78 : vector<8x16x128xf32>
      %80 = arith.addf %73, %79 : vector<8x16x128xf32>
      %81 = vector.extract_strided_slice %39 {offsets = [0, 6, 0], sizes = [8, 16, 128], strides = [1, 1, 1]} : vector<8x22x128xf32> to vector<8x16x128xf32>
      %c0_44 = arith.constant 0 : index
      %c6 = arith.constant 6 : index
      %c0_45 = arith.constant 0 : index
      %82 = vector.load %arg4[%c0_44, %c6, %c0_45] : memref<7x7x128xf32, #tpu.memory_space<vmem>>, vector<1x1x128xf32>
      %83 = vector.shape_cast %82 : vector<1x1x128xf32> to vector<128xf32>
      %84 = vector.shape_cast %83 : vector<128xf32> to vector<1x1x128xf32>
      %85 = vector.broadcast %84 : vector<1x1x128xf32> to vector<8x16x128xf32>
      %86 = arith.mulf %81, %85 : vector<8x16x128xf32>
      %87 = arith.addf %80, %86 : vector<8x16x128xf32>
      %c0_46 = arith.constant 0 : index
      %c0_47 = arith.constant 0 : index
      %c0_48 = arith.constant 0 : index
      %88 = vector.load %arg15[%c0_46, %c0_47, %c0_48] : memref<8x16x128xf32, #tpu.memory_space<vmem>>, vector<8x16x128xf32>
      %89 = arith.addf %88, %87 : vector<8x16x128xf32>
      %c0_49 = arith.constant 0 : index
      %c0_50 = arith.constant 0 : index
      %c0_51 = arith.constant 0 : index
      %90 = vector.load %arg15[%c0_49, %c0_50, %c0_51] : memref<8x16x128xf32, #tpu.memory_space<vmem>>, vector<8x16x128xf32>
      tpu.vector_store %arg15[%c0_49, %c0_50, %c0_51], %89 {strides = array<i32>} : memref<8x16x128xf32, #tpu.memory_space<vmem>>, vector<8x16x128xf32>,
      %c1_52 = arith.constant 1 : index
      %c0_53 = arith.constant 0 : index
      %c0_54 = arith.constant 0 : index
      %91 = vector.load %arg14[%c1_52, %c0_53, %c0_54] : memref<14x22x128xf32, #tpu.memory_space<vmem>>, vector<8x22x128xf32>
      %92 = vector.extract_strided_slice %91 {offsets = [0, 0, 0], sizes = [8, 16, 128], strides = [1, 1, 1]} : vector<8x22x128xf32> to vector<8x16x128xf32>
      %c1_55 = arith.constant 1 : index
      %c0_56 = arith.constant 0 : index
      %c0_57 = arith.constant 0 : index
      %93 = vector.load %arg4[%c1_55, %c0_56, %c0_57] : memref<7x7x128xf32, #tpu.memory_space<vmem>>, vector<1x1x128xf32>
      %94 = vector.shape_cast %93 : vector<1x1x128xf32> to vector<128xf32>
      %95 = vector.shape_cast %94 : vector<128xf32> to vector<1x1x128xf32>
      %96 = vector.broadcast %95 : vector<1x1x128xf32> to vector<8x16x128xf32>
      %97 = arith.mulf %92, %96 : vector<8x16x128xf32>
      %98 = vector.extract_strided_slice %91 {offsets = [0, 1, 0], sizes = [8, 16, 128], strides = [1, 1, 1]} : vector<8x22x128xf32> to vector<8x16x128xf32>
      %c1_58 = arith.constant 1 : index
      %c1_59 = arith.constant 1 : index
      %c0_60 = arith.constant 0 : index
      %99 = vector.load %arg4[%c1_58, %c1_59, %c0_60] : memref<7x7x128xf32, #tpu.memory_space<vmem>>, vector<1x1x128xf32>
      %100 = vector.shape_cast %99 : vector<1x1x128xf32> to vector<128xf32>
      %101 = vector.shape_cast %100 : vector<128xf32> to vector<1x1x128xf32>
      %102 = vector.broadcast %101 : vector<1x1x128xf32> to vector<8x16x128xf32>
      %103 = arith.mulf %98, %102 : vector<8x16x128xf32>
      %104 = arith.addf %97, %103 : vector<8x16x128xf32>
      %105 = vector.extract_strided_slice %91 {offsets = [0, 2, 0], sizes = [8, 16, 128], strides = [1, 1, 1]} : vector<8x22x128xf32> to vector<8x16x128xf32>
      %c1_61 = arith.constant 1 : index
      %c2_62 = arith.constant 2 : index
      %c0_63 = arith.constant 0 : index
      %106 = vector.load %arg4[%c1_61, %c2_62, %c0_63] : memref<7x7x128xf32, #tpu.memory_space<vmem>>, vector<1x1x128xf32>
      %107 = vector.shape_cast %106 : vector<1x1x128xf32> to vector<128xf32>
      %108 = vector.shape_cast %107 : vector<128xf32> to vector<1x1x128xf32>
      %109 = vector.broadcast %108 : vector<1x1x128xf32> to vector<8x16x128xf32>
      %110 = arith.mulf %105, %109 : vector<8x16x128xf32>
      %111 = arith.addf %104, %110 : vector<8x16x128xf32>
      %112 = vector.extract_strided_slice %91 {offsets = [0, 3, 0], sizes = [8, 16, 128], strides = [1, 1, 1]} : vector<8x22x128xf32> to vector<8x16x128xf32>
      %c1_64 = arith.constant 1 : index
      %c3_65 = arith.constant 3 : index
      %c0_66 = arith.constant 0 : index
      %113 = vector.load %arg4[%c1_64, %c3_65, %c0_66] : memref<7x7x128xf32, #tpu.memory_space<vmem>>, vector<1x1x128xf32>
      %114 = vector.shape_cast %113 : vector<1x1x128xf32> to vector<128xf32>
      %115 = vector.shape_cast %114 : vector<128xf32> to vector<1x1x128xf32>
      %116 = vector.broadcast %115 : vector<1x1x128xf32> to vector<8x16x128xf32>
      %117 = arith.mulf %112, %116 : vector<8x16x128xf32>
      %118 = arith.addf %111, %117 : vector<8x16x128xf32>
      %119 = vector.extract_strided_slice %91 {offsets = [0, 4, 0], sizes = [8, 16, 128], strides = [1, 1, 1]} : vector<8x22x128xf32> to vector<8x16x128xf32>
      %c1_67 = arith.constant 1 : index
      %c4_68 = arith.constant 4 : index
      %c0_69 = arith.constant 0 : index
      %120 = vector.load %arg4[%c1_67, %c4_68, %c0_69] : memref<7x7x128xf32, #tpu.memory_space<vmem>>, vector<1x1x128xf32>
      %121 = vector.shape_cast %120 : vector<1x1x128xf32> to vector<128xf32>
      %122 = vector.shape_cast %121 : vector<128xf32> to vector<1x1x128xf32>
      %123 = vector.broadcast %122 : vector<1x1x128xf32> to vector<8x16x128xf32>
      %124 = arith.mulf %119, %123 : vector<8x16x128xf32>
      %125 = arith.addf %118, %124 : vector<8x16x128xf32>
      %126 = vector.extract_strided_slice %91 {offsets = [0, 5, 0], sizes = [8, 16, 128], strides = [1, 1, 1]} : vector<8x22x128xf32> to vector<8x16x128xf32>
      %c1_70 = arith.constant 1 : index
      %c5_71 = arith.constant 5 : index
      %c0_72 = arith.constant 0 : index
      %127 = vector.load %arg4[%c1_70, %c5_71, %c0_72] : memref<7x7x128xf32, #tpu.memory_space<vmem>>, vector<1x1x128xf32>
      %128 = vector.shape_cast %127 : vector<1x1x128xf32> to vector<128xf32>
      %129 = vector.shape_cast %128 : vector<128xf32> to vector<1x1x128xf32>
      %130 = vector.broadcast %129 : vector<1x1x128xf32> to vector<8x16x128xf32>
      %131 = arith.mulf %126, %130 : vector<8x16x128xf32>
      %132 = arith.addf %125, %131 : vector<8x16x128xf32>
      %133 = vector.extract_strided_slice %91 {offsets = [0, 6, 0], sizes = [8, 16, 128], strides = [1, 1, 1]} : vector<8x22x128xf32> to vector<8x16x128xf32>
      %c1_73 = arith.constant 1 : index
      %c6_74 = arith.constant 6 : index
      %c0_75 = arith.constant 0 : index
      %134 = vector.load %arg4[%c1_73, %c6_74, %c0_75] : memref<7x7x128xf32, #tpu.memory_space<vmem>>, vector<1x1x128xf32>
      %135 = vector.shape_cast %134 : vector<1x1x128xf32> to vector<128xf32>
      %136 = vector.shape_cast %135 : vector<128xf32> to vector<1x1x128xf32>
      %137 = vector.broadcast %136 : vector<1x1x128xf32> to vector<8x16x128xf32>
      %138 = arith.mulf %133, %137 : vector<8x16x128xf32>
      %139 = arith.addf %132, %138 : vector<8x16x128xf32>
      %c0_76 = arith.constant 0 : index
      %c0_77 = arith.constant 0 : index
      %c0_78 = arith.constant 0 : index
      %140 = vector.load %arg15[%c0_76, %c0_77, %c0_78] : memref<8x16x128xf32, #tpu.memory_space<vmem>>, vector<8x16x128xf32>
      %141 = arith.addf %140, %139 : vector<8x16x128xf32>
      %c0_79 = arith.constant 0 : index
      %c0_80 = arith.constant 0 : index
      %c0_81 = arith.constant 0 : index
      %142 = vector.load %arg15[%c0_79, %c0_80, %c0_81] : memref<8x16x128xf32, #tpu.memory_space<vmem>>, vector<8x16x128xf32>
      tpu.vector_store %arg15[%c0_79, %c0_80, %c0_81], %141 {strides = array<i32>} : memref<8x16x128xf32, #tpu.memory_space<vmem>>, vector<8x16x128xf32>,
      %c2_82 = arith.constant 2 : index
      %c0_83 = arith.constant 0 : index
      %c0_84 = arith.constant 0 : index
      %143 = vector.load %arg14[%c2_82, %c0_83, %c0_84] : memref<14x22x128xf32, #tpu.memory_space<vmem>>, vector<8x22x128xf32>
      %144 = vector.extract_strided_slice %143 {offsets = [0, 0, 0], sizes = [8, 16, 128], strides = [1, 1, 1]} : vector<8x22x128xf32> to vector<8x16x128xf32>
      %c2_85 = arith.constant 2 : index
      %c0_86 = arith.constant 0 : index
      %c0_87 = arith.constant 0 : index
      %145 = vector.load %arg4[%c2_85, %c0_86, %c0_87] : memref<7x7x128xf32, #tpu.memory_space<vmem>>, vector<1x1x128xf32>
      %146 = vector.shape_cast %145 : vector<1x1x128xf32> to vector<128xf32>
      %147 = vector.shape_cast %146 : vector<128xf32> to vector<1x1x128xf32>
      %148 = vector.broadcast %147 : vector<1x1x128xf32> to vector<8x16x128xf32>
      %149 = arith.mulf %144, %148 : vector<8x16x128xf32>
      %150 = vector.extract_strided_slice %143 {offsets = [0, 1, 0], sizes = [8, 16, 128], strides = [1, 1, 1]} : vector<8x22x128xf32> to vector<8x16x128xf32>
      %c2_88 = arith.constant 2 : index
      %c1_89 = arith.constant 1 : index
      %c0_90 = arith.constant 0 : index
      %151 = vector.load %arg4[%c2_88, %c1_89, %c0_90] : memref<7x7x128xf32, #tpu.memory_space<vmem>>, vector<1x1x128xf32>
      %152 = vector.shape_cast %151 : vector<1x1x128xf32> to vector<128xf32>
      %153 = vector.shape_cast %152 : vector<128xf32> to vector<1x1x128xf32>
      %154 = vector.broadcast %153 : vector<1x1x128xf32> to vector<8x16x128xf32>
      %155 = arith.mulf %150, %154 : vector<8x16x128xf32>
      %156 = arith.addf %149, %155 : vector<8x16x128xf32>
      %157 = vector.extract_strided_slice %143 {offsets = [0, 2, 0], sizes = [8, 16, 128], strides = [1, 1, 1]} : vector<8x22x128xf32> to vector<8x16x128xf32>
      %c2_91 = arith.constant 2 : index
      %c2_92 = arith.constant 2 : index
      %c0_93 = arith.constant 0 : index
      %158 = vector.load %arg4[%c2_91, %c2_92, %c0_93] : memref<7x7x128xf32, #tpu.memory_space<vmem>>, vector<1x1x128xf32>
      %159 = vector.shape_cast %158 : vector<1x1x128xf32> to vector<128xf32>
      %160 = vector.shape_cast %159 : vector<128xf32> to vector<1x1x128xf32>
      %161 = vector.broadcast %160 : vector<1x1x128xf32> to vector<8x16x128xf32>
      %162 = arith.mulf %157, %161 : vector<8x16x128xf32>
      %163 = arith.addf %156, %162 : vector<8x16x128xf32>
      %164 = vector.extract_strided_slice %143 {offsets = [0, 3, 0], sizes = [8, 16, 128], strides = [1, 1, 1]} : vector<8x22x128xf32> to vector<8x16x128xf32>
      %c2_94 = arith.constant 2 : index
      %c3_95 = arith.constant 3 : index
      %c0_96 = arith.constant 0 : index
      %165 = vector.load %arg4[%c2_94, %c3_95, %c0_96] : memref<7x7x128xf32, #tpu.memory_space<vmem>>, vector<1x1x128xf32>
      %166 = vector.shape_cast %165 : vector<1x1x128xf32> to vector<128xf32>
      %167 = vector.shape_cast %166 : vector<128xf32> to vector<1x1x128xf32>
      %168 = vector.broadcast %167 : vector<1x1x128xf32> to vector<8x16x128xf32>
      %169 = arith.mulf %164, %168 : vector<8x16x128xf32>
      %170 = arith.addf %163, %169 : vector<8x16x128xf32>
      %171 = vector.extract_strided_slice %143 {offsets = [0, 4, 0], sizes = [8, 16, 128], strides = [1, 1, 1]} : vector<8x22x128xf32> to vector<8x16x128xf32>
      %c2_97 = arith.constant 2 : index
      %c4_98 = arith.constant 4 : index
      %c0_99 = arith.constant 0 : index
      %172 = vector.load %arg4[%c2_97, %c4_98, %c0_99] : memref<7x7x128xf32, #tpu.memory_space<vmem>>, vector<1x1x128xf32>
      %173 = vector.shape_cast %172 : vector<1x1x128xf32> to vector<128xf32>
      %174 = vector.shape_cast %173 : vector<128xf32> to vector<1x1x128xf32>
      %175 = vector.broadcast %174 : vector<1x1x128xf32> to vector<8x16x128xf32>
      %176 = arith.mulf %171, %175 : vector<8x16x128xf32>
      %177 = arith.addf %170, %176 : vector<8x16x128xf32>
      %178 = vector.extract_strided_slice %143 {offsets = [0, 5, 0], sizes = [8, 16, 128], strides = [1, 1, 1]} : vector<8x22x128xf32> to vector<8x16x128xf32>
      %c2_100 = arith.constant 2 : index
      %c5_101 = arith.constant 5 : index
      %c0_102 = arith.constant 0 : index
      %179 = vector.load %arg4[%c2_100, %c5_101, %c0_102] : memref<7x7x128xf32, #tpu.memory_space<vmem>>, vector<1x1x128xf32>
      %180 = vector.shape_cast %179 : vector<1x1x128xf32> to vector<128xf32>
      %181 = vector.shape_cast %180 : vector<128xf32> to vector<1x1x128xf32>
      %182 = vector.broadcast %181 : vector<1x1x128xf32> to vector<8x16x128xf32>
      %183 = arith.mulf %178, %182 : vector<8x16x128xf32>
      %184 = arith.addf %177, %183 : vector<8x16x128xf32>
      %185 = vector.extract_strided_slice %143 {offsets = [0, 6, 0], sizes = [8, 16, 128], strides = [1, 1, 1]} : vector<8x22x128xf32> to vector<8x16x128xf32>
      %c2_103 = arith.constant 2 : index
      %c6_104 = arith.constant 6 : index
      %c0_105 = arith.constant 0 : index
      %186 = vector.load %arg4[%c2_103, %c6_104, %c0_105] : memref<7x7x128xf32, #tpu.memory_space<vmem>>, vector<1x1x128xf32>
      %187 = vector.shape_cast %186 : vector<1x1x128xf32> to vector<128xf32>
      %188 = vector.shape_cast %187 : vector<128xf32> to vector<1x1x128xf32>
      %189 = vector.broadcast %188 : vector<1x1x128xf32> to vector<8x16x128xf32>
      %190 = arith.mulf %185, %189 : vector<8x16x128xf32>
      %191 = arith.addf %184, %190 : vector<8x16x128xf32>
      %c0_106 = arith.constant 0 : index
      %c0_107 = arith.constant 0 : index
      %c0_108 = arith.constant 0 : index
      %192 = vector.load %arg15[%c0_106, %c0_107, %c0_108] : memref<8x16x128xf32, #tpu.memory_space<vmem>>, vector<8x16x128xf32>
      %193 = arith.addf %192, %191 : vector<8x16x128xf32>
      %c0_109 = arith.constant 0 : index
      %c0_110 = arith.constant 0 : index
      %c0_111 = arith.constant 0 : index
      %194 = vector.load %arg15[%c0_109, %c0_110, %c0_111] : memref<8x16x128xf32, #tpu.memory_space<vmem>>, vector<8x16x128xf32>
      tpu.vector_store %arg15[%c0_109, %c0_110, %c0_111], %193 {strides = array<i32>} : memref<8x16x128xf32, #tpu.memory_space<vmem>>, vector<8x16x128xf32>,
      %c3_112 = arith.constant 3 : index
      %c0_113 = arith.constant 0 : index
      %c0_114 = arith.constant 0 : index
      %195 = vector.load %arg14[%c3_112, %c0_113, %c0_114] : memref<14x22x128xf32, #tpu.memory_space<vmem>>, vector<8x22x128xf32>
      %196 = vector.extract_strided_slice %195 {offsets = [0, 0, 0], sizes = [8, 16, 128], strides = [1, 1, 1]} : vector<8x22x128xf32> to vector<8x16x128xf32>
      %c3_115 = arith.constant 3 : index
      %c0_116 = arith.constant 0 : index
      %c0_117 = arith.constant 0 : index
      %197 = vector.load %arg4[%c3_115, %c0_116, %c0_117] : memref<7x7x128xf32, #tpu.memory_space<vmem>>, vector<1x1x128xf32>
      %198 = vector.shape_cast %197 : vector<1x1x128xf32> to vector<128xf32>
      %199 = vector.shape_cast %198 : vector<128xf32> to vector<1x1x128xf32>
      %200 = vector.broadcast %199 : vector<1x1x128xf32> to vector<8x16x128xf32>
      %201 = arith.mulf %196, %200 : vector<8x16x128xf32>
      %202 = vector.extract_strided_slice %195 {offsets = [0, 1, 0], sizes = [8, 16, 128], strides = [1, 1, 1]} : vector<8x22x128xf32> to vector<8x16x128xf32>
      %c3_118 = arith.constant 3 : index
      %c1_119 = arith.constant 1 : index
      %c0_120 = arith.constant 0 : index
      %203 = vector.load %arg4[%c3_118, %c1_119, %c0_120] : memref<7x7x128xf32, #tpu.memory_space<vmem>>, vector<1x1x128xf32>
      %204 = vector.shape_cast %203 : vector<1x1x128xf32> to vector<128xf32>
      %205 = vector.shape_cast %204 : vector<128xf32> to vector<1x1x128xf32>
      %206 = vector.broadcast %205 : vector<1x1x128xf32> to vector<8x16x128xf32>
      %207 = arith.mulf %202, %206 : vector<8x16x128xf32>
      %208 = arith.addf %201, %207 : vector<8x16x128xf32>
      %209 = vector.extract_strided_slice %195 {offsets = [0, 2, 0], sizes = [8, 16, 128], strides = [1, 1, 1]} : vector<8x22x128xf32> to vector<8x16x128xf32>
      %c3_121 = arith.constant 3 : index
      %c2_122 = arith.constant 2 : index
      %c0_123 = arith.constant 0 : index
      %210 = vector.load %arg4[%c3_121, %c2_122, %c0_123] : memref<7x7x128xf32, #tpu.memory_space<vmem>>, vector<1x1x128xf32>
      %211 = vector.shape_cast %210 : vector<1x1x128xf32> to vector<128xf32>
      %212 = vector.shape_cast %211 : vector<128xf32> to vector<1x1x128xf32>
      %213 = vector.broadcast %212 : vector<1x1x128xf32> to vector<8x16x128xf32>
      %214 = arith.mulf %209, %213 : vector<8x16x128xf32>
      %215 = arith.addf %208, %214 : vector<8x16x128xf32>
      %216 = vector.extract_strided_slice %195 {offsets = [0, 3, 0], sizes = [8, 16, 128], strides = [1, 1, 1]} : vector<8x22x128xf32> to vector<8x16x128xf32>
      %c3_124 = arith.constant 3 : index
      %c3_125 = arith.constant 3 : index
      %c0_126 = arith.constant 0 : index
      %217 = vector.load %arg4[%c3_124, %c3_125, %c0_126] : memref<7x7x128xf32, #tpu.memory_space<vmem>>, vector<1x1x128xf32>
      %218 = vector.shape_cast %217 : vector<1x1x128xf32> to vector<128xf32>
      %219 = vector.shape_cast %218 : vector<128xf32> to vector<1x1x128xf32>
      %220 = vector.broadcast %219 : vector<1x1x128xf32> to vector<8x16x128xf32>
      %221 = arith.mulf %216, %220 : vector<8x16x128xf32>
      %222 = arith.addf %215, %221 : vector<8x16x128xf32>
      %223 = vector.extract_strided_slice %195 {offsets = [0, 4, 0], sizes = [8, 16, 128], strides = [1, 1, 1]} : vector<8x22x128xf32> to vector<8x16x128xf32>
      %c3_127 = arith.constant 3 : index
      %c4_128 = arith.constant 4 : index
      %c0_129 = arith.constant 0 : index
      %224 = vector.load %arg4[%c3_127, %c4_128, %c0_129] : memref<7x7x128xf32, #tpu.memory_space<vmem>>, vector<1x1x128xf32>
      %225 = vector.shape_cast %224 : vector<1x1x128xf32> to vector<128xf32>
      %226 = vector.shape_cast %225 : vector<128xf32> to vector<1x1x128xf32>
      %227 = vector.broadcast %226 : vector<1x1x128xf32> to vector<8x16x128xf32>
      %228 = arith.mulf %223, %227 : vector<8x16x128xf32>
      %229 = arith.addf %222, %228 : vector<8x16x128xf32>
      %230 = vector.extract_strided_slice %195 {offsets = [0, 5, 0], sizes = [8, 16, 128], strides = [1, 1, 1]} : vector<8x22x128xf32> to vector<8x16x128xf32>
      %c3_130 = arith.constant 3 : index
      %c5_131 = arith.constant 5 : index
      %c0_132 = arith.constant 0 : index
      %231 = vector.load %arg4[%c3_130, %c5_131, %c0_132] : memref<7x7x128xf32, #tpu.memory_space<vmem>>, vector<1x1x128xf32>
      %232 = vector.shape_cast %231 : vector<1x1x128xf32> to vector<128xf32>
      %233 = vector.shape_cast %232 : vector<128xf32> to vector<1x1x128xf32>
      %234 = vector.broadcast %233 : vector<1x1x128xf32> to vector<8x16x128xf32>
      %235 = arith.mulf %230, %234 : vector<8x16x128xf32>
      %236 = arith.addf %229, %235 : vector<8x16x128xf32>
      %237 = vector.extract_strided_slice %195 {offsets = [0, 6, 0], sizes = [8, 16, 128], strides = [1, 1, 1]} : vector<8x22x128xf32> to vector<8x16x128xf32>
      %c3_133 = arith.constant 3 : index
      %c6_134 = arith.constant 6 : index
      %c0_135 = arith.constant 0 : index
      %238 = vector.load %arg4[%c3_133, %c6_134, %c0_135] : memref<7x7x128xf32, #tpu.memory_space<vmem>>, vector<1x1x128xf32>
      %239 = vector.shape_cast %238 : vector<1x1x128xf32> to vector<128xf32>
      %240 = vector.shape_cast %239 : vector<128xf32> to vector<1x1x128xf32>
      %241 = vector.broadcast %240 : vector<1x1x128xf32> to vector<8x16x128xf32>
      %242 = arith.mulf %237, %241 : vector<8x16x128xf32>
      %243 = arith.addf %236, %242 : vector<8x16x128xf32>
      %c0_136 = arith.constant 0 : index
      %c0_137 = arith.constant 0 : index
      %c0_138 = arith.constant 0 : index
      %244 = vector.load %arg15[%c0_136, %c0_137, %c0_138] : memref<8x16x128xf32, #tpu.memory_space<vmem>>, vector<8x16x128xf32>
      %245 = arith.addf %244, %243 : vector<8x16x128xf32>
      %c0_139 = arith.constant 0 : index
      %c0_140 = arith.constant 0 : index
      %c0_141 = arith.constant 0 : index
      %246 = vector.load %arg15[%c0_139, %c0_140, %c0_141] : memref<8x16x128xf32, #tpu.memory_space<vmem>>, vector<8x16x128xf32>
      tpu.vector_store %arg15[%c0_139, %c0_140, %c0_141], %245 {strides = array<i32>} : memref<8x16x128xf32, #tpu.memory_space<vmem>>, vector<8x16x128xf32>,
      %c4_142 = arith.constant 4 : index
      %c0_143 = arith.constant 0 : index
      %c0_144 = arith.constant 0 : index
      %247 = vector.load %arg14[%c4_142, %c0_143, %c0_144] : memref<14x22x128xf32, #tpu.memory_space<vmem>>, vector<8x22x128xf32>
      %248 = vector.extract_strided_slice %247 {offsets = [0, 0, 0], sizes = [8, 16, 128], strides = [1, 1, 1]} : vector<8x22x128xf32> to vector<8x16x128xf32>
      %c4_145 = arith.constant 4 : index
      %c0_146 = arith.constant 0 : index
      %c0_147 = arith.constant 0 : index
      %249 = vector.load %arg4[%c4_145, %c0_146, %c0_147] : memref<7x7x128xf32, #tpu.memory_space<vmem>>, vector<1x1x128xf32>
      %250 = vector.shape_cast %249 : vector<1x1x128xf32> to vector<128xf32>
      %251 = vector.shape_cast %250 : vector<128xf32> to vector<1x1x128xf32>
      %252 = vector.broadcast %251 : vector<1x1x128xf32> to vector<8x16x128xf32>
      %253 = arith.mulf %248, %252 : vector<8x16x128xf32>
      %254 = vector.extract_strided_slice %247 {offsets = [0, 1, 0], sizes = [8, 16, 128], strides = [1, 1, 1]} : vector<8x22x128xf32> to vector<8x16x128xf32>
      %c4_148 = arith.constant 4 : index
      %c1_149 = arith.constant 1 : index
      %c0_150 = arith.constant 0 : index
      %255 = vector.load %arg4[%c4_148, %c1_149, %c0_150] : memref<7x7x128xf32, #tpu.memory_space<vmem>>, vector<1x1x128xf32>
      %256 = vector.shape_cast %255 : vector<1x1x128xf32> to vector<128xf32>
      %257 = vector.shape_cast %256 : vector<128xf32> to vector<1x1x128xf32>
      %258 = vector.broadcast %257 : vector<1x1x128xf32> to vector<8x16x128xf32>
      %259 = arith.mulf %254, %258 : vector<8x16x128xf32>
      %260 = arith.addf %253, %259 : vector<8x16x128xf32>
      %261 = vector.extract_strided_slice %247 {offsets = [0, 2, 0], sizes = [8, 16, 128], strides = [1, 1, 1]} : vector<8x22x128xf32> to vector<8x16x128xf32>
      %c4_151 = arith.constant 4 : index
      %c2_152 = arith.constant 2 : index
      %c0_153 = arith.constant 0 : index
      %262 = vector.load %arg4[%c4_151, %c2_152, %c0_153] : memref<7x7x128xf32, #tpu.memory_space<vmem>>, vector<1x1x128xf32>
      %263 = vector.shape_cast %262 : vector<1x1x128xf32> to vector<128xf32>
      %264 = vector.shape_cast %263 : vector<128xf32> to vector<1x1x128xf32>
      %265 = vector.broadcast %264 : vector<1x1x128xf32> to vector<8x16x128xf32>
      %266 = arith.mulf %261, %265 : vector<8x16x128xf32>
      %267 = arith.addf %260, %266 : vector<8x16x128xf32>
      %268 = vector.extract_strided_slice %247 {offsets = [0, 3, 0], sizes = [8, 16, 128], strides = [1, 1, 1]} : vector<8x22x128xf32> to vector<8x16x128xf32>
      %c4_154 = arith.constant 4 : index
      %c3_155 = arith.constant 3 : index
      %c0_156 = arith.constant 0 : index
      %269 = vector.load %arg4[%c4_154, %c3_155, %c0_156] : memref<7x7x128xf32, #tpu.memory_space<vmem>>, vector<1x1x128xf32>
      %270 = vector.shape_cast %269 : vector<1x1x128xf32> to vector<128xf32>
      %271 = vector.shape_cast %270 : vector<128xf32> to vector<1x1x128xf32>
      %272 = vector.broadcast %271 : vector<1x1x128xf32> to vector<8x16x128xf32>
      %273 = arith.mulf %268, %272 : vector<8x16x128xf32>
      %274 = arith.addf %267, %273 : vector<8x16x128xf32>
      %275 = vector.extract_strided_slice %247 {offsets = [0, 4, 0], sizes = [8, 16, 128], strides = [1, 1, 1]} : vector<8x22x128xf32> to vector<8x16x128xf32>
      %c4_157 = arith.constant 4 : index
      %c4_158 = arith.constant 4 : index
      %c0_159 = arith.constant 0 : index
      %276 = vector.load %arg4[%c4_157, %c4_158, %c0_159] : memref<7x7x128xf32, #tpu.memory_space<vmem>>, vector<1x1x128xf32>
      %277 = vector.shape_cast %276 : vector<1x1x128xf32> to vector<128xf32>
      %278 = vector.shape_cast %277 : vector<128xf32> to vector<1x1x128xf32>
      %279 = vector.broadcast %278 : vector<1x1x128xf32> to vector<8x16x128xf32>
      %280 = arith.mulf %275, %279 : vector<8x16x128xf32>
      %281 = arith.addf %274, %280 : vector<8x16x128xf32>
      %282 = vector.extract_strided_slice %247 {offsets = [0, 5, 0], sizes = [8, 16, 128], strides = [1, 1, 1]} : vector<8x22x128xf32> to vector<8x16x128xf32>
      %c4_160 = arith.constant 4 : index
      %c5_161 = arith.constant 5 : index
      %c0_162 = arith.constant 0 : index
      %283 = vector.load %arg4[%c4_160, %c5_161, %c0_162] : memref<7x7x128xf32, #tpu.memory_space<vmem>>, vector<1x1x128xf32>
      %284 = vector.shape_cast %283 : vector<1x1x128xf32> to vector<128xf32>
      %285 = vector.shape_cast %284 : vector<128xf32> to vector<1x1x128xf32>
      %286 = vector.broadcast %285 : vector<1x1x128xf32> to vector<8x16x128xf32>
      %287 = arith.mulf %282, %286 : vector<8x16x128xf32>
      %288 = arith.addf %281, %287 : vector<8x16x128xf32>
      %289 = vector.extract_strided_slice %247 {offsets = [0, 6, 0], sizes = [8, 16, 128], strides = [1, 1, 1]} : vector<8x22x128xf32> to vector<8x16x128xf32>
      %c4_163 = arith.constant 4 : index
      %c6_164 = arith.constant 6 : index
      %c0_165 = arith.constant 0 : index
      %290 = vector.load %arg4[%c4_163, %c6_164, %c0_165] : memref<7x7x128xf32, #tpu.memory_space<vmem>>, vector<1x1x128xf32>
      %291 = vector.shape_cast %290 : vector<1x1x128xf32> to vector<128xf32>
      %292 = vector.shape_cast %291 : vector<128xf32> to vector<1x1x128xf32>
      %293 = vector.broadcast %292 : vector<1x1x128xf32> to vector<8x16x128xf32>
      %294 = arith.mulf %289, %293 : vector<8x16x128xf32>
      %295 = arith.addf %288, %294 : vector<8x16x128xf32>
      %c0_166 = arith.constant 0 : index
      %c0_167 = arith.constant 0 : index
      %c0_168 = arith.constant 0 : index
      %296 = vector.load %arg15[%c0_166, %c0_167, %c0_168] : memref<8x16x128xf32, #tpu.memory_space<vmem>>, vector<8x16x128xf32>
      %297 = arith.addf %296, %295 : vector<8x16x128xf32>
      %c0_169 = arith.constant 0 : index
      %c0_170 = arith.constant 0 : index
      %c0_171 = arith.constant 0 : index
      %298 = vector.load %arg15[%c0_169, %c0_170, %c0_171] : memref<8x16x128xf32, #tpu.memory_space<vmem>>, vector<8x16x128xf32>
      tpu.vector_store %arg15[%c0_169, %c0_170, %c0_171], %297 {strides = array<i32>} : memref<8x16x128xf32, #tpu.memory_space<vmem>>, vector<8x16x128xf32>,
      %c5_172 = arith.constant 5 : index
      %c0_173 = arith.constant 0 : index
      %c0_174 = arith.constant 0 : index
      %299 = vector.load %arg14[%c5_172, %c0_173, %c0_174] : memref<14x22x128xf32, #tpu.memory_space<vmem>>, vector<8x22x128xf32>
      %300 = vector.extract_strided_slice %299 {offsets = [0, 0, 0], sizes = [8, 16, 128], strides = [1, 1, 1]} : vector<8x22x128xf32> to vector<8x16x128xf32>
      %c5_175 = arith.constant 5 : index
      %c0_176 = arith.constant 0 : index
      %c0_177 = arith.constant 0 : index
      %301 = vector.load %arg4[%c5_175, %c0_176, %c0_177] : memref<7x7x128xf32, #tpu.memory_space<vmem>>, vector<1x1x128xf32>
      %302 = vector.shape_cast %301 : vector<1x1x128xf32> to vector<128xf32>
      %303 = vector.shape_cast %302 : vector<128xf32> to vector<1x1x128xf32>
      %304 = vector.broadcast %303 : vector<1x1x128xf32> to vector<8x16x128xf32>
      %305 = arith.mulf %300, %304 : vector<8x16x128xf32>
      %306 = vector.extract_strided_slice %299 {offsets = [0, 1, 0], sizes = [8, 16, 128], strides = [1, 1, 1]} : vector<8x22x128xf32> to vector<8x16x128xf32>
      %c5_178 = arith.constant 5 : index
      %c1_179 = arith.constant 1 : index
      %c0_180 = arith.constant 0 : index
      %307 = vector.load %arg4[%c5_178, %c1_179, %c0_180] : memref<7x7x128xf32, #tpu.memory_space<vmem>>, vector<1x1x128xf32>
      %308 = vector.shape_cast %307 : vector<1x1x128xf32> to vector<128xf32>
      %309 = vector.shape_cast %308 : vector<128xf32> to vector<1x1x128xf32>
      %310 = vector.broadcast %309 : vector<1x1x128xf32> to vector<8x16x128xf32>
      %311 = arith.mulf %306, %310 : vector<8x16x128xf32>
      %312 = arith.addf %305, %311 : vector<8x16x128xf32>
      %313 = vector.extract_strided_slice %299 {offsets = [0, 2, 0], sizes = [8, 16, 128], strides = [1, 1, 1]} : vector<8x22x128xf32> to vector<8x16x128xf32>
      %c5_181 = arith.constant 5 : index
      %c2_182 = arith.constant 2 : index
      %c0_183 = arith.constant 0 : index
      %314 = vector.load %arg4[%c5_181, %c2_182, %c0_183] : memref<7x7x128xf32, #tpu.memory_space<vmem>>, vector<1x1x128xf32>
      %315 = vector.shape_cast %314 : vector<1x1x128xf32> to vector<128xf32>
      %316 = vector.shape_cast %315 : vector<128xf32> to vector<1x1x128xf32>
      %317 = vector.broadcast %316 : vector<1x1x128xf32> to vector<8x16x128xf32>
      %318 = arith.mulf %313, %317 : vector<8x16x128xf32>
      %319 = arith.addf %312, %318 : vector<8x16x128xf32>
      %320 = vector.extract_strided_slice %299 {offsets = [0, 3, 0], sizes = [8, 16, 128], strides = [1, 1, 1]} : vector<8x22x128xf32> to vector<8x16x128xf32>
      %c5_184 = arith.constant 5 : index
      %c3_185 = arith.constant 3 : index
      %c0_186 = arith.constant 0 : index
      %321 = vector.load %arg4[%c5_184, %c3_185, %c0_186] : memref<7x7x128xf32, #tpu.memory_space<vmem>>, vector<1x1x128xf32>
      %322 = vector.shape_cast %321 : vector<1x1x128xf32> to vector<128xf32>
      %323 = vector.shape_cast %322 : vector<128xf32> to vector<1x1x128xf32>
      %324 = vector.broadcast %323 : vector<1x1x128xf32> to vector<8x16x128xf32>
      %325 = arith.mulf %320, %324 : vector<8x16x128xf32>
      %326 = arith.addf %319, %325 : vector<8x16x128xf32>
      %327 = vector.extract_strided_slice %299 {offsets = [0, 4, 0], sizes = [8, 16, 128], strides = [1, 1, 1]} : vector<8x22x128xf32> to vector<8x16x128xf32>
      %c5_187 = arith.constant 5 : index
      %c4_188 = arith.constant 4 : index
      %c0_189 = arith.constant 0 : index
      %328 = vector.load %arg4[%c5_187, %c4_188, %c0_189] : memref<7x7x128xf32, #tpu.memory_space<vmem>>, vector<1x1x128xf32>
      %329 = vector.shape_cast %328 : vector<1x1x128xf32> to vector<128xf32>
      %330 = vector.shape_cast %329 : vector<128xf32> to vector<1x1x128xf32>
      %331 = vector.broadcast %330 : vector<1x1x128xf32> to vector<8x16x128xf32>
      %332 = arith.mulf %327, %331 : vector<8x16x128xf32>
      %333 = arith.addf %326, %332 : vector<8x16x128xf32>
      %334 = vector.extract_strided_slice %299 {offsets = [0, 5, 0], sizes = [8, 16, 128], strides = [1, 1, 1]} : vector<8x22x128xf32> to vector<8x16x128xf32>
      %c5_190 = arith.constant 5 : index
      %c5_191 = arith.constant 5 : index
      %c0_192 = arith.constant 0 : index
      %335 = vector.load %arg4[%c5_190, %c5_191, %c0_192] : memref<7x7x128xf32, #tpu.memory_space<vmem>>, vector<1x1x128xf32>
      %336 = vector.shape_cast %335 : vector<1x1x128xf32> to vector<128xf32>
      %337 = vector.shape_cast %336 : vector<128xf32> to vector<1x1x128xf32>
      %338 = vector.broadcast %337 : vector<1x1x128xf32> to vector<8x16x128xf32>
      %339 = arith.mulf %334, %338 : vector<8x16x128xf32>
      %340 = arith.addf %333, %339 : vector<8x16x128xf32>
      %341 = vector.extract_strided_slice %299 {offsets = [0, 6, 0], sizes = [8, 16, 128], strides = [1, 1, 1]} : vector<8x22x128xf32> to vector<8x16x128xf32>
      %c5_193 = arith.constant 5 : index
      %c6_194 = arith.constant 6 : index
      %c0_195 = arith.constant 0 : index
      %342 = vector.load %arg4[%c5_193, %c6_194, %c0_195] : memref<7x7x128xf32, #tpu.memory_space<vmem>>, vector<1x1x128xf32>
      %343 = vector.shape_cast %342 : vector<1x1x128xf32> to vector<128xf32>
      %344 = vector.shape_cast %343 : vector<128xf32> to vector<1x1x128xf32>
      %345 = vector.broadcast %344 : vector<1x1x128xf32> to vector<8x16x128xf32>
      %346 = arith.mulf %341, %345 : vector<8x16x128xf32>
      %347 = arith.addf %340, %346 : vector<8x16x128xf32>
      %c0_196 = arith.constant 0 : index
      %c0_197 = arith.constant 0 : index
      %c0_198 = arith.constant 0 : index
      %348 = vector.load %arg15[%c0_196, %c0_197, %c0_198] : memref<8x16x128xf32, #tpu.memory_space<vmem>>, vector<8x16x128xf32>
      %349 = arith.addf %348, %347 : vector<8x16x128xf32>
      %c0_199 = arith.constant 0 : index
      %c0_200 = arith.constant 0 : index
      %c0_201 = arith.constant 0 : index
      %350 = vector.load %arg15[%c0_199, %c0_200, %c0_201] : memref<8x16x128xf32, #tpu.memory_space<vmem>>, vector<8x16x128xf32>
      tpu.vector_store %arg15[%c0_199, %c0_200, %c0_201], %349 {strides = array<i32>} : memref<8x16x128xf32, #tpu.memory_space<vmem>>, vector<8x16x128xf32>,
      %c6_202 = arith.constant 6 : index
      %c0_203 = arith.constant 0 : index
      %c0_204 = arith.constant 0 : index
      %351 = vector.load %arg14[%c6_202, %c0_203, %c0_204] : memref<14x22x128xf32, #tpu.memory_space<vmem>>, vector<8x22x128xf32>
      %352 = vector.extract_strided_slice %351 {offsets = [0, 0, 0], sizes = [8, 16, 128], strides = [1, 1, 1]} : vector<8x22x128xf32> to vector<8x16x128xf32>
      %c6_205 = arith.constant 6 : index
      %c0_206 = arith.constant 0 : index
      %c0_207 = arith.constant 0 : index
      %353 = vector.load %arg4[%c6_205, %c0_206, %c0_207] : memref<7x7x128xf32, #tpu.memory_space<vmem>>, vector<1x1x128xf32>
      %354 = vector.shape_cast %353 : vector<1x1x128xf32> to vector<128xf32>
      %355 = vector.shape_cast %354 : vector<128xf32> to vector<1x1x128xf32>
      %356 = vector.broadcast %355 : vector<1x1x128xf32> to vector<8x16x128xf32>
      %357 = arith.mulf %352, %356 : vector<8x16x128xf32>
      %358 = vector.extract_strided_slice %351 {offsets = [0, 1, 0], sizes = [8, 16, 128], strides = [1, 1, 1]} : vector<8x22x128xf32> to vector<8x16x128xf32>
      %c6_208 = arith.constant 6 : index
      %c1_209 = arith.constant 1 : index
      %c0_210 = arith.constant 0 : index
      %359 = vector.load %arg4[%c6_208, %c1_209, %c0_210] : memref<7x7x128xf32, #tpu.memory_space<vmem>>, vector<1x1x128xf32>
      %360 = vector.shape_cast %359 : vector<1x1x128xf32> to vector<128xf32>
      %361 = vector.shape_cast %360 : vector<128xf32> to vector<1x1x128xf32>
      %362 = vector.broadcast %361 : vector<1x1x128xf32> to vector<8x16x128xf32>
      %363 = arith.mulf %358, %362 : vector<8x16x128xf32>
      %364 = arith.addf %357, %363 : vector<8x16x128xf32>
      %365 = vector.extract_strided_slice %351 {offsets = [0, 2, 0], sizes = [8, 16, 128], strides = [1, 1, 1]} : vector<8x22x128xf32> to vector<8x16x128xf32>
      %c6_211 = arith.constant 6 : index
      %c2_212 = arith.constant 2 : index
      %c0_213 = arith.constant 0 : index
      %366 = vector.load %arg4[%c6_211, %c2_212, %c0_213] : memref<7x7x128xf32, #tpu.memory_space<vmem>>, vector<1x1x128xf32>
      %367 = vector.shape_cast %366 : vector<1x1x128xf32> to vector<128xf32>
      %368 = vector.shape_cast %367 : vector<128xf32> to vector<1x1x128xf32>
      %369 = vector.broadcast %368 : vector<1x1x128xf32> to vector<8x16x128xf32>
      %370 = arith.mulf %365, %369 : vector<8x16x128xf32>
      %371 = arith.addf %364, %370 : vector<8x16x128xf32>
      %372 = vector.extract_strided_slice %351 {offsets = [0, 3, 0], sizes = [8, 16, 128], strides = [1, 1, 1]} : vector<8x22x128xf32> to vector<8x16x128xf32>
      %c6_214 = arith.constant 6 : index
      %c3_215 = arith.constant 3 : index
      %c0_216 = arith.constant 0 : index
      %373 = vector.load %arg4[%c6_214, %c3_215, %c0_216] : memref<7x7x128xf32, #tpu.memory_space<vmem>>, vector<1x1x128xf32>
      %374 = vector.shape_cast %373 : vector<1x1x128xf32> to vector<128xf32>
      %375 = vector.shape_cast %374 : vector<128xf32> to vector<1x1x128xf32>
      %376 = vector.broadcast %375 : vector<1x1x128xf32> to vector<8x16x128xf32>
      %377 = arith.mulf %372, %376 : vector<8x16x128xf32>
      %378 = arith.addf %371, %377 : vector<8x16x128xf32>
      %379 = vector.extract_strided_slice %351 {offsets = [0, 4, 0], sizes = [8, 16, 128], strides = [1, 1, 1]} : vector<8x22x128xf32> to vector<8x16x128xf32>
      %c6_217 = arith.constant 6 : index
      %c4_218 = arith.constant 4 : index
      %c0_219 = arith.constant 0 : index
      %380 = vector.load %arg4[%c6_217, %c4_218, %c0_219] : memref<7x7x128xf32, #tpu.memory_space<vmem>>, vector<1x1x128xf32>
      %381 = vector.shape_cast %380 : vector<1x1x128xf32> to vector<128xf32>
      %382 = vector.shape_cast %381 : vector<128xf32> to vector<1x1x128xf32>
      %383 = vector.broadcast %382 : vector<1x1x128xf32> to vector<8x16x128xf32>
      %384 = arith.mulf %379, %383 : vector<8x16x128xf32>
      %385 = arith.addf %378, %384 : vector<8x16x128xf32>
      %386 = vector.extract_strided_slice %351 {offsets = [0, 5, 0], sizes = [8, 16, 128], strides = [1, 1, 1]} : vector<8x22x128xf32> to vector<8x16x128xf32>
      %c6_220 = arith.constant 6 : index
      %c5_221 = arith.constant 5 : index
      %c0_222 = arith.constant 0 : index
      %387 = vector.load %arg4[%c6_220, %c5_221, %c0_222] : memref<7x7x128xf32, #tpu.memory_space<vmem>>, vector<1x1x128xf32>
      %388 = vector.shape_cast %387 : vector<1x1x128xf32> to vector<128xf32>
      %389 = vector.shape_cast %388 : vector<128xf32> to vector<1x1x128xf32>
      %390 = vector.broadcast %389 : vector<1x1x128xf32> to vector<8x16x128xf32>
      %391 = arith.mulf %386, %390 : vector<8x16x128xf32>
      %392 = arith.addf %385, %391 : vector<8x16x128xf32>
      %393 = vector.extract_strided_slice %351 {offsets = [0, 6, 0], sizes = [8, 16, 128], strides = [1, 1, 1]} : vector<8x22x128xf32> to vector<8x16x128xf32>
      %c6_223 = arith.constant 6 : index
      %c6_224 = arith.constant 6 : index
      %c0_225 = arith.constant 0 : index
      %394 = vector.load %arg4[%c6_223, %c6_224, %c0_225] : memref<7x7x128xf32, #tpu.memory_space<vmem>>, vector<1x1x128xf32>
      %395 = vector.shape_cast %394 : vector<1x1x128xf32> to vector<128xf32>
      %396 = vector.shape_cast %395 : vector<128xf32> to vector<1x1x128xf32>
      %397 = vector.broadcast %396 : vector<1x1x128xf32> to vector<8x16x128xf32>
      %398 = arith.mulf %393, %397 : vector<8x16x128xf32>
      %399 = arith.addf %392, %398 : vector<8x16x128xf32>
      %c0_226 = arith.constant 0 : index
      %c0_227 = arith.constant 0 : index
      %c0_228 = arith.constant 0 : index
      %400 = vector.load %arg15[%c0_226, %c0_227, %c0_228] : memref<8x16x128xf32, #tpu.memory_space<vmem>>, vector<8x16x128xf32>
      %401 = arith.addf %400, %399 : vector<8x16x128xf32>
      %c0_229 = arith.constant 0 : index
      %c0_230 = arith.constant 0 : index
      %c0_231 = arith.constant 0 : index
      %402 = vector.load %arg15[%c0_229, %c0_230, %c0_231] : memref<8x16x128xf32, #tpu.memory_space<vmem>>, vector<8x16x128xf32>
      tpu.vector_store %arg15[%c0_229, %c0_230, %c0_231], %401 {strides = array<i32>} : memref<8x16x128xf32, #tpu.memory_space<vmem>>, vector<8x16x128xf32>,
      %c0_232 = arith.constant 0 : index
      %c0_233 = arith.constant 0 : index
      %c0_234 = arith.constant 0 : index
      %403 = vector.load %arg15[%c0_232, %c0_233, %c0_234] : memref<8x16x128xf32, #tpu.memory_space<vmem>>, vector<8x16x128xf32>
      %404 = vector.shape_cast %403 : vector<8x16x128xf32> to vector<128x128xf32>
      %cst_235 = arith.constant dense<0.000000e+00> : vector<128xf32>
      %405 = vector.multi_reduction <add>, %404, %cst_235 [1] : vector<128x128xf32> to vector<128xf32>
      %406 = vector.shape_cast %405 : vector<128xf32> to vector<128x1xf32>
      %cst_236 = arith.constant 2.500000e-01 : f32
      %407 = vector.broadcast %cst_236 : f32 to vector<128x1xf32>
      %408 = arith.mulf %406, %407 : vector<128x1xf32>
      %409 = vector.broadcast %408 : vector<128x1xf32> to vector<128x128xf32>
      %410 = arith.subf %404, %409 : vector<128x128xf32>
      %411 = tpu.iota {dimensions = array<i32: 1>} : vector<1x128xi32>
      %c4_i32 = arith.constant 4 : i32
      %412 = vector.broadcast %c4_i32 : i32 to vector<1x128xi32>
      %413 = arith.cmpi slt, %411, %412 : vector<1x128xi32>
      %cst_237 = arith.constant 0.000000e+00 : f32
      %414 = vector.shape_cast %413 : vector<1x128xi1> to vector<1x128xi1>
      %415 = vector.broadcast %414 : vector<1x128xi1> to vector<128x128xi1>
      %416 = vector.broadcast %cst_237 : f32 to vector<128x128xf32>
      %417 = arith.select %415, %410, %416 : vector<128x128xi1>, vector<128x128xf32>
      %418 = arith.mulf %417, %417 : vector<128x128xf32>
      %cst_238 = arith.constant dense<0.000000e+00> : vector<128xf32>
      %419 = vector.multi_reduction <add>, %418, %cst_238 [1] : vector<128x128xf32> to vector<128xf32>
      %420 = vector.shape_cast %419 : vector<128xf32> to vector<128x1xf32>
      %cst_239 = arith.constant 2.500000e-01 : f32
      %421 = vector.broadcast %cst_239 : f32 to vector<128x1xf32>
      %422 = arith.mulf %420, %421 : vector<128x1xf32>
      %cst_240 = arith.constant 9.99999997E-7 : f32
      %423 = vector.broadcast %cst_240 : f32 to vector<128x1xf32>
      %424 = arith.addf %422, %423 : vector<128x1xf32>
      %425 = math.rsqrt %424 : vector<128x1xf32>
      %426 = vector.broadcast %425 : vector<128x1xf32> to vector<128x128xf32>
      %427 = arith.mulf %417, %426 : vector<128x128xf32>
      %c0_241 = arith.constant 0 : index
      %c0_242 = arith.constant 0 : index
      %428 = vector.load %arg6[%c0_241, %c0_242] : memref<1x128xf32, #tpu.memory_space<vmem>>, vector<1x128xf32>
      %429 = vector.broadcast %428 : vector<1x128xf32> to vector<128x128xf32>
      %430 = arith.mulf %427, %429 : vector<128x128xf32>
      %c0_243 = arith.constant 0 : index
      %c0_244 = arith.constant 0 : index
      %431 = vector.load %arg7[%c0_243, %c0_244] : memref<1x128xf32, #tpu.memory_space<vmem>>, vector<1x128xf32>
      %432 = vector.broadcast %431 : vector<1x128xf32> to vector<128x128xf32>
      %433 = arith.addf %430, %432 : vector<128x128xf32>
      %c0_245 = arith.constant 0 : index
      %c0_246 = arith.constant 0 : index
      %434 = vector.load %arg16[%c0_245, %c0_246] : memref<128x128xf32, #tpu.memory_space<vmem>>, vector<128x128xf32>
      tpu.vector_store %arg16[%c0_245, %c0_246], %433 {strides = array<i32>} : memref<128x128xf32, #tpu.memory_space<vmem>>, vector<128x128xf32>,
    } else {
    }
    %c0 = arith.constant 0 : index
    %c0_1 = arith.constant 0 : index
    %3 = vector.load %arg16[%c0, %c0_1] : memref<128x128xf32, #tpu.memory_space<vmem>>, vector<128x128xf32>
    %c0_2 = arith.constant 0 : index
    %c0_3 = arith.constant 0 : index
    %4 = vector.load %arg8[%c0_2, %c0_3] : memref<128x128xf32, #tpu.memory_space<vmem>>, vector<128x128xf32>
    %cst = arith.constant dense<0.000000e+00> : vector<128x128xf32>
    %5 = tpu.matmul %3, %4, %cst {dimension_numbers = #tpu.dot_dimension_numbers<[1], [0], [0], [1], [0, 0, 1, 1], [], []>} : vector<128x128xf32>, vector<128x128xf32>, vector<128x128xf32> -> vector<128x128xf32>
    %c0_4 = arith.constant 0 : index
    %c0_5 = arith.constant 0 : index
    %6 = vector.load %arg9[%c0_4, %c0_5] : memref<1x128xf32, #tpu.memory_space<vmem>>, vector<1x128xf32>
    %7 = vector.broadcast %6 : vector<1x128xf32> to vector<128x128xf32>
    %8 = arith.addf %5, %7 : vector<128x128xf32>
    %cst_6 = arith.constant 5.000000e-01 : f32
    %9 = vector.broadcast %cst_6 : f32 to vector<128x128xf32>
    %10 = arith.mulf %9, %8 : vector<128x128xf32>
    %cst_7 = arith.constant 0.707106769 : f32
    %11 = vector.broadcast %cst_7 : f32 to vector<128x128xf32>
    %12 = arith.mulf %8, %11 : vector<128x128xf32>
    %13 = math.erf %12 : vector<128x128xf32>
    %cst_8 = arith.constant 1.000000e+00 : f32
    %14 = vector.broadcast %cst_8 : f32 to vector<128x128xf32>
    %15 = arith.addf %14, %13 : vector<128x128xf32>
    %16 = arith.mulf %10, %15 : vector<128x128xf32>
    %c0_9 = arith.constant 0 : index
    %c0_10 = arith.constant 0 : index
    %17 = vector.load %arg10[%c0_9, %c0_10] : memref<128x128xf32, #tpu.memory_space<vmem>>, vector<128x128xf32>
    %cst_11 = arith.constant dense<0.000000e+00> : vector<128x128xf32>
    %18 = tpu.matmul %16, %17, %cst_11 {dimension_numbers = #tpu.dot_dimension_numbers<[1], [0], [0], [1], [0, 0, 1, 1], [], []>} : vector<128x128xf32>, vector<128x128xf32>, vector<128x128xf32> -> vector<128x128xf32>
    %c0_i32_12 = arith.constant 0 : i32
    %19 = arith.cmpi eq, %arg2, %c0_i32_12 : i32
    %20 = arith.extui %19 : i1 to i32
    %c0_i32_13 = arith.constant 0 : i32
    %21 = arith.cmpi ne, %20, %c0_i32_13 : i32
    scf.if %21 {
      %c0_18 = arith.constant 0 : index
      %c0_19 = arith.constant 0 : index
      %28 = vector.load %arg17[%c0_18, %c0_19] : memref<128x128xf32, #tpu.memory_space<vmem>>, vector<128x128xf32>
      tpu.vector_store %arg17[%c0_18, %c0_19], %18 {strides = array<i32>} : memref<128x128xf32, #tpu.memory_space<vmem>>, vector<128x128xf32>,
    } else {
    }
    %c0_i32_14 = arith.constant 0 : i32
    %22 = arith.cmpi sgt, %arg2, %c0_i32_14 : i32
    %23 = arith.extui %22 : i1 to i32
    %c0_i32_15 = arith.constant 0 : i32
    %24 = arith.cmpi ne, %23, %c0_i32_15 : i32
    scf.if %24 {
      %c0_18 = arith.constant 0 : index
      %c0_19 = arith.constant 0 : index
      %28 = vector.load %arg17[%c0_18, %c0_19] : memref<128x128xf32, #tpu.memory_space<vmem>>, vector<128x128xf32>
      %29 = arith.addf %28, %18 : vector<128x128xf32>
      %c0_20 = arith.constant 0 : index
      %c0_21 = arith.constant 0 : index
      %30 = vector.load %arg17[%c0_20, %c0_21] : memref<128x128xf32, #tpu.memory_space<vmem>>, vector<128x128xf32>
      tpu.vector_store %arg17[%c0_20, %c0_21], %29 {strides = array<i32>} : memref<128x128xf32, #tpu.memory_space<vmem>>, vector<128x128xf32>,
    } else {
    }
    %c0_i32_16 = arith.constant 0 : i32
    %25 = arith.cmpi eq, %arg2, %c0_i32_16 : i32
    %26 = arith.extui %25 : i1 to i32
    %c0_i32_17 = arith.constant 0 : i32
    %27 = arith.cmpi ne, %26, %c0_i32_17 : i32
    scf.if %27 {
      %c3 = arith.constant 3 : index
      %c3_18 = arith.constant 3 : index
      %c0_19 = arith.constant 0 : index
      %28 = vector.load %arg14[%c3, %c3_18, %c0_19] : memref<14x22x128xf32, #tpu.memory_space<vmem>>, vector<8x16x128xf32>
      %29 = vector.shape_cast %28 : vector<8x16x128xf32> to vector<128x128xf32>
      %c0_20 = arith.constant 0 : index
      %c0_21 = arith.constant 0 : index
      %30 = vector.load %arg12[%c0_20, %c0_21] : memref<1x128xf32, #tpu.memory_space<vmem>>, vector<1x128xf32>
      %c0_22 = arith.constant 0 : index
      %c0_23 = arith.constant 0 : index
      %31 = vector.load %arg17[%c0_22, %c0_23] : memref<128x128xf32, #tpu.memory_space<vmem>>, vector<128x128xf32>
      %c0_24 = arith.constant 0 : index
      %c0_25 = arith.constant 0 : index
      %32 = vector.load %arg11[%c0_24, %c0_25] : memref<1x128xf32, #tpu.memory_space<vmem>>, vector<1x128xf32>
      %33 = vector.broadcast %32 : vector<1x128xf32> to vector<128x128xf32>
      %34 = arith.addf %31, %33 : vector<128x128xf32>
      %35 = vector.broadcast %30 : vector<1x128xf32> to vector<128x128xf32>
      %36 = arith.mulf %35, %34 : vector<128x128xf32>
      %37 = arith.addf %29, %36 : vector<128x128xf32>
      %38 = vector.shape_cast %37 : vector<128x128xf32> to vector<1x128x128xf32>
      %c0_26 = arith.constant 0 : index
      %c0_27 = arith.constant 0 : index
      %c0_28 = arith.constant 0 : index
      %39 = vector.load %arg13[%c0_26, %c0_27, %c0_28] : memref<1x128x128xf32, #tpu.memory_space<vmem>>, vector<1x128x128xf32>
      tpu.vector_store %arg13[%c0_26, %c0_27, %c0_28], %38 {strides = array<i32>} : memref<1x128x128xf32, #tpu.memory_space<vmem>>, vector<1x128x128xf32>,
    } else {
    }
    return
  }
  func.func @transform_1(%arg0: i32, %arg1: i32, %arg2: i32) -> (i32, i32, i32) {
    %c0_i32 = arith.constant 0 : i32
    %c0_i32_0 = arith.constant 0 : i32
    %c0_i32_1 = arith.constant 0 : i32
    %c0_i32_2 = arith.constant 0 : i32
    return %c0_i32, %c0_i32_0, %c0_i32_1 : i32, i32, i32
  }
  func.func @transform_2(%arg0: i32, %arg1: i32, %arg2: i32) -> (i32, i32) {
    %c0_i32 = arith.constant 0 : i32
    %c0_i32_0 = arith.constant 0 : i32
    %c0_i32_1 = arith.constant 0 : i32
    return %c0_i32, %c0_i32_0 : i32, i32
  }
  func.func @transform_3(%arg0: i32, %arg1: i32, %arg2: i32) -> (i32, i32) {
    %c0_i32 = arith.constant 0 : i32
    %c0_i32_0 = arith.constant 0 : i32
    %c0_i32_1 = arith.constant 0 : i32
    return %c0_i32, %c0_i32_0 : i32, i32
  }
  func.func @transform_4(%arg0: i32, %arg1: i32, %arg2: i32) -> (i32, i32) {
    %c0_i32 = arith.constant 0 : i32
    %c0_i32_0 = arith.constant 0 : i32
    %c0_i32_1 = arith.constant 0 : i32
    return %c0_i32, %c0_i32_0 : i32, i32
  }
  func.func @transform_5(%arg0: i32, %arg1: i32, %arg2: i32) -> (i32, i32) {
    %c0_i32 = arith.constant 0 : i32
    %c0_i32_0 = arith.constant 0 : i32
    return %c0_i32, %arg2 : i32, i32
  }
  func.func @transform_6(%arg0: i32, %arg1: i32, %arg2: i32) -> (i32, i32) {
    %c0_i32 = arith.constant 0 : i32
    %c0_i32_0 = arith.constant 0 : i32
    return %c0_i32, %arg2 : i32, i32
  }
  func.func @transform_7(%arg0: i32, %arg1: i32, %arg2: i32) -> (i32, i32) {
    %c0_i32 = arith.constant 0 : i32
    %c0_i32_0 = arith.constant 0 : i32
    return %arg2, %c0_i32 : i32, i32
  }
  func.func @transform_8(%arg0: i32, %arg1: i32, %arg2: i32) -> (i32, i32) {
    %c0_i32 = arith.constant 0 : i32
    %c0_i32_0 = arith.constant 0 : i32
    %c0_i32_1 = arith.constant 0 : i32
    return %c0_i32, %c0_i32_0 : i32, i32
  }
  func.func @transform_9(%arg0: i32, %arg1: i32, %arg2: i32) -> (i32, i32) {
    %c0_i32 = arith.constant 0 : i32
    %c0_i32_0 = arith.constant 0 : i32
    %c0_i32_1 = arith.constant 0 : i32
    return %c0_i32, %c0_i32_0 : i32, i32
  }
  func.func @transform_10(%arg0: i32, %arg1: i32, %arg2: i32) -> (i32, i32, i32) {
    %c0_i32 = arith.constant 0 : i32
    %c0_i32_0 = arith.constant 0 : i32
    return %arg0, %arg1, %c0_i32 : i32, i32, i32
  }
}

</mosaic_0001>

<bundles_post_ra>
// kernel: _lambda_.1
= control target key start
LH: loop header
LB: loop body
LE: loop exit
PB: predicated region body
PF: predicated region fallthrough
CT: control target
= control target key end

     0   :  { %s8381_s13 = smov 0   ;;  %s8383_s14 = smov 0   ;;  %s15311_s0 = inlined_call_operand.vmem [shape: f32[2,22,22,128], index: 0, kind: input, shape index: {}]   ;;  %s15312_s1 = inlined_call_operand.vmem [shape: f32[7,7,128], index: 1, kind: input, shape index: {}]   ;;  %s15313_s2 = inlined_call_operand.vmem [shape: f32[1,128], index: 2, kind: input, shape index: {}]   ;;  %s15314_s3 = inlined_call_operand.vmem [shape: f32[1,128], index: 3, kind: input, shape index: {}]   ;;  %s15315_s4 = inlined_call_operand.vmem [shape: f32[1,128], index: 4, kind: input, shape index: {}]   ;;  %s15316_s5 = inlined_call_operand.vmem [shape: f32[128,128], index: 5, kind: input, shape index: {}]   ;;  %s15317_s6 = inlined_call_operand.vmem [shape: f32[1,128], index: 6, kind: input, shape index: {}]   ;;  %s15318_s7 = inlined_call_operand.vmem [shape: f32[128,128], index: 7, kind: input, shape index: {}]   ;;  %s15319_s8 = inlined_call_operand.vmem [shape: f32[1,128], index: 8, kind: input, shape index: {}]   ;;  %s15320_s9 = inlined_call_operand.vmem [shape: f32[1,128], index: 9, kind: input, shape index: {}]   ;;  %s15321_s10 = inlined_call_operand.vmem [shape: f32[2,256,128], index: 10, kind: output, shape index: {}]  }
   0x1   :  { %s8385_s15 = smov 0   ;;  %s8387_s16 = smov 0  }
   0x2   :  { %s8389_s17 = smov 0  }
   0x3 LB: > { %s35_s18 = sadd.s32 1, %s8316_s15  ;;  %s39_s19 = sadd.s32 1, %s8320_s16  ;;  %s8324_s17 = sphi %s8389_s17, %s20_s17   ;;  %s8320_s16 = sphi %s8387_s16, %s17461_s16   ;;  %s8316_s15 = sphi %s8385_s15, %s17460_s15   ;;  %s8312_s14 = sphi %s8383_s14, %s17459_s14   ;;  %s8308_s13 = sphi %s8381_s13, %s17458_s13  }
   0x4   : > { %p37_p0 = scmp.ge.s32.totalorder %s35_s18, 2  ;;  %p7545_p1 = scmp.ge.s32.totalorder %s8324_s17, 1 }
   0x5   : > { %p327_p2 = scmp.lt.s32.totalorder %s8324_s17, 5 }
   0x6   : > { %s17463_s18 = smov (%p37_p0, %s35_s18), 0  ;;  %s17465_s19 = smov (!%p37_p0, %s39_s19), %s8320_s16 }
   0x7   : > { %p328_p3 = pnand %p7545_p1, %p327_p2  ;;  %p41_p4 = scmp.ge.s32.totalorder %s17465_s19, 2 }
   0x9   : > { %s17467_s19 = smov (%p41_p4, %s17465_s19), 0  ;;  %331 = sbr.rel (%p328_p3) target bundleno = 1809 (0x711), region = 56 }
   0xa   : > { %16223 = sst [smem:[#allocation9_spill]] %s17467_s19 }
  0x10   : > { %s7546_s20 = sshll.u32 %s8308_s13, 4  ;;  %p388_p5 = scmp.lt.s32.totalorder %s8312_s14, 1 }
  0x11   : > { %p390_p6 = scmp.lt.s32.totalorder %s7546_s20, 31  ;;  %s7550_s21 = smul.u32 192, %s8308_s13 }
  0x12   : > { %s389_s22 = scalar_select %p388_p5, %s8312_s14, 1 }
  0x13   : > { %s17469_s20 = smov (!%p390_p6, %s7546_s20), 31  ;;  %s403_s24 = smul.u32 528, %s8312_s14 }
  0x14   : > { %s7547_s23 = sshll.u32 %s389_s22, 5 }
  0x15   : > { %s393_s25 = sadd.s32 %s7547_s23, %s17469_s20  ;;  %s404_s27 = sadd.s32 %s7550_s21, %s403_s24 }
  0x16   : > { %s7548_s26 = sshll.u32 %s393_s25, 3  ;;  %s8419_s19 = scalar_lea.vmem %s15311_s0, %s404_s27 }
  0x17   : > { %s8414_s30 = scalar_lea.vmem %s15321_s10, %s7548_s26  ;;  %v469_v0 = vld [vmem:[%s8419_s19] sm:$0xff]  ;;  %v471_v1 = vld [vmem:[%s8419_s19 + $0x8] sm:$0xff]  ;;  %v473_v2 = vld [vmem:[%s8419_s19 + $0x18] sm:$0xff] }
  0x18   : > { %470 = vst [vmem:[#allocation2] sm:$0xff] %v469_v0  ;;  %472 = vst [vmem:[#allocation2 + $0x8] sm:$0xff] %v471_v1  ;;  %v475_v3 = vld [vmem:[%s8419_s19 + $0x20] sm:$0xff]  ;;  %v477_v4 = vld [vmem:[%s8419_s19 + $0x30] sm:$0xff] }
  0x19   : > { %474 = vst [vmem:[#allocation2 + $0x18] sm:$0xff] %v473_v2  ;;  %v479_v5 = vld [vmem:[%s8419_s19 + $0x38] sm:$0xff]  ;;  %476 = vst [vmem:[#allocation2 + $0x20] sm:$0xff] %v475_v3  ;;  %v481_v6 = vld [vmem:[%s8419_s19 + $0x48] sm:$0xff] }
  0x1a   : > { %478 = vst [vmem:[#allocation2 + $0x30] sm:$0xff] %v477_v4  ;;  %480 = vst [vmem:[#allocation2 + $0x38] sm:$0xff] %v479_v5  ;;  %v483_v7 = vld [vmem:[%s8419_s19 + $0x50] sm:$0xff]  ;;  %v485_v8 = vld [vmem:[%s8419_s19 + $0x60] sm:$0xff] }
  0x1b   : > { %482 = vst [vmem:[#allocation2 + $0x48] sm:$0xff] %v481_v6  ;;  %484 = vst [vmem:[#allocation2 + $0x50] sm:$0xff] %v483_v7  ;;  %v487_v9 = vld [vmem:[%s8419_s19 + $0x68] sm:$0xff]  ;;  %v489_v10 = vld [vmem:[%s8419_s19 + $0x78] sm:$0xff] }
  0x1c   : > { %486 = vst [vmem:[#allocation2 + $0x60] sm:$0xff] %v485_v8  ;;  %v491_v11 = vld [vmem:[%s8419_s19 + $0x80] sm:$0xff]  ;;  %488 = vst [vmem:[#allocation2 + $0x68] sm:$0xff] %v487_v9  ;;  %v493_v12 = vld [vmem:[%s8419_s19 + $0x90] sm:$0xff] }
  0x1d   : > { %490 = vst [vmem:[#allocation2 + $0x78] sm:$0xff] %v489_v10  ;;  %492 = vst [vmem:[#allocation2 + $0x80] sm:$0xff] %v491_v11  ;;  %v495_v13 = vld [vmem:[%s8419_s19 + $0x98] sm:$0xff]  ;;  %v497_v14 = vld [vmem:[%s8419_s19 + $0xa8] sm:$0xff] }
  0x1e   : > { %494 = vst [vmem:[#allocation2 + $0x90] sm:$0xff] %v493_v12  ;;  %496 = vst [vmem:[#allocation2 + $0x98] sm:$0xff] %v495_v13  ;;  %v499_v15 = vld [vmem:[%s8419_s19 + $0xb0] sm:$0xff]  ;;  %v501_v16 = vld [vmem:[%s8419_s19 + $0xc0] sm:$0xff] }
  0x1f   : > { %498 = vst [vmem:[#allocation2 + $0xa8] sm:$0xff] %v497_v14  ;;  %v503_v17 = vld [vmem:[%s8419_s19 + $0xc8] sm:$0xff]  ;;  %500 = vst [vmem:[#allocation2 + $0xb0] sm:$0xff] %v499_v15  ;;  %v505_v18 = vld [vmem:[%s8419_s19 + $0xd8] sm:$0xff] }
  0x20   : > { %502 = vst [vmem:[#allocation2 + $0xc0] sm:$0xff] %v501_v16  ;;  %504 = vst [vmem:[#allocation2 + $0xc8] sm:$0xff] %v503_v17  ;;  %v507_v19 = vld [vmem:[%s8419_s19 + $0xe0] sm:$0xff]  ;;  %v509_v20 = vld [vmem:[%s8419_s19 + $0xf0] sm:$0xff] }
  0x21   : > { %506 = vst [vmem:[#allocation2 + $0xd8] sm:$0xff] %v505_v18  ;;  %508 = vst [vmem:[#allocation2 + $0xe0] sm:$0xff] %v507_v19  ;;  %v511_v21 = vld [vmem:[%s8419_s19 + $0xf8] sm:$0xff]  ;;  %v513_v22 = vld [vmem:[%s8419_s19 + $0x108] sm:$0xff] }
  0x22   : > { %510 = vst [vmem:[#allocation2 + $0xf0] sm:$0xff] %v509_v20  ;;  %v515_v23 = vld [vmem:[%s8419_s19 + $0x110] sm:$0xff]  ;;  %512 = vst [vmem:[#allocation2 + $0xf8] sm:$0xff] %v511_v21  ;;  %v517_v24 = vld [vmem:[%s8419_s19 + $0x120] sm:$0xff] }
  0x23   : > { %514 = vst [vmem:[#allocation2 + $0x108] sm:$0xff] %v513_v22  ;;  %516 = vst [vmem:[#allocation2 + $0x110] sm:$0xff] %v515_v23  ;;  %v519_v25 = vld [vmem:[%s8419_s19 + $0x128] sm:$0xff]  ;;  %v521_v26 = vld [vmem:[%s8419_s19 + $0x138] sm:$0xff] }
  0x24   : > { %518 = vst [vmem:[#allocation2 + $0x120] sm:$0xff] %v517_v24  ;;  %520 = vst [vmem:[#allocation2 + $0x128] sm:$0xff] %v519_v25  ;;  %v523_v27 = vld [vmem:[%s8419_s19 + $0x140] sm:$0xff]  ;;  %v7551_v28 = vld [vmem:[%s8419_s19 + $0x10] sm:$0x3f] }
  0x25   : > { %522 = vst [vmem:[#allocation2 + $0x138] sm:$0xff] %v521_v26  ;;  %v7552_v29 = vld [vmem:[%s8419_s19 + $0x28] sm:$0x3f]  ;;  %524 = vst [vmem:[#allocation2 + $0x140] sm:$0xff] %v523_v27  ;;  %v7553_v30 = vld [vmem:[%s8419_s19 + $0x40] sm:$0x3f] }
  0x26   : > { %535 = vst [vmem:[#allocation2 + $0x10] sm:$0x3f] %v7551_v28  ;;  %537 = vst [vmem:[#allocation2 + $0x28] sm:$0x3f] %v7552_v29  ;;  %v7554_v31 = vld [vmem:[%s8419_s19 + $0x58] sm:$0x3f] }
  0x27   : > { %v7555_v32 = vld [vmem:[%s8419_s19 + $0x70] sm:$0x3f]  ;;  %539 = vst [vmem:[#allocation2 + $0x40] sm:$0x3f] %v7553_v30  ;;  %541 = vst [vmem:[#allocation2 + $0x58] sm:$0x3f] %v7554_v31 }
  0x28   : > { %543 = vst [vmem:[#allocation2 + $0x70] sm:$0x3f] %v7555_v32  ;;  %v7556_v33 = vld [vmem:[%s8419_s19 + $0x88] sm:$0x3f]  ;;  %v7557_v34 = vld [vmem:[%s8419_s19 + $0xa0] sm:$0x3f] }
  0x29   : > { %v7558_v35 = vld [vmem:[%s8419_s19 + $0xb8] sm:$0x3f]  ;;  %545 = vst [vmem:[#allocation2 + $0x88] sm:$0x3f] %v7556_v33  ;;  %547 = vst [vmem:[#allocation2 + $0xa0] sm:$0x3f] %v7557_v34 }
  0x2a   : > { %549 = vst [vmem:[#allocation2 + $0xb8] sm:$0x3f] %v7558_v35  ;;  %v7559_v36 = vld [vmem:[%s8419_s19 + $0xd0] sm:$0x3f]  ;;  %v7560_v37 = vld [vmem:[%s8419_s19 + $0xe8] sm:$0x3f] }
  0x2b   : > { %v7561_v38 = vld [vmem:[%s8419_s19 + $0x100] sm:$0x3f]  ;;  %551 = vst [vmem:[#allocation2 + $0xd0] sm:$0x3f] %v7559_v36  ;;  %553 = vst [vmem:[#allocation2 + $0xe8] sm:$0x3f] %v7560_v37 }
  0x2c   : > { %555 = vst [vmem:[#allocation2 + $0x100] sm:$0x3f] %v7561_v38  ;;  %v7562_v39 = vld [vmem:[%s8419_s19 + $0x118] sm:$0x3f]  ;;  %v7563_v40 = vld [vmem:[%s8419_s19 + $0x130] sm:$0x3f] }
  0x2d   : > { %v7564_v41 = vld [vmem:[%s8419_s19 + $0x148] sm:$0x3f]  ;;  %557 = vst [vmem:[#allocation2 + $0x118] sm:$0x3f] %v7562_v39  ;;  %559 = vst [vmem:[#allocation2 + $0x130] sm:$0x3f] %v7563_v40 }
  0x2e   : > { %561 = vst [vmem:[#allocation2 + $0x148] sm:$0x3f] %v7564_v41 }
  0x2f   : > { %565 = vsyncadd [#allocation6], 4928 }
  0x30   : > { %8304 = dma.done.wait [#allocation6], 4928 }
  0x31   : > { %8305 = vsyncadd [#allocation6], 4294962368  ;;  %vm692_vm0 = vcmask 1046528   ;;  %v594_v42 = vld [vmem:[#allocation2] sm:$0xff]  ;;  %v595_v43 = vld [vmem:[#allocation2 + $0x8] sm:$0xff]  ;;  %vm818_vm1 = vcmask 1045504  }
  0x32   : > { %vm944_vm2 = vcmask 1044480   ;;  %vm1070_vm3 = vcmask 1043456   ;;  %vm1196_vm4 = vcmask 1042432   ;;  %v8466_v44 = vld [vmem:[%s15312_s1] ss:$0 sm:$0xff]  ;;  %vm1322_vm5 = vcmask 1041408  }
  0x33   : > { %v8471_v45 = vld [vmem:[%s15312_s1 + $0x1] ss:$0 sm:$0xff]  ;;  %v8476_v46 = vld [vmem:[%s15312_s1 + $0x2] ss:$0 sm:$0xff]  ;;  %v623_v47 = vmul.f32 %v8466_v44, %v594_v42  ;;  %v8487_v51 = vld [vmem:[%s15312_s1 + $0x3] ss:$0 sm:$0xff] }
  0x34   : > { %v644_v48 = vmul.f32 %v8471_v45, %v594_v42  ;;  %v8481_v49 = vmul.f32 %v8471_v45, %v595_v43  ;;  %v770_v50 = vmul.f32 %v8476_v46, %v594_v42  ;;  %v8492_v52 = vld [vmem:[%s15312_s1 + $0x4] ss:$0 sm:$0xff]  ;;  %v8495_v53 = vmul.f32 %v8476_v46, %v595_v43  ;;  %v8505_v57 = vld [vmem:[%s15312_s1 + $0x5] ss:$0 sm:$0xff]  ;;  %v8514_v62 = vld [vmem:[%s15312_s1 + $0x6] ss:$0 sm:$0xff] }
  0x35   : > { %v896_v54 = vmul.f32 %v8487_v51, %v594_v42  ;;  %v8499_v55 = vmul.f32 %v8487_v51, %v595_v43  ;;  %v1022_v56 = vmul.f32 %v8492_v52, %v594_v42  ;;  %v8509_v61 = vmul.f32 %v8492_v52, %v595_v43  ;;  %v8526_v7 = vld [vmem:[#allocation2 + $0x18] sm:$0xff]  ;;  %v8531_v8 = vld [vmem:[%s15312_s1 + $0x8] ss:$0 sm:$0xff]  ;;  %v8536_v9 = vld [vmem:[%s15312_s1 + $0x9] ss:$0 sm:$0xff] }
  0x36   : > { %16224 = vst [vmem:[#allocation10_spill] sm:$0xff] %v8481_v49  ;;  %16225 = vst [vmem:[#allocation11_spill] sm:$0xff] %v8495_v53  ;;  %v693_v58 = vrot.slane %v644_v48, 1  ;;  %v15336_v59 = vrot.slane %v8481_v49, 1  ;;  %v819_v60 = vrot.slane %v770_v50, 2  ;;  %v15335_v63 = vrot.slane %v8495_v53, 2 }
  0x37   : > { %16226 = vst [vmem:[#allocation12_spill] sm:$0xff] %v8499_v55  ;;  %16227 = vst [vmem:[#allocation13_spill] sm:$0xff] %v8509_v61  ;;  %v945_v0 = vrot.slane %v896_v54, 3  ;;  %v15333_v1 = vrot.slane %v8499_v55, 3  ;;  %v1071_v2 = vrot.slane %v1022_v56, 4  ;;  %v15330_v4 = vrot.slane %v8509_v61, 4 }
  0x38   : > { %v695_v3 = vsel %vm692_vm0, %v693_v58, %v15336_v59  ;;  %v1148_v5 = vmul.f32 %v8505_v57, %v594_v42  ;;  %v8524_v6 = vmul.f32 %v8505_v57, %v595_v43  ;;  %v821_v11 = vsel %vm818_vm1, %v819_v60, %v15335_v63  ;;  %v8545_v14 = vld [vmem:[#allocation2 + $0x20] sm:$0xff]  ;;  %v8550_v15 = vld [vmem:[%s15312_s1 + $0xa] ss:$0 sm:$0xff]  ;;  %v8562_v20 = vld [vmem:[%s15312_s1 + $0xb] ss:$0 sm:$0xff] }
  0x39   : > { %v749_v10 = vadd.f32 %v695_v3, %v623_v47  ;;  %v947_v12 = vsel %vm944_vm2, %v945_v0, %v15333_v1  ;;  %v1274_v13 = vmul.f32 %v8514_v62, %v594_v42  ;;  %v1073_v16 = vsel %vm1070_vm3, %v1071_v2, %v15330_v4  ;;  %v8581_v29 = vld [vmem:[%s15312_s1 + $0xc] ss:$0 sm:$0xff]  ;;  %v8592_v34 = vld [vmem:[%s15312_s1 + $0xd] ss:$0 sm:$0xff]  ;;  %v8618_v54 = vld [vmem:[%s15312_s1 + $0xe] ss:$0 sm:$0xff] }
  0x3a   : > { %16228 = vst [vmem:[#allocation14_spill] sm:$0xff] %v8524_v6  ;;  %v1197_v17 = vrot.slane %v1148_v5, 5  ;;  %v15329_v18 = vrot.slane %v8524_v6, 5  ;;  %v8557_v19 = vmul.f32 %v8514_v62, %v595_v43  ;;  %v1474_v23 = vmul.f32 %v8531_v8, %v8526_v7  ;;  %v8623_v2 = vld [vmem:[#allocation2 + $0x30] sm:$0xff]  ;;  %v8731_v4 = vld [vmem:[#allocation2 + $0x48] sm:$0xff]  ;;  %v8932_v53 = vld [vmem:[#allocation2 + $0x78] sm:$0xff] }
  0x3b   : > { %v875_v21 = vadd.f32 %v821_v11, %v749_v10  ;;  %v1323_v22 = vrot.slane %v1274_v13, 6  ;;  %v1495_v24 = vmul.f32 %v8536_v9, %v8526_v7  ;;  %v8574_v27 = vmul.f32 %v8536_v9, %v8545_v14  ;;  %v8628_v3 = vld [vmem:[%s15312_s1 + $0x10] ss:$0 sm:$0xff]  ;;  %v8633_v5 = vld [vmem:[%s15312_s1 + $0x11] ss:$0 sm:$0xff] }
  0x3c   : > { %16229 = vst [vmem:[#allocation15_spill] sm:$0xff] %v8557_v19  ;;  %v1199_v25 = vsel %vm1196_vm4, %v1197_v17, %v15329_v18  ;;  %v15328_v26 = vrot.slane %v8557_v19, 6  ;;  %v1620_v28 = vmul.f32 %v8550_v15, %v8526_v7  ;;  %v8585_v32 = vmul.f32 %v8550_v15, %v8545_v14  ;;  %v8638_v10 = vld [vmem:[%s15313_s2] ss:$0 sm:$0xff]  ;;  %v8921_v6 = vld [vmem:[%s15312_s1 + $0x26] ss:$0 sm:$0xff] }
  0x3d   : > { %16230 = vst [vmem:[#allocation16_spill] sm:$0xff] %v8574_v27  ;;  %v1001_v30 = vadd.f32 %v947_v12, %v875_v21  ;;  %v1543_v31 = vrot.slane %v1495_v24, 1  ;;  %v1745_v33 = vmul.f32 %v8562_v20, %v8526_v7  ;;  %v15327_v36 = vrot.slane %v8574_v27, 1  ;;  %v8654_v24 = vld [vmem:[#allocation2 + $0x38] sm:$0xff]  ;;  %16260 = vst [vmem:[#allocation44_spill] sm:$0xff] %v8921_v6 }
  0x3e   : > { %16231 = vst [vmem:[#allocation17_spill] sm:$0xff] %v8585_v32  ;;  %v1325_v35 = vsel %vm1322_vm5, %v1323_v22, %v15328_v26  ;;  %v1668_v37 = vrot.slane %v1620_v28, 2  ;;  %v8600_v38 = vmul.f32 %v8562_v20, %v8545_v14  ;;  %v15326_v40 = vrot.slane %v8585_v32, 2 }
  0x3f   : > { %v1127_v39 = vadd.f32 %v1073_v16, %v1001_v30  ;;  %v1793_v41 = vrot.slane %v1745_v33, 3  ;;  %v1870_v42 = vmul.f32 %v8581_v29, %v8526_v7  ;;  %v1545_v43 = vsel %vm692_vm0, %v1543_v31, %v15327_v36 }
  0x40   : > { %16232 = vst [vmem:[#allocation18_spill] sm:$0xff] %v8600_v38  ;;  %v15325_v47 = vrot.slane %v8600_v38, 3  ;;  %v8611_v48 = vmul.f32 %v8581_v29, %v8545_v14  ;;  %v1995_v50 = vmul.f32 %v8592_v34, %v8526_v7  ;;  %v1599_v58 = vadd.f32 %v1545_v43, %v1474_v23  ;;  %v8679_v43 = vld [vmem:[%s15312_s1 + $0x14] ss:$0 sm:$0xff] }
  0x41   : > { %v1253_v56 = vadd.f32 %v1199_v25, %v1127_v39  ;;  %v1670_v60 = vsel %vm818_vm1, %v1668_v37, %v15326_v40  ;;  %v1918_v0 = vrot.slane %v1870_v42, 4  ;;  %v8646_v13 = vmul.f32 %v8592_v34, %v8545_v14  ;;  %v8659_v25 = vld [vmem:[%s15312_s1 + $0x12] ss:$0 sm:$0xff] }
  0x42   : > { %16233 = vst [vmem:[#allocation19_spill] sm:$0xff] %v8611_v48  ;;  %v1795_v11 = vsel %vm944_vm2, %v1793_v41, %v15325_v47  ;;  %v15324_v12 = vrot.slane %v8611_v48, 4  ;;  %v2043_v16 = vrot.slane %v1995_v50, 5  ;;  %v1724_v21 = vadd.f32 %v1670_v60, %v1599_v58  ;;  %v8719_v47 = vld [vmem:[%s15312_s1 + $0x16] ss:$0 sm:$0xff] }
  0x43   : > { %16234 = vst [vmem:[#allocation20_spill] sm:$0xff] %v8646_v13  ;;  %v1379_v17 = vadd.f32 %v1325_v35, %v1253_v56  ;;  %v2120_v22 = vmul.f32 %v8618_v54, %v8526_v7  ;;  %v8652_v23 = vmul.f32 %v8618_v54, %v8545_v14  ;;  %v15323_v30 = vrot.slane %v8646_v13, 5  ;;  %v8672_v35 = vld [vmem:[%s15312_s1 + $0x13] ss:$0 sm:$0xff] }
  0x44   : > { %v1920_v28 = vsel %vm1070_vm3, %v1918_v0, %v15324_v12  ;;  %v2319_v31 = vmul.f32 %v8628_v3, %v8623_v2  ;;  %v2340_v33 = vmul.f32 %v8633_v5, %v8623_v2  ;;  %v1849_v39 = vadd.f32 %v1795_v11, %v1724_v21  ;;  %v8702_v21 = vld [vmem:[%s15312_s1 + $0x15] ss:$0 sm:$0xff] }
  0x45   : > { %16235 = vst [vmem:[#allocation21_spill] sm:$0xff] %v8652_v23  ;;  %v1411_v37 = vadd.f32 %v8638_v10, %v1379_v17  ;;  %v2168_v41 = vrot.slane %v2120_v22, 6  ;;  %v15322_v42 = vrot.slane %v8652_v23, 6  ;;  %v2045_v50 = vsel %vm1196_vm4, %v2043_v16, %v15323_v30 }
  0x46   : > { %v8686_v56 = vmul.f32 %v8633_v5, %v8654_v24  ;;  %v2388_v58 = vrot.slane %v2340_v33, 1  ;;  %v2465_v60 = vmul.f32 %v8659_v25, %v8623_v2  ;;  %v1974_v0 = vadd.f32 %v1920_v28, %v1849_v39 }
  0x47   : > { %v2170_v11 = vsel %vm1322_vm5, %v2168_v41, %v15322_v42  ;;  %v8695_v17 = vmul.f32 %v8659_v25, %v8654_v24  ;;  %v2590_v16 = vmul.f32 %v8672_v35, %v8623_v2  ;;  %v8707_v28 = vmul.f32 %v8672_v35, %v8654_v24 }
  0x48   : > { %16236 = vst [vmem:[#allocation22_spill] sm:$0xff] %v8686_v56  ;;  %v15332_v22 = vrot.slane %v8686_v56, 1  ;;  %v2513_v33 = vrot.slane %v2465_v60, 2  ;;  %v2715_v39 = vmul.f32 %v8679_v43, %v8623_v2  ;;  %v2099_v41 = vadd.f32 %v2045_v50, %v1974_v0 }
  0x49   : > { %16237 = vst [vmem:[#allocation23_spill] sm:$0xff] %v8695_v17  ;;  %16238 = vst [vmem:[#allocation24_spill] sm:$0xff] %v8707_v28  ;;  %v15331_v42 = vrot.slane %v8695_v17, 2  ;;  %v2638_v30 = vrot.slane %v2590_v16, 3  ;;  %v8714_v12 = vmul.f32 %v8679_v43, %v8654_v24  ;;  %v15334_v40 = vrot.slane %v8707_v28, 3 }
  0x4a   : > { %v2390_v60 = vsel %vm692_vm0, %v2388_v58, %v15332_v22  ;;  %v2763_v36 = vrot.slane %v2715_v39, 4  ;;  %v2840_v50 = vmul.f32 %v8702_v21, %v8623_v2  ;;  %v2224_v0 = vadd.f32 %v2170_v11, %v2099_v41  ;;  %v8736_v58 = vld [vmem:[%s15312_s1 + $0x18] ss:$0 sm:$0xff]  ;;  %v8741_v39 = vld [vmem:[%s15312_s1 + $0x19] ss:$0 sm:$0xff] }
  0x4b   : > { %16239 = vst [vmem:[#allocation25_spill] sm:$0xff] %v8714_v12  ;;  %v2444_v16 = vadd.f32 %v2390_v60, %v2319_v31  ;;  %v2515_v26 = vsel %vm818_vm1, %v2513_v33, %v15331_v42  ;;  %v15337_v18 = vrot.slane %v8714_v12, 4  ;;  %v2640_v31 = vsel %vm944_vm2, %v2638_v30, %v15334_v40  ;;  %v8752_v60 = vld [vmem:[#allocation2 + $0x50] sm:$0xff]  ;;  %v8757_v42 = vld [vmem:[%s15312_s1 + $0x1a] ss:$0 sm:$0xff] }
  0x4c   : > { %v8748_v11 = vmul.f32 %v8702_v21, %v8654_v24  ;;  %v2888_v33 = vrot.slane %v2840_v50, 5  ;;  %v2965_v41 = vmul.f32 %v8719_v47, %v8623_v2  ;;  %v2256_v22 = vadd.f32 %v2224_v0, %v1411_v37  ;;  %v8769_v50 = vld [vmem:[%s15312_s1 + $0x1b] ss:$0 sm:$0xff] }
  0x4d   : > { %v2569_v1 = vadd.f32 %v2515_v26, %v2444_v16  ;;  %v2765_v30 = vsel %vm1070_vm3, %v2763_v36, %v15337_v18  ;;  %v8764_v40 = vmul.f32 %v8719_v47, %v8654_v24  ;;  %v3164_v37 = vmul.f32 %v8736_v58, %v8731_v4  ;;  %v8800_v36 = vld [vmem:[%s15312_s1 + $0x1d] ss:$0 sm:$0xff] }
  0x4e   : > { %16240 = vst [vmem:[#allocation26_spill] sm:$0xff] %v8748_v11  ;;  %v15343_v63 = vrot.slane %v8748_v11, 5  ;;  %v3013_v59 = vrot.slane %v2965_v41, 6  ;;  %v3185_v26 = vmul.f32 %v8741_v39, %v8731_v4  ;;  %v8779_v16 = vmul.f32 %v8741_v39, %v8752_v60  ;;  %v8786_v41 = vld [vmem:[%s15312_s1 + $0x1c] ss:$0 sm:$0xff] }
  0x4f   : > { %16241 = vst [vmem:[#allocation27_spill] sm:$0xff] %v8764_v40  ;;  %v2694_v0 = vadd.f32 %v2640_v31, %v2569_v1  ;;  %v3310_v18 = vmul.f32 %v8757_v42, %v8731_v4  ;;  %v8793_v1 = vmul.f32 %v8757_v42, %v8752_v60  ;;  %v3435_v31 = vmul.f32 %v8769_v50, %v8731_v4 }
  0x50   : > { %16242 = vst [vmem:[#allocation28_spill] sm:$0xff] %v8779_v16  ;;  %v2890_v12 = vsel %vm1196_vm4, %v2888_v33, %v15343_v63  ;;  %v3233_v28 = vrot.slane %v3185_v26, 1  ;;  %v16244_v56 = vrot.slane %v8764_v40, 6  ;;  %v15348_v33 = vrot.slane %v8779_v16, 1  ;;  %v8862_v16 = vld [vmem:[%s15312_s1 + $0x22] ss:$0 sm:$0xff] }
  0x51   : > { %16243 = vst [vmem:[#allocation29_spill] sm:$0xff] %v8793_v1  ;;  %v2819_v17 = vadd.f32 %v2765_v30, %v2694_v0  ;;  %v3358_v26 = vrot.slane %v3310_v18, 2  ;;  %v15351_v63 = vrot.slane %v8793_v1, 2  ;;  %v8809_v23 = vmul.f32 %v8769_v50, %v8752_v60  ;;  %16251 = vst [vmem:[#allocation36_spill] sm:$0xff] %v8862_v16 }
  0x52   : > { %v3015_v11 = vsel %vm1322_vm5, %v3013_v59, %v16244_v56  ;;  %v3483_v13 = vrot.slane %v3435_v31, 3  ;;  %v3560_v48 = vmul.f32 %v8786_v41, %v8731_v4  ;;  %v3235_v30 = vsel %vm692_vm0, %v3233_v28, %v15348_v33  ;;  %v8825_v56 = vld [vmem:[%s15312_s1 + $0x1e] ss:$0 sm:$0xff]  ;;  %v8834_v31 = vld [vmem:[%s15312_s1 + $0x20] ss:$0 sm:$0xff] }
  0x53   : > { %16245 = vst [vmem:[#allocation30_spill] sm:$0xff] %v8809_v23  ;;  %v2944_v38 = vadd.f32 %v2890_v12, %v2819_v17  ;;  %v8818_v59 = vmul.f32 %v8786_v41, %v8752_v60  ;;  %v3685_v18 = vmul.f32 %v8800_v36, %v8731_v4  ;;  %v3289_v0 = vadd.f32 %v3235_v30, %v3164_v37  ;;  %v8841_v30 = vld [vmem:[#allocation2 + $0x60] sm:$0xff] }
  0x54   : > { %v3360_v12 = vsel %vm818_vm1, %v3358_v26, %v15351_v63  ;;  %v15353_v17 = vrot.slane %v8809_v23, 3  ;;  %v3608_v28 = vrot.slane %v3560_v48, 4  ;;  %16247 = vst [vmem:[#allocation32_spill] sm:$0xff] %v8834_v31  ;;  %v8839_v40 = vmul.f32 %v8800_v36, %v8752_v60  ;;  %v8846_v26 = vld [vmem:[%s15312_s1 + $0x21] ss:$0 sm:$0xff] }
  0x55   : > { %16246 = vst [vmem:[#allocation31_spill] sm:$0xff] %v8818_v59  ;;  %v3069_v33 = vadd.f32 %v3015_v11, %v2944_v38  ;;  %v3733_v37 = vrot.slane %v3685_v18, 5  ;;  %16249 = vst [vmem:[#allocation34_spill] sm:$0xff] %v8846_v26  ;;  %v3414_v48 = vadd.f32 %v3360_v12, %v3289_v0  ;;  %v3810_v38 = vmul.f32 %v8825_v56, %v8731_v4  ;;  %v8857_v18 = vld [vmem:[#allocation2 + $0x68] sm:$0xff]  ;;  %v8873_v23 = vld [vmem:[%s15312_s1 + $0x23] ss:$0 sm:$0xff] }
  0x56   : > { %16248 = vst [vmem:[#allocation33_spill] sm:$0xff] %v8839_v40  ;;  %v3485_v63 = vsel %vm944_vm2, %v3483_v13, %v15353_v17  ;;  %v8855_v11 = vmul.f32 %v8825_v56, %v8752_v60  ;;  %v16252_v0 = vrot.slane %v8818_v59, 4  ;;  %v15358_v13 = vrot.slane %v8839_v40, 5  ;;  %16253 = vst [vmem:[#allocation37_spill] sm:$0xff] %v8873_v23  ;;  %v8904_v59 = vld [vmem:[%s15312_s1 + $0x25] ss:$0 sm:$0xff] }
  0x57   : > { %v3101_v1 = vadd.f32 %v3069_v33, %v2256_v22  ;;  %v4009_v17 = vmul.f32 %v8834_v31, %v8841_v30  ;;  %v3539_v32 = vadd.f32 %v3485_v63, %v3414_v48  ;;  %v3858_v27 = vrot.slane %v3810_v38, 6  ;;  %v8894_v48 = vld [vmem:[%s15312_s1 + $0x24] ss:$0 sm:$0xff]  ;;  %16257 = vst [vmem:[#allocation41_spill] sm:$0xff] %v8904_v59 }
  0x58   : > { %16250 = vst [vmem:[#allocation35_spill] sm:$0xff] %v8855_v11  ;;  %v3610_v12 = vsel %vm1070_vm3, %v3608_v28, %v16252_v0  ;;  %v15364_v19 = vrot.slane %v8855_v11, 6  ;;  %v4030_v22 = vmul.f32 %v8846_v26, %v8841_v30  ;;  %v3735_v33 = vsel %vm1196_vm4, %v3733_v37, %v15358_v13  ;;  %16256 = vst [vmem:[#allocation40_spill] sm:$0xff] %v8894_v48 }
  0x59   : > { %v8883_v28 = vmul.f32 %v8846_v26, %v8857_v18  ;;  %v4155_v0 = vmul.f32 %v8862_v16, %v8841_v30  ;;  %v8889_v63 = vmul.f32 %v8862_v16, %v8857_v18  ;;  %v3664_v38 = vadd.f32 %v3610_v12, %v3539_v32 }
  0x5a   : > { %v3860_v37 = vsel %vm1322_vm5, %v3858_v27, %v15364_v19  ;;  %v4078_v13 = vrot.slane %v4030_v22, 1  ;;  %v4280_v40 = vmul.f32 %v8873_v23, %v8841_v30  ;;  %v8910_v32 = vmul.f32 %v8873_v23, %v8857_v18 }
  0x5b   : > { %16254 = vst [vmem:[#allocation38_spill] sm:$0xff] %v8883_v28  ;;  %16255 = vst [vmem:[#allocation39_spill] sm:$0xff] %v8889_v63  ;;  %v4203_v61 = vrot.slane %v4155_v0, 2  ;;  %v3789_v12 = vadd.f32 %v3735_v33, %v3664_v38  ;;  %v4405_v22 = vmul.f32 %v8894_v48, %v8841_v30  ;;  %v8916_v19 = vmul.f32 %v8894_v48, %v8857_v18 }
  0x5c   : > { %16258 = vst [vmem:[#allocation42_spill] sm:$0xff] %v8910_v32  ;;  %v4328_v27 = vrot.slane %v4280_v40, 3  ;;  %v16261_v0 = vrot.slane %v8883_v28, 1  ;;  %v16262_v11 = vrot.slane %v8889_v63, 2  ;;  %v15375_v33 = vrot.slane %v8910_v32, 3 }
  0x5d   : > { %16259 = vst [vmem:[#allocation43_spill] sm:$0xff] %v8916_v19  ;;  %v4530_v38 = vmul.f32 %v8904_v59, %v8841_v30  ;;  %v3914_v49 = vadd.f32 %v3860_v37, %v3789_v12  ;;  %v4453_v23 = vrot.slane %v4405_v22, 4  ;;  %v4655_v37 = vmul.f32 %v8921_v6, %v8841_v30  ;;  %v8954_v12 = vld [vmem:[#allocation2 + $0x80] sm:$0xff]  ;;  %v8959_v22 = vld [vmem:[%s15312_s1 + $0x2a] ss:$0 sm:$0xff] }
  0x5e   : > { %v4080_v55 = vsel %vm692_vm0, %v4078_v13, %v16261_v0  ;;  %v4205_v40 = vsel %vm818_vm1, %v4203_v61, %v16262_v11  ;;  %v8938_v13 = vld [vmem:[%s15312_s1 + $0x28] ss:$0 sm:$0xff]  ;;  %v8943_v61 = vld [vmem:[%s15312_s1 + $0x29] ss:$0 sm:$0xff]  ;;  %v4330_v11 = vsel %vm944_vm2, %v4328_v27, %v15375_v33  ;;  %16266 = vst [vmem:[#allocation48_spill] sm:$0xff] %v8954_v12  ;;  %16267 = vst [vmem:[#allocation49_spill] sm:$0xff] %v8959_v22 }
  0x5f   : > { %v4134_v48 = vadd.f32 %v4080_v55, %v4009_v17  ;;  %16263 = vst [vmem:[#allocation45_spill] sm:$0xff] %v8938_v13  ;;  %16264 = vst [vmem:[#allocation46_spill] sm:$0xff] %v8943_v61  ;;  %v8950_v55 = vmul.f32 %v8904_v59, %v8857_v18  ;;  %v4578_v17 = vrot.slane %v4530_v38, 5  ;;  %v3946_v0 = vadd.f32 %v3914_v49, %v3101_v1  ;;  %v8971_v38 = vld [vmem:[%s15312_s1 + $0x2b] ss:$0 sm:$0xff] }
  0x60   : > { %v16268_v32 = vrot.slane %v8916_v19, 4  ;;  %v8966_v33 = vmul.f32 %v8921_v6, %v8857_v18  ;;  %16270 = vst [vmem:[#allocation51_spill] sm:$0xff] %v8971_v38  ;;  %v4703_v28 = vrot.slane %v4655_v37, 6  ;;  %v4854_v49 = vmul.f32 %v8938_v13, %v8932_v53  ;;  %v8988_v37 = vld [vmem:[%s15312_s1 + $0x2c] ss:$0 sm:$0xff] }
  0x61   : > { %16265 = vst [vmem:[#allocation47_spill] sm:$0xff] %v8950_v55  ;;  %v4259_v16 = vadd.f32 %v4205_v40, %v4134_v48  ;;  %v15386_v63 = vrot.slane %v8950_v55, 5  ;;  %v4875_v1 = vmul.f32 %v8943_v61, %v8932_v53  ;;  %v5000_v40 = vmul.f32 %v8959_v22, %v8932_v53  ;;  %16272 = vst [vmem:[#allocation53_spill] sm:$0xff] %v8988_v37 }
  0x62   : > { %v4455_v27 = vsel %vm1070_vm3, %v4453_v23, %v16268_v32  ;;  %16269 = vst [vmem:[#allocation50_spill] sm:$0xff] %v8966_v33  ;;  %v8981_v32 = vmul.f32 %v8943_v61, %v8954_v12  ;;  %v9002_v23 = vld [vmem:[%s15312_s1 + $0x2d] ss:$0 sm:$0xff]  ;;  %v16275_v6 = vrot.slane %v8966_v33, 6  ;;  %v5250_v26 = vmul.f32 %v8988_v37, %v8932_v53 }
  0x63   : > { %v4384_v48 = vadd.f32 %v4330_v11, %v4259_v16  ;;  %v4580_v19 = vsel %vm1196_vm4, %v4578_v17, %v15386_v63  ;;  %v4923_v13 = vrot.slane %v4875_v1, 1  ;;  %v8995_v16 = vmul.f32 %v8959_v22, %v8954_v12  ;;  %16274 = vst [vmem:[#allocation55_spill] sm:$0xff] %v9002_v23 }
  0x64   : > { %16271 = vst [vmem:[#allocation52_spill] sm:$0xff] %v8981_v32  ;;  %v5125_v11 = vmul.f32 %v8971_v38, %v8932_v53  ;;  %v4705_v55 = vsel %vm1322_vm5, %v4703_v28, %v16275_v6  ;;  %v15394_v17 = vrot.slane %v8981_v32, 1  ;;  %v5048_v1 = vrot.slane %v5000_v40, 2  ;;  %v9064_v32 = vld [vmem:[%s15312_s1 + $0x32] ss:$0 sm:$0xff] }
  0x65   : > { %16273 = vst [vmem:[#allocation54_spill] sm:$0xff] %v8995_v16  ;;  %v4509_v61 = vadd.f32 %v4455_v27, %v4384_v48  ;;  %v15397_v63 = vrot.slane %v8995_v16, 2  ;;  %v9011_v22 = vmul.f32 %v8971_v38, %v8954_v12  ;;  %v9020_v6 = vmul.f32 %v8988_v37, %v8954_v12  ;;  %v9027_v48 = vld [vmem:[%s15312_s1 + $0x2e] ss:$0 sm:$0xff]  ;;  %16283 = vst [vmem:[#allocation63_spill] sm:$0xff] %v9064_v32 }
  0x66   : > { %v5173_v59 = vrot.slane %v5125_v11, 3  ;;  %v4925_v27 = vsel %vm692_vm0, %v4923_v13, %v15394_v17  ;;  %v5375_v28 = vmul.f32 %v9002_v23, %v8932_v53  ;;  %16278 = vst [vmem:[#allocation58_spill] sm:$0xff] %v9027_v48  ;;  %v5298_v13 = vrot.slane %v5250_v26, 4  ;;  %v9036_v11 = vld [vmem:[%s15312_s1 + $0x30] ss:$0 sm:$0xff] }
  0x67   : > { %16276 = vst [vmem:[#allocation56_spill] sm:$0xff] %v9011_v22  ;;  %v4634_v31 = vadd.f32 %v4580_v19, %v4509_v61  ;;  %16277 = vst [vmem:[#allocation57_spill] sm:$0xff] %v9020_v6  ;;  %v4979_v40 = vadd.f32 %v4925_v27, %v4854_v49  ;;  %v5050_v19 = vsel %vm818_vm1, %v5048_v1, %v15397_v63  ;;  %v15399_v61 = vrot.slane %v9011_v22, 3  ;;  %v9043_v27 = vld [vmem:[#allocation2 + $0x90] sm:$0xff] }
  0x68   : > { %16279 = vst [vmem:[#allocation59_spill] sm:$0xff] %v9036_v11  ;;  %v9041_v33 = vmul.f32 %v9002_v23, %v8954_v12  ;;  %v5423_v49 = vrot.slane %v5375_v28, 5  ;;  %v9048_v1 = vld [vmem:[%s15312_s1 + $0x31] ss:$0 sm:$0xff]  ;;  %v9059_v28 = vld [vmem:[#allocation2 + $0x98] sm:$0xff] }
  0x69   : > { %v4759_v17 = vadd.f32 %v4705_v55, %v4634_v31  ;;  %16281 = vst [vmem:[#allocation61_spill] sm:$0xff] %v9048_v1  ;;  %v5104_v26 = vadd.f32 %v5050_v19, %v4979_v40  ;;  %v5175_v63 = vsel %vm944_vm2, %v5173_v59, %v15399_v61  ;;  %v5500_v31 = vmul.f32 %v9027_v48, %v8932_v53  ;;  %v9075_v22 = vld [vmem:[%s15312_s1 + $0x33] ss:$0 sm:$0xff] }
  0x6a   : > { %16280 = vst [vmem:[#allocation60_spill] sm:$0xff] %v9041_v33  ;;  %v9057_v55 = vmul.f32 %v9027_v48, %v8954_v12  ;;  %v16284_v40 = vrot.slane %v9020_v6, 4  ;;  %v15407_v59 = vrot.slane %v9041_v33, 5  ;;  %v5699_v61 = vmul.f32 %v9036_v11, %v9043_v27  ;;  %16285 = vst [vmem:[#allocation64_spill] sm:$0xff] %v9075_v22  ;;  %v9106_v6 = vld [vmem:[%s15312_s1 + $0x35] ss:$0 sm:$0xff] }
  0x6b   : > { %v4791_v16 = vadd.f32 %v4759_v17, %v3946_v0  ;;  %v5229_v48 = vadd.f32 %v5175_v63, %v5104_v26  ;;  %v5548_v23 = vrot.slane %v5500_v31, 6  ;;  %v5720_v0 = vmul.f32 %v9048_v1, %v9043_v27  ;;  %v9096_v26 = vld [vmem:[%s15312_s1 + $0x34] ss:$0 sm:$0xff] }
  0x6c   : > { %16282 = vst [vmem:[#allocation62_spill] sm:$0xff] %v9057_v55  ;;  %v5300_v19 = vsel %vm1070_vm3, %v5298_v13, %v16284_v40  ;;  %v15416_v37 = vrot.slane %v9057_v55, 6  ;;  %v5425_v17 = vsel %vm1196_vm4, %v5423_v49, %v15407_v59  ;;  %v9085_v13 = vmul.f32 %v9048_v1, %v9059_v28  ;;  %16288 = vst [vmem:[#allocation67_spill] sm:$0xff] %v9096_v26 }
  0x6d   : > { %v5845_v40 = vmul.f32 %v9064_v32, %v9043_v27  ;;  %v9091_v63 = vmul.f32 %v9064_v32, %v9059_v28  ;;  %v5354_v31 = vadd.f32 %v5300_v19, %v5229_v48  ;;  %v5768_v59 = vrot.slane %v5720_v0, 1  ;;  %v9123_v32 = vld [vmem:[%s15312_s1 + $0x36] ss:$0 sm:$0xff] }
  0x6e   : > { %16286 = vst [vmem:[#allocation65_spill] sm:$0xff] %v9085_v13  ;;  %v5550_v49 = vsel %vm1322_vm5, %v5548_v23, %v15416_v37  ;;  %v5970_v33 = vmul.f32 %v9075_v22, %v9043_v27  ;;  %v9112_v48 = vmul.f32 %v9075_v22, %v9059_v28  ;;  %v6095_v0 = vmul.f32 %v9096_v26, %v9043_v27 }
  0x6f   : > { %16287 = vst [vmem:[#allocation66_spill] sm:$0xff] %v9091_v63  ;;  %v5893_v1 = vrot.slane %v5845_v40, 2  ;;  %v5479_v19 = vadd.f32 %v5425_v17, %v5354_v31  ;;  %v9118_v37 = vmul.f32 %v9096_v26, %v9059_v28  ;;  %v16289_v40 = vrot.slane %v9085_v13, 1 }
  0x70   : > { %v6018_v23 = vrot.slane %v5970_v33, 3  ;;  %v16290_v55 = vrot.slane %v9091_v63, 2  ;;  %v15429_v17 = vrot.slane %v9112_v48, 3  ;;  %v6220_v31 = vmul.f32 %v9106_v6, %v9043_v27 }
  0x71   : > { %v5770_v11 = vsel %vm692_vm0, %v5768_v59, %v16289_v40  ;;  %v5604_v26 = vadd.f32 %v5550_v49, %v5479_v19  ;;  %v6143_v38 = vrot.slane %v6095_v0, 4  ;;  %v15428_v12 = vrot.slane %v9118_v37, 4 }
  0x72   : > { %v5895_v33 = vsel %vm818_vm1, %v5893_v1, %v16290_v55  ;;  %v5824_v22 = vadd.f32 %v5770_v11, %v5699_v61  ;;  %v6020_v13 = vsel %vm944_vm2, %v6018_v23, %v15429_v17  ;;  %v9140_v59 = vmul.f32 %v9106_v6, %v9059_v28 }
  0x73   : > { %v6268_v40 = vrot.slane %v6220_v31, 5  ;;  %v6345_v1 = vmul.f32 %v9123_v32, %v9043_v27  ;;  %v5636_v55 = vadd.f32 %v5604_v26, %v4791_v16  ;;  %v6145_v61 = vsel %vm1070_vm3, %v6143_v38, %v15428_v12 }
  0x74   : > { %v5949_v63 = vadd.f32 %v5895_v33, %v5824_v22  ;;  %v9149_v11 = vmul.f32 %v9123_v32, %v9059_v28  ;;  %v15430_v49 = vrot.slane %v9140_v59, 5  ;;  %v625_v23 = vmul.f32 %v8466_v44, %v8526_v7 }
  0x75   : > { %v6393_v19 = vrot.slane %v6345_v1, 6  ;;  %v647_v0 = vmul.f32 %v8471_v45, %v8526_v7  ;;  %v9159_v16 = vmul.f32 %v8471_v45, %v8545_v14  ;;  %v773_v38 = vmul.f32 %v8476_v46, %v8526_v7 }
  0x76   : > { %v6074_v31 = vadd.f32 %v6020_v13, %v5949_v63  ;;  %v15431_v22 = vrot.slane %v9149_v11, 6  ;;  %v6270_v26 = vsel %vm1196_vm4, %v6268_v40, %v15430_v49  ;;  %v9168_v44 = vmul.f32 %v8476_v46, %v8545_v14 }
  0x77   : > { %v698_v33 = vrot.slane %v647_v0, 1  ;;  %v899_v13 = vmul.f32 %v8487_v51, %v8526_v7  ;;  %v15432_v1 = vrot.slane %v9159_v16, 1  ;;  %v824_v12 = vrot.slane %v773_v38, 2 }
  0x78   : > { %v6199_v63 = vadd.f32 %v6145_v61, %v6074_v31  ;;  %v6395_v45 = vsel %vm1322_vm5, %v6393_v19, %v15431_v22  ;;  %v15460_v17 = vrot.slane %v9168_v44, 2  ;;  %v9179_v40 = vmul.f32 %v8487_v51, %v8545_v14 }
  0x79   : > { %v950_v0 = vrot.slane %v899_v13, 3  ;;  %v1025_v46 = vmul.f32 %v8492_v52, %v8526_v7  ;;  %v700_v61 = vsel %vm692_vm0, %v698_v33, %v15432_v1  ;;  %v9188_v19 = vmul.f32 %v8492_v52, %v8545_v14 }
  0x7a   : > { %v6324_v49 = vadd.f32 %v6270_v26, %v6199_v63  ;;  %v1151_v31 = vmul.f32 %v8505_v57, %v8526_v7  ;;  %v751_v38 = vadd.f32 %v700_v61, %v625_v23  ;;  %v826_v51 = vsel %vm818_vm1, %v824_v12, %v15460_v17 }
  0x7b   : > { %16291 = vst [vmem:[#allocation68_spill] sm:$0xff] %v9188_v19  ;;  %v15459_v13 = vrot.slane %v9179_v40, 3  ;;  %v1076_v22 = vrot.slane %v1025_v46, 4  ;;  %v15437_v63 = vrot.slane %v9188_v19, 4  ;;  %v9199_v33 = vmul.f32 %v8505_v57, %v8545_v14 }
  0x7c   : > { %v6449_v26 = vadd.f32 %v6395_v45, %v6324_v49  ;;  %v1202_v52 = vrot.slane %v1151_v31, 5  ;;  %v877_v1 = vadd.f32 %v826_v51, %v751_v38  ;;  %v1277_v61 = vmul.f32 %v8514_v62, %v8526_v7 }
  0x7d   : > { %16292 = vst [vmem:[#allocation69_spill] sm:$0xff] %v9199_v33  ;;  %v952_v23 = vsel %vm944_vm2, %v950_v0, %v15459_v13  ;;  %v9208_v12 = vmul.f32 %v8514_v62, %v8545_v14  ;;  %v1078_v57 = vsel %vm1070_vm3, %v1076_v22, %v15437_v63  ;;  %v15433_v45 = vrot.slane %v9199_v33, 5 }
  0x7e   : > { %v9210_v49 = vadd.f32 %v6449_v26, %v5636_v55  ;;  %v1476_v46 = vmul.f32 %v8531_v8, %v8623_v2  ;;  %v1003_v31 = vadd.f32 %v952_v23, %v877_v1  ;;  %v1328_v0 = vrot.slane %v1277_v61, 6 }
  0x7f   : > { %16293 = vst [vmem:[#allocation70_spill] sm:$0xff] %v9208_v12  ;;  %v15434_v38 = vrot.slane %v9208_v12, 6  ;;  %v1498_v7 = vmul.f32 %v8536_v9, %v8623_v2  ;;  %v1204_v62 = vsel %vm1196_vm4, %v1202_v52, %v15433_v45  ;;  %v9227_v14 = vmul.f32 %v8536_v9, %v8654_v24 }
  0x80   : > { %16294 = vst [vmem:[#allocation71_spill] sm:$0xff] %v9210_v49  ;;  %6529 = vadd.xlane.f32.xlu0 %v9210_v49  ;;  %v1623_v8 = vmul.f32 %v8550_v15, %v8623_v2  ;;  %v9233_v55 = vmul.f32 %v8550_v15, %v8654_v24  ;;  %v1129_v22 = vadd.f32 %v1078_v57, %v1003_v31 }
  0x81   : > { %16295 = vst [vmem:[#allocation72_spill] sm:$0xff] %v9227_v14  ;;  %v1330_v1 = vsel %vm1322_vm5, %v1328_v0, %v15434_v38  ;;  %v1548_v51 = vrot.slane %v1498_v7, 1  ;;  %v1748_v26 = vmul.f32 %v8562_v20, %v8623_v2  ;;  %v15435_v52 = vrot.slane %v9227_v14, 1 }
  0x82   : > { %16296 = vst [vmem:[#allocation73_spill] sm:$0xff] %v9233_v55  ;;  %v1673_v9 = vrot.slane %v1623_v8, 2  ;;  %v15436_v23 = vrot.slane %v9233_v55, 2  ;;  %v9244_v61 = vmul.f32 %v8562_v20, %v8654_v24  ;;  %v1255_v15 = vadd.f32 %v1204_v62, %v1129_v22 }
  0x83   : > { %v1798_v45 = vrot.slane %v1748_v26, 3  ;;  %v1873_v57 = vmul.f32 %v8581_v29, %v8623_v2  ;;  %v9250_v31 = vmul.f32 %v8581_v29, %v8654_v24  ;;  %v1550_v0 = vsel %vm692_vm0, %v1548_v51, %v15435_v52 }
  0x84   : > { %16297 = vst [vmem:[#allocation74_spill] sm:$0xff] %v9244_v61  ;;  %v1675_v7 = vsel %vm818_vm1, %v1673_v9, %v15436_v23  ;;  %v15457_v20 = vrot.slane %v9244_v61, 3  ;;  %v1998_v62 = vmul.f32 %v8592_v34, %v8623_v2  ;;  %v1381_v8 = vadd.f32 %v1330_v1, %v1255_v15 }
  0x85   : > { %16298 = vst [vmem:[#allocation75_spill] sm:$0xff] %v9250_v31  ;;  %v1601_v22 = vadd.f32 %v1550_v0, %v1476_v46  ;;  %v1923_v26 = vrot.slane %v1873_v57, 4  ;;  %v15456_v38 = vrot.slane %v9250_v31, 4  ;;  %v9267_v51 = vmul.f32 %v8592_v34, %v8654_v24  ;;  %v16361_v31 = vld [vmem:[#allocation14_spill] sm:$0xff] }
  0x86   : > { %v1800_v29 = vsel %vm944_vm2, %v1798_v45, %v15457_v20  ;;  %v2048_v52 = vrot.slane %v1998_v62, 5  ;;  %v2123_v9 = vmul.f32 %v8618_v54, %v8623_v2  ;;  %v1413_v23 = vadd.f32 %v8638_v10, %v1381_v8  ;;  %v16332_v20 = vld [vmem:[#allocation51_spill] sm:$0xff] }
  0x87   : > { %16299 = vst [vmem:[#allocation76_spill] sm:$0xff] %v9267_v51  ;;  %v1726_v63 = vadd.f32 %v1675_v7, %v1601_v22  ;;  %v1925_v46 = vsel %vm1070_vm3, %v1923_v26, %v15456_v38  ;;  %v9277_v1 = vmul.f32 %v8618_v54, %v8654_v24  ;;  %v15452_v45 = vrot.slane %v9267_v51, 5 }
  0x88   : > { %v2173_v15 = vrot.slane %v2123_v9, 6  ;;  %v2321_v34 = vmul.f32 %v8628_v3, %v8731_v4  ;;  %v2343_v2 = vmul.f32 %v8633_v5, %v8731_v4  ;;  %v9287_v0 = vmul.f32 %v8633_v5, %v8752_v60 }
  0x89   : > { %16300 = vst [vmem:[#allocation77_spill] sm:$0xff] %v9277_v1  ;;  %v1851_v57 = vadd.f32 %v1800_v29, %v1726_v63  ;;  %v15450_v10 = vrot.slane %v9277_v1, 6  ;;  %v2468_v54 = vmul.f32 %v8659_v25, %v8731_v4  ;;  %v2050_v24 = vsel %vm1196_vm4, %v2048_v52, %v15452_v45 }
  0x8a   : > { %16301 = vst [vmem:[#allocation78_spill] sm:$0xff] %v9287_v0  ;;  %v2393_v7 = vrot.slane %v2343_v2, 1  ;;  %v9296_v3 = vmul.f32 %v8659_v25, %v8752_v60  ;;  %v2593_v63 = vmul.f32 %v8672_v35, %v8731_v4  ;;  %v15438_v8 = vrot.slane %v9287_v0, 1  ;;  %v16355_v0 = vld [vmem:[#allocation11_spill] sm:$0xff] }
  0x8b   : > { %v1976_v62 = vadd.f32 %v1925_v46, %v1851_v57  ;;  %v2175_v5 = vsel %vm1322_vm5, %v2173_v15, %v15450_v10  ;;  %v2518_v22 = vrot.slane %v2468_v54, 2  ;;  %v9307_v52 = vmul.f32 %v8672_v35, %v8752_v60 }
  0x8c   : > { %16302 = vst [vmem:[#allocation79_spill] sm:$0xff] %v9296_v3  ;;  %v15448_v26 = vrot.slane %v9296_v3, 2  ;;  %v2643_v29 = vrot.slane %v2593_v63, 3  ;;  %v2718_v25 = vmul.f32 %v8679_v43, %v8731_v4  ;;  %v2395_v46 = vsel %vm692_vm0, %v2393_v7, %v15438_v8 }
  0x8d   : > { %16303 = vst [vmem:[#allocation80_spill] sm:$0xff] %v9307_v52  ;;  %v2101_v9 = vadd.f32 %v2050_v24, %v1976_v62  ;;  %v9316_v15 = vmul.f32 %v8679_v43, %v8752_v60  ;;  %v2843_v2 = vmul.f32 %v8702_v21, %v8731_v4  ;;  %v2446_v57 = vadd.f32 %v2395_v46, %v2321_v34 }
  0x8e   : > { %v2520_v35 = vsel %vm818_vm1, %v2518_v22, %v15448_v26  ;;  %v15446_v54 = vrot.slane %v9307_v52, 3  ;;  %v2768_v63 = vrot.slane %v2718_v25, 4  ;;  %v9327_v7 = vmul.f32 %v8702_v21, %v8752_v60 }
  0x8f   : > { %16304 = vst [vmem:[#allocation81_spill] sm:$0xff] %v9316_v15  ;;  %v2226_v24 = vadd.f32 %v2175_v5, %v2101_v9  ;;  %v15443_v62 = vrot.slane %v9316_v15, 4  ;;  %v2893_v43 = vrot.slane %v2843_v2, 5  ;;  %v2571_v8 = vadd.f32 %v2520_v35, %v2446_v57  ;;  %v9631_v15 = vld [vmem:[%s15312_s1 + $0x6] ss:$0 sm:$0xff] }
  0x90   : > { %16305 = vst [vmem:[#allocation82_spill] sm:$0xff] %v9327_v7  ;;  %v2645_v34 = vsel %vm944_vm2, %v2643_v29, %v15446_v54  ;;  %v2968_v46 = vmul.f32 %v8719_v47, %v8731_v4  ;;  %v9336_v22 = vmul.f32 %v8719_v47, %v8752_v60  ;;  %v15439_v21 = vrot.slane %v9327_v7, 5 }
  0x91   : > { %v2258_v5 = vadd.f32 %v2226_v24, %v1413_v23  ;;  %v2770_v25 = vsel %vm1070_vm3, %v2768_v63, %v15443_v62  ;;  %v3166_v9 = vmul.f32 %v8736_v58, %v8841_v30  ;;  %v2696_v2 = vadd.f32 %v2645_v34, %v2571_v8 }
  0x92   : > { %16306 = vst [vmem:[#allocation83_spill] sm:$0xff] %v9336_v22  ;;  %v3018_v57 = vrot.slane %v2968_v46, 6  ;;  %v15440_v29 = vrot.slane %v9336_v22, 6  ;;  %v3188_v4 = vmul.f32 %v8741_v39, %v8841_v30  ;;  %v2895_v47 = vsel %vm1196_vm4, %v2893_v43, %v15439_v21 }
  0x93   : > { %v9352_v60 = vmul.f32 %v8741_v39, %v8857_v18  ;;  %v3313_v23 = vmul.f32 %v8757_v42, %v8841_v30  ;;  %v9358_v58 = vmul.f32 %v8757_v42, %v8857_v18  ;;  %v2821_v8 = vadd.f32 %v2770_v25, %v2696_v2 }
  0x94   : > { %v3020_v35 = vsel %vm1322_vm5, %v3018_v57, %v15440_v29  ;;  %v3238_v63 = vrot.slane %v3188_v4, 1  ;;  %v3438_v24 = vmul.f32 %v8769_v50, %v8841_v30  ;;  %v9369_v46 = vmul.f32 %v8769_v50, %v8857_v18 }
  0x95   : > { %16307 = vst [vmem:[#allocation84_spill] sm:$0xff] %v9352_v60  ;;  %16308 = vst [vmem:[#allocation85_spill] sm:$0xff] %v9358_v58  ;;  %v15441_v43 = vrot.slane %v9352_v60, 1  ;;  %v3363_v39 = vrot.slane %v3313_v23, 2  ;;  %v15442_v34 = vrot.slane %v9358_v58, 2  ;;  %v2946_v42 = vadd.f32 %v2895_v47, %v2821_v8 }
  0x96   : > { %16309 = vst [vmem:[#allocation86_spill] sm:$0xff] %v9369_v46  ;;  %v3488_v21 = vrot.slane %v3438_v24, 3  ;;  %v3563_v25 = vmul.f32 %v8786_v41, %v8841_v30  ;;  %v9375_v2 = vmul.f32 %v8786_v41, %v8857_v18  ;;  %v15445_v50 = vrot.slane %v9369_v46, 3 }
  0x97   : > { %v3240_v57 = vsel %vm692_vm0, %v3238_v63, %v15441_v43  ;;  %v3365_v4 = vsel %vm818_vm1, %v3363_v39, %v15442_v34  ;;  %v3688_v47 = vmul.f32 %v8800_v36, %v8841_v30  ;;  %v3071_v23 = vadd.f32 %v3020_v35, %v2946_v42 }
  0x98   : > { %16310 = vst [vmem:[#allocation87_spill] sm:$0xff] %v9375_v2  ;;  %v3291_v8 = vadd.f32 %v3240_v57, %v3166_v9  ;;  %v3613_v24 = vrot.slane %v3563_v25, 4  ;;  %v15444_v29 = vrot.slane %v9375_v2, 4  ;;  %v3490_v41 = vsel %vm944_vm2, %v3488_v21, %v15445_v50  ;;  %v16314_v57 = vld [vmem:[#allocation34_spill] sm:$0xff] }
  0x99   : > { %v9392_v63 = vmul.f32 %v8800_v36, %v8857_v18  ;;  %v3738_v43 = vrot.slane %v3688_v47, 5  ;;  %v3813_v39 = vmul.f32 %v8825_v56, %v8841_v30  ;;  %v3103_v34 = vadd.f32 %v3071_v23, %v2258_v5  ;;  %v16313_v36 = vld [vmem:[#allocation32_spill] sm:$0xff] }
  0x9a   : > { %v3416_v62 = vadd.f32 %v3365_v4, %v3291_v8  ;;  %v3615_v9 = vsel %vm1070_vm3, %v3613_v24, %v15444_v29  ;;  %v9401_v35 = vmul.f32 %v8825_v56, %v8857_v18  ;;  %v4011_v25 = vmul.f32 %v16313_v36, %v8932_v53  ;;  %v16315_v4 = vld [vmem:[#allocation48_spill] sm:$0xff] }
  0x9b   : > { %16311 = vst [vmem:[#allocation88_spill] sm:$0xff] %v9392_v63  ;;  %v15447_v21 = vrot.slane %v9392_v63, 5  ;;  %v3863_v42 = vrot.slane %v3813_v39, 6  ;;  %v4033_v47 = vmul.f32 %v16314_v57, %v8932_v53  ;;  %v9411_v23 = vmul.f32 %v16314_v57, %v16315_v4  ;;  %v16317_v8 = vld [vmem:[#allocation36_spill] sm:$0xff] }
  0x9c   : > { %16312 = vst [vmem:[#allocation89_spill] sm:$0xff] %v9401_v35  ;;  %v3541_v30 = vadd.f32 %v3490_v41, %v3416_v62  ;;  %v15449_v5 = vrot.slane %v9401_v35, 6  ;;  %v4158_v56 = vmul.f32 %v16317_v8, %v8932_v53  ;;  %v9420_v39 = vmul.f32 %v16317_v8, %v16315_v4  ;;  %v16319_v62 = vld [vmem:[#allocation37_spill] sm:$0xff]  ;;  %v16321_v8 = vld [vmem:[#allocation40_spill] sm:$0xff] }
  0x9d   : > { %16316 = vst [vmem:[#allocation32_spill] sm:$0xff] %v9411_v23  ;;  %v3740_v18 = vsel %vm1196_vm4, %v3738_v43, %v15447_v21  ;;  %v4083_v24 = vrot.slane %v4033_v47, 1  ;;  %v4283_v41 = vmul.f32 %v16319_v62, %v8932_v53  ;;  %v15451_v29 = vrot.slane %v9411_v23, 1  ;;  %v5672_v23 = vld [vmem:[#allocation2 + $0xa8] sm:$0xff] }
  0x9e   : > { %16318 = vst [vmem:[#allocation34_spill] sm:$0xff] %v9420_v39  ;;  %v3666_v36 = vadd.f32 %v3615_v9, %v3541_v30  ;;  %v3865_v57 = vsel %vm1322_vm5, %v3863_v42, %v15449_v5  ;;  %v4208_v50 = vrot.slane %v4158_v56, 2  ;;  %v15453_v54 = vrot.slane %v9420_v39, 2  ;;  %v16323_v30 = vld [vmem:[#allocation41_spill] sm:$0xff] }
  0x9f   : > { %v9431_v43 = vmul.f32 %v16319_v62, %v16315_v4  ;;  %v4333_v47 = vrot.slane %v4283_v41, 3  ;;  %v4408_v21 = vmul.f32 %v16321_v8, %v8932_v53  ;;  %v4085_v9 = vsel %vm692_vm0, %v4083_v24, %v15451_v29 }
  0xa0   : > { %v3791_v26 = vadd.f32 %v3740_v18, %v3666_v36  ;;  %v9440_v42 = vmul.f32 %v16321_v8, %v16315_v4  ;;  %v4533_v56 = vmul.f32 %v16323_v30, %v8932_v53  ;;  %v4136_v5 = vadd.f32 %v4085_v9, %v4011_v25  ;;  %v16325_v9 = vld [vmem:[#allocation44_spill] sm:$0xff] }
  0xa1   : > { %16320 = vst [vmem:[#allocation48_spill] sm:$0xff] %v9431_v43  ;;  %v4210_v62 = vsel %vm818_vm1, %v4208_v50, %v15453_v54  ;;  %v15454_v41 = vrot.slane %v9431_v43, 3  ;;  %v4458_v10 = vrot.slane %v4408_v21, 4  ;;  %v9451_v24 = vmul.f32 %v16323_v30, %v16315_v4 }
  0xa2   : > { %16322 = vst [vmem:[#allocation36_spill] sm:$0xff] %v9440_v42  ;;  %v3916_v18 = vadd.f32 %v3865_v57, %v3791_v26  ;;  %v15455_v36 = vrot.slane %v9440_v42, 4  ;;  %v4583_v8 = vrot.slane %v4533_v56, 5  ;;  %v4261_v29 = vadd.f32 %v4210_v62, %v4136_v5  ;;  %v16327_v5 = vld [vmem:[#allocation45_spill] sm:$0xff] }
  0xa3   : > { %16324 = vst [vmem:[#allocation37_spill] sm:$0xff] %v9451_v24  ;;  %v4335_v25 = vsel %vm944_vm2, %v4333_v47, %v15454_v41  ;;  %v4658_v45 = vmul.f32 %v16325_v9, %v8932_v53  ;;  %v9460_v50 = vmul.f32 %v16325_v9, %v16315_v4  ;;  %v15458_v57 = vrot.slane %v9451_v24, 5  ;;  %v16328_v53 = vld [vmem:[#allocation46_spill] sm:$0xff] }
  0xa4   : > { %v3948_v26 = vadd.f32 %v3916_v18, %v3103_v34  ;;  %v4460_v21 = vsel %vm1070_vm3, %v4458_v10, %v15455_v36  ;;  %v4856_v56 = vmul.f32 %v16327_v5, %v9043_v27  ;;  %v4386_v62 = vadd.f32 %v4335_v25, %v4261_v29  ;;  %v16330_v10 = vld [vmem:[#allocation49_spill] sm:$0xff] }
  0xa5   : > { %16326 = vst [vmem:[#allocation40_spill] sm:$0xff] %v9460_v50  ;;  %v4708_v54 = vrot.slane %v4658_v45, 6  ;;  %v15464_v47 = vrot.slane %v9460_v50, 6  ;;  %v4878_v41 = vmul.f32 %v16328_v53, %v9043_v27  ;;  %v4585_v34 = vsel %vm1196_vm4, %v4583_v8, %v15458_v57 }
  0xa6   : > { %v9476_v18 = vmul.f32 %v16328_v53, %v9059_v28  ;;  %v5003_v36 = vmul.f32 %v16330_v10, %v9043_v27  ;;  %v9482_v29 = vmul.f32 %v16330_v10, %v9059_v28  ;;  %v4511_v45 = vadd.f32 %v4460_v21, %v4386_v62  ;;  %v16334_v21 = vld [vmem:[#allocation53_spill] sm:$0xff] }
  0xa7   : > { %v4710_v25 = vsel %vm1322_vm5, %v4708_v54, %v15464_v47  ;;  %v4928_v38 = vrot.slane %v4878_v41, 1  ;;  %v5128_v8 = vmul.f32 %v16332_v20, %v9043_v27  ;;  %v9493_v49 = vmul.f32 %v16332_v20, %v9059_v28 }
  0xa8   : > { %16329 = vst [vmem:[#allocation41_spill] sm:$0xff] %v9476_v18  ;;  %16331 = vst [vmem:[#allocation44_spill] sm:$0xff] %v9482_v29  ;;  %v15471_v57 = vrot.slane %v9476_v18, 1  ;;  %v5053_v13 = vrot.slane %v5003_v36, 2  ;;  %v15470_v17 = vrot.slane %v9482_v29, 2  ;;  %v4636_v24 = vadd.f32 %v4585_v34, %v4511_v45  ;;  %v16336_v34 = vld [vmem:[#allocation55_spill] sm:$0xff] }
  0xa9   : > { %16333 = vst [vmem:[#allocation45_spill] sm:$0xff] %v9493_v49  ;;  %v5178_v42 = vrot.slane %v5128_v8, 3  ;;  %v5253_v62 = vmul.f32 %v16334_v21, %v9043_v27  ;;  %v9499_v54 = vmul.f32 %v16334_v21, %v9059_v28  ;;  %v15473_v47 = vrot.slane %v9493_v49, 3  ;;  %v9520_v29 = vld [vmem:[#allocation2 + $0xb0] sm:$0xff]  ;;  %v16342_v49 = vld [vmem:[#allocation61_spill] sm:$0xff] }
  0xaa   : > { %v4930_v41 = vsel %vm692_vm0, %v4928_v38, %v15471_v57  ;;  %v5055_v36 = vsel %vm818_vm1, %v5053_v13, %v15470_v17  ;;  %v5378_v45 = vmul.f32 %v16336_v34, %v9043_v27  ;;  %v4761_v8 = vadd.f32 %v4710_v25, %v4636_v24  ;;  %v16338_v17 = vld [vmem:[#allocation58_spill] sm:$0xff]  ;;  %16339 = vst [vmem:[#allocation51_spill] sm:$0xff] %v9520_v29 }
  0xab   : > { %16335 = vst [vmem:[#allocation46_spill] sm:$0xff] %v9499_v54  ;;  %v4981_v50 = vadd.f32 %v4930_v41, %v4856_v56  ;;  %v5303_v43 = vrot.slane %v5253_v62, 4  ;;  %v15477_v39 = vrot.slane %v9499_v54, 4  ;;  %v5180_v18 = vsel %vm944_vm2, %v5178_v42, %v15473_v47  ;;  %v16341_v47 = vld [vmem:[#allocation59_spill] sm:$0xff] }
  0xac   : > { %v9516_v38 = vmul.f32 %v16336_v34, %v9059_v28  ;;  %v5428_v13 = vrot.slane %v5378_v45, 5  ;;  %v5503_v57 = vmul.f32 %v16338_v17, %v9043_v27  ;;  %v4793_v24 = vadd.f32 %v4761_v8, %v3948_v26  ;;  %v16344_v26 = vld [vmem:[#allocation63_spill] sm:$0xff] }
  0xad   : > { %v5106_v56 = vadd.f32 %v5055_v36, %v4981_v50  ;;  %v5305_v25 = vsel %vm1070_vm3, %v5303_v43, %v15477_v39  ;;  %v9527_v62 = vmul.f32 %v16338_v17, %v9059_v28  ;;  %v5701_v45 = vmul.f32 %v16341_v47, %v5672_v23  ;;  %v16346_v39 = vld [vmem:[#allocation64_spill] sm:$0xff] }
  0xae   : > { %16337 = vst [vmem:[#allocation49_spill] sm:$0xff] %v9516_v38  ;;  %v15482_v42 = vrot.slane %v9516_v38, 5  ;;  %v5553_v41 = vrot.slane %v5503_v57, 6  ;;  %v5723_v35 = vmul.f32 %v16342_v49, %v5672_v23  ;;  %v9535_v50 = vmul.f32 %v16342_v49, %v9520_v29 }
  0xaf   : > { %16340 = vst [vmem:[#allocation53_spill] sm:$0xff] %v9527_v62  ;;  %v5231_v27 = vadd.f32 %v5180_v18, %v5106_v56  ;;  %v15485_v63 = vrot.slane %v9527_v62, 6  ;;  %v5848_v43 = vmul.f32 %v16344_v26, %v5672_v23  ;;  %v9543_v57 = vmul.f32 %v16344_v26, %v9520_v29 }
  0xb0   : > { %16343 = vst [vmem:[#allocation55_spill] sm:$0xff] %v9535_v50  ;;  %v5430_v36 = vsel %vm1196_vm4, %v5428_v13, %v15482_v42  ;;  %v5773_v8 = vrot.slane %v5723_v35, 1  ;;  %v5973_v54 = vmul.f32 %v16346_v39, %v5672_v23  ;;  %v15488_v2 = vrot.slane %v9535_v50, 1  ;;  %v16348_v42 = vld [vmem:[#allocation67_spill] sm:$0xff] }
  0xb1   : > { %16345 = vst [vmem:[#allocation58_spill] sm:$0xff] %v9543_v57  ;;  %v5356_v18 = vadd.f32 %v5305_v25, %v5231_v27  ;;  %v5555_v56 = vsel %vm1322_vm5, %v5553_v41, %v15485_v63  ;;  %v5898_v46 = vrot.slane %v5848_v43, 2  ;;  %v15493_v58 = vrot.slane %v9543_v57, 2 }
  0xb2   : > { %v9553_v13 = vmul.f32 %v16346_v39, %v9520_v29  ;;  %v6023_v35 = vrot.slane %v5973_v54, 3  ;;  %v6098_v38 = vmul.f32 %v16348_v42, %v5672_v23  ;;  %v5775_v25 = vsel %vm692_vm0, %v5773_v8, %v15488_v2  ;;  %v596_v2 = vld [vmem:[#allocation2 + $0x10] sm:$0x3f] }
  0xb3   : > { %v5481_v60 = vadd.f32 %v5430_v36, %v5356_v18  ;;  %v9561_v41 = vmul.f32 %v16348_v42, %v9520_v29  ;;  %v6223_v27 = vmul.f32 %v9106_v6, %v5672_v23  ;;  %v5826_v43 = vadd.f32 %v5775_v25, %v5701_v45 }
  0xb4   : > { %16347 = vst [vmem:[#allocation59_spill] sm:$0xff] %v9553_v13  ;;  %v5900_v63 = vsel %vm818_vm1, %v5898_v46, %v15493_v58  ;;  %v15490_v54 = vrot.slane %v9553_v13, 3  ;;  %v6148_v62 = vrot.slane %v6098_v38, 4  ;;  %v9571_v8 = vmul.f32 %v9106_v6, %v9520_v29 }
  0xb5   : > { %16349 = vst [vmem:[#allocation61_spill] sm:$0xff] %v9561_v41  ;;  %v5606_v22 = vadd.f32 %v5555_v56, %v5481_v60  ;;  %v15491_v36 = vrot.slane %v9561_v41, 4  ;;  %v6273_v18 = vrot.slane %v6223_v27, 5  ;;  %v5951_v50 = vadd.f32 %v5900_v63, %v5826_v43  ;;  %v8009_v27 = vld [vmem:[#allocation2 + $0x8] sm:$0xff]  ;;  %v9588_v63 = vld [vmem:[%s15312_s1] ss:$0 sm:$0xff] }
  0xb6   : > { %16350 = vst [vmem:[#allocation63_spill] sm:$0xff] %v9571_v8  ;;  %v6025_v45 = vsel %vm944_vm2, %v6023_v35, %v15490_v54  ;;  %v6348_v25 = vmul.f32 %v9123_v32, %v5672_v23  ;;  %v9579_v46 = vmul.f32 %v9123_v32, %v9520_v29  ;;  %v15492_v56 = vrot.slane %v9571_v8, 5  ;;  %v9625_v41 = vld [vmem:[%s15312_s1 + $0x5] ss:$0 sm:$0xff] }
  0xb7   : > { %v5638_v60 = vadd.f32 %v5606_v22, %v4793_v24  ;;  %v6150_v38 = vsel %vm1070_vm3, %v6148_v62, %v15491_v36  ;;  %v624_v35 = vmul.f32 %v9588_v63, %v8009_v27  ;;  %v6076_v23 = vadd.f32 %v6025_v45, %v5951_v50  ;;  %v9595_v22 = vld [vmem:[%s15312_s1 + $0x1] ss:$0 sm:$0xff]  ;;  %v9604_v36 = vld [vmem:[%s15312_s1 + $0x2] ss:$0 sm:$0xff]  ;;  %v9610_v45 = vld [vmem:[%s15312_s1 + $0x3] ss:$0 sm:$0xff] }
  0xb8   : > { %16351 = vst [vmem:[#allocation64_spill] sm:$0xff] %v9579_v46  ;;  %v6398_v43 = vrot.slane %v6348_v25, 6  ;;  %v15501_v54 = vrot.slane %v9579_v46, 6  ;;  %v646_v24 = vmul.f32 %v9595_v22, %v596_v2  ;;  %v6275_v62 = vsel %vm1196_vm4, %v6273_v18, %v15492_v56  ;;  %v9616_v27 = vld [vmem:[%s15312_s1 + $0x4] ss:$0 sm:$0xff] }
  0xb9   : > { %v772_v50 = vmul.f32 %v9604_v36, %v596_v2  ;;  %v898_v25 = vmul.f32 %v9610_v45, %v596_v2  ;;  %v1024_v18 = vmul.f32 %v9616_v27, %v596_v2  ;;  %v6201_v56 = vadd.f32 %v6150_v38, %v6076_v23  ;;  %v1446_v23 = vld [vmem:[#allocation2 + $0x28] sm:$0x3f] }
  0xba   : > { %v6400_v58 = vsel %vm1322_vm5, %v6398_v43, %v15501_v54  ;;  %v696_v8 = vrot.slane %v646_v24, 1  ;;  %v1150_v13 = vmul.f32 %v9625_v41, %v596_v2  ;;  %v1276_v38 = vmul.f32 %v9631_v15, %v596_v2  ;;  %v16352_v24 = vld [vmem:[#allocation10_spill] sm:$0xff] }
  0xbb   : > { %v822_v57 = vrot.slane %v772_v50, 2  ;;  %v948_v29 = vrot.slane %v898_v25, 3  ;;  %v1074_v7 = vrot.slane %v1024_v18, 4  ;;  %v6326_v43 = vadd.f32 %v6275_v62, %v6201_v56  ;;  %v9640_v50 = vld [vmem:[%s15312_s1 + $0x8] ss:$0 sm:$0xff]  ;;  %v9642_v25 = vld [vmem:[#allocation2 + $0x20] sm:$0xff] }
  0xbc   : > { %v16353_v54 = vrot.slane %v16352_v24, 1  ;;  %v1200_v52 = vrot.slane %v1150_v13, 5  ;;  %16354 = vst [vmem:[#allocation67_spill] sm:$0xff] %v9640_v50  ;;  %v1475_v18 = vmul.f32 %v9642_v25, %v9640_v50  ;;  %v16356_v2 = vrot.slane %v16355_v0, 2  ;;  %v16357_v62 = vld [vmem:[#allocation12_spill] sm:$0xff]  ;;  %v16359_v13 = vld [vmem:[#allocation13_spill] sm:$0xff] }
  0xbd   : > { %v16358_v24 = vrot.slane %v16357_v62, 3  ;;  %v6451_v51 = vadd.f32 %v6400_v58, %v6326_v43  ;;  %v16362_v61 = vrot.slane %v16361_v31, 5  ;;  %v1326_v14 = vrot.slane %v1276_v38, 6  ;;  %v9661_v0 = vld [vmem:[%s15312_s1 + $0x9] ss:$0 sm:$0xff] }
  0xbe   : > { %v697_v46 = vsel %vm692_vm0, %v16353_v54, %v696_v8  ;;  %v823_v56 = vsel %vm818_vm1, %v16356_v2, %v822_v57  ;;  %v16360_v8 = vrot.slane %v16359_v13, 4  ;;  %16363 = vst [vmem:[#allocation10_spill] sm:$0xff] %v9661_v0  ;;  %v1497_v57 = vmul.f32 %v9661_v0, %v1446_v23 }
  0xbf   : > { %v750_v3 = vadd.f32 %v697_v46, %v624_v35  ;;  %v949_v54 = vsel %vm944_vm2, %v16358_v24, %v948_v29  ;;  %v1201_v55 = vsel %vm1196_vm4, %v16362_v61, %v1200_v52  ;;  %v9667_v29 = vld [vmem:[%s15312_s1 + $0xa] ss:$0 sm:$0xff]  ;;  %v9673_v61 = vld [vmem:[%s15312_s1 + $0xb] ss:$0 sm:$0xff]  ;;  %v9679_v52 = vld [vmem:[%s15312_s1 + $0xc] ss:$0 sm:$0xff]  ;;  %v9682_v58 = vadd.f32 %v6451_v51, %v5638_v60 }
  0xc0   : > { %v1075_v1 = vsel %vm1070_vm3, %v16360_v8, %v1074_v7  ;;  %16364 = vst [vmem:[#allocation11_spill] sm:$0xff] %v9667_v29  ;;  %v1622_v7 = vmul.f32 %v9667_v29, %v1446_v23  ;;  %16365 = vst [vmem:[#allocation12_spill] sm:$0xff] %v9673_v61  ;;  %v1747_v31 = vmul.f32 %v9673_v61, %v1446_v23  ;;  %v16368_v35 = vld [vmem:[#allocation15_spill] sm:$0xff]  ;;  %v1546_v2 = vrot.slane %v1497_v57, 1  ;;  %v2291_v61 = vld [vmem:[#allocation2 + $0x40] sm:$0x3f] }
  0xc1   : > { %v876_v46 = vadd.f32 %v823_v56, %v750_v3  ;;  %16366 = vst [vmem:[#allocation13_spill] sm:$0xff] %v9679_v52  ;;  %v1872_v3 = vmul.f32 %v9679_v52, %v1446_v23  ;;  %16367 = vst [vmem:[#allocation14_spill] sm:$0xff] %v9682_v58  ;;  %v16369_v38 = vrot.slane %v16368_v35, 6  ;;  %v9690_v56 = vld [vmem:[%s15312_s1 + $0xd] ss:$0 sm:$0xff]  ;;  %6533 = vadd.xlane.f32.xlu1 %v9682_v58  ;;  %v16371_v51 = vld [vmem:[#allocation16_spill] sm:$0xff] }
  0xc2   : > { %16370 = vst [vmem:[#allocation15_spill] sm:$0xff] %v9690_v56  ;;  %v1997_v62 = vmul.f32 %v9690_v56, %v1446_v23  ;;  %v1671_v13 = vrot.slane %v1622_v7, 2  ;;  %v1796_v8 = vrot.slane %v1747_v31, 3  ;;  %v16372_v60 = vrot.slane %v16371_v51, 1  ;;  %v9700_v57 = vld [vmem:[%s15312_s1 + $0xe] ss:$0 sm:$0xff] }
  0xc3   : > { %v1327_v43 = vsel %vm1322_vm5, %v16369_v38, %v1326_v14  ;;  %v1002_v24 = vadd.f32 %v949_v54, %v876_v46  ;;  %v1921_v12 = vrot.slane %v1872_v3, 4  ;;  %16373 = vst [vmem:[#allocation16_spill] sm:$0xff] %v9700_v57  ;;  %v2122_v38 = vmul.f32 %v9700_v57, %v1446_v23  ;;  %v9706_v54 = vld [vmem:[%s15312_s1 + $0x10] ss:$0 sm:$0xff]  ;;  %v9708_v46 = vld [vmem:[#allocation2 + $0x38] sm:$0xff]  ;;  %v16382_v29 = vld [vmem:[#allocation20_spill] sm:$0xff] }
  0xc4   : > { %v1547_v35 = vsel %vm692_vm0, %v16372_v60, %v1546_v2  ;;  %v2046_v14 = vrot.slane %v1997_v62, 5  ;;  %16374 = vst [vmem:[#allocation90_spill] sm:$0xff] %v9706_v54  ;;  %16375 = vst [vmem:[#allocation91_spill] sm:$0xff] %v9708_v46  ;;  %v2320_v7 = vmul.f32 %v9708_v46, %v9706_v54  ;;  %v16376_v2 = vld [vmem:[#allocation17_spill] sm:$0xff]  ;;  %v16378_v60 = vld [vmem:[#allocation18_spill] sm:$0xff]  ;;  %v16383_v0 = vrot.slane %v16382_v29, 5 }
  0xc5   : > { %v1128_v31 = vadd.f32 %v1075_v1, %v1002_v24  ;;  %v1600_v3 = vadd.f32 %v1547_v35, %v1475_v18  ;;  %v16377_v62 = vrot.slane %v16376_v2, 2  ;;  %v16379_v58 = vrot.slane %v16378_v60, 3  ;;  %v16380_v57 = vld [vmem:[#allocation19_spill] sm:$0xff]  ;;  %v9727_v1 = vld [vmem:[%s15312_s1 + $0x11] ss:$0 sm:$0xff] }
  0xc6   : > { %v16381_v56 = vrot.slane %v16380_v57, 4  ;;  %v2047_v50 = vsel %vm1196_vm4, %v16383_v0, %v2046_v14  ;;  %v2171_v33 = vrot.slane %v2122_v38, 6  ;;  %16384 = vst [vmem:[#allocation17_spill] sm:$0xff] %v9727_v1  ;;  %v2342_v18 = vmul.f32 %v9727_v1, %v2291_v61  ;;  %v9739_v0 = vld [vmem:[%s15312_s1 + $0x13] ss:$0 sm:$0xff] }
  0xc7   : > { %v1672_v51 = vsel %vm818_vm1, %v16377_v62, %v1671_v13  ;;  %v1797_v23 = vsel %vm944_vm2, %v16379_v58, %v1796_v8  ;;  %v1254_v24 = vadd.f32 %v1201_v55, %v1128_v31  ;;  %v9733_v58 = vld [vmem:[%s15312_s1 + $0x12] ss:$0 sm:$0xff]  ;;  %16386 = vst [vmem:[#allocation19_spill] sm:$0xff] %v9739_v0  ;;  %v2592_v29 = vmul.f32 %v9739_v0, %v2291_v61  ;;  %v9748_v14 = vld [vmem:[%s15312_s1 + $0x14] ss:$0 sm:$0xff] }
  0xc8   : > { %v1922_v52 = vsel %vm1070_vm3, %v16381_v56, %v1921_v12  ;;  %v1725_v13 = vadd.f32 %v1672_v51, %v1600_v3  ;;  %16385 = vst [vmem:[#allocation18_spill] sm:$0xff] %v9733_v58  ;;  %v2467_v12 = vmul.f32 %v9733_v58, %v2291_v61  ;;  %v16387_v56 = vld [vmem:[#allocation21_spill] sm:$0xff]  ;;  %v2391_v55 = vrot.slane %v2342_v18, 1  ;;  %16389 = vst [vmem:[#allocation20_spill] sm:$0xff] %v9748_v14  ;;  %v9754_v38 = vld [vmem:[%s15312_s1 + $0x15] ss:$0 sm:$0xff] }
  0xc9   : > { %v16388_v8 = vrot.slane %v16387_v56, 6  ;;  %v2717_v57 = vmul.f32 %v9748_v14, %v2291_v61  ;;  %16390 = vst [vmem:[#allocation21_spill] sm:$0xff] %v9754_v38  ;;  %v2842_v31 = vmul.f32 %v9754_v38, %v2291_v61  ;;  %v1380_v3 = vadd.f32 %v1327_v43, %v1254_v24  ;;  %v9763_v14 = vld [vmem:[%s15312_s1 + $0x16] ss:$0 sm:$0xff]  ;;  %v3136_v58 = vld [vmem:[#allocation2 + $0x58] sm:$0x3f] }
  0xca   : > { %v1850_v2 = vadd.f32 %v1797_v23, %v1725_v13  ;;  %v2516_v62 = vrot.slane %v2467_v12, 2  ;;  %v2641_v51 = vrot.slane %v2592_v29, 3  ;;  %v2967_v0 = vmul.f32 %v9763_v14, %v2291_v61  ;;  %v9769_v43 = vld [vmem:[%s15313_s2] ss:$0 sm:$0xff]  ;;  %v16395_v12 = vld [vmem:[#allocation23_spill] sm:$0xff]  ;;  %v16401_v38 = vld [vmem:[#allocation26_spill] sm:$0xff] }
  0xcb   : > { %v2172_v35 = vsel %vm1322_vm5, %v16388_v8, %v2171_v33  ;;  %v16391_v33 = vld [vmem:[#allocation22_spill] sm:$0xff]  ;;  %v2766_v56 = vrot.slane %v2717_v57, 4  ;;  %v2891_v8 = vrot.slane %v2842_v31, 5  ;;  %16394 = vst [vmem:[#allocation92_spill] sm:$0xff] %v9769_v43  ;;  %v1412_v23 = vadd.f32 %v9769_v43, %v1380_v3  ;;  %v16397_v57 = vld [vmem:[#allocation24_spill] sm:$0xff] }
  0xcc   : > { %v16392_v60 = vrot.slane %v16391_v33, 1  ;;  %16393 = vst [vmem:[#allocation22_spill] sm:$0xff] %v9763_v14  ;;  %v1975_v24 = vadd.f32 %v1922_v52, %v1850_v2  ;;  %v16396_v29 = vrot.slane %v16395_v12, 2  ;;  %v16398_v31 = vrot.slane %v16397_v57, 3  ;;  %v9789_v2 = vld [vmem:[#allocation2 + $0x50] sm:$0xff] }
  0xcd   : > { %v16402_v1 = vrot.slane %v16401_v38, 5  ;;  %v3016_v46 = vrot.slane %v2967_v0, 6  ;;  %16404 = vst [vmem:[#allocation24_spill] sm:$0xff] %v9789_v2  ;;  %v16406_v0 = vld [vmem:[#allocation27_spill] sm:$0xff] }
  0xce   : > { %v2392_v18 = vsel %vm692_vm0, %v16392_v60, %v2391_v55  ;;  %v2517_v55 = vsel %vm818_vm1, %v16396_v29, %v2516_v62  ;;  %v2642_v33 = vsel %vm944_vm2, %v16398_v31, %v2641_v51  ;;  %v16399_v60 = vld [vmem:[#allocation25_spill] sm:$0xff]  ;;  %v2100_v3 = vadd.f32 %v2047_v50, %v1975_v24  ;;  %v9796_v51 = vld [vmem:[%s15312_s1 + $0x19] ss:$0 sm:$0xff]  ;;  %v9823_v57 = vld [vmem:[%s15312_s1 + $0x1d] ss:$0 sm:$0xff] }
  0xcf   : > { %v2445_v13 = vadd.f32 %v2392_v18, %v2320_v7  ;;  %v16400_v61 = vrot.slane %v16399_v60, 4  ;;  %v2892_v54 = vsel %vm1196_vm4, %v16402_v1, %v2891_v8  ;;  %v9787_v7 = vld [vmem:[%s15312_s1 + $0x18] ss:$0 sm:$0xff]  ;;  %16405 = vst [vmem:[#allocation25_spill] sm:$0xff] %v9796_v51  ;;  %v3187_v1 = vmul.f32 %v9796_v51, %v3136_v58  ;;  %v9805_v18 = vld [vmem:[%s15312_s1 + $0x1a] ss:$0 sm:$0xff] }
  0xd0   : > { %16403 = vst [vmem:[#allocation23_spill] sm:$0xff] %v9787_v7  ;;  %v3165_v62 = vmul.f32 %v9789_v2, %v9787_v7  ;;  %v16407_v50 = vrot.slane %v16406_v0, 6  ;;  %16408 = vst [vmem:[#allocation26_spill] sm:$0xff] %v9805_v18  ;;  %v9811_v8 = vld [vmem:[%s15312_s1 + $0x1b] ss:$0 sm:$0xff]  ;;  %v2225_v12 = vadd.f32 %v2172_v35, %v2100_v3  ;;  %v3687_v31 = vmul.f32 %v9823_v57, %v3136_v58  ;;  %v16413_v3 = vld [vmem:[#allocation28_spill] sm:$0xff] }
  0xd1   : > { %v2767_v14 = vsel %vm1070_vm3, %v16400_v61, %v2766_v56  ;;  %v2570_v52 = vadd.f32 %v2517_v55, %v2445_v13  ;;  %v3312_v56 = vmul.f32 %v9805_v18, %v3136_v58  ;;  %16409 = vst [vmem:[#allocation27_spill] sm:$0xff] %v9811_v8  ;;  %v3437_v24 = vmul.f32 %v9811_v8, %v3136_v58  ;;  %v9817_v13 = vld [vmem:[%s15312_s1 + $0x1c] ss:$0 sm:$0xff]  ;;  %v3981_v18 = vld [vmem:[#allocation2 + $0x70] sm:$0x3f] }
  0xd2   : > { %v3017_v38 = vsel %vm1322_vm5, %v16407_v50, %v3016_v46  ;;  %16410 = vst [vmem:[#allocation93_spill] sm:$0xff] %v9817_v13  ;;  %v3562_v46 = vmul.f32 %v9817_v13, %v3136_v58  ;;  %v3236_v55 = vrot.slane %v3187_v1, 1  ;;  %16411 = vst [vmem:[#allocation94_spill] sm:$0xff] %v9823_v57  ;;  %v9829_v50 = vld [vmem:[%s15312_s1 + $0x1e] ss:$0 sm:$0xff]  ;;  %v2257_v35 = vadd.f32 %v2225_v12, %v1412_v23  ;;  %v16415_v57 = vld [vmem:[#allocation29_spill] sm:$0xff] }
  0xd3   : > { %v2695_v29 = vadd.f32 %v2642_v33, %v2570_v52  ;;  %v3361_v60 = vrot.slane %v3312_v56, 2  ;;  %v3486_v61 = vrot.slane %v3437_v24, 3  ;;  %16412 = vst [vmem:[#allocation95_spill] sm:$0xff] %v9829_v50  ;;  %v3812_v13 = vmul.f32 %v9829_v50, %v3136_v58  ;;  %v16419_v2 = vld [vmem:[#allocation31_spill] sm:$0xff]  ;;  %v16421_v23 = vld [vmem:[#allocation33_spill] sm:$0xff] }
  0xd4   : > { %v3611_v0 = vrot.slane %v3562_v46, 4  ;;  %v16414_v52 = vrot.slane %v16413_v3, 1  ;;  %v3736_v8 = vrot.slane %v3687_v31, 5  ;;  %v16416_v56 = vrot.slane %v16415_v57, 2  ;;  %v16417_v46 = vld [vmem:[#allocation30_spill] sm:$0xff]  ;;  %v9852_v57 = vld [vmem:[#allocation2 + $0x68] sm:$0xff] }
  0xd5   : > { %v2820_v33 = vadd.f32 %v2767_v14, %v2695_v29  ;;  %v16418_v7 = vrot.slane %v16417_v46, 3  ;;  %v16420_v19 = vrot.slane %v16419_v2, 4  ;;  %v16422_v12 = vrot.slane %v16421_v23, 5  ;;  %v9865_v2 = vld [vmem:[%s15312_s1 + $0x22] ss:$0 sm:$0xff] }
  0xd6   : > { %v3237_v1 = vsel %vm692_vm0, %v16414_v52, %v3236_v55  ;;  %v3362_v24 = vsel %vm818_vm1, %v16416_v56, %v3361_v60  ;;  %v3861_v55 = vrot.slane %v3812_v13, 6  ;;  %16425 = vst [vmem:[#allocation30_spill] sm:$0xff] %v9865_v2  ;;  %v9871_v13 = vld [vmem:[%s15312_s1 + $0x23] ss:$0 sm:$0xff]  ;;  %v9880_v3 = vld [vmem:[%s15312_s1 + $0x24] ss:$0 sm:$0xff] }
  0xd7   : > { %v3290_v51 = vadd.f32 %v3237_v1, %v3165_v62  ;;  %v3487_v43 = vsel %vm944_vm2, %v16418_v7, %v3486_v61  ;;  %v3612_v58 = vsel %vm1070_vm3, %v16420_v19, %v3611_v0  ;;  %v2945_v14 = vadd.f32 %v2892_v54, %v2820_v33  ;;  %v9850_v62 = vld [vmem:[%s15312_s1 + $0x20] ss:$0 sm:$0xff]  ;;  %v9859_v19 = vld [vmem:[%s15312_s1 + $0x21] ss:$0 sm:$0xff]  ;;  %16426 = vst [vmem:[#allocation31_spill] sm:$0xff] %v9871_v13  ;;  %v16427_v61 = vld [vmem:[#allocation35_spill] sm:$0xff] }
  0xd8   : > { %v3737_v29 = vsel %vm1196_vm4, %v16422_v12, %v3736_v8  ;;  %16423 = vst [vmem:[#allocation28_spill] sm:$0xff] %v9850_v62  ;;  %v4010_v7 = vmul.f32 %v9852_v57, %v9850_v62  ;;  %16424 = vst [vmem:[#allocation29_spill] sm:$0xff] %v9859_v19  ;;  %v4032_v54 = vmul.f32 %v9859_v19, %v3981_v18  ;;  %v16428_v0 = vrot.slane %v16427_v61, 6  ;;  %v4826_v61 = vld [vmem:[#allocation2 + $0x88] sm:$0x3f]  ;;  %v16432_v62 = vld [vmem:[#allocation39_spill] sm:$0xff] }
  0xd9   : > { %v3415_v31 = vadd.f32 %v3362_v24, %v3290_v51  ;;  %v4157_v8 = vmul.f32 %v9865_v2, %v3981_v18  ;;  %v4282_v51 = vmul.f32 %v9871_v13, %v3981_v18  ;;  %v3070_v60 = vadd.f32 %v3017_v38, %v2945_v14  ;;  %16429 = vst [vmem:[#allocation33_spill] sm:$0xff] %v9880_v3 }
  0xda   : > { %v3862_v33 = vsel %vm1322_vm5, %v16428_v0, %v3861_v55  ;;  %v4407_v52 = vmul.f32 %v9880_v3, %v3981_v18  ;;  %v4532_v1 = vmul.f32 %v16323_v30, %v3981_v18  ;;  %v4081_v24 = vrot.slane %v4032_v54, 1  ;;  %v16430_v0 = vld [vmem:[#allocation38_spill] sm:$0xff] }
  0xdb   : > { %v3540_v56 = vadd.f32 %v3487_v43, %v3415_v31  ;;  %v4206_v46 = vrot.slane %v4157_v8, 2  ;;  %v4331_v23 = vrot.slane %v4282_v51, 3  ;;  %v3102_v12 = vadd.f32 %v3070_v60, %v2257_v35  ;;  %v16434_v30 = vld [vmem:[#allocation42_spill] sm:$0xff]  ;;  %v16436_v35 = vld [vmem:[#allocation43_spill] sm:$0xff] }
  0xdc   : > { %v4456_v13 = vrot.slane %v4407_v52, 4  ;;  %v4581_v38 = vrot.slane %v4532_v1, 5  ;;  %v4657_v14 = vmul.f32 %v16325_v9, %v3981_v18  ;;  %v16431_v2 = vrot.slane %v16430_v0, 1  ;;  %v16438_v9 = vld [vmem:[#allocation47_spill] sm:$0xff] }
  0xdd   : > { %v3665_v55 = vadd.f32 %v3612_v58, %v3540_v56  ;;  %v16433_v50 = vrot.slane %v16432_v62, 2  ;;  %v16435_v43 = vrot.slane %v16434_v30, 3  ;;  %v16437_v8 = vrot.slane %v16436_v35, 4  ;;  %v16440_v56 = vld [vmem:[#allocation50_spill] sm:$0xff] }
  0xde   : > { %v4082_v19 = vsel %vm692_vm0, %v16431_v2, %v4081_v24  ;;  %v16439_v18 = vrot.slane %v16438_v9, 5  ;;  %v4706_v60 = vrot.slane %v4657_v14, 6  ;;  %v4855_v62 = vmul.f32 %v16327_v5, %v16315_v4  ;;  %v16448_v9 = vld [vmem:[#allocation57_spill] sm:$0xff] }
  0xdf   : > { %v4207_v3 = vsel %vm818_vm1, %v16433_v50, %v4206_v46  ;;  %v4332_v31 = vsel %vm944_vm2, %v16435_v43, %v4331_v23  ;;  %v4135_v54 = vadd.f32 %v4082_v19, %v4010_v7  ;;  %v4457_v51 = vsel %vm1070_vm3, %v16437_v8, %v4456_v13  ;;  %v16444_v43 = vld [vmem:[#allocation54_spill] sm:$0xff]  ;;  %v16446_v8 = vld [vmem:[#allocation56_spill] sm:$0xff] }
  0xe0   : > { %v4582_v58 = vsel %vm1196_vm4, %v16439_v18, %v4581_v38  ;;  %v3790_v52 = vadd.f32 %v3737_v29, %v3665_v55  ;;  %v4877_v50 = vmul.f32 %v16328_v53, %v4826_v61  ;;  %v5002_v2 = vmul.f32 %v16330_v10, %v4826_v61  ;;  %v5671_v10 = vld [vmem:[#allocation2 + $0xa0] sm:$0x3f] }
  0xe1   : > { %v4260_v1 = vadd.f32 %v4207_v3, %v4135_v54  ;;  %v16441_v7 = vrot.slane %v16440_v56, 6  ;;  %v5127_v13 = vmul.f32 %v16332_v20, %v4826_v61  ;;  %v5252_v24 = vmul.f32 %v16334_v21, %v4826_v61  ;;  %v16442_v55 = vld [vmem:[#allocation52_spill] sm:$0xff] }
  0xe2   : > { %v3915_v46 = vadd.f32 %v3862_v33, %v3790_v52  ;;  %v4926_v23 = vrot.slane %v4877_v50, 1  ;;  %v5051_v38 = vrot.slane %v5002_v2, 2  ;;  %v5377_v29 = vmul.f32 %v16336_v34, %v4826_v61 }
  0xe3   : > { %v4707_v19 = vsel %vm1322_vm5, %v16441_v7, %v4706_v60  ;;  %v4385_v14 = vadd.f32 %v4332_v31, %v4260_v1  ;;  %v5176_v4 = vrot.slane %v5127_v13, 3  ;;  %v5301_v5 = vrot.slane %v5252_v24, 4  ;;  %v16452_v7 = vld [vmem:[#allocation62_spill] sm:$0xff] }
  0xe4   : > { %v5502_v53 = vmul.f32 %v16338_v17, %v4826_v61  ;;  %v3947_v3 = vadd.f32 %v3915_v46, %v3102_v12  ;;  %v16443_v0 = vrot.slane %v16442_v55, 1  ;;  %v16445_v20 = vrot.slane %v16444_v43, 2  ;;  %v16450_v12 = vld [vmem:[#allocation60_spill] sm:$0xff]  ;;  %v16456_v43 = vld [vmem:[#allocation66_spill] sm:$0xff] }
  0xe5   : > { %v5426_v33 = vrot.slane %v5377_v29, 5  ;;  %v4510_v54 = vadd.f32 %v4457_v51, %v4385_v14  ;;  %v16447_v34 = vrot.slane %v16446_v8, 3  ;;  %v16449_v18 = vrot.slane %v16448_v9, 4 }
  0xe6   : > { %v4927_v30 = vsel %vm692_vm0, %v16443_v0, %v4926_v23  ;;  %v5052_v21 = vsel %vm818_vm1, %v16445_v20, %v5051_v38  ;;  %v16451_v61 = vrot.slane %v16450_v12, 5  ;;  %v5551_v52 = vrot.slane %v5502_v53, 6  ;;  %v599_v53 = vld [vmem:[#allocation2 + $0x28] sm:$0x3f] }
  0xe7   : > { %v4980_v35 = vadd.f32 %v4927_v30, %v4855_v62  ;;  %v5177_v31 = vsel %vm944_vm2, %v16447_v34, %v5176_v4  ;;  %v5302_v17 = vsel %vm1070_vm3, %v16449_v18, %v5301_v5  ;;  %v5700_v50 = vmul.f32 %v16341_v47, %v9059_v28 }
  0xe8   : > { %v5427_v60 = vsel %vm1196_vm4, %v16451_v61, %v5426_v33  ;;  %v5722_v2 = vmul.f32 %v16342_v49, %v5671_v10  ;;  %v4635_v51 = vadd.f32 %v4582_v58, %v4510_v54  ;;  %v5847_v1 = vmul.f32 %v16344_v26, %v5671_v10  ;;  %v16454_v49 = vld [vmem:[#allocation65_spill] sm:$0xff] }
  0xe9   : > { %v5105_v62 = vadd.f32 %v5052_v21, %v4980_v35  ;;  %v5972_v56 = vmul.f32 %v16346_v39, %v5671_v10  ;;  %v16453_v13 = vrot.slane %v16452_v7, 6  ;;  %v6097_v23 = vmul.f32 %v16348_v42, %v5671_v10 }
  0xea   : > { %v5771_v46 = vrot.slane %v5722_v2, 1  ;;  %v6222_v38 = vmul.f32 %v9106_v6, %v5671_v10  ;;  %v4760_v29 = vadd.f32 %v4707_v19, %v4635_v51  ;;  %v5896_v28 = vrot.slane %v5847_v1, 2 }
  0xeb   : > { %v5552_v24 = vsel %vm1322_vm5, %v16453_v13, %v5551_v52  ;;  %v5230_v14 = vadd.f32 %v5177_v31, %v5105_v62  ;;  %v6021_v47 = vrot.slane %v5972_v56, 3  ;;  %v16455_v58 = vrot.slane %v16454_v49, 1  ;;  %v1449_v56 = vld [vmem:[#allocation2 + $0x40] sm:$0x3f] }
  0xec   : > { %v6146_v26 = vrot.slane %v6097_v23, 4  ;;  %v6271_v5 = vrot.slane %v6222_v38, 5  ;;  %v6347_v39 = vmul.f32 %v9123_v32, %v5671_v10  ;;  %v4792_v55 = vadd.f32 %v4760_v29, %v3947_v3  ;;  %v16465_v38 = vld [vmem:[#allocation68_spill] sm:$0xff] }
  0xed   : > { %v5772_v4 = vsel %vm692_vm0, %v16455_v58, %v5771_v46  ;;  %v5355_v0 = vadd.f32 %v5302_v17, %v5230_v14  ;;  %v16457_v42 = vrot.slane %v16456_v43, 2  ;;  %v16458_v19 = vrot.slane %v9112_v48, 3 }
  0xee   : > { %v5825_v30 = vadd.f32 %v5772_v4, %v5700_v50  ;;  %v16459_v21 = vrot.slane %v9118_v37, 4  ;;  %v16460_v54 = vrot.slane %v9140_v59, 5  ;;  %v6396_v10 = vrot.slane %v6347_v39, 6  ;;  %v16469_v4 = vld [vmem:[#allocation67_spill] sm:$0xff]  ;;  %v16471_v39 = vld [vmem:[#allocation10_spill] sm:$0xff] }
  0xef   : > { %v5897_v6 = vsel %vm818_vm1, %v16457_v42, %v5896_v28  ;;  %v6022_v20 = vsel %vm944_vm2, %v16458_v19, %v6021_v47  ;;  %v5480_v3 = vadd.f32 %v5427_v60, %v5355_v0  ;;  %v626_v8 = vmul.f32 %v9642_v25, %v9588_v63  ;;  %v16467_v47 = vld [vmem:[#allocation69_spill] sm:$0xff]  ;;  %v16473_v0 = vld [vmem:[#allocation12_spill] sm:$0xff]  ;;  %v16474_v42 = vld [vmem:[#allocation70_spill] sm:$0xff] }
  0xf0   : > { %v6147_v33 = vsel %vm1070_vm3, %v16459_v21, %v6146_v26  ;;  %v6272_v32 = vsel %vm1196_vm4, %v16460_v54, %v6271_v5  ;;  %v5950_v35 = vadd.f32 %v5897_v6, %v5825_v30  ;;  %v649_v34 = vmul.f32 %v9595_v22, %v599_v53  ;;  %v16470_v26 = vld [vmem:[#allocation91_spill] sm:$0xff] }
  0xf1   : > { %v16461_v48 = vrot.slane %v9149_v11, 6  ;;  %v775_v37 = vmul.f32 %v9604_v36, %v599_v53  ;;  %v901_v9 = vmul.f32 %v9610_v45, %v599_v53  ;;  %v1027_v59 = vmul.f32 %v9616_v27, %v599_v53 }
  0xf2   : > { %v5605_v18 = vadd.f32 %v5552_v24, %v5480_v3  ;;  %v6075_v17 = vadd.f32 %v6022_v20, %v5950_v35  ;;  %v701_v12 = vrot.slane %v649_v34, 1  ;;  %v1153_v61 = vmul.f32 %v9625_v41, %v599_v53  ;;  %v16476_v20 = vld [vmem:[#allocation13_spill] sm:$0xff] }
  0xf3   : > { %v6397_v31 = vsel %vm1322_vm5, %v16461_v48, %v6396_v10  ;;  %v827_v60 = vrot.slane %v775_v37, 2  ;;  %v953_v52 = vrot.slane %v901_v9, 3  ;;  %v1079_v25 = vrot.slane %v1027_v59, 4  ;;  %v16479_v37 = vld [vmem:[#allocation16_spill] sm:$0xff]  ;;  %v2294_v59 = vld [vmem:[#allocation2 + $0x58] sm:$0x3f] }
  0xf4   : > { %v1279_v50 = vmul.f32 %v9631_v15, %v599_v53  ;;  %v5637_v2 = vadd.f32 %v5605_v18, %v4792_v55  ;;  %v6200_v11 = vadd.f32 %v6147_v33, %v6075_v17  ;;  %v16462_v51 = vrot.slane %v9159_v16, 1  ;;  %v16472_v55 = vld [vmem:[#allocation11_spill] sm:$0xff]  ;;  %v16480_v18 = vld [vmem:[#allocation72_spill] sm:$0xff] }
  0xf5   : > { %v1205_v1 = vrot.slane %v1153_v61, 5  ;;  %v16463_v13 = vrot.slane %v9168_v44, 2  ;;  %v16464_v46 = vrot.slane %v9179_v40, 3  ;;  %v16466_v29 = vrot.slane %v16465_v38, 4  ;;  %v16477_v33 = vld [vmem:[#allocation15_spill] sm:$0xff]  ;;  %v16482_v61 = vld [vmem:[#allocation73_spill] sm:$0xff] }
  0xf6   : > { %v702_v62 = vsel %vm692_vm0, %v16462_v51, %v701_v12  ;;  %v6325_v28 = vadd.f32 %v6272_v32, %v6200_v11  ;;  %v16468_v16 = vrot.slane %v16467_v47, 5  ;;  %v1331_v58 = vrot.slane %v1279_v50, 6  ;;  %v16486_v51 = vld [vmem:[#allocation75_spill] sm:$0xff]  ;;  %v16491_v38 = vld [vmem:[#allocation24_spill] sm:$0xff]  ;;  %v16493_v47 = vld [vmem:[#allocation18_spill] sm:$0xff] }
  0xf7   : > { %v752_v7 = vadd.f32 %v702_v62, %v626_v8  ;;  %v828_v24 = vsel %vm818_vm1, %v16463_v13, %v827_v60  ;;  %v954_v23 = vsel %vm944_vm2, %v16464_v46, %v953_v52  ;;  %v1080_v14 = vsel %vm1070_vm3, %v16466_v29, %v1079_v25  ;;  %v16484_v25 = vld [vmem:[#allocation74_spill] sm:$0xff] }
  0xf8   : > { %v1206_v49 = vsel %vm1196_vm4, %v16468_v16, %v1205_v1  ;;  %v1477_v5 = vmul.f32 %v16470_v26, %v16469_v4  ;;  %v1500_v53 = vmul.f32 %v16471_v39, %v1449_v56  ;;  %v1625_v40 = vmul.f32 %v16472_v55, %v1449_v56  ;;  %v16494_v26 = vld [vmem:[#allocation77_spill] sm:$0xff] }
  0xf9   : > { %v878_v44 = vadd.f32 %v828_v24, %v752_v7  ;;  %v1750_v30 = vmul.f32 %v16473_v0, %v1449_v56  ;;  %v6450_v43 = vadd.f32 %v6397_v31, %v6325_v28  ;;  %v16475_v6 = vrot.slane %v16474_v42, 6 }
  0xfa   : > { %v1875_v21 = vmul.f32 %v16476_v20, %v1449_v56  ;;  %v2000_v54 = vmul.f32 %v16477_v33, %v1449_v56  ;;  %v1551_v10 = vrot.slane %v1500_v53, 1  ;;  %v1676_v3 = vrot.slane %v1625_v40, 2  ;;  %v16496_v53 = vld [vmem:[#allocation19_spill] sm:$0xff] }
  0xfb   : > { %v1332_v19 = vsel %vm1322_vm5, %v16475_v6, %v1331_v58  ;;  %v1004_v32 = vadd.f32 %v954_v23, %v878_v44  ;;  %v1801_v35 = vrot.slane %v1750_v30, 3  ;;  %v9988_v8 = vadd.f32 %v6450_v43, %v5637_v2  ;;  %v16490_v23 = vld [vmem:[#allocation90_spill] sm:$0xff]  ;;  %v16497_v30 = vld [vmem:[#allocation20_spill] sm:$0xff] }
  0xfc   : > { %v1926_v34 = vrot.slane %v1875_v21, 4  ;;  %v2051_v48 = vrot.slane %v2000_v54, 5  ;;  %v2125_v9 = vmul.f32 %v16479_v37, %v1449_v56  ;;  %v16481_v17 = vrot.slane %v16480_v18, 1  ;;  %v16488_v56 = vld [vmem:[#allocation76_spill] sm:$0xff]  ;;  %v16501_v18 = vld [vmem:[#allocation78_spill] sm:$0xff] }
  0xfd   : > { %16478 = vst [vmem:[#allocation35_spill] sm:$0xff] %v9988_v8  ;;  %v1130_v31 = vadd.f32 %v1080_v14, %v1004_v32  ;;  %v16483_v60 = vrot.slane %v16482_v61, 2  ;;  %v16485_v50 = vrot.slane %v16484_v25, 3  ;;  %6531 = vadd.xlane.f32.xlu0 %v9988_v8  ;;  %v16487_v62 = vrot.slane %v16486_v51, 4  ;;  %v16492_v14 = vld [vmem:[#allocation17_spill] sm:$0xff]  ;;  %v16503_v61 = vld [vmem:[#allocation79_spill] sm:$0xff] }
  0xfe   : > { %v1552_v12 = vsel %vm692_vm0, %v16481_v17, %v1551_v10  ;;  %v16489_v7 = vrot.slane %v16488_v56, 5  ;;  %v2176_v24 = vrot.slane %v2125_v9, 6  ;;  %v2322_v29 = vmul.f32 %v16491_v38, %v16490_v23  ;;  %v16500_v9 = vld [vmem:[#allocation92_spill] sm:$0xff] }
  0xff   : > { %v1677_v52 = vsel %vm818_vm1, %v16483_v60, %v1676_v3  ;;  %v1802_v11 = vsel %vm944_vm2, %v16485_v50, %v1801_v35  ;;  %v1602_v2 = vadd.f32 %v1552_v12, %v1477_v5  ;;  %v1927_v1 = vsel %vm1070_vm3, %v16487_v62, %v1926_v34  ;;  %v16499_v35 = vld [vmem:[#allocation22_spill] sm:$0xff]  ;;  %v16507_v62 = vld [vmem:[#allocation81_spill] sm:$0xff] }
 0x100   : > { %v2052_v13 = vsel %vm1196_vm4, %v16489_v7, %v2051_v48  ;;  %v1256_v46 = vadd.f32 %v1206_v49, %v1130_v31  ;;  %v2345_v28 = vmul.f32 %v16492_v14, %v2294_v59  ;;  %v2470_v16 = vmul.f32 %v16493_v47, %v2294_v59  ;;  %v16498_v49 = vld [vmem:[#allocation21_spill] sm:$0xff]  ;;  %v3139_v48 = vld [vmem:[#allocation2 + $0x70] sm:$0x3f] }
 0x101   : > { %v1727_v58 = vadd.f32 %v1677_v52, %v1602_v2  ;;  %v16495_v5 = vrot.slane %v16494_v26, 6  ;;  %v2595_v40 = vmul.f32 %v16496_v53, %v2294_v59  ;;  %v2720_v43 = vmul.f32 %v16497_v30, %v2294_v59  ;;  %v16505_v2 = vld [vmem:[#allocation80_spill] sm:$0xff]  ;;  %v16509_v7 = vld [vmem:[#allocation82_spill] sm:$0xff] }
 0x102   : > { %v1382_v42 = vadd.f32 %v1332_v19, %v1256_v46  ;;  %v2396_v6 = vrot.slane %v2345_v28, 1  ;;  %v2521_v21 = vrot.slane %v2470_v16, 2  ;;  %v2845_v54 = vmul.f32 %v16498_v49, %v2294_v59  ;;  %v16511_v28 = vld [vmem:[#allocation23_spill] sm:$0xff] }
 0x103   : > { %v2177_v44 = vsel %vm1322_vm5, %v16495_v5, %v2176_v24  ;;  %v1852_v32 = vadd.f32 %v1802_v11, %v1727_v58  ;;  %v2646_v10 = vrot.slane %v2595_v40, 3  ;;  %v2771_v3 = vrot.slane %v2720_v43, 4  ;;  %v16512_v58 = vld [vmem:[#allocation25_spill] sm:$0xff]  ;;  %v16513_v5 = vld [vmem:[#allocation26_spill] sm:$0xff]  ;;  %v16514_v43 = vld [vmem:[#allocation27_spill] sm:$0xff] }
 0x104   : > { %v2970_v34 = vmul.f32 %v16499_v35, %v2294_v59  ;;  %v1414_v31 = vadd.f32 %v16500_v9, %v1382_v42  ;;  %v16502_v17 = vrot.slane %v16501_v18, 1  ;;  %v16504_v60 = vrot.slane %v16503_v61, 2  ;;  %v16518_v18 = vld [vmem:[#allocation94_spill] sm:$0xff] }
 0x105   : > { %v2896_v52 = vrot.slane %v2845_v54, 5  ;;  %v1977_v25 = vadd.f32 %v1927_v1, %v1852_v32  ;;  %v16506_v11 = vrot.slane %v16505_v2, 3  ;;  %v16508_v59 = vrot.slane %v16507_v62, 4 }
 0x106   : > { %v2397_v12 = vsel %vm692_vm0, %v16502_v17, %v2396_v6  ;;  %v2522_v19 = vsel %vm818_vm1, %v16504_v60, %v2521_v21  ;;  %v16510_v24 = vrot.slane %v16509_v7, 5  ;;  %v3021_v38 = vrot.slane %v2970_v34, 6  ;;  %v16515_v6 = vld [vmem:[#allocation83_spill] sm:$0xff]  ;;  %v16519_v60 = vld [vmem:[#allocation84_spill] sm:$0xff] }
 0x107   : > { %v2447_v50 = vadd.f32 %v2397_v12, %v2322_v29  ;;  %v2647_v51 = vsel %vm944_vm2, %v16506_v11, %v2646_v10  ;;  %v2772_v56 = vsel %vm1070_vm3, %v16508_v59, %v2771_v3  ;;  %v3167_v16 = vmul.f32 %v9852_v57, %v16511_v28  ;;  %v16517_v10 = vld [vmem:[#allocation93_spill] sm:$0xff] }
 0x108   : > { %v2897_v46 = vsel %vm1196_vm4, %v16510_v24, %v2896_v52  ;;  %v3190_v26 = vmul.f32 %v16512_v58, %v3139_v48  ;;  %v2102_v1 = vadd.f32 %v2052_v13, %v1977_v25  ;;  %v3315_v40 = vmul.f32 %v16513_v5, %v3139_v48  ;;  %v3984_v11 = vld [vmem:[#allocation2 + $0x88] sm:$0x3f] }
 0x109   : > { %v2572_v29 = vadd.f32 %v2522_v19, %v2447_v50  ;;  %v3440_v42 = vmul.f32 %v16514_v43, %v3139_v48  ;;  %v16516_v21 = vrot.slane %v16515_v6, 6  ;;  %v3565_v3 = vmul.f32 %v16517_v10, %v3139_v48  ;;  %v16521_v50 = vld [vmem:[#allocation95_spill] sm:$0xff]  ;;  %v16522_v24 = vld [vmem:[#allocation85_spill] sm:$0xff]  ;;  %v16528_v6 = vld [vmem:[#allocation88_spill] sm:$0xff] }
 0x10a   : > { %v3241_v32 = vrot.slane %v3190_v26, 1  ;;  %v3690_v34 = vmul.f32 %v16518_v18, %v3139_v48  ;;  %v2227_v17 = vadd.f32 %v2177_v44, %v2102_v1  ;;  %v3366_v57 = vrot.slane %v3315_v40, 2  ;;  %v16524_v44 = vld [vmem:[#allocation86_spill] sm:$0xff] }
 0x10b   : > { %v3022_v54 = vsel %vm1322_vm5, %v16516_v21, %v3021_v38  ;;  %v2697_v12 = vadd.f32 %v2647_v51, %v2572_v29  ;;  %v3491_v61 = vrot.slane %v3440_v42, 3  ;;  %v16520_v13 = vrot.slane %v16519_v60, 1  ;;  %v16526_v29 = vld [vmem:[#allocation87_spill] sm:$0xff] }
 0x10c   : > { %v3616_v52 = vrot.slane %v3565_v3, 4  ;;  %v3741_v25 = vrot.slane %v3690_v34, 5  ;;  %v3815_v2 = vmul.f32 %v16521_v50, %v3139_v48  ;;  %v2259_v62 = vadd.f32 %v2227_v17, %v1414_v31  ;;  %v16530_v3 = vld [vmem:[#allocation28_spill] sm:$0xff]  ;;  %v16531_v17 = vld [vmem:[#allocation29_spill] sm:$0xff] }
 0x10d   : > { %v3242_v19 = vsel %vm692_vm0, %v16520_v13, %v3241_v32  ;;  %v2822_v59 = vadd.f32 %v2772_v56, %v2697_v12  ;;  %v16523_v38 = vrot.slane %v16522_v24, 2  ;;  %v16525_v51 = vrot.slane %v16524_v44, 3  ;;  %v16534_v13 = vld [vmem:[#allocation30_spill] sm:$0xff]  ;;  %v16535_v24 = vld [vmem:[#allocation31_spill] sm:$0xff] }
 0x10e   : > { %v3292_v7 = vadd.f32 %v3242_v19, %v3167_v16  ;;  %v16527_v40 = vrot.slane %v16526_v29, 4  ;;  %v16529_v21 = vrot.slane %v16528_v6, 5  ;;  %v3866_v32 = vrot.slane %v3815_v2, 6  ;;  %v8048_v16 = vld [vmem:[#allocation2 + $0x80] sm:$0xff] }
 0x10f   : > { %v3367_v26 = vsel %vm818_vm1, %v16523_v38, %v3366_v57  ;;  %v3492_v1 = vsel %vm944_vm2, %v16525_v51, %v3491_v61  ;;  %v2947_v31 = vadd.f32 %v2897_v46, %v2822_v59  ;;  %v4012_v34 = vmul.f32 %v8048_v16, %v16530_v3  ;;  %v16532_v57 = vld [vmem:[#allocation89_spill] sm:$0xff]  ;;  %v10071_v46 = vld [vmem:[%s15312_s1 + $0x25] ss:$0 sm:$0xff] }
 0x110   : > { %v3617_v42 = vsel %vm1070_vm3, %v16527_v40, %v3616_v52  ;;  %v3742_v48 = vsel %vm1196_vm4, %v16529_v21, %v3741_v25  ;;  %v3417_v56 = vadd.f32 %v3367_v26, %v3292_v7  ;;  %v4035_v12 = vmul.f32 %v16531_v17, %v3984_v11  ;;  %v16536_v38 = vld [vmem:[#allocation33_spill] sm:$0xff]  ;;  %16537 = vst [vmem:[#allocation38_spill] sm:$0xff] %v10071_v46  ;;  %v10077_v40 = vld [vmem:[%s15312_s1 + $0x26] ss:$0 sm:$0xff]  ;;  %v4829_v16 = vld [vmem:[#allocation2 + $0xa0] sm:$0x3f] }
 0x111   : > { %v16533_v60 = vrot.slane %v16532_v57, 6  ;;  %v4160_v19 = vmul.f32 %v16534_v13, %v3984_v11  ;;  %v4285_v52 = vmul.f32 %v16535_v24, %v3984_v11  ;;  %v4410_v44 = vmul.f32 %v16536_v38, %v3984_v11  ;;  %v16538_v21 = vld [vmem:[#allocation32_spill] sm:$0xff]  ;;  %v16540_v57 = vld [vmem:[#allocation34_spill] sm:$0xff] }
 0x112   : > { %v3072_v51 = vadd.f32 %v3022_v54, %v2947_v31  ;;  %v3542_v25 = vadd.f32 %v3492_v1, %v3417_v56  ;;  %v4086_v2 = vrot.slane %v4035_v12, 1  ;;  %v4535_v59 = vmul.f32 %v10071_v46, %v3984_v11  ;;  %v16544_v46 = vld [vmem:[#allocation36_spill] sm:$0xff] }
 0x113   : > { %v3867_v61 = vsel %vm1322_vm5, %v16533_v60, %v3866_v32  ;;  %v4211_v7 = vrot.slane %v4160_v19, 2  ;;  %v4336_v26 = vrot.slane %v4285_v52, 3  ;;  %v4461_v29 = vrot.slane %v4410_v44, 4  ;;  %v16542_v52 = vld [vmem:[#allocation48_spill] sm:$0xff] }
 0x114   : > { %v4660_v6 = vmul.f32 %v10077_v40, %v3984_v11  ;;  %v3104_v54 = vadd.f32 %v3072_v51, %v2259_v62  ;;  %v3667_v1 = vadd.f32 %v3617_v42, %v3542_v25  ;;  %v16539_v32 = vrot.slane %v16538_v21, 1  ;;  %v16546_v42 = vld [vmem:[#allocation37_spill] sm:$0xff] }
 0x115   : > { %v4586_v56 = vrot.slane %v4535_v59, 5  ;;  %v16541_v60 = vrot.slane %v16540_v57, 2  ;;  %v16543_v44 = vrot.slane %v16542_v52, 3  ;;  %v16545_v38 = vrot.slane %v16544_v46, 4  ;;  %v8052_v59 = vld [vmem:[#allocation2 + $0x98] sm:$0xff] }
 0x116   : > { %v4087_v31 = vsel %vm692_vm0, %v16539_v32, %v4086_v2  ;;  %v3792_v62 = vadd.f32 %v3742_v48, %v3667_v1  ;;  %v16547_v51 = vrot.slane %v16546_v42, 5  ;;  %v4711_v2 = vrot.slane %v4660_v6, 6  ;;  %v10104_v46 = vld [vmem:[%s15312_s1 + $0x29] ss:$0 sm:$0xff]  ;;  %v16552_v32 = vld [vmem:[#allocation40_spill] sm:$0xff] }
 0x117   : > { %v4137_v12 = vadd.f32 %v4087_v31, %v4012_v34  ;;  %v4212_v19 = vsel %vm818_vm1, %v16541_v60, %v4211_v7  ;;  %v4337_v8 = vsel %vm944_vm2, %v16543_v44, %v4336_v26  ;;  %v4462_v11 = vsel %vm1070_vm3, %v16545_v38, %v4461_v29  ;;  %v10098_v34 = vld [vmem:[%s15312_s1 + $0x28] ss:$0 sm:$0xff]  ;;  %16549 = vst [vmem:[#allocation42_spill] sm:$0xff] %v10104_v46  ;;  %v10110_v38 = vld [vmem:[%s15312_s1 + $0x2a] ss:$0 sm:$0xff] }
 0x118   : > { %v4587_v25 = vsel %vm1196_vm4, %v16547_v51, %v4586_v56  ;;  %16548 = vst [vmem:[#allocation39_spill] sm:$0xff] %v10098_v34  ;;  %v4857_v7 = vmul.f32 %v8052_v59, %v10098_v34  ;;  %v4880_v48 = vmul.f32 %v10104_v46, %v4829_v16  ;;  %16550 = vst [vmem:[#allocation43_spill] sm:$0xff] %v10110_v38  ;;  %v10116_v29 = vld [vmem:[%s15312_s1 + $0x2b] ss:$0 sm:$0xff]  ;;  %v16553_v31 = vrot.slane %v16552_v32, 6 }
 0x119   : > { %v4262_v21 = vadd.f32 %v4212_v19, %v4137_v12  ;;  %v5005_v26 = vmul.f32 %v10110_v38, %v4829_v16  ;;  %16551 = vst [vmem:[#allocation47_spill] sm:$0xff] %v10116_v29  ;;  %v5130_v6 = vmul.f32 %v10116_v29, %v4829_v16  ;;  %v3917_v1 = vadd.f32 %v3867_v61, %v3792_v62  ;;  %v10125_v12 = vld [vmem:[%s15312_s1 + $0x2c] ss:$0 sm:$0xff]  ;;  %v10131_v60 = vld [vmem:[%s15312_s1 + $0x2d] ss:$0 sm:$0xff] }
 0x11a   : > { %v4712_v56 = vsel %vm1322_vm5, %v16553_v31, %v4711_v2  ;;  %16554 = vst [vmem:[#allocation50_spill] sm:$0xff] %v10125_v12  ;;  %v5255_v57 = vmul.f32 %v10125_v12, %v4829_v16  ;;  %16555 = vst [vmem:[#allocation52_spill] sm:$0xff] %v10131_v60  ;;  %v5380_v19 = vmul.f32 %v10131_v60, %v4829_v16  ;;  %v4931_v61 = vrot.slane %v4880_v48, 1  ;;  %v10137_v59 = vld [vmem:[%s15312_s1 + $0x2e] ss:$0 sm:$0xff] }
 0x11b   : > { %v4387_v52 = vadd.f32 %v4337_v8, %v4262_v21  ;;  %v5056_v44 = vrot.slane %v5005_v26, 2  ;;  %v5181_v62 = vrot.slane %v5130_v6, 3  ;;  %v3949_v42 = vadd.f32 %v3917_v1, %v3104_v54  ;;  %16556 = vst [vmem:[#allocation54_spill] sm:$0xff] %v10137_v59  ;;  %v5674_v31 = vld [vmem:[#allocation2 + $0xb8] sm:$0x3f]  ;;  %v16557_v29 = vld [vmem:[#allocation41_spill] sm:$0xff] }
 0x11c   : > { %v5306_v51 = vrot.slane %v5255_v57, 4  ;;  %v5431_v2 = vrot.slane %v5380_v19, 5  ;;  %v5505_v32 = vmul.f32 %v10137_v59, %v4829_v16  ;;  %v16558_v38 = vrot.slane %v16557_v29, 1  ;;  %v16559_v8 = vld [vmem:[#allocation44_spill] sm:$0xff]  ;;  %v16561_v54 = vld [vmem:[#allocation45_spill] sm:$0xff]  ;;  %v16563_v57 = vld [vmem:[#allocation46_spill] sm:$0xff] }
 0x11d   : > { %v4512_v12 = vadd.f32 %v4462_v11, %v4387_v52  ;;  %v16560_v21 = vrot.slane %v16559_v8, 2  ;;  %v16562_v26 = vrot.slane %v16561_v54, 3  ;;  %v16564_v19 = vrot.slane %v16563_v57, 4  ;;  %v16565_v16 = vld [vmem:[#allocation49_spill] sm:$0xff]  ;;  %v10192_v57 = vld [vmem:[%s15312_s1 + $0x35] ss:$0 sm:$0xff] }
 0x11e   : > { %v4932_v60 = vsel %vm692_vm0, %v16558_v38, %v4931_v61  ;;  %v16566_v59 = vrot.slane %v16565_v16, 5  ;;  %v5556_v29 = vrot.slane %v5505_v32, 6  ;;  %v10158_v38 = vld [vmem:[%s15312_s1 + $0x30] ss:$0 sm:$0xff]  ;;  %v16568_v61 = vld [vmem:[#allocation51_spill] sm:$0xff]  ;;  %16575 = vst [vmem:[#allocation66_spill] sm:$0xff] %v10192_v57 }
 0x11f   : > { %v5057_v48 = vsel %vm818_vm1, %v16560_v21, %v5056_v44  ;;  %v5182_v6 = vsel %vm944_vm2, %v16562_v26, %v5181_v62  ;;  %v4982_v1 = vadd.f32 %v4932_v60, %v4857_v7  ;;  %v5307_v46 = vsel %vm1070_vm3, %v16564_v19, %v5306_v51  ;;  %16567 = vst [vmem:[#allocation56_spill] sm:$0xff] %v10158_v38  ;;  %v10165_v7 = vld [vmem:[%s15312_s1 + $0x31] ss:$0 sm:$0xff]  ;;  %v10171_v62 = vld [vmem:[%s15312_s1 + $0x32] ss:$0 sm:$0xff]  ;;  %v16571_v51 = vld [vmem:[#allocation53_spill] sm:$0xff] }
 0x120   : > { %v5432_v11 = vsel %vm1196_vm4, %v16566_v59, %v5431_v2  ;;  %v4637_v52 = vadd.f32 %v4587_v25, %v4512_v12  ;;  %v5702_v44 = vmul.f32 %v10158_v38, %v16568_v61  ;;  %16569 = vst [vmem:[#allocation57_spill] sm:$0xff] %v10165_v7  ;;  %v5725_v60 = vmul.f32 %v10165_v7, %v5674_v31  ;;  %v10180_v32 = vld [vmem:[%s15312_s1 + $0x33] ss:$0 sm:$0xff]  ;;  %v10186_v21 = vld [vmem:[%s15312_s1 + $0x34] ss:$0 sm:$0xff]  ;;  %v16581_v7 = vld [vmem:[#allocation59_spill] sm:$0xff] }
 0x121   : > { %16570 = vst [vmem:[#allocation60_spill] sm:$0xff] %v10171_v62  ;;  %v5850_v25 = vmul.f32 %v10171_v62, %v5674_v31  ;;  %v5107_v12 = vadd.f32 %v5057_v48, %v4982_v1  ;;  %v16572_v2 = vrot.slane %v16571_v51, 6  ;;  %16573 = vst [vmem:[#allocation62_spill] sm:$0xff] %v10180_v32  ;;  %v5975_v8 = vmul.f32 %v10180_v32, %v5674_v31  ;;  %v10198_v51 = vld [vmem:[%s15312_s1 + $0x36] ss:$0 sm:$0xff] }
 0x122   : > { %16574 = vst [vmem:[#allocation65_spill] sm:$0xff] %v10186_v21  ;;  %v6100_v54 = vmul.f32 %v10186_v21, %v5674_v31  ;;  %v4762_v26 = vadd.f32 %v4712_v56, %v4637_v52  ;;  %v5776_v48 = vrot.slane %v5725_v60, 1  ;;  %v6225_v19 = vmul.f32 %v10192_v57, %v5674_v31  ;;  %16576 = vst [vmem:[#allocation68_spill] sm:$0xff] %v10198_v51  ;;  %v600_v56 = vld [vmem:[#allocation2 + $0x30] sm:$0xff]  ;;  %v16577_v60 = vld [vmem:[#allocation55_spill] sm:$0xff] }
 0x123   : > { %v5557_v59 = vsel %vm1322_vm5, %v16572_v2, %v5556_v29  ;;  %v5901_v1 = vrot.slane %v5850_v25, 2  ;;  %v5232_v16 = vadd.f32 %v5182_v6, %v5107_v12  ;;  %v6026_v29 = vrot.slane %v5975_v8, 3  ;;  %v16579_v32 = vld [vmem:[#allocation58_spill] sm:$0xff]  ;;  %v10207_v12 = vld [vmem:[#allocation2 + $0x38] sm:$0xff] }
 0x124   : > { %v6151_v61 = vrot.slane %v6100_v54, 4  ;;  %v6350_v2 = vmul.f32 %v10198_v51, %v5674_v31  ;;  %v4794_v52 = vadd.f32 %v4762_v26, %v3949_v42  ;;  %v16578_v25 = vrot.slane %v16577_v60, 1  ;;  %v16583_v31 = vld [vmem:[#allocation61_spill] sm:$0xff]  ;;  %v16585_v26 = vld [vmem:[#allocation63_spill] sm:$0xff] }
 0x125   : > { %v16580_v62 = vrot.slane %v16579_v32, 2  ;;  %v6276_v6 = vrot.slane %v6225_v19, 5  ;;  %v5357_v8 = vadd.f32 %v5307_v46, %v5232_v16  ;;  %v16582_v38 = vrot.slane %v16581_v7, 3  ;;  %v16587_v7 = vld [vmem:[#allocation64_spill] sm:$0xff] }
 0x126   : > { %v5777_v21 = vsel %vm692_vm0, %v16578_v25, %v5776_v48  ;;  %v16584_v51 = vrot.slane %v16583_v31, 4  ;;  %v16586_v60 = vrot.slane %v16585_v26, 5  ;;  %v6401_v32 = vrot.slane %v6350_v2, 6 }
 0x127   : > { %v5902_v57 = vsel %vm818_vm1, %v16580_v62, %v5901_v1  ;;  %v5827_v54 = vadd.f32 %v5777_v21, %v5702_v44  ;;  %v6027_v34 = vsel %vm944_vm2, %v16582_v38, %v6026_v29  ;;  %v627_v62 = vmul.f32 %v9588_v63, %v600_v56 }
 0x128   : > { %v6152_v42 = vsel %vm1070_vm3, %v16584_v51, %v6151_v61  ;;  %v6277_v48 = vsel %vm1196_vm4, %v16586_v60, %v6276_v6  ;;  %v650_v1 = vmul.f32 %v9595_v22, %v600_v56  ;;  %v5482_v19 = vadd.f32 %v5432_v11, %v5357_v8 }
 0x129   : > { %v5952_v46 = vadd.f32 %v5902_v57, %v5827_v54  ;;  %v10222_v44 = vmul.f32 %v9595_v22, %v10207_v12  ;;  %v776_v38 = vmul.f32 %v9604_v36, %v600_v56  ;;  %v16588_v21 = vrot.slane %v16587_v7, 6 }
 0x12a   : > { %v703_v29 = vrot.slane %v650_v1, 1  ;;  %v10230_v61 = vmul.f32 %v9604_v36, %v10207_v12  ;;  %v902_v63 = vmul.f32 %v9610_v45, %v600_v56  ;;  %v5607_v51 = vadd.f32 %v5557_v59, %v5482_v19 }
 0x12b   : > { %v6402_v16 = vsel %vm1322_vm5, %v16588_v21, %v6401_v32  ;;  %v6077_v11 = vadd.f32 %v6027_v34, %v5952_v46  ;;  %v15630_v57 = vrot.slane %v10222_v44, 1  ;;  %v829_v2 = vrot.slane %v776_v38, 2  ;;  %v10267_v38 = vld [vmem:[#allocation2 + $0x50] sm:$0xff] }
 0x12c   : > { %v15628_v22 = vrot.slane %v10230_v61, 2  ;;  %v10237_v25 = vmul.f32 %v9610_v45, %v10207_v12  ;;  %v955_v6 = vrot.slane %v902_v63, 3  ;;  %v1028_v8 = vmul.f32 %v9616_v27, %v600_v56 }
 0x12d   : > { %v5639_v54 = vadd.f32 %v5607_v51, %v4794_v52  ;;  %v6202_v31 = vadd.f32 %v6152_v42, %v6077_v11  ;;  %v705_v36 = vsel %vm692_vm0, %v703_v29, %v15630_v57  ;;  %v10245_v34 = vmul.f32 %v9616_v27, %v10207_v12 }
 0x12e   : > { %v753_v59 = vadd.f32 %v705_v36, %v627_v62  ;;  %v831_v26 = vsel %vm818_vm1, %v829_v2, %v15628_v22  ;;  %v15627_v45 = vrot.slane %v10237_v25, 3  ;;  %v1081_v60 = vrot.slane %v1028_v8, 4 }
 0x12f   : > { %v6327_v32 = vadd.f32 %v6277_v48, %v6202_v31  ;;  %v15626_v52 = vrot.slane %v10245_v34, 4  ;;  %v1154_v42 = vmul.f32 %v9625_v41, %v600_v56  ;;  %v10255_v1 = vmul.f32 %v9625_v41, %v10207_v12  ;;  %v10265_v48 = vld [vmem:[#allocation2 + $0x48] sm:$0xff] }
 0x130   : > { %v879_v19 = vadd.f32 %v831_v26, %v753_v59  ;;  %v957_v27 = vsel %vm944_vm2, %v955_v6, %v15627_v45  ;;  %v1280_v62 = vmul.f32 %v9631_v15, %v600_v56  ;;  %v10263_v46 = vmul.f32 %v9631_v15, %v10207_v12  ;;  %16589 = vst [vmem:[#allocation69_spill] sm:$0xff] %v10265_v48 }
 0x131   : > { %v6452_v7 = vadd.f32 %v6402_v16, %v6327_v32  ;;  %v1083_v41 = vsel %vm1070_vm3, %v1081_v60, %v15626_v52  ;;  %v1207_v21 = vrot.slane %v1154_v42, 5  ;;  %v15624_v29 = vrot.slane %v10255_v1, 5  ;;  %v16599_v52 = vld [vmem:[#allocation42_spill] sm:$0xff] }
 0x132   : > { %v1005_v63 = vadd.f32 %v957_v27, %v879_v19  ;;  %v1333_v51 = vrot.slane %v1280_v62, 6  ;;  %v15621_v56 = vrot.slane %v10263_v46, 6  ;;  %v1478_v15 = vmul.f32 %v16469_v4, %v10265_v48 }
 0x133   : > { %v10276_v11 = vadd.f32 %v6452_v7, %v5639_v54  ;;  %v1209_v16 = vsel %vm1196_vm4, %v1207_v21, %v15624_v29  ;;  %v1501_v2 = vmul.f32 %v16471_v39, %v10265_v48  ;;  %v10285_v6 = vmul.f32 %v16471_v39, %v10267_v38  ;;  %v10531_v29 = vld [vmem:[#allocation2 + $0xb0] sm:$0xff] }
 0x134   : > { %v1131_v8 = vadd.f32 %v1083_v41, %v1005_v63  ;;  %v1335_v31 = vsel %vm1322_vm5, %v1333_v51, %v15621_v56  ;;  %v1626_v4 = vmul.f32 %v16472_v55, %v10265_v48  ;;  %v10294_v54 = vmul.f32 %v16472_v55, %v10267_v38 }
 0x135   : > { %16590 = vst [vmem:[#allocation67_spill] sm:$0xff] %v10276_v11  ;;  %6535 = vadd.xlane.f32.xlu1 %v10276_v11  ;;  %v1553_v36 = vrot.slane %v1501_v2, 1  ;;  %v15620_v59 = vrot.slane %v10285_v6, 1  ;;  %v1751_v39 = vmul.f32 %v16473_v0, %v10265_v48  ;;  %v10302_v26 = vmul.f32 %v16473_v0, %v10267_v38 }
 0x136   : > { %v1257_v60 = vadd.f32 %v1209_v16, %v1131_v8  ;;  %v1678_v32 = vrot.slane %v1626_v4, 2  ;;  %v15614_v42 = vrot.slane %v10294_v54, 2  ;;  %v1876_v55 = vmul.f32 %v16476_v20, %v10265_v48  ;;  %v10328_v8 = vld [vmem:[#allocation2 + $0x60] sm:$0xff] }
 0x137   : > { %v1555_v19 = vsel %vm692_vm0, %v1553_v36, %v15620_v59  ;;  %v1803_v27 = vrot.slane %v1751_v39, 3  ;;  %v15608_v62 = vrot.slane %v10302_v26, 3  ;;  %v10313_v7 = vmul.f32 %v16476_v20, %v10267_v38  ;;  %16591 = vst [vmem:[#allocation91_spill] sm:$0xff] %v10328_v8  ;;  %v10337_v39 = vld [vmem:[#allocation2 + $0x68] sm:$0xff] }
 0x138   : > { %v1383_v0 = vadd.f32 %v1335_v31, %v1257_v60  ;;  %v1603_v41 = vadd.f32 %v1555_v19, %v1478_v15  ;;  %v1680_v21 = vsel %vm818_vm1, %v1678_v32, %v15614_v42  ;;  %v1928_v63 = vrot.slane %v1876_v55, 4 }
 0x139   : > { %v1805_v51 = vsel %vm944_vm2, %v1803_v27, %v15608_v62  ;;  %v15604_v16 = vrot.slane %v10313_v7, 4  ;;  %v2001_v2 = vmul.f32 %v16477_v33, %v10265_v48  ;;  %v10326_v20 = vmul.f32 %v16477_v33, %v10267_v38  ;;  %v10399_v62 = vld [vmem:[#allocation2 + $0x80] sm:$0xff] }
 0x13a   : > { %v1415_v15 = vadd.f32 %v16500_v9, %v1383_v0  ;;  %v1728_v31 = vadd.f32 %v1680_v21, %v1603_v41  ;;  %v2126_v4 = vmul.f32 %v16479_v37, %v10265_v48  ;;  %v10335_v36 = vmul.f32 %v16479_v37, %v10267_v38 }
 0x13b   : > { %v1930_v60 = vsel %vm1070_vm3, %v1928_v63, %v15604_v16  ;;  %v2053_v33 = vrot.slane %v2001_v2, 5  ;;  %v15603_v32 = vrot.slane %v10326_v20, 5  ;;  %v2323_v9 = vmul.f32 %v16490_v23, %v10328_v8 }
 0x13c   : > { %v1853_v55 = vadd.f32 %v1805_v51, %v1728_v31  ;;  %v2178_v19 = vrot.slane %v2126_v4, 6  ;;  %v15605_v27 = vrot.slane %v10335_v36, 6  ;;  %v2346_v37 = vmul.f32 %v16492_v14, %v10328_v8 }
 0x13d   : > { %v2055_v0 = vsel %vm1196_vm4, %v2053_v33, %v15603_v32  ;;  %v10353_v41 = vmul.f32 %v16492_v14, %v10337_v39  ;;  %v2471_v21 = vmul.f32 %v16493_v47, %v10328_v8  ;;  %v10359_v23 = vmul.f32 %v16493_v47, %v10337_v39 }
 0x13e   : > { %v1978_v63 = vadd.f32 %v1930_v60, %v1853_v55  ;;  %v2180_v51 = vsel %vm1322_vm5, %v2178_v19, %v15605_v27  ;;  %v2398_v2 = vrot.slane %v2346_v37, 1  ;;  %v2596_v31 = vmul.f32 %v16496_v53, %v10328_v8 }
 0x13f   : > { %v15606_v4 = vrot.slane %v10353_v41, 1  ;;  %v2523_v14 = vrot.slane %v2471_v21, 2  ;;  %v15607_v33 = vrot.slane %v10359_v23, 2  ;;  %v10370_v32 = vmul.f32 %v16496_v53, %v10337_v39 }
 0x140   : > { %v2103_v47 = vadd.f32 %v2055_v0, %v1978_v63  ;;  %v2648_v16 = vrot.slane %v2596_v31, 3  ;;  %v2721_v60 = vmul.f32 %v16497_v30, %v10328_v8  ;;  %v10376_v55 = vmul.f32 %v16497_v30, %v10337_v39  ;;  %v10388_v30 = vld [vmem:[#allocation2 + $0x78] sm:$0xff] }
 0x141   : > { %v2400_v19 = vsel %vm692_vm0, %v2398_v2, %v15606_v4  ;;  %v2525_v37 = vsel %vm818_vm1, %v2523_v14, %v15607_v33  ;;  %v15609_v53 = vrot.slane %v10370_v32, 3  ;;  %v2846_v0 = vmul.f32 %v16498_v49, %v10328_v8  ;;  %16592 = vst [vmem:[#allocation10_spill] sm:$0xff] %v10388_v30 }
 0x142   : > { %v2228_v21 = vadd.f32 %v2180_v51, %v2103_v47  ;;  %v2448_v63 = vadd.f32 %v2400_v19, %v2323_v9  ;;  %v2773_v31 = vrot.slane %v2721_v60, 4  ;;  %v15610_v27 = vrot.slane %v10376_v55, 4 }
 0x143   : > { %v2650_v2 = vsel %vm944_vm2, %v2648_v16, %v15609_v53  ;;  %v10395_v4 = vmul.f32 %v16498_v49, %v10337_v39  ;;  %v2898_v14 = vrot.slane %v2846_v0, 5  ;;  %v2971_v33 = vmul.f32 %v16499_v35, %v10328_v8 }
 0x144   : > { %v2260_v9 = vadd.f32 %v2228_v21, %v1415_v15  ;;  %v2573_v51 = vadd.f32 %v2525_v37, %v2448_v63  ;;  %v2775_v47 = vsel %vm1070_vm3, %v2773_v31, %v15610_v27  ;;  %v10406_v60 = vmul.f32 %v16499_v35, %v10337_v39 }
 0x145   : > { %v15611_v16 = vrot.slane %v10395_v4, 5  ;;  %v3023_v49 = vrot.slane %v2971_v33, 6  ;;  %v3168_v19 = vmul.f32 %v16511_v28, %v10388_v30  ;;  %v3191_v0 = vmul.f32 %v16512_v58, %v10388_v30 }
 0x146   : > { %v2698_v53 = vadd.f32 %v2650_v2, %v2573_v51  ;;  %v15612_v15 = vrot.slane %v10406_v60, 6  ;;  %v10416_v37 = vmul.f32 %v16512_v58, %v10399_v62  ;;  %v3316_v35 = vmul.f32 %v16513_v5, %v10388_v30 }
 0x147   : > { %v2900_v33 = vsel %vm1196_vm4, %v2898_v14, %v15611_v16  ;;  %v3243_v21 = vrot.slane %v3191_v0, 1  ;;  %v10425_v28 = vmul.f32 %v16513_v5, %v10399_v62  ;;  %v3441_v63 = vmul.f32 %v16514_v43, %v10388_v30 }
 0x148   : > { %v2823_v31 = vadd.f32 %v2775_v47, %v2698_v53  ;;  %v3025_v58 = vsel %vm1322_vm5, %v3023_v49, %v15612_v15  ;;  %v15613_v2 = vrot.slane %v10416_v37, 1  ;;  %v3368_v51 = vrot.slane %v3316_v35, 2 }
 0x149   : > { %v15618_v27 = vrot.slane %v10425_v28, 2  ;;  %v10436_v14 = vmul.f32 %v16514_v43, %v10399_v62  ;;  %v3493_v0 = vrot.slane %v3441_v63, 3  ;;  %v3566_v5 = vmul.f32 %v16517_v10, %v10388_v30 }
 0x14a   : > { %v2948_v16 = vadd.f32 %v2900_v33, %v2823_v31  ;;  %v3245_v53 = vsel %vm692_vm0, %v3243_v21, %v15613_v2  ;;  %v10445_v47 = vmul.f32 %v16517_v10, %v10399_v62  ;;  %v3691_v49 = vmul.f32 %v16518_v18, %v10388_v30  ;;  %v10458_v2 = vld [vmem:[#allocation2 + $0x90] sm:$0xff] }
 0x14b   : > { %v3293_v35 = vadd.f32 %v3245_v53, %v3168_v19  ;;  %v3370_v43 = vsel %vm818_vm1, %v3368_v51, %v15618_v27  ;;  %v15617_v63 = vrot.slane %v10436_v14, 3  ;;  %v3618_v15 = vrot.slane %v3566_v5, 4  ;;  %16593 = vst [vmem:[#allocation11_spill] sm:$0xff] %v10458_v2 }
 0x14c   : > { %v3073_v33 = vadd.f32 %v3025_v58, %v2948_v16  ;;  %v15616_v31 = vrot.slane %v10445_v47, 4  ;;  %v10456_v21 = vmul.f32 %v16518_v18, %v10399_v62  ;;  %v3743_v10 = vrot.slane %v3691_v49, 5  ;;  %v10469_v58 = vld [vmem:[#allocation2 + $0x98] sm:$0xff] }
 0x14d   : > { %v3418_v42 = vadd.f32 %v3370_v43, %v3293_v35  ;;  %v3495_v19 = vsel %vm944_vm2, %v3493_v0, %v15617_v63  ;;  %v3816_v51 = vmul.f32 %v16521_v50, %v10388_v30  ;;  %v10467_v16 = vmul.f32 %v16521_v50, %v10399_v62 }
 0x14e   : > { %v3105_v5 = vadd.f32 %v3073_v33, %v2260_v9  ;;  %v3620_v18 = vsel %vm1070_vm3, %v3618_v15, %v15616_v31  ;;  %v15615_v53 = vrot.slane %v10456_v21, 5  ;;  %v4013_v49 = vmul.f32 %v16530_v3, %v10458_v2 }
 0x14f   : > { %v3543_v0 = vadd.f32 %v3495_v19, %v3418_v42  ;;  %v3868_v35 = vrot.slane %v3816_v51, 6  ;;  %v15619_v43 = vrot.slane %v10467_v16, 6  ;;  %v4036_v50 = vmul.f32 %v16531_v17, %v10458_v2 }
 0x150   : > { %v3745_v9 = vsel %vm1196_vm4, %v3743_v10, %v15615_v53  ;;  %v10485_v33 = vmul.f32 %v16531_v17, %v10469_v58  ;;  %v4161_v15 = vmul.f32 %v16534_v13, %v10458_v2  ;;  %v10491_v3 = vmul.f32 %v16534_v13, %v10469_v58 }
 0x151   : > { %v3668_v42 = vadd.f32 %v3620_v18, %v3543_v0  ;;  %v3870_v19 = vsel %vm1322_vm5, %v3868_v35, %v15619_v43  ;;  %v4088_v51 = vrot.slane %v4036_v50, 1  ;;  %v4286_v10 = vmul.f32 %v16535_v24, %v10458_v2  ;;  %v16594_v18 = vld [vmem:[#allocation33_spill] sm:$0xff] }
 0x152   : > { %v15622_v53 = vrot.slane %v10485_v33, 1  ;;  %v4213_v17 = vrot.slane %v4161_v15, 2  ;;  %v15623_v31 = vrot.slane %v10491_v3, 2  ;;  %v10502_v63 = vmul.f32 %v16535_v24, %v10469_v58 }
 0x153   : > { %v3793_v13 = vadd.f32 %v3745_v9, %v3668_v42  ;;  %v4338_v27 = vrot.slane %v4286_v10, 3  ;;  %v4411_v0 = vmul.f32 %v16594_v18, %v10458_v2  ;;  %v10508_v35 = vmul.f32 %v16594_v18, %v10469_v58  ;;  %v16595_v9 = vld [vmem:[#allocation38_spill] sm:$0xff]  ;;  %v10520_v18 = vld [vmem:[#allocation2 + $0xa8] sm:$0xff] }
 0x154   : > { %v4090_v50 = vsel %vm692_vm0, %v4088_v51, %v15622_v53  ;;  %v4215_v15 = vsel %vm818_vm1, %v4213_v17, %v15623_v31  ;;  %v15625_v24 = vrot.slane %v10502_v63, 3  ;;  %v4536_v42 = vmul.f32 %v16595_v9, %v10458_v2  ;;  %16596 = vst [vmem:[#allocation12_spill] sm:$0xff] %v10520_v18 }
 0x155   : > { %v3918_v10 = vadd.f32 %v3870_v19, %v3793_v13  ;;  %v4138_v43 = vadd.f32 %v4090_v50, %v4013_v49  ;;  %v4463_v59 = vrot.slane %v4411_v0, 4  ;;  %v15629_v56 = vrot.slane %v10508_v35, 4 }
 0x156   : > { %v4340_v51 = vsel %vm944_vm2, %v4338_v27, %v15625_v24  ;;  %v10527_v53 = vmul.f32 %v16595_v9, %v10469_v58  ;;  %v4588_v17 = vrot.slane %v4536_v42, 5  ;;  %v4661_v31 = vmul.f32 %v10077_v40, %v10458_v2  ;;  %v16598_v42 = vld [vmem:[#allocation39_spill] sm:$0xff] }
 0x157   : > { %v3950_v49 = vadd.f32 %v3918_v10, %v3105_v5  ;;  %v4263_v19 = vadd.f32 %v4215_v15, %v4138_v43  ;;  %v4465_v13 = vsel %vm1070_vm3, %v4463_v59, %v15629_v56  ;;  %v10538_v0 = vmul.f32 %v10077_v40, %v10469_v58  ;;  %v16601_v59 = vld [vmem:[#allocation43_spill] sm:$0xff] }
 0x158   : > { %v15638_v27 = vrot.slane %v10527_v53, 5  ;;  %v4713_v50 = vrot.slane %v4661_v31, 6  ;;  %v4858_v24 = vmul.f32 %v16598_v42, %v10520_v18  ;;  %v4881_v45 = vmul.f32 %v16599_v52, %v10520_v18 }
 0x159   : > { %16597 = vst [vmem:[#allocation70_spill] sm:$0xff] %v10538_v0  ;;  %v4388_v22 = vadd.f32 %v4340_v51, %v4263_v19  ;;  %v15642_v5 = vrot.slane %v10538_v0, 6  ;;  %v10548_v43 = vmul.f32 %v16599_v52, %v10531_v29  ;;  %v5006_v15 = vmul.f32 %v16601_v59, %v10520_v18  ;;  %v16603_v51 = vld [vmem:[#allocation47_spill] sm:$0xff] }
 0x15a   : > { %v4590_v31 = vsel %vm1196_vm4, %v4588_v17, %v15638_v27  ;;  %v4933_v10 = vrot.slane %v4881_v45, 1  ;;  %v10557_v56 = vmul.f32 %v16601_v59, %v10531_v29  ;;  %v5131_v19 = vmul.f32 %v16603_v51, %v10520_v18  ;;  %v16605_v27 = vld [vmem:[#allocation50_spill] sm:$0xff] }
 0x15b   : > { %16600 = vst [vmem:[#allocation13_spill] sm:$0xff] %v10548_v43  ;;  %v4513_v57 = vadd.f32 %v4465_v13, %v4388_v22  ;;  %v4715_v11 = vsel %vm1322_vm5, %v4713_v50, %v15642_v5  ;;  %v15645_v2 = vrot.slane %v10548_v43, 1  ;;  %v5058_v30 = vrot.slane %v5006_v15, 2  ;;  %v16607_v50 = vld [vmem:[#allocation52_spill] sm:$0xff] }
 0x15c   : > { %16602 = vst [vmem:[#allocation15_spill] sm:$0xff] %v10557_v56  ;;  %v15648_v8 = vrot.slane %v10557_v56, 2  ;;  %v10568_v45 = vmul.f32 %v16603_v51, %v10531_v29  ;;  %v5183_v17 = vrot.slane %v5131_v19, 3  ;;  %v5256_v48 = vmul.f32 %v16605_v27, %v10520_v18  ;;  %v10590_v43 = vld [vmem:[#allocation2 + $0xc0] sm:$0xff] }
 0x15d   : > { %v4638_v59 = vadd.f32 %v4590_v31, %v4513_v57  ;;  %v4935_v22 = vsel %vm692_vm0, %v4933_v10, %v15645_v2  ;;  %v10577_v13 = vmul.f32 %v16605_v27, %v10531_v29  ;;  %v5381_v15 = vmul.f32 %v16607_v50, %v10520_v18  ;;  %16609 = vst [vmem:[#allocation74_spill] sm:$0xff] %v10590_v43 }
 0x15e   : > { %16604 = vst [vmem:[#allocation16_spill] sm:$0xff] %v10568_v45  ;;  %v4983_v5 = vadd.f32 %v4935_v22, %v4858_v24  ;;  %v5060_v19 = vsel %vm818_vm1, %v5058_v30, %v15648_v8  ;;  %v15649_v0 = vrot.slane %v10568_v45, 3  ;;  %v5308_v51 = vrot.slane %v5256_v48, 4  ;;  %v16610_v30 = vld [vmem:[#allocation54_spill] sm:$0xff]  ;;  %v16613_v45 = vld [vmem:[#allocation57_spill] sm:$0xff] }
 0x15f   : > { %16606 = vst [vmem:[#allocation72_spill] sm:$0xff] %v10577_v13  ;;  %v4763_v57 = vadd.f32 %v4715_v11, %v4638_v59  ;;  %v15654_v31 = vrot.slane %v10577_v13, 4  ;;  %v10588_v10 = vmul.f32 %v16607_v50, %v10531_v29  ;;  %v5433_v2 = vrot.slane %v5381_v15, 5  ;;  %v10601_v11 = vld [vmem:[#allocation2 + $0xc8] sm:$0xff] }
 0x160   : > { %v5108_v27 = vadd.f32 %v5060_v19, %v4983_v5  ;;  %v5185_v24 = vsel %vm944_vm2, %v5183_v17, %v15649_v0  ;;  %v5506_v22 = vmul.f32 %v16610_v30, %v10520_v18  ;;  %v10599_v48 = vmul.f32 %v16610_v30, %v10531_v29  ;;  %v16612_v19 = vld [vmem:[#allocation56_spill] sm:$0xff] }
 0x161   : > { %16608 = vst [vmem:[#allocation73_spill] sm:$0xff] %v10588_v10  ;;  %v4795_v59 = vadd.f32 %v4763_v57, %v3950_v49  ;;  %v5310_v15 = vsel %vm1070_vm3, %v5308_v51, %v15654_v31  ;;  %v15656_v5 = vrot.slane %v10588_v10, 5  ;;  %v5703_v8 = vmul.f32 %v16612_v19, %v10590_v43  ;;  %v16615_v51 = vld [vmem:[#allocation60_spill] sm:$0xff]  ;;  %v16617_v10 = vld [vmem:[#allocation62_spill] sm:$0xff] }
 0x162   : > { %16611 = vst [vmem:[#allocation75_spill] sm:$0xff] %v10599_v48  ;;  %v5233_v17 = vadd.f32 %v5185_v24, %v5108_v27  ;;  %v5558_v0 = vrot.slane %v5506_v22, 6  ;;  %v15662_v18 = vrot.slane %v10599_v48, 6  ;;  %v5726_v56 = vmul.f32 %v16613_v45, %v10590_v43 }
 0x163   : > { %v5435_v49 = vsel %vm1196_vm4, %v5433_v2, %v15656_v5  ;;  %v10617_v57 = vmul.f32 %v16613_v45, %v10601_v11  ;;  %v5851_v31 = vmul.f32 %v16615_v51, %v10590_v43  ;;  %v10623_v27 = vmul.f32 %v16615_v51, %v10601_v11 }
 0x164   : > { %v5358_v24 = vadd.f32 %v5310_v15, %v5233_v17  ;;  %v5560_v22 = vsel %vm1322_vm5, %v5558_v0, %v15662_v18  ;;  %v5778_v19 = vrot.slane %v5726_v56, 1  ;;  %v5976_v2 = vmul.f32 %v16617_v10, %v10590_v43  ;;  %v16618_v15 = vld [vmem:[#allocation65_spill] sm:$0xff] }
 0x165   : > { %16614 = vst [vmem:[#allocation76_spill] sm:$0xff] %v10617_v57  ;;  %16616 = vst [vmem:[#allocation90_spill] sm:$0xff] %v10623_v27  ;;  %v15669_v5 = vrot.slane %v10617_v57, 1  ;;  %v5903_v45 = vrot.slane %v5851_v31, 2  ;;  %v15668_v13 = vrot.slane %v10623_v27, 2  ;;  %v10634_v30 = vmul.f32 %v16617_v10, %v10601_v11 }
 0x166   : > { %v5483_v51 = vadd.f32 %v5435_v49, %v5358_v24  ;;  %v6028_v50 = vrot.slane %v5976_v2, 3  ;;  %v6101_v17 = vmul.f32 %v16618_v15, %v10590_v43  ;;  %v10640_v56 = vmul.f32 %v16618_v15, %v10601_v11  ;;  %v16620_v49 = vld [vmem:[#allocation66_spill] sm:$0xff]  ;;  %v602_v15 = vld [vmem:[#allocation2 + $0x40] sm:$0x3f] }
 0x167   : > { %v5780_v0 = vsel %vm692_vm0, %v5778_v19, %v15669_v5  ;;  %v5905_v31 = vsel %vm818_vm1, %v5903_v45, %v15668_v13  ;;  %v15672_v18 = vrot.slane %v10634_v30, 3  ;;  %v6226_v24 = vmul.f32 %v16620_v49, %v10590_v43  ;;  %v16622_v13 = vld [vmem:[#allocation68_spill] sm:$0xff] }
 0x168   : > { %16619 = vst [vmem:[#allocation24_spill] sm:$0xff] %v10640_v56  ;;  %v5608_v2 = vadd.f32 %v5560_v22, %v5483_v51  ;;  %v5828_v10 = vadd.f32 %v5780_v0, %v5703_v8  ;;  %v6153_v48 = vrot.slane %v6101_v17, 4  ;;  %v15671_v52 = vrot.slane %v10640_v56, 4  ;;  %v10672_v17 = vld [vmem:[%s15312_s1] ss:$0 sm:$0xff] }
 0x169   : > { %v6030_v57 = vsel %vm944_vm2, %v6028_v50, %v15672_v18  ;;  %v10657_v19 = vmul.f32 %v16620_v49, %v10601_v11  ;;  %v6278_v45 = vrot.slane %v6226_v24, 5  ;;  %v6351_v5 = vmul.f32 %v16622_v13, %v10590_v43  ;;  %16624 = vst [vmem:[#allocation77_spill] sm:$0xff] %v10672_v17  ;;  %v10719_v56 = vld [vmem:[%s15312_s1 + $0x6] ss:$0 sm:$0xff] }
 0x16a   : > { %v5640_v27 = vadd.f32 %v5608_v2, %v4795_v59  ;;  %v5953_v42 = vadd.f32 %v5905_v31, %v5828_v10  ;;  %v6155_v8 = vsel %vm1070_vm3, %v6153_v48, %v15671_v52  ;;  %v10666_v51 = vmul.f32 %v16622_v13, %v10601_v11  ;;  %v10679_v10 = vld [vmem:[%s15312_s1 + $0x1] ss:$0 sm:$0xff]  ;;  %v10701_v52 = vld [vmem:[%s15312_s1 + $0x4] ss:$0 sm:$0xff]  ;;  %v10707_v31 = vld [vmem:[%s15312_s1 + $0x5] ss:$0 sm:$0xff] }
 0x16b   : > { %16621 = vst [vmem:[#allocation17_spill] sm:$0xff] %v10657_v19  ;;  %v15679_v50 = vrot.slane %v10657_v19, 5  ;;  %v6403_v22 = vrot.slane %v6351_v5, 6  ;;  %v628_v59 = vmul.f32 %v10672_v17, %v10207_v12  ;;  %16625 = vst [vmem:[#allocation19_spill] sm:$0xff] %v10679_v10  ;;  %v652_v48 = vmul.f32 %v10679_v10, %v602_v15  ;;  %v10686_v5 = vld [vmem:[%s15312_s1 + $0x2] ss:$0 sm:$0xff] }
 0x16c   : > { %16623 = vst [vmem:[#allocation18_spill] sm:$0xff] %v10666_v51  ;;  %v6078_v0 = vadd.f32 %v6030_v57, %v5953_v42  ;;  %16626 = vst [vmem:[#allocation20_spill] sm:$0xff] %v10686_v5  ;;  %v778_v24 = vmul.f32 %v10686_v5, %v602_v15  ;;  %v10692_v12 = vld [vmem:[%s15312_s1 + $0x3] ss:$0 sm:$0xff]  ;;  %v1030_v18 = vmul.f32 %v10701_v52, %v602_v15  ;;  %v16630_v5 = vrot.slane %v10666_v51, 6 }
 0x16d   : > { %16627 = vst [vmem:[#allocation21_spill] sm:$0xff] %v10692_v12  ;;  %v904_v2 = vmul.f32 %v10692_v12, %v602_v15  ;;  %v6280_v42 = vsel %vm1196_vm4, %v6278_v45, %v15679_v50  ;;  %v706_v57 = vrot.slane %v652_v48, 1  ;;  %16628 = vst [vmem:[#allocation22_spill] sm:$0xff] %v10701_v52  ;;  %v1156_v43 = vmul.f32 %v10707_v31, %v602_v15 }
 0x16e   : > { %16629 = vst [vmem:[#allocation92_spill] sm:$0xff] %v10707_v31  ;;  %v6203_v12 = vadd.f32 %v6155_v8, %v6078_v0  ;;  %v6405_v45 = vsel %vm1322_vm5, %v6403_v22, %v16630_v5  ;;  %v832_v48 = vrot.slane %v778_v24, 2  ;;  %v16631_v10 = vrot.slane %v10222_v44, 1  ;;  %v1452_v8 = vld [vmem:[#allocation2 + $0x58] sm:$0x3f] }
 0x16f   : > { %v958_v50 = vrot.slane %v904_v2, 3  ;;  %v1084_v19 = vrot.slane %v1030_v18, 4  ;;  %v1210_v52 = vrot.slane %v1156_v43, 5  ;;  %v1282_v31 = vmul.f32 %v10719_v56, %v602_v15 }
 0x170   : > { %v707_v17 = vsel %vm692_vm0, %v16631_v10, %v706_v57  ;;  %v6328_v0 = vadd.f32 %v6280_v42, %v6203_v12  ;;  %v16632_v22 = vrot.slane %v10230_v61, 2  ;;  %v16633_v44 = vrot.slane %v10237_v25, 3  ;;  %v10765_v42 = vld [vmem:[%s15312_s1 + $0xc] ss:$0 sm:$0xff] }
 0x171   : > { %v754_v51 = vadd.f32 %v707_v17, %v628_v59  ;;  %v16634_v18 = vrot.slane %v10245_v34, 4  ;;  %v16635_v24 = vrot.slane %v10255_v1, 5  ;;  %v1336_v15 = vrot.slane %v1282_v31, 6  ;;  %v10737_v17 = vld [vmem:[%s15312_s1 + $0x8] ss:$0 sm:$0xff]  ;;  %16638 = vst [vmem:[#allocation79_spill] sm:$0xff] %v10765_v42 }
 0x172   : > { %v833_v5 = vsel %vm818_vm1, %v16632_v22, %v832_v48  ;;  %v959_v10 = vsel %vm944_vm2, %v16633_v44, %v958_v50  ;;  %v1479_v61 = vmul.f32 %v10737_v17, %v10267_v38  ;;  %v6453_v25 = vadd.f32 %v6405_v45, %v6328_v0  ;;  %v10744_v34 = vld [vmem:[%s15312_s1 + $0x9] ss:$0 sm:$0xff] }
 0x173   : > { %v1085_v43 = vsel %vm1070_vm3, %v16634_v18, %v1084_v19  ;;  %v1211_v2 = vsel %vm1196_vm4, %v16635_v24, %v1210_v52  ;;  %v880_v59 = vadd.f32 %v833_v5, %v754_v51  ;;  %v1503_v1 = vmul.f32 %v10744_v34, %v1452_v8  ;;  %v10750_v52 = vld [vmem:[%s15312_s1 + $0xa] ss:$0 sm:$0xff]  ;;  %v10759_v51 = vld [vmem:[%s15312_s1 + $0xb] ss:$0 sm:$0xff] }
 0x174   : > { %v1628_v19 = vmul.f32 %v10750_v52, %v1452_v8  ;;  %v16636_v50 = vrot.slane %v10263_v46, 6  ;;  %16637 = vst [vmem:[#allocation78_spill] sm:$0xff] %v10759_v51  ;;  %v1753_v12 = vmul.f32 %v10759_v51, %v1452_v8  ;;  %v1878_v57 = vmul.f32 %v10765_v42, %v1452_v8  ;;  %v10771_v46 = vld [vmem:[%s15312_s1 + $0xd] ss:$0 sm:$0xff]  ;;  %v2297_v42 = vld [vmem:[#allocation2 + $0x70] sm:$0x3f] }
 0x175   : > { %v2003_v45 = vmul.f32 %v10771_v46, %v1452_v8  ;;  %v10774_v48 = vadd.f32 %v6453_v25, %v5640_v27  ;;  %v1006_v0 = vadd.f32 %v959_v10, %v880_v59  ;;  %v1556_v22 = vrot.slane %v1503_v1, 1  ;;  %v10792_v1 = vld [vmem:[%s15312_s1 + $0x10] ss:$0 sm:$0xff] }
 0x176   : > { %v1337_v31 = vsel %vm1322_vm5, %v16636_v50, %v1336_v15  ;;  %v1681_v5 = vrot.slane %v1628_v19, 2  ;;  %v1806_v44 = vrot.slane %v1753_v12, 3  ;;  %v1931_v18 = vrot.slane %v1878_v57, 4  ;;  %v10779_v15 = vld [vmem:[%s15312_s1 + $0xe] ss:$0 sm:$0xff] }
 0x177   : > { %16639 = vst [vmem:[#allocation80_spill] sm:$0xff] %v10774_v48  ;;  %v2056_v24 = vrot.slane %v2003_v45, 5  ;;  %v2128_v50 = vmul.f32 %v10779_v15, %v1452_v8  ;;  %6537 = vadd.xlane.f32.xlu0 %v10774_v48  ;;  %v1132_v51 = vadd.f32 %v1085_v43, %v1006_v0  ;;  %v16640_v27 = vrot.slane %v10285_v6, 1 }
 0x178   : > { %v16641_v25 = vrot.slane %v10294_v54, 2  ;;  %v2324_v8 = vmul.f32 %v10792_v1, %v10337_v39  ;;  %v16642_v12 = vrot.slane %v10302_v26, 3  ;;  %v16643_v6 = vrot.slane %v10313_v7, 4  ;;  %v10814_v26 = vld [vmem:[%s15312_s1 + $0x12] ss:$0 sm:$0xff] }
 0x179   : > { %v1557_v10 = vsel %vm692_vm0, %v16640_v27, %v1556_v22  ;;  %v16644_v54 = vrot.slane %v10326_v20, 5  ;;  %v1258_v0 = vadd.f32 %v1211_v2, %v1132_v51  ;;  %v2181_v22 = vrot.slane %v2128_v50, 6  ;;  %16646 = vst [vmem:[#allocation82_spill] sm:$0xff] %v10814_v26  ;;  %v10820_v20 = vld [vmem:[%s15312_s1 + $0x13] ss:$0 sm:$0xff] }
 0x17a   : > { %v1682_v59 = vsel %vm818_vm1, %v16641_v25, %v1681_v5  ;;  %v1604_v19 = vadd.f32 %v1557_v10, %v1479_v61  ;;  %v1807_v43 = vsel %vm944_vm2, %v16642_v12, %v1806_v44  ;;  %v1932_v57 = vsel %vm1070_vm3, %v16643_v6, %v1931_v18  ;;  %v10808_v5 = vld [vmem:[%s15312_s1 + $0x11] ss:$0 sm:$0xff]  ;;  %16647 = vst [vmem:[#allocation23_spill] sm:$0xff] %v10820_v20  ;;  %v10826_v51 = vld [vmem:[%s15312_s1 + $0x14] ss:$0 sm:$0xff] }
 0x17b   : > { %v2057_v45 = vsel %vm1196_vm4, %v16644_v54, %v2056_v24  ;;  %16645 = vst [vmem:[#allocation81_spill] sm:$0xff] %v10808_v5  ;;  %v2348_v61 = vmul.f32 %v10808_v5, %v2297_v42  ;;  %v2473_v7 = vmul.f32 %v10814_v26, %v2297_v42  ;;  %v2598_v2 = vmul.f32 %v10820_v20, %v2297_v42  ;;  %v10832_v24 = vld [vmem:[%s15312_s1 + $0x15] ss:$0 sm:$0xff]  ;;  %v3142_v20 = vld [vmem:[#allocation2 + $0x88] sm:$0x3f] }
 0x17c   : > { %v1729_v44 = vadd.f32 %v1682_v59, %v1604_v19  ;;  %16648 = vst [vmem:[#allocation25_spill] sm:$0xff] %v10826_v51  ;;  %v2723_v18 = vmul.f32 %v10826_v51, %v2297_v42  ;;  %v2848_v50 = vmul.f32 %v10832_v24, %v2297_v42  ;;  %v1384_v27 = vadd.f32 %v1337_v31, %v1258_v0  ;;  %v10841_v51 = vld [vmem:[%s15313_s2] ss:$0 sm:$0xff] }
 0x17d   : > { %v16649_v10 = vrot.slane %v10335_v36, 6  ;;  %v2401_v59 = vrot.slane %v2348_v61, 1  ;;  %v2526_v19 = vrot.slane %v2473_v7, 2  ;;  %v2651_v6 = vrot.slane %v2598_v2, 3  ;;  %16650 = vst [vmem:[#allocation26_spill] sm:$0xff] %v10841_v51 }
 0x17e   : > { %v1854_v12 = vadd.f32 %v1807_v43, %v1729_v44  ;;  %v2776_v54 = vrot.slane %v2723_v18, 4  ;;  %v2901_v48 = vrot.slane %v2848_v50, 5  ;;  %v1416_v26 = vadd.f32 %v10841_v51, %v1384_v27  ;;  %v10853_v43 = vld [vmem:[%s15312_s1 + $0x16] ss:$0 sm:$0xff] }
 0x17f   : > { %v2182_v25 = vsel %vm1322_vm5, %v16649_v10, %v2181_v22  ;;  %v16651_v31 = vrot.slane %v10353_v41, 1  ;;  %v16652_v0 = vrot.slane %v10359_v23, 2  ;;  %v2973_v61 = vmul.f32 %v10853_v43, %v2297_v42 }
 0x180   : > { %v1979_v7 = vadd.f32 %v1932_v57, %v1854_v12  ;;  %v16653_v2 = vrot.slane %v10370_v32, 3  ;;  %v16654_v41 = vrot.slane %v10376_v55, 4  ;;  %v16655_v23 = vrot.slane %v10395_v4, 5  ;;  %v10875_v32 = vld [vmem:[%s15312_s1 + $0x19] ss:$0 sm:$0xff] }
 0x181   : > { %v2402_v36 = vsel %vm692_vm0, %v16651_v31, %v2401_v59  ;;  %v2527_v22 = vsel %vm818_vm1, %v16652_v0, %v2526_v19  ;;  %v3026_v10 = vrot.slane %v2973_v61, 6  ;;  %v10868_v59 = vld [vmem:[%s15312_s1 + $0x18] ss:$0 sm:$0xff]  ;;  %16657 = vst [vmem:[#allocation83_spill] sm:$0xff] %v10875_v32  ;;  %v3193_v55 = vmul.f32 %v10875_v32, %v3142_v20  ;;  %v10887_v19 = vld [vmem:[%s15312_s1 + $0x1b] ss:$0 sm:$0xff] }
 0x182   : > { %v2449_v44 = vadd.f32 %v2402_v36, %v2324_v8  ;;  %v2652_v18 = vsel %vm944_vm2, %v16653_v2, %v2651_v6  ;;  %v2777_v50 = vsel %vm1070_vm3, %v16654_v41, %v2776_v54  ;;  %v2902_v27 = vsel %vm1196_vm4, %v16655_v23, %v2901_v48  ;;  %16656 = vst [vmem:[#allocation27_spill] sm:$0xff] %v10868_v59  ;;  %v10881_v48 = vld [vmem:[%s15312_s1 + $0x1a] ss:$0 sm:$0xff]  ;;  %v10896_v31 = vld [vmem:[%s15312_s1 + $0x1c] ss:$0 sm:$0xff] }
 0x183   : > { %v3169_v42 = vmul.f32 %v10868_v59, %v10399_v62  ;;  %v2104_v8 = vadd.f32 %v2057_v45, %v1979_v7  ;;  %16658 = vst [vmem:[#allocation93_spill] sm:$0xff] %v10881_v48  ;;  %v3318_v57 = vmul.f32 %v10881_v48, %v3142_v20  ;;  %16659 = vst [vmem:[#allocation94_spill] sm:$0xff] %v10887_v19  ;;  %v16660_v6 = vrot.slane %v10406_v60, 6  ;;  %v10902_v0 = vld [vmem:[%s15312_s1 + $0x1d] ss:$0 sm:$0xff] }
 0x184   : > { %v2574_v4 = vadd.f32 %v2527_v22, %v2449_v44  ;;  %v3443_v12 = vmul.f32 %v10887_v19, %v3142_v20  ;;  %v3246_v45 = vrot.slane %v3193_v55, 1  ;;  %16661 = vst [vmem:[#allocation84_spill] sm:$0xff] %v10896_v31  ;;  %v3568_v36 = vmul.f32 %v10896_v31, %v3142_v20  ;;  %16662 = vst [vmem:[#allocation95_spill] sm:$0xff] %v10902_v0  ;;  %v10911_v55 = vld [vmem:[%s15312_s1 + $0x1e] ss:$0 sm:$0xff] }
 0x185   : > { %v3027_v54 = vsel %vm1322_vm5, %v16660_v6, %v3026_v10  ;;  %v3693_v22 = vmul.f32 %v10902_v0, %v3142_v20  ;;  %v2229_v61 = vadd.f32 %v2182_v25, %v2104_v8  ;;  %v3371_v60 = vrot.slane %v3318_v57, 2  ;;  %v3987_v31 = vld [vmem:[#allocation2 + $0xa0] sm:$0x3f] }
 0x186   : > { %v2699_v7 = vadd.f32 %v2652_v18, %v2574_v4  ;;  %v3496_v44 = vrot.slane %v3443_v12, 3  ;;  %v16663_v2 = vrot.slane %v10416_v37, 1  ;;  %v3621_v23 = vrot.slane %v3568_v36, 4 }
 0x187   : > { %v3746_v10 = vrot.slane %v3693_v22, 5  ;;  %v3818_v6 = vmul.f32 %v10911_v55, %v3142_v20  ;;  %v2261_v19 = vadd.f32 %v2229_v61, %v1416_v26  ;;  %v16664_v18 = vrot.slane %v10425_v28, 2  ;;  %v10929_v28 = vld [vmem:[%s15312_s1 + $0x20] ss:$0 sm:$0xff]  ;;  %v10951_v61 = vld [vmem:[%s15312_s1 + $0x23] ss:$0 sm:$0xff] }
 0x188   : > { %v3247_v41 = vsel %vm692_vm0, %v16663_v2, %v3246_v45  ;;  %v2824_v0 = vadd.f32 %v2777_v50, %v2699_v7  ;;  %v16665_v37 = vrot.slane %v10436_v14, 3  ;;  %v16666_v57 = vrot.slane %v10445_v47, 4  ;;  %16668 = vst [vmem:[#allocation85_spill] sm:$0xff] %v10929_v28  ;;  %v10936_v47 = vld [vmem:[%s15312_s1 + $0x21] ss:$0 sm:$0xff]  ;;  %16672 = vst [vmem:[#allocation88_spill] sm:$0xff] %v10951_v61 }
 0x189   : > { %v3294_v25 = vadd.f32 %v3247_v41, %v3169_v42  ;;  %v3372_v8 = vsel %vm818_vm1, %v16664_v18, %v3371_v60  ;;  %v16667_v45 = vrot.slane %v10456_v21, 5  ;;  %v3871_v36 = vrot.slane %v3818_v6, 6  ;;  %16669 = vst [vmem:[#allocation86_spill] sm:$0xff] %v10936_v47 }
 0x18a   : > { %v3497_v4 = vsel %vm944_vm2, %v16665_v37, %v3496_v44  ;;  %v3622_v12 = vsel %vm1070_vm3, %v16666_v57, %v3621_v23  ;;  %v2949_v26 = vadd.f32 %v2902_v27, %v2824_v0  ;;  %v4014_v14 = vmul.f32 %v10929_v28, %v10469_v58  ;;  %v10945_v0 = vld [vmem:[%s15312_s1 + $0x22] ss:$0 sm:$0xff] }
 0x18b   : > { %v3747_v20 = vsel %vm1196_vm4, %v16667_v45, %v3746_v10  ;;  %v3419_v50 = vadd.f32 %v3372_v8, %v3294_v25  ;;  %v4038_v21 = vmul.f32 %v10936_v47, %v3987_v31  ;;  %v16670_v42 = vrot.slane %v10467_v16, 6  ;;  %16671 = vst [vmem:[#allocation87_spill] sm:$0xff] %v10945_v0  ;;  %v10957_v16 = vld [vmem:[%s15312_s1 + $0x24] ss:$0 sm:$0xff] }
 0x18c   : > { %v4163_v22 = vmul.f32 %v10945_v0, %v3987_v31  ;;  %v4288_v7 = vmul.f32 %v10951_v61, %v3987_v31  ;;  %16673 = vst [vmem:[#allocation28_spill] sm:$0xff] %v10957_v16  ;;  %v4413_v60 = vmul.f32 %v10957_v16, %v3987_v31  ;;  %v3074_v44 = vadd.f32 %v3027_v54, %v2949_v26 }
 0x18d   : > { %v3872_v27 = vsel %vm1322_vm5, %v16670_v42, %v3871_v36  ;;  %v3544_v2 = vadd.f32 %v3497_v4, %v3419_v50  ;;  %v4091_v41 = vrot.slane %v4038_v21, 1  ;;  %v4538_v23 = vmul.f32 %v16595_v9, %v3987_v31  ;;  %v4832_v42 = vld [vmem:[#allocation2 + $0xb8] sm:$0x3f] }
 0x18e   : > { %v4216_v10 = vrot.slane %v4163_v22, 2  ;;  %v4341_v6 = vrot.slane %v4288_v7, 3  ;;  %v4466_v25 = vrot.slane %v4413_v60, 4  ;;  %v4663_v18 = vmul.f32 %v10077_v40, %v3987_v31  ;;  %v16680_v22 = vld [vmem:[#allocation42_spill] sm:$0xff]  ;;  %v16681_v60 = vld [vmem:[#allocation43_spill] sm:$0xff] }
 0x18f   : > { %v3106_v8 = vadd.f32 %v3074_v44, %v2261_v19  ;;  %v3669_v37 = vadd.f32 %v3622_v12, %v3544_v2  ;;  %v16674_v57 = vrot.slane %v10485_v33, 1  ;;  %v4591_v36 = vrot.slane %v4538_v23, 5  ;;  %v16682_v44 = vld [vmem:[#allocation47_spill] sm:$0xff] }
 0x190   : > { %v16675_v54 = vrot.slane %v10491_v3, 2  ;;  %v16676_v9 = vrot.slane %v10502_v63, 3  ;;  %v16677_v50 = vrot.slane %v10508_v35, 4  ;;  %v16678_v33 = vrot.slane %v10527_v53, 5  ;;  %v16683_v35 = vld [vmem:[#allocation70_spill] sm:$0xff] }
 0x191   : > { %v4092_v45 = vsel %vm692_vm0, %v16674_v57, %v4091_v41  ;;  %v3794_v19 = vadd.f32 %v3747_v20, %v3669_v37  ;;  %v4716_v12 = vrot.slane %v4663_v18, 6  ;;  %v4883_v7 = vmul.f32 %v16680_v22, %v4832_v42 }
 0x192   : > { %v4139_v61 = vadd.f32 %v4092_v45, %v4014_v14  ;;  %v4217_v4 = vsel %vm818_vm1, %v16675_v54, %v4216_v10  ;;  %v4342_v26 = vsel %vm944_vm2, %v16676_v9, %v4341_v6  ;;  %v4467_v40 = vsel %vm1070_vm3, %v16677_v50, %v4466_v25  ;;  %v16679_v14 = vld [vmem:[#allocation39_spill] sm:$0xff]  ;;  %v16685_v10 = vld [vmem:[#allocation50_spill] sm:$0xff]  ;;  %v16686_v6 = vld [vmem:[#allocation52_spill] sm:$0xff] }
 0x193   : > { %v4592_v31 = vsel %vm1196_vm4, %v16678_v33, %v4591_v36  ;;  %v4859_v21 = vmul.f32 %v16679_v14, %v10531_v29  ;;  %v5008_v63 = vmul.f32 %v16681_v60, %v4832_v42  ;;  %v5133_v2 = vmul.f32 %v16682_v44, %v4832_v42  ;;  %v5677_v50 = vld [vmem:[#allocation2 + $0xd0] sm:$0x3f]  ;;  %v16692_v44 = vld [vmem:[#allocation16_spill] sm:$0xff] }
 0x194   : > { %v4264_v3 = vadd.f32 %v4217_v4, %v4139_v61  ;;  %v3919_v41 = vadd.f32 %v3872_v27, %v3794_v19  ;;  %v16684_v23 = vrot.slane %v16683_v35, 6  ;;  %v5258_v53 = vmul.f32 %v16685_v10, %v4832_v42  ;;  %v16687_v4 = vld [vmem:[#allocation54_spill] sm:$0xff]  ;;  %v16688_v27 = vld [vmem:[#allocation13_spill] sm:$0xff]  ;;  %v16698_v10 = vld [vmem:[#allocation56_spill] sm:$0xff] }
 0x195   : > { %v5383_v25 = vmul.f32 %v16686_v6, %v4832_v42  ;;  %v4936_v37 = vrot.slane %v4883_v7, 1  ;;  %v5061_v57 = vrot.slane %v5008_v63, 2  ;;  %v5186_v45 = vrot.slane %v5133_v2, 3  ;;  %v16699_v6 = vld [vmem:[#allocation57_spill] sm:$0xff] }
 0x196   : > { %v4717_v20 = vsel %vm1322_vm5, %v16684_v23, %v4716_v12  ;;  %v4389_v18 = vadd.f32 %v4342_v26, %v4264_v3  ;;  %v3951_v61 = vadd.f32 %v3919_v41, %v3106_v8  ;;  %v5311_v36 = vrot.slane %v5258_v53, 4  ;;  %v16690_v12 = vld [vmem:[#allocation15_spill] sm:$0xff]  ;;  %v16694_v8 = vld [vmem:[#allocation72_spill] sm:$0xff] }
 0x197   : > { %v5436_v54 = vrot.slane %v5383_v25, 5  ;;  %v5508_v9 = vmul.f32 %v16687_v4, %v4832_v42  ;;  %v16689_v19 = vrot.slane %v16688_v27, 1  ;;  %v16691_v22 = vrot.slane %v16690_v12, 2  ;;  %v16696_v42 = vld [vmem:[#allocation73_spill] sm:$0xff]  ;;  %v16703_v27 = vld [vmem:[#allocation62_spill] sm:$0xff] }
 0x198   : > { %v4514_v33 = vadd.f32 %v4467_v40, %v4389_v18  ;;  %v16693_v26 = vrot.slane %v16692_v44, 3  ;;  %v16695_v63 = vrot.slane %v16694_v8, 4  ;;  %v16697_v41 = vrot.slane %v16696_v42, 5  ;;  %v16700_v18 = vld [vmem:[#allocation60_spill] sm:$0xff]  ;;  %v16707_v42 = vld [vmem:[#allocation90_spill] sm:$0xff] }
 0x199   : > { %v4937_v14 = vsel %vm692_vm0, %v16689_v19, %v4936_v37  ;;  %v5062_v60 = vsel %vm818_vm1, %v16691_v22, %v5061_v57  ;;  %v5561_v35 = vrot.slane %v5508_v9, 6  ;;  %v5704_v53 = vmul.f32 %v16698_v10, %v10601_v11  ;;  %v16704_v19 = vld [vmem:[#allocation65_spill] sm:$0xff] }
 0x19a   : > { %v5187_v3 = vsel %vm944_vm2, %v16693_v26, %v5186_v45  ;;  %v4984_v7 = vadd.f32 %v4937_v14, %v4859_v21  ;;  %v5312_v2 = vsel %vm1070_vm3, %v16695_v63, %v5311_v36  ;;  %v5437_v40 = vsel %vm1196_vm4, %v16697_v41, %v5436_v54  ;;  %v16701_v45 = vld [vmem:[#allocation75_spill] sm:$0xff] }
 0x19b   : > { %v4639_v23 = vadd.f32 %v4592_v31, %v4514_v33  ;;  %v5728_v25 = vmul.f32 %v16699_v6, %v5677_v50  ;;  %v5853_v37 = vmul.f32 %v16700_v18, %v5677_v50  ;;  %v16702_v21 = vrot.slane %v16701_v45, 6  ;;  %v16715_v45 = vld [vmem:[#allocation77_spill] sm:$0xff] }
 0x19c   : > { %v5109_v57 = vadd.f32 %v5062_v60, %v4984_v7  ;;  %v5978_v36 = vmul.f32 %v16703_v27, %v5677_v50  ;;  %v6103_v14 = vmul.f32 %v16704_v19, %v5677_v50  ;;  %v6228_v31 = vmul.f32 %v16620_v49, %v5677_v50  ;;  %v16705_v60 = vld [vmem:[#allocation76_spill] sm:$0xff]  ;;  %v16716_v27 = vld [vmem:[#allocation19_spill] sm:$0xff] }
 0x19d   : > { %v5562_v4 = vsel %vm1322_vm5, %v16702_v21, %v5561_v35  ;;  %v4764_v12 = vadd.f32 %v4717_v20, %v4639_v23  ;;  %v5781_v54 = vrot.slane %v5728_v25, 1  ;;  %v5906_v9 = vrot.slane %v5853_v37, 2  ;;  %v16717_v19 = vld [vmem:[#allocation20_spill] sm:$0xff] }
 0x19e   : > { %v5234_v33 = vadd.f32 %v5187_v3, %v5109_v57  ;;  %v6031_v22 = vrot.slane %v5978_v36, 3  ;;  %v6156_v44 = vrot.slane %v6103_v14, 4  ;;  %v6353_v26 = vmul.f32 %v16622_v13, %v5677_v50  ;;  %v16710_v3 = vld [vmem:[#allocation24_spill] sm:$0xff]  ;;  %v16714_v57 = vld [vmem:[#allocation69_spill] sm:$0xff] }
 0x19f   : > { %v4796_v8 = vadd.f32 %v4764_v12, %v3951_v61  ;;  %v16706_v7 = vrot.slane %v16705_v60, 1  ;;  %v16708_v41 = vrot.slane %v16707_v42, 2  ;;  %v6281_v10 = vrot.slane %v6228_v31, 5  ;;  %v16712_v61 = vld [vmem:[#allocation17_spill] sm:$0xff]  ;;  %v16718_v12 = vld [vmem:[#allocation18_spill] sm:$0xff] }
 0x1a0   : > { %v5359_v20 = vadd.f32 %v5312_v2, %v5234_v33  ;;  %v16709_v6 = vrot.slane %v10634_v30, 3  ;;  %v16711_v25 = vrot.slane %v16710_v3, 4  ;;  %v16713_v50 = vrot.slane %v16712_v61, 5 }
 0x1a1   : > { %v5782_v63 = vsel %vm692_vm0, %v16706_v7, %v5781_v54  ;;  %v5907_v35 = vsel %vm818_vm1, %v16708_v41, %v5906_v9  ;;  %v6406_v37 = vrot.slane %v6353_v26, 6  ;;  %v629_v21 = vmul.f32 %v16715_v45, %v16714_v57 }
 0x1a2   : > { %v5829_v23 = vadd.f32 %v5782_v63, %v5704_v53  ;;  %v6032_v49 = vsel %vm944_vm2, %v16709_v6, %v6031_v22  ;;  %v6157_v13 = vsel %vm1070_vm3, %v16711_v25, %v6156_v44  ;;  %v6282_v18 = vsel %vm1196_vm4, %v16713_v50, %v6281_v10  ;;  %v16720_v22 = vld [vmem:[#allocation21_spill] sm:$0xff] }
 0x1a3   : > { %v653_v2 = vmul.f32 %v16716_v27, %v16714_v57  ;;  %v5484_v53 = vadd.f32 %v5437_v40, %v5359_v20  ;;  %v11035_v30 = vmul.f32 %v16716_v27, %v10267_v38  ;;  %v779_v14 = vmul.f32 %v16717_v19, %v16714_v57 }
 0x1a4   : > { %v5954_v36 = vadd.f32 %v5907_v35, %v5829_v23  ;;  %v16719_v54 = vrot.slane %v16718_v12, 6  ;;  %v11044_v33 = vmul.f32 %v16717_v19, %v10267_v38  ;;  %v905_v40 = vmul.f32 %v16720_v22, %v16714_v57  ;;  %v16721_v35 = vld [vmem:[#allocation22_spill] sm:$0xff] }
 0x1a5   : > { %v708_v31 = vrot.slane %v653_v2, 1  ;;  %v5609_v44 = vadd.f32 %v5562_v4, %v5484_v53  ;;  %v15720_v60 = vrot.slane %v11035_v30, 1  ;;  %v834_v7 = vrot.slane %v779_v14, 2 }
 0x1a6   : > { %v6407_v9 = vsel %vm1322_vm5, %v16719_v54, %v6406_v37  ;;  %v6079_v26 = vadd.f32 %v6032_v49, %v5954_v36  ;;  %v15718_v63 = vrot.slane %v11044_v33, 2  ;;  %v11052_v42 = vmul.f32 %v16720_v22, %v10267_v38 }
 0x1a7   : > { %v960_v41 = vrot.slane %v905_v40, 3  ;;  %v1031_v10 = vmul.f32 %v16721_v35, %v16714_v57  ;;  %v5641_v20 = vadd.f32 %v5609_v44, %v4796_v8  ;;  %v710_v4 = vsel %vm692_vm0, %v708_v31, %v15720_v60 }
 0x1a8   : > { %v6204_v23 = vadd.f32 %v6157_v13, %v6079_v26  ;;  %v11061_v6 = vmul.f32 %v16721_v35, %v10267_v38  ;;  %v755_v49 = vadd.f32 %v710_v4, %v629_v21  ;;  %v836_v3 = vsel %vm818_vm1, %v834_v7, %v15718_v63  ;;  %v16722_v13 = vld [vmem:[#allocation92_spill] sm:$0xff]  ;;  %v16723_v7 = vld [vmem:[#allocation91_spill] sm:$0xff] }
 0x1a9   : > { %v15716_v25 = vrot.slane %v11052_v42, 3  ;;  %v1086_v61 = vrot.slane %v1031_v10, 4  ;;  %v1157_v37 = vmul.f32 %v16722_v13, %v16714_v57  ;;  %v11072_v2 = vmul.f32 %v16722_v13, %v10267_v38  ;;  %v16732_v63 = vld [vmem:[#allocation23_spill] sm:$0xff] }
 0x1aa   : > { %v6329_v50 = vadd.f32 %v6282_v18, %v6204_v23  ;;  %v15712_v8 = vrot.slane %v11061_v6, 4  ;;  %v881_v53 = vadd.f32 %v836_v3, %v755_v49  ;;  %v1283_v36 = vmul.f32 %v10719_v56, %v16714_v57 }
 0x1ab   : > { %v962_v21 = vsel %vm944_vm2, %v960_v41, %v15716_v25  ;;  %v11081_v18 = vmul.f32 %v10719_v56, %v10267_v38  ;;  %v1212_v54 = vrot.slane %v1157_v37, 5  ;;  %v15711_v31 = vrot.slane %v11072_v2, 5 }
 0x1ac   : > { %v6454_v14 = vadd.f32 %v6407_v9, %v6329_v50  ;;  %v1088_v12 = vsel %vm1070_vm3, %v1086_v61, %v15712_v8  ;;  %v1007_v40 = vadd.f32 %v962_v21, %v881_v53  ;;  %v1338_v44 = vrot.slane %v1283_v36, 6  ;;  %v16725_v50 = vld [vmem:[#allocation78_spill] sm:$0xff] }
 0x1ad   : > { %v15710_v26 = vrot.slane %v11081_v18, 6  ;;  %v1480_v41 = vmul.f32 %v10737_v17, %v16723_v7  ;;  %v1214_v38 = vsel %vm1196_vm4, %v1212_v54, %v15711_v31  ;;  %v1504_v9 = vmul.f32 %v10744_v34, %v16723_v7 }
 0x1ae   : > { %v11090_v57 = vadd.f32 %v6454_v14, %v5641_v20  ;;  %v11099_v10 = vmul.f32 %v10744_v34, %v10337_v39  ;;  %v1133_v23 = vadd.f32 %v1088_v12, %v1007_v40  ;;  %v1629_v20 = vmul.f32 %v10750_v52, %v16723_v7  ;;  %v16726_v12 = vld [vmem:[#allocation79_spill] sm:$0xff] }
 0x1af   : > { %v1340_v4 = vsel %vm1322_vm5, %v1338_v44, %v15710_v26  ;;  %v11108_v49 = vmul.f32 %v10750_v52, %v10337_v39  ;;  %v1558_v3 = vrot.slane %v1504_v9, 1  ;;  %v1754_v37 = vmul.f32 %v16725_v50, %v16723_v7 }
 0x1b0   : > { %16724 = vst [vmem:[#allocation29_spill] sm:$0xff] %v11090_v57  ;;  %6539 = vadd.xlane.f32.xlu1 %v11090_v57  ;;  %v15713_v61 = vrot.slane %v11099_v10, 1  ;;  %v11116_v53 = vmul.f32 %v16725_v50, %v10337_v39  ;;  %v1259_v21 = vadd.f32 %v1214_v38, %v1133_v23  ;;  %v1683_v36 = vrot.slane %v1629_v20, 2 }
 0x1b1   : > { %v15715_v14 = vrot.slane %v11108_v49, 2  ;;  %v1879_v54 = vmul.f32 %v16726_v12, %v16723_v7  ;;  %v1808_v44 = vrot.slane %v1754_v37, 3  ;;  %v11127_v26 = vmul.f32 %v16726_v12, %v10337_v39 }
 0x1b2   : > { %v1560_v40 = vsel %vm692_vm0, %v1558_v3, %v15713_v61  ;;  %v15714_v9 = vrot.slane %v11116_v53, 3  ;;  %v1385_v31 = vadd.f32 %v1340_v4, %v1259_v21  ;;  %v2004_v37 = vmul.f32 %v10771_v46, %v16723_v7 }
 0x1b3   : > { %v1605_v8 = vadd.f32 %v1560_v40, %v1480_v41  ;;  %v1685_v38 = vsel %vm818_vm1, %v1683_v36, %v15715_v14  ;;  %v1933_v23 = vrot.slane %v1879_v54, 4  ;;  %v15717_v3 = vrot.slane %v11127_v26, 4 }
 0x1b4   : > { %v1810_v20 = vsel %vm944_vm2, %v1808_v44, %v15714_v9  ;;  %v11140_v61 = vmul.f32 %v10771_v46, %v10337_v39  ;;  %v1417_v41 = vadd.f32 %v10841_v51, %v1385_v31  ;;  %v2129_v21 = vmul.f32 %v10779_v15, %v16723_v7  ;;  %v16728_v9 = vld [vmem:[#allocation10_spill] sm:$0xff] }
 0x1b5   : > { %v1730_v4 = vadd.f32 %v1685_v38, %v1605_v8  ;;  %v11147_v36 = vmul.f32 %v10779_v15, %v10337_v39  ;;  %v1935_v54 = vsel %vm1070_vm3, %v1933_v23, %v15717_v3  ;;  %v2058_v40 = vrot.slane %v2004_v37, 5  ;;  %v16730_v23 = vld [vmem:[#allocation82_spill] sm:$0xff] }
 0x1b6   : > { %v15719_v44 = vrot.slane %v11140_v61, 5  ;;  %v2325_v14 = vmul.f32 %v10792_v1, %v16728_v9  ;;  %v2183_v31 = vrot.slane %v2129_v21, 6  ;;  %v2349_v7 = vmul.f32 %v10808_v5, %v16728_v9 }
 0x1b7   : > { %16727 = vst [vmem:[#allocation89_spill] sm:$0xff] %v11147_v36  ;;  %v1855_v25 = vadd.f32 %v1810_v20, %v1730_v4  ;;  %v15725_v8 = vrot.slane %v11147_v36, 6  ;;  %v11163_v38 = vmul.f32 %v10808_v5, %v10399_v62  ;;  %v2474_v37 = vmul.f32 %v16730_v23, %v16728_v9 }
 0x1b8   : > { %v2060_v39 = vsel %vm1196_vm4, %v2058_v40, %v15719_v44  ;;  %v11169_v20 = vmul.f32 %v16730_v23, %v10399_v62  ;;  %v2403_v3 = vrot.slane %v2349_v7, 1  ;;  %v2599_v40 = vmul.f32 %v16732_v63, %v16728_v9 }
 0x1b9   : > { %16729 = vst [vmem:[#allocation30_spill] sm:$0xff] %v11163_v38  ;;  %v1980_v4 = vadd.f32 %v1935_v54, %v1855_v25  ;;  %v2185_v21 = vsel %vm1322_vm5, %v2183_v31, %v15725_v8  ;;  %v15729_v44 = vrot.slane %v11163_v38, 1  ;;  %v2528_v60 = vrot.slane %v2474_v37, 2  ;;  %v16733_v25 = vld [vmem:[#allocation25_spill] sm:$0xff] }
 0x1ba   : > { %16731 = vst [vmem:[#allocation31_spill] sm:$0xff] %v11169_v20  ;;  %v15730_v57 = vrot.slane %v11169_v20, 2  ;;  %v11180_v51 = vmul.f32 %v16732_v63, %v10399_v62  ;;  %v2653_v5 = vrot.slane %v2599_v40, 3  ;;  %v2724_v54 = vmul.f32 %v16733_v25, %v16728_v9 }
 0x1bb   : > { %v2105_v23 = vadd.f32 %v2060_v39, %v1980_v4  ;;  %v11186_v31 = vmul.f32 %v16733_v25, %v10399_v62  ;;  %v2405_v7 = vsel %vm692_vm0, %v2403_v3, %v15729_v44  ;;  %v2849_v39 = vmul.f32 %v10832_v24, %v16728_v9 }
 0x1bc   : > { %v2530_v37 = vsel %vm818_vm1, %v2528_v60, %v15730_v57  ;;  %v15733_v8 = vrot.slane %v11180_v51, 3  ;;  %v2450_v40 = vadd.f32 %v2405_v7, %v2325_v14  ;;  %v2778_v36 = vrot.slane %v2724_v54, 4  ;;  %v16736_v54 = vld [vmem:[#allocation11_spill] sm:$0xff] }
 0x1bd   : > { %v2230_v4 = vadd.f32 %v2185_v21, %v2105_v23  ;;  %v15732_v63 = vrot.slane %v11186_v31, 4  ;;  %v11203_v3 = vmul.f32 %v10832_v24, %v10399_v62  ;;  %v2903_v44 = vrot.slane %v2849_v39, 5 }
 0x1be   : > { %v2655_v38 = vsel %vm944_vm2, %v2653_v5, %v15733_v8  ;;  %v2974_v60 = vmul.f32 %v10853_v43, %v16728_v9  ;;  %v2575_v20 = vadd.f32 %v2530_v37, %v2450_v40  ;;  %v11212_v23 = vmul.f32 %v10853_v43, %v10399_v62 }
 0x1bf   : > { %16734 = vst [vmem:[#allocation32_spill] sm:$0xff] %v11203_v3  ;;  %v2262_v57 = vadd.f32 %v2230_v4, %v1417_v41  ;;  %v2780_v14 = vsel %vm1070_vm3, %v2778_v36, %v15732_v63  ;;  %v15736_v5 = vrot.slane %v11203_v3, 5  ;;  %v3170_v7 = vmul.f32 %v10868_v59, %v16736_v54 }
 0x1c0   : > { %16735 = vst [vmem:[#allocation34_spill] sm:$0xff] %v11212_v23  ;;  %v3028_v21 = vrot.slane %v2974_v60, 6  ;;  %v3194_v39 = vmul.f32 %v10875_v32, %v16736_v54  ;;  %v2700_v9 = vadd.f32 %v2655_v38, %v2575_v20  ;;  %v15739_v41 = vrot.slane %v11212_v23, 6  ;;  %v16738_v38 = vld [vmem:[#allocation94_spill] sm:$0xff] }
 0x1c1   : > { %v11222_v37 = vmul.f32 %v10875_v32, %v10469_v58  ;;  %v3319_v62 = vmul.f32 %v10881_v48, %v16736_v54  ;;  %v2905_v36 = vsel %vm1196_vm4, %v2903_v44, %v15736_v5  ;;  %v11231_v40 = vmul.f32 %v10881_v48, %v10469_v58  ;;  %v16739_v5 = vld [vmem:[#allocation84_spill] sm:$0xff] }
 0x1c2   : > { %v3248_v4 = vrot.slane %v3194_v39, 1  ;;  %v3444_v20 = vmul.f32 %v16738_v38, %v16736_v54  ;;  %v2825_v60 = vadd.f32 %v2780_v14, %v2700_v9  ;;  %v3030_v63 = vsel %vm1322_vm5, %v3028_v21, %v15739_v41  ;;  %v16740_v9 = vld [vmem:[#allocation95_spill] sm:$0xff] }
 0x1c3   : > { %16737 = vst [vmem:[#allocation48_spill] sm:$0xff] %v11222_v37  ;;  %v15742_v8 = vrot.slane %v11222_v37, 1  ;;  %v3373_v32 = vrot.slane %v3319_v62, 2  ;;  %v15744_v59 = vrot.slane %v11231_v40, 2  ;;  %v11242_v44 = vmul.f32 %v16738_v38, %v10469_v58 }
 0x1c4   : > { %v3498_v39 = vrot.slane %v3444_v20, 3  ;;  %v3569_v48 = vmul.f32 %v16739_v5, %v16736_v54  ;;  %v2950_v3 = vadd.f32 %v2905_v36, %v2825_v60  ;;  %v11251_v21 = vmul.f32 %v16739_v5, %v10469_v58 }
 0x1c5   : > { %v3250_v14 = vsel %vm692_vm0, %v3248_v4, %v15742_v8  ;;  %v3694_v62 = vmul.f32 %v16740_v9, %v16736_v54  ;;  %v3375_v20 = vsel %vm818_vm1, %v3373_v32, %v15744_v59  ;;  %v15747_v23 = vrot.slane %v11242_v44, 3 }
 0x1c6   : > { %v3295_v41 = vadd.f32 %v3250_v14, %v3170_v7  ;;  %v3623_v38 = vrot.slane %v3569_v48, 4  ;;  %v3075_v36 = vadd.f32 %v3030_v63, %v2950_v3  ;;  %v15745_v60 = vrot.slane %v11251_v21, 4 }
 0x1c7   : > { %v11262_v4 = vmul.f32 %v16740_v9, %v10469_v58  ;;  %v3748_v8 = vrot.slane %v3694_v62, 5  ;;  %v3500_v7 = vsel %vm944_vm2, %v3498_v39, %v15747_v23  ;;  %v3819_v14 = vmul.f32 %v10911_v55, %v16736_v54  ;;  %v16742_v62 = vld [vmem:[#allocation12_spill] sm:$0xff] }
 0x1c8   : > { %v3420_v37 = vadd.f32 %v3375_v20, %v3295_v41  ;;  %v11271_v32 = vmul.f32 %v10911_v55, %v10469_v58  ;;  %v3107_v48 = vadd.f32 %v3075_v36, %v2262_v57  ;;  %v3625_v63 = vsel %vm1070_vm3, %v3623_v38, %v15745_v60  ;;  %v16745_v60 = vld [vmem:[#allocation88_spill] sm:$0xff] }
 0x1c9   : > { %16741 = vst [vmem:[#allocation36_spill] sm:$0xff] %v11262_v4  ;;  %v15746_v3 = vrot.slane %v11262_v4, 5  ;;  %v4015_v41 = vmul.f32 %v10929_v28, %v16742_v62  ;;  %v3873_v59 = vrot.slane %v3819_v14, 6  ;;  %v4039_v54 = vmul.f32 %v10936_v47, %v16742_v62 }
 0x1ca   : > { %v3545_v20 = vadd.f32 %v3500_v7, %v3420_v37  ;;  %v15752_v39 = vrot.slane %v11271_v32, 6  ;;  %v11287_v57 = vmul.f32 %v10936_v47, %v10531_v29  ;;  %v4164_v38 = vmul.f32 %v10945_v0, %v16742_v62 }
 0x1cb   : > { %v3750_v58 = vsel %vm1196_vm4, %v3748_v8, %v15746_v3  ;;  %v11293_v37 = vmul.f32 %v10945_v0, %v10531_v29  ;;  %v4093_v14 = vrot.slane %v4039_v54, 1  ;;  %v4289_v8 = vmul.f32 %v16745_v60, %v16742_v62 }
 0x1cc   : > { %16743 = vst [vmem:[#allocation37_spill] sm:$0xff] %v11287_v57  ;;  %v3670_v36 = vadd.f32 %v3625_v63, %v3545_v20  ;;  %v3875_v7 = vsel %vm1322_vm5, %v3873_v59, %v15752_v39  ;;  %v15756_v3 = vrot.slane %v11287_v57, 1  ;;  %v4218_v23 = vrot.slane %v4164_v38, 2 }
 0x1cd   : > { %16744 = vst [vmem:[#allocation40_spill] sm:$0xff] %v11293_v37  ;;  %v15755_v47 = vrot.slane %v11293_v37, 2  ;;  %v11304_v28 = vmul.f32 %v16745_v60, %v10531_v29  ;;  %v4343_v4 = vrot.slane %v4289_v8, 3  ;;  %v4414_v63 = vmul.f32 %v10957_v16, %v16742_v62 }
 0x1ce   : > { %v3795_v0 = vadd.f32 %v3750_v58, %v3670_v36  ;;  %v11310_v59 = vmul.f32 %v10957_v16, %v10531_v29  ;;  %v4095_v20 = vsel %vm692_vm0, %v4093_v14, %v15756_v3  ;;  %v11322_v58 = vld [vmem:[%s15312_s1 + $0x25] ss:$0 sm:$0xff]  ;;  %v11337_v3 = vld [vmem:[%s15312_s1 + $0x26] ss:$0 sm:$0xff] }
 0x1cf   : > { %16746 = vst [vmem:[#allocation41_spill] sm:$0xff] %v11304_v28  ;;  %v4220_v54 = vsel %vm818_vm1, %v4218_v23, %v15755_v47  ;;  %v15757_v38 = vrot.slane %v11304_v28, 3  ;;  %16748 = vst [vmem:[#allocation45_spill] sm:$0xff] %v11322_v58  ;;  %v4539_v36 = vmul.f32 %v11322_v58, %v16742_v62  ;;  %v4140_v39 = vadd.f32 %v4095_v20, %v4015_v41  ;;  %v16753_v28 = vld [vmem:[#allocation74_spill] sm:$0xff] }
 0x1d0   : > { %16747 = vst [vmem:[#allocation44_spill] sm:$0xff] %v11310_v59  ;;  %v3920_v8 = vadd.f32 %v3875_v7, %v3795_v0  ;;  %v4468_v16 = vrot.slane %v4414_v63, 4  ;;  %v15759_v57 = vrot.slane %v11310_v59, 4  ;;  %v11332_v23 = vmul.f32 %v11322_v58, %v10531_v29  ;;  %16750 = vst [vmem:[#allocation49_spill] sm:$0xff] %v11337_v3  ;;  %v11428_v58 = vld [vmem:[#allocation2 + $0xd8] sm:$0xff] }
 0x1d1   : > { %v4345_v14 = vsel %vm944_vm2, %v4343_v4, %v15757_v38  ;;  %v4593_v47 = vrot.slane %v4539_v36, 5  ;;  %v4664_v0 = vmul.f32 %v11337_v3, %v16742_v62  ;;  %v4265_v7 = vadd.f32 %v4220_v54, %v4140_v39  ;;  %v11352_v38 = vld [vmem:[%s15312_s1 + $0x28] ss:$0 sm:$0xff]  ;;  %v11359_v62 = vld [vmem:[%s15312_s1 + $0x29] ss:$0 sm:$0xff]  ;;  %16765 = vst [vmem:[#allocation68_spill] sm:$0xff] %v11428_v58 }
 0x1d2   : > { %16749 = vst [vmem:[#allocation46_spill] sm:$0xff] %v11332_v23  ;;  %v3952_v41 = vadd.f32 %v3920_v8, %v3107_v48  ;;  %v4470_v63 = vsel %vm1070_vm3, %v4468_v16, %v15759_v57  ;;  %v11346_v4 = vmul.f32 %v11337_v3, %v10531_v29  ;;  %v15766_v20 = vrot.slane %v11332_v23, 5  ;;  %16752 = vst [vmem:[#allocation53_spill] sm:$0xff] %v11352_v38  ;;  %v11371_v8 = vld [vmem:[%s15312_s1 + $0x2a] ss:$0 sm:$0xff] }
 0x1d3   : > { %v4718_v36 = vrot.slane %v4664_v0, 6  ;;  %v4860_v48 = vmul.f32 %v11352_v38, %v16753_v28  ;;  %16754 = vst [vmem:[#allocation55_spill] sm:$0xff] %v11359_v62  ;;  %v4884_v29 = vmul.f32 %v11359_v62, %v16753_v28  ;;  %v4390_v16 = vadd.f32 %v4345_v14, %v4265_v7  ;;  %16756 = vst [vmem:[#allocation59_spill] sm:$0xff] %v11371_v8  ;;  %v11385_v7 = vld [vmem:[%s15312_s1 + $0x2b] ss:$0 sm:$0xff] }
 0x1d4   : > { %16751 = vst [vmem:[#allocation51_spill] sm:$0xff] %v11346_v4  ;;  %v11366_v54 = vmul.f32 %v11359_v62, %v10601_v11  ;;  %v5009_v0 = vmul.f32 %v11371_v8, %v16753_v28  ;;  %v4595_v57 = vsel %vm1196_vm4, %v4593_v47, %v15766_v20  ;;  %v11380_v14 = vmul.f32 %v11371_v8, %v10601_v11  ;;  %v11401_v3 = vld [vmem:[%s15312_s1 + $0x2c] ss:$0 sm:$0xff] }
 0x1d5   : > { %v4938_v38 = vrot.slane %v4884_v29, 1  ;;  %16758 = vst [vmem:[#allocation63_spill] sm:$0xff] %v11385_v7  ;;  %v5134_v39 = vmul.f32 %v11385_v7, %v16753_v28  ;;  %v4515_v62 = vadd.f32 %v4470_v63, %v4390_v16  ;;  %v16759_v59 = vrot.slane %v11346_v4, 6  ;;  %16761 = vst [vmem:[#allocation33_spill] sm:$0xff] %v11401_v3 }
 0x1d6   : > { %16755 = vst [vmem:[#allocation58_spill] sm:$0xff] %v11366_v54  ;;  %16757 = vst [vmem:[#allocation61_spill] sm:$0xff] %v11380_v14  ;;  %v15773_v47 = vrot.slane %v11366_v54, 1  ;;  %v5063_v29 = vrot.slane %v5009_v0, 2  ;;  %v11396_v8 = vmul.f32 %v11385_v7, %v10601_v11  ;;  %v5259_v63 = vmul.f32 %v11401_v3, %v16753_v28 }
 0x1d7   : > { %v4720_v23 = vsel %vm1322_vm5, %v4718_v36, %v16759_v59  ;;  %v5188_v37 = vrot.slane %v5134_v39, 3  ;;  %v4640_v16 = vadd.f32 %v4595_v57, %v4515_v62  ;;  %v11410_v36 = vmul.f32 %v11401_v3, %v10601_v11  ;;  %v11415_v39 = vld [vmem:[%s15312_s1 + $0x2d] ss:$0 sm:$0xff] }
 0x1d8   : > { %16760 = vst [vmem:[#allocation64_spill] sm:$0xff] %v11396_v8  ;;  %v4940_v59 = vsel %vm692_vm0, %v4938_v38, %v15773_v47  ;;  %v5384_v0 = vmul.f32 %v11415_v39, %v16753_v28  ;;  %v16763_v4 = vrot.slane %v11380_v14, 2  ;;  %v15783_v62 = vrot.slane %v11396_v8, 3 }
 0x1d9   : > { %16762 = vst [vmem:[#allocation38_spill] sm:$0xff] %v11410_v36  ;;  %v4985_v20 = vadd.f32 %v4940_v59, %v4860_v48  ;;  %v5313_v38 = vrot.slane %v5259_v63, 4  ;;  %v4765_v47 = vadd.f32 %v4720_v23, %v4640_v16  ;;  %v15782_v54 = vrot.slane %v11410_v36, 4  ;;  %v11444_v63 = vld [vmem:[#allocation2 + $0xe0] sm:$0xff]  ;;  %v11453_v59 = vld [vmem:[%s15312_s1 + $0x30] ss:$0 sm:$0xff] }
 0x1da   : > { %v5065_v57 = vsel %vm818_vm1, %v5063_v29, %v16763_v4  ;;  %v11426_v3 = vmul.f32 %v11415_v39, %v10601_v11  ;;  %v5438_v7 = vrot.slane %v5384_v0, 5  ;;  %v5190_v48 = vsel %vm944_vm2, %v5188_v37, %v15783_v62  ;;  %v11436_v4 = vld [vmem:[%s15312_s1 + $0x2e] ss:$0 sm:$0xff]  ;;  %16768 = vst [vmem:[#allocation43_spill] sm:$0xff] %v11453_v59 }
 0x1db   : > { %v5110_v60 = vadd.f32 %v5065_v57, %v4985_v20  ;;  %16766 = vst [vmem:[#allocation39_spill] sm:$0xff] %v11436_v4  ;;  %v5509_v23 = vmul.f32 %v11436_v4, %v16753_v28  ;;  %v11442_v29 = vmul.f32 %v11436_v4, %v10601_v11  ;;  %v4797_v16 = vadd.f32 %v4765_v47, %v3952_v41  ;;  %v11461_v41 = vld [vmem:[%s15312_s1 + $0x31] ss:$0 sm:$0xff] }
 0x1dc   : > { %16764 = vst [vmem:[#allocation66_spill] sm:$0xff] %v11426_v3  ;;  %v5315_v20 = vsel %vm1070_vm3, %v5313_v38, %v15782_v54  ;;  %v15784_v37 = vrot.slane %v11426_v3, 5  ;;  %v5705_v28 = vmul.f32 %v11453_v59, %v11428_v58  ;;  %16769 = vst [vmem:[#allocation47_spill] sm:$0xff] %v11461_v41  ;;  %v5729_v47 = vmul.f32 %v11461_v41, %v11428_v58 }
 0x1dd   : > { %16767 = vst [vmem:[#allocation42_spill] sm:$0xff] %v11442_v29  ;;  %v5235_v0 = vadd.f32 %v5190_v48, %v5110_v60  ;;  %v5563_v11 = vrot.slane %v5509_v23, 6  ;;  %v15793_v57 = vrot.slane %v11442_v29, 6  ;;  %v11470_v54 = vmul.f32 %v11461_v41, %v11444_v63  ;;  %v11475_v60 = vld [vmem:[%s15312_s1 + $0x32] ss:$0 sm:$0xff] }
 0x1de   : > { %v5440_v38 = vsel %vm1196_vm4, %v5438_v7, %v15784_v37  ;;  %16771 = vst [vmem:[#allocation50_spill] sm:$0xff] %v11475_v60  ;;  %v5854_v48 = vmul.f32 %v11475_v60, %v11428_v58  ;;  %v11481_v23 = vmul.f32 %v11475_v60, %v11444_v63  ;;  %v5783_v37 = vrot.slane %v5729_v47, 1  ;;  %v11489_v41 = vld [vmem:[%s15312_s1 + $0x33] ss:$0 sm:$0xff]  ;;  %v11502_v47 = vld [vmem:[%s15312_s1 + $0x34] ss:$0 sm:$0xff] }
 0x1df   : > { %16770 = vst [vmem:[#allocation70_spill] sm:$0xff] %v11470_v54  ;;  %v5360_v62 = vadd.f32 %v5315_v20, %v5235_v0  ;;  %v5565_v7 = vsel %vm1322_vm5, %v5563_v11, %v15793_v57  ;;  %16773 = vst [vmem:[#allocation54_spill] sm:$0xff] %v11489_v41  ;;  %v5979_v59 = vmul.f32 %v11489_v41, %v11428_v58 }
 0x1e0   : > { %16772 = vst [vmem:[#allocation52_spill] sm:$0xff] %v11481_v23  ;;  %v5908_v36 = vrot.slane %v5854_v48, 2  ;;  %v11497_v20 = vmul.f32 %v11489_v41, %v11444_v63  ;;  %16775 = vst [vmem:[#allocation15_spill] sm:$0xff] %v11502_v47  ;;  %v6104_v57 = vmul.f32 %v11502_v47, %v11428_v58  ;;  %v11508_v3 = vmul.f32 %v11502_v47, %v11444_v63 }
 0x1e1   : > { %v5485_v0 = vadd.f32 %v5440_v38, %v5360_v62  ;;  %v6033_v11 = vrot.slane %v5979_v59, 3  ;;  %v16776_v48 = vrot.slane %v11470_v54, 1  ;;  %v16777_v41 = vrot.slane %v11481_v23, 2  ;;  %v11520_v38 = vld [vmem:[%s15312_s1 + $0x35] ss:$0 sm:$0xff] }
 0x1e2   : > { %16774 = vst [vmem:[#allocation13_spill] sm:$0xff] %v11497_v20  ;;  %v15803_v59 = vrot.slane %v11497_v20, 3  ;;  %16778 = vst [vmem:[#allocation16_spill] sm:$0xff] %v11520_v38  ;;  %v6229_v29 = vmul.f32 %v11520_v38, %v11428_v58  ;;  %v6158_v14 = vrot.slane %v6104_v57, 4  ;;  %v15809_v54 = vrot.slane %v11508_v3, 4 }
 0x1e3   : > { %v5785_v60 = vsel %vm692_vm0, %v5783_v37, %v16776_v48  ;;  %v5910_v62 = vsel %vm818_vm1, %v5908_v36, %v16777_v41  ;;  %v5610_v47 = vadd.f32 %v5565_v7, %v5485_v0  ;;  %v605_v37 = vld [vmem:[#allocation2 + $0x58] sm:$0x3f]  ;;  %v11530_v41 = vmul.f32 %v11520_v38, %v11444_v63  ;;  %v11535_v23 = vld [vmem:[%s15312_s1 + $0x36] ss:$0 sm:$0xff] }
 0x1e4   : > { %v5830_v8 = vadd.f32 %v5785_v60, %v5705_v28  ;;  %v6035_v36 = vsel %vm944_vm2, %v6033_v11, %v15803_v59  ;;  %v6283_v48 = vrot.slane %v6229_v29, 5  ;;  %v6354_v28 = vmul.f32 %v11535_v23, %v11428_v58  ;;  %v8116_v59 = vld [vmem:[#allocation2 + $0x50] sm:$0xff] }
 0x1e5   : > { %v5642_v57 = vadd.f32 %v5610_v47, %v4797_v16  ;;  %v6160_v7 = vsel %vm1070_vm3, %v6158_v14, %v15809_v54  ;;  %v11544_v0 = vmul.f32 %v11535_v23, %v11444_v63  ;;  %v15812_v29 = vrot.slane %v11530_v41, 5 }
 0x1e6   : > { %v5955_v60 = vadd.f32 %v5910_v62, %v5830_v8  ;;  %v6408_v11 = vrot.slane %v6354_v28, 6  ;;  %v630_v20 = vmul.f32 %v8116_v59, %v16715_v45  ;;  %v655_v38 = vmul.f32 %v16716_v27, %v605_v37 }
 0x1e7   : > { %v6409_v16 = vrot.slane %v11544_v0, 6  ;;  %v781_v8 = vmul.f32 %v16717_v19, %v605_v37  ;;  %v907_v47 = vmul.f32 %v16720_v22, %v605_v37  ;;  %v6285_v14 = vsel %vm1196_vm4, %v6283_v48, %v15812_v29 }
 0x1e8   : > { %v6080_v4 = vadd.f32 %v6035_v36, %v5955_v60  ;;  %v711_v62 = vrot.slane %v655_v38, 1  ;;  %v1033_v54 = vmul.f32 %v16721_v35, %v605_v37  ;;  %v1159_v28 = vmul.f32 %v16722_v13, %v605_v37  ;;  %v1455_v38 = vld [vmem:[#allocation2 + $0x70] sm:$0x3f] }
 0x1e9   : > { %v6410_v45 = vsel %vm1322_vm5, %v6408_v11, %v6409_v16  ;;  %v837_v27 = vrot.slane %v781_v8, 2  ;;  %v963_v59 = vrot.slane %v907_v47, 3  ;;  %v16779_v19 = vrot.slane %v11035_v30, 1 }
 0x1ea   : > { %v6205_v58 = vadd.f32 %v6160_v7, %v6080_v4  ;;  %v1089_v36 = vrot.slane %v1033_v54, 4  ;;  %v1215_v60 = vrot.slane %v1159_v28, 5  ;;  %v1285_v48 = vmul.f32 %v10719_v56, %v605_v37  ;;  %v8117_v37 = vld [vmem:[#allocation2 + $0x68] sm:$0xff] }
 0x1eb   : > { %v712_v22 = vsel %vm692_vm0, %v16779_v19, %v711_v62  ;;  %v16780_v13 = vrot.slane %v11044_v33, 2  ;;  %v16781_v7 = vrot.slane %v11052_v42, 3  ;;  %v16782_v8 = vrot.slane %v11061_v6, 4 }
 0x1ec   : > { %v6330_v29 = vadd.f32 %v6285_v14, %v6205_v58  ;;  %v756_v35 = vadd.f32 %v712_v22, %v630_v20  ;;  %v16783_v54 = vrot.slane %v11072_v2, 5  ;;  %v1341_v56 = vrot.slane %v1285_v48, 6 }
 0x1ed   : > { %v838_v4 = vsel %vm818_vm1, %v16780_v13, %v837_v27  ;;  %v964_v11 = vsel %vm944_vm2, %v16781_v7, %v963_v59  ;;  %v1090_v30 = vsel %vm1070_vm3, %v16782_v8, %v1089_v36  ;;  %v1481_v58 = vmul.f32 %v8117_v37, %v10737_v17  ;;  %v2300_v36 = vld [vmem:[#allocation2 + $0x88] sm:$0x3f]  ;;  %v16793_v37 = vld [vmem:[#allocation23_spill] sm:$0xff] }
 0x1ee   : > { %v1216_v47 = vsel %vm1196_vm4, %v16783_v54, %v1215_v60  ;;  %v6455_v20 = vadd.f32 %v6410_v45, %v6330_v29  ;;  %v882_v33 = vadd.f32 %v838_v4, %v756_v35  ;;  %v1506_v14 = vmul.f32 %v10744_v34, %v1455_v38  ;;  %v8118_v60 = vld [vmem:[#allocation2 + $0x80] sm:$0xff]  ;;  %v16791_v8 = vld [vmem:[#allocation81_spill] sm:$0xff]  ;;  %v16792_v54 = vld [vmem:[#allocation82_spill] sm:$0xff] }
 0x1ef   : > { %v1631_v42 = vmul.f32 %v10750_v52, %v1455_v38  ;;  %v16784_v62 = vrot.slane %v11081_v18, 6  ;;  %v1756_v28 = vmul.f32 %v16725_v50, %v1455_v38  ;;  %v1881_v2 = vmul.f32 %v16726_v12, %v1455_v38 }
 0x1f0   : > { %v2006_v27 = vmul.f32 %v10771_v46, %v1455_v38  ;;  %v11585_v59 = vadd.f32 %v6455_v20, %v5642_v57  ;;  %v1008_v19 = vadd.f32 %v964_v11, %v882_v33  ;;  %v1561_v17 = vrot.slane %v1506_v14, 1  ;;  %v16794_v33 = vld [vmem:[#allocation89_spill] sm:$0xff] }
 0x1f1   : > { %v1342_v6 = vsel %vm1322_vm5, %v16784_v62, %v1341_v56  ;;  %v1686_v29 = vrot.slane %v1631_v42, 2  ;;  %v1811_v45 = vrot.slane %v1756_v28, 3  ;;  %v1936_v22 = vrot.slane %v1881_v2, 4 }
 0x1f2   : > { %16785 = vst [vmem:[#allocation72_spill] sm:$0xff] %v11585_v59  ;;  %v2061_v34 = vrot.slane %v2006_v27, 5  ;;  %v2131_v52 = vmul.f32 %v10779_v15, %v1455_v38  ;;  %6541 = vadd.xlane.f32.xlu0 %v11585_v59  ;;  %v1134_v18 = vadd.f32 %v1090_v30, %v1008_v19  ;;  %v16786_v50 = vrot.slane %v11099_v10, 1  ;;  %v3145_v19 = vld [vmem:[#allocation2 + $0xa0] sm:$0x3f] }
 0x1f3   : > { %v16787_v46 = vrot.slane %v11108_v49, 2  ;;  %v2326_v48 = vmul.f32 %v8118_v60, %v10792_v1  ;;  %v16788_v13 = vrot.slane %v11116_v53, 3  ;;  %v16789_v38 = vrot.slane %v11127_v26, 4 }
 0x1f4   : > { %v1562_v12 = vsel %vm692_vm0, %v16786_v50, %v1561_v17  ;;  %v16790_v10 = vrot.slane %v11140_v61, 5  ;;  %v1260_v11 = vadd.f32 %v1216_v47, %v1134_v18  ;;  %v2186_v49 = vrot.slane %v2131_v52, 6  ;;  %v16796_v17 = vld [vmem:[#allocation26_spill] sm:$0xff] }
 0x1f5   : > { %v1687_v57 = vsel %vm818_vm1, %v16787_v46, %v1686_v29  ;;  %v1606_v35 = vadd.f32 %v1562_v12, %v1481_v58  ;;  %v1812_v15 = vsel %vm944_vm2, %v16788_v13, %v1811_v45  ;;  %v1937_v4 = vsel %vm1070_vm3, %v16789_v38, %v1936_v22  ;;  %v16797_v45 = vld [vmem:[#allocation30_spill] sm:$0xff] }
 0x1f6   : > { %v2062_v7 = vsel %vm1196_vm4, %v16790_v10, %v2061_v34  ;;  %v2351_v30 = vmul.f32 %v16791_v8, %v2300_v36  ;;  %v2476_v56 = vmul.f32 %v16792_v54, %v2300_v36  ;;  %v2601_v58 = vmul.f32 %v16793_v37, %v2300_v36  ;;  %v16799_v34 = vld [vmem:[#allocation31_spill] sm:$0xff] }
 0x1f7   : > { %v1731_v1 = vadd.f32 %v1687_v57, %v1606_v35  ;;  %v2726_v53 = vmul.f32 %v16733_v25, %v2300_v36  ;;  %v2851_v20 = vmul.f32 %v10832_v24, %v2300_v36  ;;  %v1386_v26 = vadd.f32 %v1342_v6, %v1260_v11  ;;  %v16803_v35 = vld [vmem:[#allocation32_spill] sm:$0xff]  ;;  %v8119_v10 = vld [vmem:[#allocation2 + $0x98] sm:$0xff] }
 0x1f8   : > { %v16795_v14 = vrot.slane %v16794_v33, 6  ;;  %v2406_v42 = vrot.slane %v2351_v30, 1  ;;  %v2531_v62 = vrot.slane %v2476_v56, 2  ;;  %v2656_v28 = vrot.slane %v2601_v58, 3  ;;  %v16805_v11 = vld [vmem:[#allocation27_spill] sm:$0xff]  ;;  %v16808_v30 = vld [vmem:[#allocation94_spill] sm:$0xff] }
 0x1f9   : > { %v1856_v47 = vadd.f32 %v1812_v15, %v1731_v1  ;;  %v2781_v2 = vrot.slane %v2726_v53, 4  ;;  %v2906_v27 = vrot.slane %v2851_v20, 5  ;;  %v1418_v29 = vadd.f32 %v16796_v17, %v1386_v26  ;;  %v16806_v8 = vld [vmem:[#allocation83_spill] sm:$0xff]  ;;  %v16809_v56 = vld [vmem:[#allocation34_spill] sm:$0xff] }
 0x1fa   : > { %v2187_v61 = vsel %vm1322_vm5, %v16795_v14, %v2186_v49  ;;  %v16798_v22 = vrot.slane %v16797_v45, 1  ;;  %v16800_v24 = vrot.slane %v16799_v34, 2  ;;  %v2976_v52 = vmul.f32 %v10853_v43, %v2300_v36 }
 0x1fb   : > { %v1981_v18 = vadd.f32 %v1937_v4, %v1856_v47  ;;  %v16801_v12 = vrot.slane %v11180_v51, 3  ;;  %v16802_v57 = vrot.slane %v11186_v31, 4  ;;  %v16804_v13 = vrot.slane %v16803_v35, 5  ;;  %v16807_v4 = vld [vmem:[#allocation93_spill] sm:$0xff]  ;;  %v16821_v35 = vld [vmem:[#allocation87_spill] sm:$0xff] }
 0x1fc   : > { %v2407_v25 = vsel %vm692_vm0, %v16798_v22, %v2406_v42  ;;  %v2532_v6 = vsel %vm818_vm1, %v16800_v24, %v2531_v62  ;;  %v3031_v38 = vrot.slane %v2976_v52, 6  ;;  %v3171_v49 = vmul.f32 %v8119_v10, %v16805_v11  ;;  %v16811_v42 = vld [vmem:[#allocation48_spill] sm:$0xff] }
 0x1fd   : > { %v2451_v50 = vadd.f32 %v2407_v25, %v2326_v48  ;;  %v2657_v46 = vsel %vm944_vm2, %v16801_v12, %v2656_v28  ;;  %v2782_v60 = vsel %vm1070_vm3, %v16802_v57, %v2781_v2  ;;  %v2907_v15 = vsel %vm1196_vm4, %v16804_v13, %v2906_v27  ;;  %v3990_v27 = vld [vmem:[#allocation2 + $0xb8] sm:$0x3f]  ;;  %v16818_v12 = vld [vmem:[#allocation85_spill] sm:$0xff]  ;;  %v16822_v13 = vld [vmem:[#allocation88_spill] sm:$0xff] }
 0x1fe   : > { %v3196_v43 = vmul.f32 %v16806_v8, %v3145_v19  ;;  %v2106_v36 = vadd.f32 %v2062_v7, %v1981_v18  ;;  %v3321_v51 = vmul.f32 %v16807_v4, %v3145_v19  ;;  %v3446_v54 = vmul.f32 %v16808_v30, %v3145_v19  ;;  %v16823_v10 = vld [vmem:[#allocation28_spill] sm:$0xff]  ;;  %v16825_v30 = vld [vmem:[#allocation49_spill] sm:$0xff] }
 0x1ff   : > { %v2576_v48 = vadd.f32 %v2532_v6, %v2451_v50  ;;  %v16810_v31 = vrot.slane %v16809_v56, 6  ;;  %v3571_v58 = vmul.f32 %v16739_v5, %v3145_v19  ;;  %v3696_v53 = vmul.f32 %v16740_v9, %v3145_v19  ;;  %v16816_v6 = vld [vmem:[#allocation36_spill] sm:$0xff]  ;;  %v8120_v50 = vld [vmem:[#allocation2 + $0xb0] sm:$0xff] }
 0x200   : > { %v3251_v37 = vrot.slane %v3196_v43, 1  ;;  %v2231_v20 = vadd.f32 %v2187_v61, %v2106_v36  ;;  %v3376_v33 = vrot.slane %v3321_v51, 2  ;;  %v3501_v14 = vrot.slane %v3446_v54, 3 }
 0x201   : > { %v3032_v1 = vsel %vm1322_vm5, %v16810_v31, %v3031_v38  ;;  %v2701_v26 = vadd.f32 %v2657_v46, %v2576_v48  ;;  %v16812_v7 = vrot.slane %v16811_v42, 1  ;;  %v3626_v47 = vrot.slane %v3571_v58, 4  ;;  %v16819_v46 = vld [vmem:[#allocation86_spill] sm:$0xff]  ;;  %v16826_v31 = vld [vmem:[#allocation37_spill] sm:$0xff] }
 0x202   : > { %v3751_v28 = vrot.slane %v3696_v53, 5  ;;  %v3821_v2 = vmul.f32 %v10911_v55, %v3145_v19  ;;  %v2263_v17 = vadd.f32 %v2231_v20, %v1418_v29  ;;  %v16813_v5 = vrot.slane %v11231_v40, 2  ;;  %v4835_v20 = vld [vmem:[#allocation2 + $0xd0] sm:$0x3f]  ;;  %v16830_v42 = vld [vmem:[#allocation41_spill] sm:$0xff] }
 0x203   : > { %v3252_v62 = vsel %vm692_vm0, %v16812_v7, %v3251_v37  ;;  %v2826_v45 = vadd.f32 %v2782_v60, %v2701_v26  ;;  %v16814_v61 = vrot.slane %v11242_v44, 3  ;;  %v16815_v34 = vrot.slane %v11251_v21, 4 }
 0x204   : > { %v3296_v22 = vadd.f32 %v3252_v62, %v3171_v49  ;;  %v3377_v9 = vsel %vm818_vm1, %v16813_v5, %v3376_v33  ;;  %v16817_v52 = vrot.slane %v16816_v6, 5  ;;  %v3876_v19 = vrot.slane %v3821_v2, 6  ;;  %v16828_v33 = vld [vmem:[#allocation40_spill] sm:$0xff] }
 0x205   : > { %v3502_v25 = vsel %vm944_vm2, %v16814_v61, %v3501_v14  ;;  %v3627_v24 = vsel %vm1070_vm3, %v16815_v34, %v3626_v47  ;;  %v2951_v29 = vadd.f32 %v2907_v15, %v2826_v45  ;;  %v4016_v40 = vmul.f32 %v8120_v50, %v16818_v12  ;;  %v16824_v15 = vld [vmem:[#allocation45_spill] sm:$0xff]  ;;  %v16832_v47 = vld [vmem:[#allocation44_spill] sm:$0xff]  ;;  %v16840_v12 = vld [vmem:[#allocation51_spill] sm:$0xff] }
 0x206   : > { %v3752_v55 = vsel %vm1196_vm4, %v16817_v52, %v3751_v28  ;;  %v3421_v18 = vadd.f32 %v3377_v9, %v3296_v22  ;;  %v4041_v57 = vmul.f32 %v16819_v46, %v3990_v27  ;;  %v16820_v44 = vrot.slane %v11271_v32, 6  ;;  %v8121_v9 = vld [vmem:[#allocation2 + $0xc8] sm:$0xff]  ;;  %v16838_v52 = vld [vmem:[#allocation59_spill] sm:$0xff] }
 0x207   : > { %v4166_v21 = vmul.f32 %v16821_v35, %v3990_v27  ;;  %v4291_v38 = vmul.f32 %v16822_v13, %v3990_v27  ;;  %v4416_v11 = vmul.f32 %v16823_v10, %v3990_v27  ;;  %v3076_v49 = vadd.f32 %v3032_v1, %v2951_v29  ;;  %v16836_v61 = vld [vmem:[#allocation53_spill] sm:$0xff]  ;;  %v16839_v29 = vld [vmem:[#allocation63_spill] sm:$0xff] }
 0x208   : > { %v3877_v60 = vsel %vm1322_vm5, %v16820_v44, %v3876_v19  ;;  %v3546_v8 = vadd.f32 %v3502_v25, %v3421_v18  ;;  %v4096_v43 = vrot.slane %v4041_v57, 1  ;;  %v4541_v36 = vmul.f32 %v16824_v15, %v3990_v27  ;;  %v16842_v46 = vld [vmem:[#allocation33_spill] sm:$0xff] }
 0x209   : > { %v4221_v48 = vrot.slane %v4166_v21, 2  ;;  %v4346_v4 = vrot.slane %v4291_v38, 3  ;;  %v4471_v51 = vrot.slane %v4416_v11, 4  ;;  %v4666_v54 = vmul.f32 %v16825_v30, %v3990_v27 }
 0x20a   : > { %v3108_v56 = vadd.f32 %v3076_v49, %v2263_v17  ;;  %v3671_v32 = vadd.f32 %v3627_v24, %v3546_v8  ;;  %v16827_v37 = vrot.slane %v16826_v31, 1  ;;  %v4596_v53 = vrot.slane %v4541_v36, 5  ;;  %v16834_v17 = vld [vmem:[#allocation46_spill] sm:$0xff]  ;;  %v16837_v24 = vld [vmem:[#allocation55_spill] sm:$0xff]  ;;  %v5680_v36 = vld [vmem:[#allocation2 + $0xe8] sm:$0x3f] }
 0x20b   : > { %v16829_v1 = vrot.slane %v16828_v33, 2  ;;  %v16831_v7 = vrot.slane %v16830_v42, 3  ;;  %v16833_v28 = vrot.slane %v16832_v47, 4  ;;  %v16835_v45 = vrot.slane %v16834_v17, 5  ;;  %v16843_v8 = vld [vmem:[#allocation39_spill] sm:$0xff]  ;;  %v16856_v17 = vld [vmem:[#allocation50_spill] sm:$0xff] }
 0x20c   : > { %v4097_v58 = vsel %vm692_vm0, %v16827_v37, %v4096_v43  ;;  %v3796_v27 = vadd.f32 %v3752_v55, %v3671_v32  ;;  %v4721_v5 = vrot.slane %v4666_v54, 6  ;;  %v4861_v25 = vmul.f32 %v8121_v9, %v16836_v61  ;;  %v16846_v54 = vld [vmem:[#allocation61_spill] sm:$0xff]  ;;  %v16848_v37 = vld [vmem:[#allocation64_spill] sm:$0xff]  ;;  %v16854_v47 = vld [vmem:[#allocation43_spill] sm:$0xff] }
 0x20d   : > { %v4141_v26 = vadd.f32 %v4097_v58, %v4016_v40  ;;  %v4222_v14 = vsel %vm818_vm1, %v16829_v1, %v4221_v48  ;;  %v4347_v62 = vsel %vm944_vm2, %v16831_v7, %v4346_v4  ;;  %v4472_v2 = vsel %vm1070_vm3, %v16833_v28, %v4471_v51  ;;  %v16857_v9 = vld [vmem:[#allocation42_spill] sm:$0xff] }
 0x20e   : > { %v4597_v22 = vsel %vm1196_vm4, %v16835_v45, %v4596_v53  ;;  %v4886_v6 = vmul.f32 %v16837_v24, %v4835_v20  ;;  %v5011_v19 = vmul.f32 %v16838_v52, %v4835_v20  ;;  %v5136_v18 = vmul.f32 %v16839_v29, %v4835_v20 }
 0x20f   : > { %v4266_v34 = vadd.f32 %v4222_v14, %v4141_v26  ;;  %v3921_v50 = vadd.f32 %v3877_v60, %v3796_v27  ;;  %v16841_v40 = vrot.slane %v16840_v12, 6  ;;  %v5261_v57 = vmul.f32 %v16842_v46, %v4835_v20  ;;  %v16844_v60 = vld [vmem:[#allocation58_spill] sm:$0xff] }
 0x210   : > { %v5386_v44 = vmul.f32 %v11415_v39, %v4835_v20  ;;  %v4941_v21 = vrot.slane %v4886_v6, 1  ;;  %v5066_v13 = vrot.slane %v5011_v19, 2  ;;  %v5191_v38 = vrot.slane %v5136_v18, 3  ;;  %v16859_v6 = vld [vmem:[#allocation54_spill] sm:$0xff]  ;;  %v16860_v18 = vld [vmem:[#allocation15_spill] sm:$0xff] }
 0x211   : > { %v4722_v55 = vsel %vm1322_vm5, %v16841_v40, %v4721_v5  ;;  %v4391_v35 = vadd.f32 %v4347_v62, %v4266_v34  ;;  %v3953_v10 = vadd.f32 %v3921_v50, %v3108_v56  ;;  %v5316_v11 = vrot.slane %v5261_v57, 4  ;;  %v16850_v56 = vld [vmem:[#allocation38_spill] sm:$0xff] }
 0x212   : > { %v5441_v49 = vrot.slane %v5386_v44, 5  ;;  %v5511_v43 = vmul.f32 %v16843_v8, %v4835_v20  ;;  %v16845_v4 = vrot.slane %v16844_v60, 1  ;;  %v16847_v32 = vrot.slane %v16846_v54, 2  ;;  %v16852_v20 = vld [vmem:[#allocation66_spill] sm:$0xff] }
 0x213   : > { %v4516_v48 = vadd.f32 %v4472_v2, %v4391_v35  ;;  %v16849_v58 = vrot.slane %v16848_v37, 3  ;;  %v16851_v33 = vrot.slane %v16850_v56, 4  ;;  %v16853_v14 = vrot.slane %v16852_v20, 5  ;;  %v16855_v2 = vld [vmem:[#allocation47_spill] sm:$0xff] }
 0x214   : > { %v4942_v51 = vsel %vm692_vm0, %v16845_v4, %v4941_v21  ;;  %v5067_v31 = vsel %vm818_vm1, %v16847_v32, %v5066_v13  ;;  %v5566_v7 = vrot.slane %v5511_v43, 6  ;;  %v5706_v28 = vmul.f32 %v16854_v47, %v11444_v63  ;;  %v16862_v43 = vld [vmem:[#allocation70_spill] sm:$0xff]  ;;  %v16864_v4 = vld [vmem:[#allocation52_spill] sm:$0xff]  ;;  %v11722_v32 = vld [vmem:[#allocation2 + $0x68] sm:$0xff] }
 0x215   : > { %v5192_v53 = vsel %vm944_vm2, %v16849_v58, %v5191_v38  ;;  %v4986_v26 = vadd.f32 %v4942_v51, %v4861_v25  ;;  %v5317_v1 = vsel %vm1070_vm3, %v16851_v33, %v5316_v11  ;;  %v5442_v42 = vsel %vm1196_vm4, %v16853_v14, %v5441_v49  ;;  %v606_v11 = vld [vmem:[#allocation2 + $0x60] sm:$0xff]  ;;  %v16866_v58 = vld [vmem:[#allocation13_spill] sm:$0xff] }
 0x216   : > { %v4641_v62 = vadd.f32 %v4597_v22, %v4516_v48  ;;  %v5731_v27 = vmul.f32 %v16855_v2, %v5680_v36  ;;  %v5856_v45 = vmul.f32 %v16856_v17, %v5680_v36  ;;  %v16858_v25 = vrot.slane %v16857_v9, 6  ;;  %v16861_v22 = vld [vmem:[#allocation16_spill] sm:$0xff] }
 0x217   : > { %v5111_v5 = vadd.f32 %v5067_v31, %v4986_v26  ;;  %v5981_v19 = vmul.f32 %v16859_v6, %v5680_v36  ;;  %v6106_v50 = vmul.f32 %v16860_v18, %v5680_v36  ;;  %v6231_v44 = vmul.f32 %v16861_v22, %v5680_v36  ;;  %v11736_v14 = vld [vmem:[%s15312_s1] ss:$0 sm:$0xff] }
 0x218   : > { %v5567_v34 = vsel %vm1322_vm5, %v16858_v25, %v5566_v7  ;;  %v4766_v12 = vadd.f32 %v4722_v55, %v4641_v62  ;;  %v5786_v40 = vrot.slane %v5731_v27, 1  ;;  %v5911_v57 = vrot.slane %v5856_v45, 2  ;;  %v11742_v7 = vld [vmem:[%s15312_s1 + $0x1] ss:$0 sm:$0xff]  ;;  %v11752_v27 = vld [vmem:[%s15312_s1 + $0x2] ss:$0 sm:$0xff] }
 0x219   : > { %v5236_v35 = vadd.f32 %v5192_v53, %v5111_v5  ;;  %v6036_v21 = vrot.slane %v5981_v19, 3  ;;  %v6161_v13 = vrot.slane %v6106_v50, 4  ;;  %v6356_v38 = vmul.f32 %v11535_v23, %v5680_v36  ;;  %v11765_v25 = vld [vmem:[%s15312_s1 + $0x3] ss:$0 sm:$0xff] }
 0x21a   : > { %v4798_v49 = vadd.f32 %v4766_v12, %v3953_v10  ;;  %v16863_v48 = vrot.slane %v16862_v43, 1  ;;  %v16865_v51 = vrot.slane %v16864_v4, 2  ;;  %v6286_v55 = vrot.slane %v6231_v44, 5 }
 0x21b   : > { %v5361_v31 = vadd.f32 %v5317_v1, %v5236_v35  ;;  %v16867_v53 = vrot.slane %v16866_v58, 3  ;;  %v16868_v36 = vrot.slane %v11508_v3, 4  ;;  %v16869_v56 = vrot.slane %v11530_v41, 5  ;;  %v11777_v35 = vld [vmem:[%s15312_s1 + $0x4] ss:$0 sm:$0xff] }
 0x21c   : > { %v5787_v60 = vsel %vm692_vm0, %v16863_v48, %v5786_v40  ;;  %v5912_v54 = vsel %vm818_vm1, %v16865_v51, %v5911_v57  ;;  %v6411_v20 = vrot.slane %v6356_v38, 6  ;;  %v631_v1 = vmul.f32 %v11736_v14, %v606_v11  ;;  %16870 = vst [vmem:[#allocation73_spill] sm:$0xff] %v11777_v35 }
 0x21d   : > { %v5831_v37 = vadd.f32 %v5787_v60, %v5706_v28  ;;  %v6037_v26 = vsel %vm944_vm2, %v16867_v53, %v6036_v21  ;;  %v6162_v10 = vsel %vm1070_vm3, %v16868_v36, %v6161_v13  ;;  %v6287_v33 = vsel %vm1196_vm4, %v16869_v56, %v6286_v55  ;;  %v11795_v55 = vld [vmem:[%s15312_s1 + $0x5] ss:$0 sm:$0xff]  ;;  %v11815_v56 = vld [vmem:[#allocation2 + $0x78] sm:$0xff] }
 0x21e   : > { %v656_v3 = vmul.f32 %v11742_v7, %v606_v11  ;;  %v5486_v62 = vadd.f32 %v5442_v42, %v5361_v31  ;;  %v11747_v41 = vmul.f32 %v11742_v7, %v11722_v32  ;;  %v782_v45 = vmul.f32 %v11752_v27, %v606_v11  ;;  %16871 = vst [vmem:[#allocation56_spill] sm:$0xff] %v11795_v55 }
 0x21f   : > { %v5956_v28 = vadd.f32 %v5912_v54, %v5831_v37  ;;  %v6412_v5 = vsel %vm1322_vm5, %v6409_v16, %v6411_v20  ;;  %v11760_v42 = vmul.f32 %v11752_v27, %v11722_v32  ;;  %v908_v19 = vmul.f32 %v11765_v25, %v606_v11  ;;  %16872 = vst [vmem:[#allocation57_spill] sm:$0xff] %v11815_v56 }
 0x220   : > { %v713_v9 = vrot.slane %v656_v3, 1  ;;  %v5611_v50 = vadd.f32 %v5567_v34, %v5486_v62  ;;  %v15821_v40 = vrot.slane %v11747_v41, 1  ;;  %v839_v57 = vrot.slane %v782_v45, 2 }
 0x221   : > { %v6081_v12 = vadd.f32 %v6037_v26, %v5956_v28  ;;  %v15820_v0 = vrot.slane %v11760_v42, 2  ;;  %v11772_v16 = vmul.f32 %v11765_v25, %v11722_v32  ;;  %v965_v44 = vrot.slane %v908_v19, 3  ;;  %v11808_v26 = vld [vmem:[%s15312_s1 + $0x6] ss:$0 sm:$0xff] }
 0x222   : > { %v1034_v21 = vmul.f32 %v11777_v35, %v606_v11  ;;  %v5643_v13 = vadd.f32 %v5611_v50, %v4798_v49  ;;  %v715_v38 = vsel %vm692_vm0, %v713_v9, %v15821_v40  ;;  %v11785_v43 = vmul.f32 %v11777_v35, %v11722_v32  ;;  %v11827_v9 = vld [vmem:[%s15312_s1 + $0x8] ss:$0 sm:$0xff] }
 0x223   : > { %v6206_v34 = vadd.f32 %v6162_v10, %v6081_v12  ;;  %v757_v48 = vadd.f32 %v715_v38, %v631_v1  ;;  %v841_v60 = vsel %vm818_vm1, %v839_v57, %v15820_v0  ;;  %v15819_v4 = vrot.slane %v11772_v16, 3  ;;  %v11839_v12 = vld [vmem:[%s15312_s1 + $0x9] ss:$0 sm:$0xff] }
 0x224   : > { %v1091_v51 = vrot.slane %v1034_v21, 4  ;;  %v15815_v49 = vrot.slane %v11785_v43, 4  ;;  %v1160_v31 = vmul.f32 %v11795_v55, %v606_v11  ;;  %v11800_v37 = vmul.f32 %v11795_v55, %v11722_v32 }
 0x225   : > { %v6331_v54 = vadd.f32 %v6287_v33, %v6206_v34  ;;  %v883_v58 = vadd.f32 %v841_v60, %v757_v48  ;;  %v967_v53 = vsel %vm944_vm2, %v965_v44, %v15819_v4  ;;  %v1286_v36 = vmul.f32 %v11808_v26, %v606_v11  ;;  %v11817_v33 = vld [vmem:[#allocation2 + $0x80] sm:$0xff]  ;;  %v11853_v34 = vld [vmem:[%s15312_s1 + $0xa] ss:$0 sm:$0xff] }
 0x226   : > { %v11813_v10 = vmul.f32 %v11808_v26, %v11722_v32  ;;  %v1093_v1 = vsel %vm1070_vm3, %v1091_v51, %v15815_v49  ;;  %v1217_v3 = vrot.slane %v1160_v31, 5  ;;  %v15814_v62 = vrot.slane %v11800_v37, 5 }
 0x227   : > { %v6456_v20 = vadd.f32 %v6412_v5, %v6331_v54  ;;  %v1009_v28 = vadd.f32 %v967_v53, %v883_v58  ;;  %v1343_v45 = vrot.slane %v1286_v36, 6  ;;  %v1482_v19 = vmul.f32 %v11827_v9, %v11815_v56  ;;  %v11866_v54 = vld [vmem:[%s15312_s1 + $0xb] ss:$0 sm:$0xff] }
 0x228   : > { %v15813_v11 = vrot.slane %v11813_v10, 6  ;;  %v1219_v50 = vsel %vm1196_vm4, %v1217_v3, %v15814_v62  ;;  %v1507_v57 = vmul.f32 %v11839_v12, %v11815_v56  ;;  %v11845_v44 = vmul.f32 %v11839_v12, %v11817_v33 }
 0x229   : > { %v11831_v5 = vadd.f32 %v6456_v20, %v5643_v13  ;;  %v1135_v21 = vadd.f32 %v1093_v1, %v1009_v28  ;;  %v1632_v38 = vmul.f32 %v11853_v34, %v11815_v56  ;;  %v11859_v48 = vmul.f32 %v11853_v34, %v11817_v33  ;;  %v11878_v1 = vld [vmem:[%s15312_s1 + $0xc] ss:$0 sm:$0xff] }
 0x22a   : > { %16874 = vst [vmem:[#allocation75_spill] sm:$0xff] %v11845_v44  ;;  %v1345_v13 = vsel %vm1322_vm5, %v1343_v45, %v15813_v11  ;;  %v1563_v60 = vrot.slane %v1507_v57, 1  ;;  %v15818_v51 = vrot.slane %v11845_v44, 1  ;;  %v1757_v31 = vmul.f32 %v11866_v54, %v11815_v56  ;;  %v12113_v44 = vld [vmem:[#allocation2 + $0xc0] sm:$0xff] }
 0x22b   : > { %16873 = vst [vmem:[#allocation60_spill] sm:$0xff] %v11831_v5  ;;  %16875 = vst [vmem:[#allocation62_spill] sm:$0xff] %v11859_v48  ;;  %6543 = vadd.xlane.f32.xlu1 %v11831_v5  ;;  %v11872_v58 = vmul.f32 %v11866_v54, %v11817_v33  ;;  %v1261_v53 = vadd.f32 %v1219_v50, %v1135_v21  ;;  %v1688_v36 = vrot.slane %v1632_v38, 2  ;;  %v15817_v20 = vrot.slane %v11859_v48, 2 }
 0x22c   : > { %v1882_v3 = vmul.f32 %v11878_v1, %v11815_v56  ;;  %v1565_v28 = vsel %vm692_vm0, %v1563_v60, %v15818_v51  ;;  %v1813_v45 = vrot.slane %v1757_v31, 3  ;;  %v11888_v50 = vmul.f32 %v11878_v1, %v11817_v33  ;;  %v11900_v31 = vld [vmem:[%s15312_s1 + $0xd] ss:$0 sm:$0xff]  ;;  %v11927_v51 = vld [vmem:[#allocation2 + $0x98] sm:$0xff]  ;;  %16917 = vst [vmem:[#allocation34_spill] sm:$0xff] %v12113_v44 }
 0x22d   : > { %16876 = vst [vmem:[#allocation65_spill] sm:$0xff] %v11872_v58  ;;  %v15816_v57 = vrot.slane %v11872_v58, 3  ;;  %v1387_v21 = vadd.f32 %v1345_v13, %v1261_v53  ;;  %v1607_v38 = vadd.f32 %v1565_v28, %v1482_v19  ;;  %v1690_v11 = vsel %vm818_vm1, %v1688_v36, %v15817_v20  ;;  %16878 = vst [vmem:[#allocation90_spill] sm:$0xff] %v11900_v31  ;;  %v11908_v53 = vld [vmem:[#allocation2 + $0x90] sm:$0xff]  ;;  %v11913_v36 = vld [vmem:[%s15313_s2] ss:$0 sm:$0xff] }
 0x22e   : > { %16877 = vst [vmem:[#allocation76_spill] sm:$0xff] %v11888_v50  ;;  %v1938_v62 = vrot.slane %v1882_v3, 4  ;;  %v15826_v60 = vrot.slane %v11888_v50, 4  ;;  %v2007_v13 = vmul.f32 %v11900_v31, %v11815_v56  ;;  %v11906_v19 = vmul.f32 %v11900_v31, %v11817_v33  ;;  %16880 = vst [vmem:[#allocation17_spill] sm:$0xff] %v11908_v53 }
 0x22f   : > { %v1815_v49 = vsel %vm944_vm2, %v1813_v45, %v15816_v57  ;;  %16881 = vst [vmem:[#allocation69_spill] sm:$0xff] %v11913_v36  ;;  %v1419_v3 = vadd.f32 %v11913_v36, %v1387_v21  ;;  %v1732_v28 = vadd.f32 %v1690_v11, %v1607_v38  ;;  %v11919_v45 = vld [vmem:[%s15312_s1 + $0xe] ss:$0 sm:$0xff]  ;;  %16884 = vst [vmem:[#allocation20_spill] sm:$0xff] %v11927_v51  ;;  %v11936_v38 = vld [vmem:[%s15312_s1 + $0x10] ss:$0 sm:$0xff] }
 0x230   : > { %16879 = vst [vmem:[#allocation24_spill] sm:$0xff] %v11906_v19  ;;  %16882 = vst [vmem:[#allocation77_spill] sm:$0xff] %v11919_v45  ;;  %v2132_v57 = vmul.f32 %v11919_v45, %v11815_v56  ;;  %v11925_v20 = vmul.f32 %v11919_v45, %v11817_v33  ;;  %v1940_v4 = vsel %vm1070_vm3, %v1938_v62, %v15826_v60  ;;  %v2063_v21 = vrot.slane %v2007_v13, 5  ;;  %v11944_v56 = vld [vmem:[%s15312_s1 + $0x11] ss:$0 sm:$0xff] }
 0x231   : > { %v15829_v11 = vrot.slane %v11906_v19, 5  ;;  %16885 = vst [vmem:[#allocation18_spill] sm:$0xff] %v11936_v38  ;;  %v2327_v0 = vmul.f32 %v11936_v38, %v11908_v53  ;;  %v1857_v40 = vadd.f32 %v1815_v49, %v1732_v28  ;;  %16886 = vst [vmem:[#allocation21_spill] sm:$0xff] %v11944_v56  ;;  %v2352_v62 = vmul.f32 %v11944_v56, %v11908_v53  ;;  %v11958_v49 = vld [vmem:[%s15312_s1 + $0x12] ss:$0 sm:$0xff] }
 0x232   : > { %16883 = vst [vmem:[#allocation19_spill] sm:$0xff] %v11925_v20  ;;  %v2188_v5 = vrot.slane %v2132_v57, 6  ;;  %v11953_v60 = vmul.f32 %v11944_v56, %v11927_v51  ;;  %16888 = vst [vmem:[#allocation92_spill] sm:$0xff] %v11958_v49  ;;  %v2477_v57 = vmul.f32 %v11958_v49, %v11908_v53  ;;  %v11964_v28 = vmul.f32 %v11958_v49, %v11927_v51  ;;  %v11972_v56 = vld [vmem:[%s15312_s1 + $0x13] ss:$0 sm:$0xff] }
 0x233   : > { %v2065_v13 = vsel %vm1196_vm4, %v2063_v21, %v15829_v11  ;;  %v1982_v59 = vadd.f32 %v1940_v4, %v1857_v40  ;;  %v16890_v36 = vrot.slane %v11925_v20, 6  ;;  %v2408_v11 = vrot.slane %v2352_v62, 1  ;;  %16891 = vst [vmem:[#allocation78_spill] sm:$0xff] %v11972_v56 }
 0x234   : > { %16887 = vst [vmem:[#allocation22_spill] sm:$0xff] %v11953_v60  ;;  %16889 = vst [vmem:[#allocation91_spill] sm:$0xff] %v11964_v28  ;;  %v2602_v19 = vmul.f32 %v11972_v56, %v11908_v53  ;;  %v2533_v58 = vrot.slane %v2477_v57, 2  ;;  %v11980_v40 = vmul.f32 %v11972_v56, %v11927_v51  ;;  %v16895_v57 = vrot.slane %v11953_v60, 1 }
 0x235   : > { %v2190_v21 = vsel %vm1322_vm5, %v2188_v5, %v16890_v36  ;;  %v2107_v4 = vadd.f32 %v2065_v13, %v1982_v59  ;;  %v11985_v36 = vld [vmem:[%s15312_s1 + $0x14] ss:$0 sm:$0xff]  ;;  %v16896_v20 = vrot.slane %v11964_v28, 2  ;;  %v12003_v13 = vld [vmem:[%s15312_s1 + $0x15] ss:$0 sm:$0xff] }
 0x236   : > { %16892 = vst [vmem:[#allocation79_spill] sm:$0xff] %v11980_v40  ;;  %v2658_v5 = vrot.slane %v2602_v19, 3  ;;  %16893 = vst [vmem:[#allocation10_spill] sm:$0xff] %v11985_v36  ;;  %v2727_v62 = vmul.f32 %v11985_v36, %v11908_v53  ;;  %v11991_v50 = vmul.f32 %v11985_v36, %v11927_v51  ;;  %v2410_v49 = vsel %vm692_vm0, %v2408_v11, %v16895_v57  ;;  %v12008_v11 = vld [vmem:[#allocation2 + $0xa8] sm:$0xff]  ;;  %v12020_v28 = vld [vmem:[%s15312_s1 + $0x16] ss:$0 sm:$0xff] }
 0x237   : > { %v2535_v59 = vsel %vm818_vm1, %v2533_v58, %v16896_v20  ;;  %v15847_v19 = vrot.slane %v11980_v40, 3  ;;  %16897 = vst [vmem:[#allocation11_spill] sm:$0xff] %v12003_v13  ;;  %v2852_v56 = vmul.f32 %v12003_v13, %v11908_v53  ;;  %v2232_v36 = vadd.f32 %v2190_v21, %v2107_v4  ;;  %16898 = vst [vmem:[#allocation84_spill] sm:$0xff] %v12008_v11  ;;  %v12037_v40 = vld [vmem:[%s15312_s1 + $0x18] ss:$0 sm:$0xff] }
 0x238   : > { %16894 = vst [vmem:[#allocation25_spill] sm:$0xff] %v11991_v50  ;;  %v2452_v38 = vadd.f32 %v2410_v49, %v2327_v0  ;;  %v2783_v48 = vrot.slane %v2727_v62, 4  ;;  %v15849_v60 = vrot.slane %v11991_v50, 4  ;;  %v12015_v20 = vmul.f32 %v12003_v13, %v11927_v51  ;;  %16900 = vst [vmem:[#allocation12_spill] sm:$0xff] %v12020_v28  ;;  %v12024_v49 = vld [vmem:[#allocation2 + $0xb0] sm:$0xff] }
 0x239   : > { %v2660_v58 = vsel %vm944_vm2, %v2658_v5, %v15847_v19  ;;  %v2908_v57 = vrot.slane %v2852_v56, 5  ;;  %v2977_v0 = vmul.f32 %v12020_v28, %v11908_v53  ;;  %16901 = vst [vmem:[#allocation74_spill] sm:$0xff] %v12024_v49  ;;  %v2264_v21 = vadd.f32 %v2232_v36, %v1419_v3  ;;  %16903 = vst [vmem:[#allocation82_spill] sm:$0xff] %v12037_v40 }
 0x23a   : > { %16899 = vst [vmem:[#allocation95_spill] sm:$0xff] %v12015_v20  ;;  %v2577_v4 = vadd.f32 %v2535_v59, %v2452_v38  ;;  %v2785_v5 = vsel %vm1070_vm3, %v2783_v48, %v15849_v60  ;;  %v12031_v62 = vmul.f32 %v12020_v28, %v11927_v51  ;;  %v3172_v3 = vmul.f32 %v12037_v40, %v12008_v11  ;;  %v12044_v38 = vld [vmem:[%s15312_s1 + $0x19] ss:$0 sm:$0xff]  ;;  %v12056_v60 = vld [vmem:[%s15312_s1 + $0x1a] ss:$0 sm:$0xff] }
 0x23b   : > { %v3033_v19 = vrot.slane %v2977_v0, 6  ;;  %16904 = vst [vmem:[#allocation23_spill] sm:$0xff] %v12044_v38  ;;  %v3197_v48 = vmul.f32 %v12044_v38, %v12008_v11  ;;  %v12051_v0 = vmul.f32 %v12044_v38, %v12024_v49  ;;  %16906 = vst [vmem:[#allocation26_spill] sm:$0xff] %v12056_v60  ;;  %v3322_v56 = vmul.f32 %v12056_v60, %v12008_v11  ;;  %v12086_v51 = vld [vmem:[%s15312_s1 + $0x1c] ss:$0 sm:$0xff] }
 0x23c   : > { %16902 = vst [vmem:[#allocation81_spill] sm:$0xff] %v12031_v62  ;;  %v2702_v36 = vadd.f32 %v2660_v58, %v2577_v4  ;;  %v16907_v53 = vrot.slane %v12015_v20, 5  ;;  %v12065_v58 = vmul.f32 %v12056_v60, %v12024_v49  ;;  %v12070_v4 = vld [vmem:[%s15312_s1 + $0x1b] ss:$0 sm:$0xff]  ;;  %v16910_v28 = vrot.slane %v12031_v62, 6  ;;  %16912 = vst [vmem:[#allocation27_spill] sm:$0xff] %v12086_v51 }
 0x23d   : > { %16905 = vst [vmem:[#allocation89_spill] sm:$0xff] %v12051_v0  ;;  %v3253_v50 = vrot.slane %v3197_v48, 1  ;;  %16909 = vst [vmem:[#allocation31_spill] sm:$0xff] %v12070_v4  ;;  %v3447_v59 = vmul.f32 %v12070_v4, %v12008_v11  ;;  %v12081_v60 = vmul.f32 %v12070_v4, %v12024_v49 }
 0x23e   : > { %v2910_v40 = vsel %vm1196_vm4, %v2908_v57, %v16907_v53  ;;  %16908 = vst [vmem:[#allocation30_spill] sm:$0xff] %v12065_v58  ;;  %v2827_v38 = vadd.f32 %v2785_v5, %v2702_v36  ;;  %v3035_v20 = vsel %vm1322_vm5, %v3033_v19, %v16910_v28  ;;  %v15867_v53 = vrot.slane %v12051_v0, 1 }
 0x23f   : > { %v3378_v57 = vrot.slane %v3322_v56, 2  ;;  %16911 = vst [vmem:[#allocation32_spill] sm:$0xff] %v12081_v60  ;;  %v3503_v13 = vrot.slane %v3447_v59, 3  ;;  %v3572_v5 = vmul.f32 %v12086_v51, %v12008_v11  ;;  %v12095_v19 = vmul.f32 %v12086_v51, %v12024_v49  ;;  %v12100_v56 = vld [vmem:[%s15312_s1 + $0x1d] ss:$0 sm:$0xff] }
 0x240   : > { %v2952_v36 = vadd.f32 %v2910_v40, %v2827_v38  ;;  %v3255_v28 = vsel %vm692_vm0, %v3253_v50, %v15867_v53  ;;  %16914 = vst [vmem:[#allocation93_spill] sm:$0xff] %v12100_v56  ;;  %v3697_v59 = vmul.f32 %v12100_v56, %v12008_v11  ;;  %v16915_v62 = vrot.slane %v12065_v58, 2 }
 0x241   : > { %16913 = vst [vmem:[#allocation83_spill] sm:$0xff] %v12095_v19  ;;  %v3297_v48 = vadd.f32 %v3255_v28, %v3172_v3  ;;  %v15876_v38 = vrot.slane %v12081_v60, 3  ;;  %v3628_v50 = vrot.slane %v3572_v5, 4  ;;  %v15879_v0 = vrot.slane %v12095_v19, 4  ;;  %v12129_v5 = vld [vmem:[#allocation2 + $0xc8] sm:$0xff] }
 0x242   : > { %v3380_v40 = vsel %vm818_vm1, %v3378_v57, %v16915_v62  ;;  %v3077_v53 = vadd.f32 %v3035_v20, %v2952_v36  ;;  %v12111_v51 = vmul.f32 %v12100_v56, %v12024_v49  ;;  %v3753_v4 = vrot.slane %v3697_v59, 5  ;;  %v12121_v62 = vld [vmem:[%s15312_s1 + $0x1e] ss:$0 sm:$0xff]  ;;  %v12138_v28 = vld [vmem:[%s15312_s1 + $0x20] ss:$0 sm:$0xff] }
 0x243   : > { %v3422_v45 = vadd.f32 %v3380_v40, %v3297_v48  ;;  %v3505_v3 = vsel %vm944_vm2, %v3503_v13, %v15876_v38  ;;  %16918 = vst [vmem:[#allocation48_spill] sm:$0xff] %v12121_v62  ;;  %v3822_v20 = vmul.f32 %v12121_v62, %v12008_v11  ;;  %v12127_v57 = vmul.f32 %v12121_v62, %v12024_v49 }
 0x244   : > { %16916 = vst [vmem:[#allocation94_spill] sm:$0xff] %v12111_v51  ;;  %v3109_v36 = vadd.f32 %v3077_v53, %v2264_v21  ;;  %v3630_v48 = vsel %vm1070_vm3, %v3628_v50, %v15879_v0  ;;  %v15882_v13 = vrot.slane %v12111_v51, 5  ;;  %16920 = vst [vmem:[#allocation85_spill] sm:$0xff] %v12138_v28  ;;  %v4017_v59 = vmul.f32 %v12138_v28, %v12113_v44  ;;  %v12146_v21 = vld [vmem:[%s15312_s1 + $0x21] ss:$0 sm:$0xff] }
 0x245   : > { %16919 = vst [vmem:[#allocation36_spill] sm:$0xff] %v12127_v57  ;;  %v3547_v40 = vadd.f32 %v3505_v3, %v3422_v45  ;;  %v3878_v38 = vrot.slane %v3822_v20, 6  ;;  %16921 = vst [vmem:[#allocation86_spill] sm:$0xff] %v12146_v21  ;;  %v4042_v53 = vmul.f32 %v12146_v21, %v12113_v44  ;;  %v12155_v0 = vmul.f32 %v12146_v21, %v12129_v5  ;;  %v12160_v45 = vld [vmem:[%s15312_s1 + $0x22] ss:$0 sm:$0xff] }
 0x246   : > { %v3755_v50 = vsel %vm1196_vm4, %v3753_v4, %v15882_v13  ;;  %16923 = vst [vmem:[#allocation88_spill] sm:$0xff] %v12160_v45  ;;  %v4167_v3 = vmul.f32 %v12160_v45, %v12113_v44  ;;  %v12166_v20 = vmul.f32 %v12160_v45, %v12129_v5  ;;  %v16925_v28 = vrot.slane %v12127_v57, 6  ;;  %v12174_v21 = vld [vmem:[%s15312_s1 + $0x23] ss:$0 sm:$0xff] }
 0x247   : > { %16922 = vst [vmem:[#allocation87_spill] sm:$0xff] %v12155_v0  ;;  %v3672_v11 = vadd.f32 %v3630_v48, %v3547_v40  ;;  %v4098_v13 = vrot.slane %v4042_v53, 1  ;;  %16926 = vst [vmem:[#allocation45_spill] sm:$0xff] %v12174_v21  ;;  %v4292_v51 = vmul.f32 %v12174_v21, %v12113_v44  ;;  %v12182_v48 = vmul.f32 %v12174_v21, %v12129_v5 }
 0x248   : > { %16924 = vst [vmem:[#allocation28_spill] sm:$0xff] %v12166_v20  ;;  %v3880_v4 = vsel %vm1322_vm5, %v3878_v38, %v16925_v28  ;;  %v4223_v60 = vrot.slane %v4167_v3, 2  ;;  %v12187_v28 = vld [vmem:[%s15312_s1 + $0x24] ss:$0 sm:$0xff]  ;;  %v16928_v3 = vrot.slane %v12155_v0, 1  ;;  %v16929_v21 = vrot.slane %v12166_v20, 2 }
 0x249   : > { %v3797_v40 = vadd.f32 %v3755_v50, %v3672_v11  ;;  %v4348_v38 = vrot.slane %v4292_v51, 3  ;;  %16927 = vst [vmem:[#allocation49_spill] sm:$0xff] %v12187_v28  ;;  %v4417_v53 = vmul.f32 %v12187_v28, %v12113_v44  ;;  %v12193_v19 = vmul.f32 %v12187_v28, %v12129_v5 }
 0x24a   : > { %v4100_v45 = vsel %vm692_vm0, %v4098_v13, %v16928_v3  ;;  %v4225_v51 = vsel %vm818_vm1, %v4223_v60, %v16929_v21  ;;  %v15904_v11 = vrot.slane %v12182_v48, 3  ;;  %v4542_v50 = vmul.f32 %v16824_v15, %v12113_v44 }
 0x24b   : > { %v3922_v57 = vadd.f32 %v3880_v4, %v3797_v40  ;;  %v4142_v58 = vadd.f32 %v4100_v45, %v4017_v59  ;;  %v4473_v62 = vrot.slane %v4417_v53, 4  ;;  %v15900_v56 = vrot.slane %v12193_v19, 4 }
 0x24c   : > { %v4350_v0 = vsel %vm944_vm2, %v4348_v38, %v15904_v11  ;;  %v12210_v13 = vmul.f32 %v16824_v15, %v12129_v5  ;;  %v4598_v3 = vrot.slane %v4542_v50, 5  ;;  %v4667_v60 = vmul.f32 %v16825_v30, %v12113_v44  ;;  %v16930_v38 = vld [vmem:[#allocation68_spill] sm:$0xff] }
 0x24d   : > { %v3954_v21 = vadd.f32 %v3922_v57, %v3109_v36  ;;  %v4267_v20 = vadd.f32 %v4225_v51, %v4142_v58  ;;  %v4475_v59 = vsel %vm1070_vm3, %v4473_v62, %v15900_v56  ;;  %v12219_v45 = vmul.f32 %v16825_v30, %v12129_v5 }
 0x24e   : > { %v15901_v4 = vrot.slane %v12210_v13, 5  ;;  %v4723_v40 = vrot.slane %v4667_v60, 6  ;;  %v4862_v15 = vmul.f32 %v16836_v61, %v16930_v38  ;;  %v4887_v53 = vmul.f32 %v16837_v24, %v16930_v38 }
 0x24f   : > { %v4392_v50 = vadd.f32 %v4350_v0, %v4267_v20  ;;  %v15902_v58 = vrot.slane %v12219_v45, 6  ;;  %v12229_v57 = vmul.f32 %v16837_v24, %v11444_v63  ;;  %v5012_v30 = vmul.f32 %v16838_v52, %v16930_v38 }
 0x250   : > { %v4600_v62 = vsel %vm1196_vm4, %v4598_v3, %v15901_v4  ;;  %v4943_v36 = vrot.slane %v4887_v53, 1  ;;  %v12238_v61 = vmul.f32 %v16838_v52, %v11444_v63  ;;  %v5137_v0 = vmul.f32 %v16839_v29, %v16930_v38 }
 0x251   : > { %v4517_v20 = vadd.f32 %v4475_v59, %v4392_v50  ;;  %v4725_v24 = vsel %vm1322_vm5, %v4723_v40, %v15902_v58  ;;  %v15903_v51 = vrot.slane %v12229_v57, 1  ;;  %v5068_v60 = vrot.slane %v5012_v30, 2 }
 0x252   : > { %v15911_v56 = vrot.slane %v12238_v61, 2  ;;  %v12249_v3 = vmul.f32 %v16839_v29, %v11444_v63  ;;  %v5193_v53 = vrot.slane %v5137_v0, 3  ;;  %v5262_v52 = vmul.f32 %v16842_v46, %v16930_v38 }
 0x253   : > { %v4642_v4 = vadd.f32 %v4600_v62, %v4517_v20  ;;  %v4945_v59 = vsel %vm692_vm0, %v4943_v36, %v15903_v51  ;;  %v12258_v40 = vmul.f32 %v16842_v46, %v11444_v63  ;;  %v5387_v50 = vmul.f32 %v11415_v39, %v16930_v38  ;;  %v12271_v51 = vld [vmem:[#allocation2 + $0xf0] sm:$0xff] }
 0x254   : > { %v4987_v30 = vadd.f32 %v4945_v59, %v4862_v15  ;;  %v5070_v29 = vsel %vm818_vm1, %v5068_v60, %v15911_v56  ;;  %v15908_v0 = vrot.slane %v12249_v3, 3  ;;  %v5318_v58 = vrot.slane %v5262_v52, 4  ;;  %16931 = vst [vmem:[#allocation37_spill] sm:$0xff] %v12271_v51 }
 0x255   : > { %v4767_v62 = vadd.f32 %v4725_v24, %v4642_v4  ;;  %v15906_v20 = vrot.slane %v12258_v40, 4  ;;  %v12269_v36 = vmul.f32 %v11415_v39, %v11444_v63  ;;  %v5443_v46 = vrot.slane %v5387_v50, 5  ;;  %v12282_v24 = vld [vmem:[#allocation2 + $0xf8] sm:$0xff] }
 0x256   : > { %v5112_v11 = vadd.f32 %v5070_v29, %v4987_v30  ;;  %v5195_v15 = vsel %vm944_vm2, %v5193_v53, %v15908_v0  ;;  %v5512_v60 = vmul.f32 %v16843_v8, %v16930_v38  ;;  %v12280_v4 = vmul.f32 %v16843_v8, %v11444_v63 }
 0x257   : > { %v4799_v52 = vadd.f32 %v4767_v62, %v3954_v21  ;;  %v5320_v39 = vsel %vm1070_vm3, %v5318_v58, %v15906_v20  ;;  %v15905_v59 = vrot.slane %v12269_v36, 5  ;;  %v5707_v50 = vmul.f32 %v16854_v47, %v12271_v51 }
 0x258   : > { %v5237_v53 = vadd.f32 %v5195_v15, %v5112_v11  ;;  %v5568_v30 = vrot.slane %v5512_v60, 6  ;;  %v15907_v38 = vrot.slane %v12280_v4, 6  ;;  %v5732_v63 = vmul.f32 %v16855_v2, %v12271_v51 }
 0x259   : > { %v5445_v8 = vsel %vm1196_vm4, %v5443_v46, %v15905_v59  ;;  %v12298_v21 = vmul.f32 %v16855_v2, %v12282_v24  ;;  %v5857_v58 = vmul.f32 %v16856_v17, %v12271_v51  ;;  %v12304_v47 = vmul.f32 %v16856_v17, %v12282_v24 }
 0x25a   : > { %v5362_v11 = vadd.f32 %v5320_v39, %v5237_v53  ;;  %v5570_v29 = vsel %vm1322_vm5, %v5568_v30, %v15907_v38  ;;  %v5788_v62 = vrot.slane %v5732_v63, 1  ;;  %v5982_v46 = vmul.f32 %v16859_v6, %v12271_v51 }
 0x25b   : > { %v15910_v15 = vrot.slane %v12298_v21, 1  ;;  %v5913_v2 = vrot.slane %v5857_v58, 2  ;;  %v15909_v60 = vrot.slane %v12304_v47, 2  ;;  %v12315_v59 = vmul.f32 %v16859_v6, %v12282_v24 }
 0x25c   : > { %v5487_v17 = vadd.f32 %v5445_v8, %v5362_v11  ;;  %v6038_v20 = vrot.slane %v5982_v46, 3  ;;  %v6107_v39 = vmul.f32 %v16860_v18, %v12271_v51  ;;  %v12321_v53 = vmul.f32 %v16860_v18, %v12282_v24  ;;  %v608_v18 = vld [vmem:[#allocation2 + $0x70] sm:$0x3f] }
 0x25d   : > { %v5790_v30 = vsel %vm692_vm0, %v5788_v62, %v15910_v15  ;;  %v5915_v63 = vsel %vm818_vm1, %v5913_v2, %v15909_v60  ;;  %v15913_v6 = vrot.slane %v12315_v59, 3  ;;  %v6232_v8 = vmul.f32 %v16861_v22, %v12271_v51 }
 0x25e   : > { %v5612_v58 = vadd.f32 %v5570_v29, %v5487_v17  ;;  %v5832_v11 = vadd.f32 %v5790_v30, %v5707_v50  ;;  %v6163_v46 = vrot.slane %v6107_v39, 4  ;;  %v15912_v38 = vrot.slane %v12321_v53, 4 }
 0x25f   : > { %v6040_v0 = vsel %vm944_vm2, %v6038_v20, %v15913_v6  ;;  %v12338_v62 = vmul.f32 %v16861_v22, %v12282_v24  ;;  %v6288_v2 = vrot.slane %v6232_v8, 5  ;;  %v6357_v60 = vmul.f32 %v11535_v23, %v12271_v51 }
 0x260   : > { %v5644_v15 = vadd.f32 %v5612_v58, %v4799_v52  ;;  %v5957_v56 = vadd.f32 %v5915_v63, %v5832_v11  ;;  %v6165_v50 = vsel %vm1070_vm3, %v6163_v46, %v15912_v38  ;;  %v12347_v29 = vmul.f32 %v11535_v23, %v12282_v24 }
 0x261   : > { %v15918_v20 = vrot.slane %v12338_v62, 5  ;;  %v6413_v17 = vrot.slane %v6357_v60, 6  ;;  %v632_v22 = vmul.f32 %v11736_v14, %v11722_v32  ;;  %v658_v39 = vmul.f32 %v11742_v7, %v608_v18 }
 0x262   : > { %v6082_v30 = vadd.f32 %v6040_v0, %v5957_v56  ;;  %v15923_v52 = vrot.slane %v12347_v29, 6  ;;  %v784_v63 = vmul.f32 %v11752_v27, %v608_v18  ;;  %v910_v8 = vmul.f32 %v11765_v25, %v608_v18 }
 0x263   : > { %v6290_v23 = vsel %vm1196_vm4, %v6288_v2, %v15918_v20  ;;  %v716_v58 = vrot.slane %v658_v39, 1  ;;  %v1036_v11 = vmul.f32 %v11777_v35, %v608_v18  ;;  %v1162_v60 = vmul.f32 %v11795_v55, %v608_v18  ;;  %v1458_v39 = vld [vmem:[#allocation2 + $0x88] sm:$0x3f] }
 0x264   : > { %v6207_v46 = vadd.f32 %v6165_v50, %v6082_v30  ;;  %v6415_v32 = vsel %vm1322_vm5, %v6413_v17, %v15923_v52  ;;  %v842_v56 = vrot.slane %v784_v63, 2  ;;  %v968_v0 = vrot.slane %v910_v8, 3 }
 0x265   : > { %v16932_v38 = vrot.slane %v11747_v41, 1  ;;  %v1094_v51 = vrot.slane %v1036_v11, 4  ;;  %v1220_v44 = vrot.slane %v1162_v60, 5  ;;  %v1288_v2 = vmul.f32 %v11808_v26, %v608_v18 }
 0x266   : > { %v6332_v20 = vadd.f32 %v6290_v23, %v6207_v46  ;;  %v16933_v55 = vrot.slane %v11760_v42, 2  ;;  %v16934_v30 = vrot.slane %v11772_v16, 3  ;;  %v16935_v63 = vrot.slane %v11785_v43, 4 }
 0x267   : > { %v717_v6 = vsel %vm692_vm0, %v16932_v38, %v716_v58  ;;  %v16936_v38 = vrot.slane %v11800_v37, 5  ;;  %v1346_v18 = vrot.slane %v1288_v2, 6  ;;  %v1634_v16 = vmul.f32 %v11853_v34, %v1458_v39  ;;  %v2303_v2 = vld [vmem:[#allocation2 + $0xa0] sm:$0x3f] }
 0x268   : > { %v758_v35 = vadd.f32 %v717_v6, %v632_v22  ;;  %v843_v50 = vsel %vm818_vm1, %v16933_v55, %v842_v56  ;;  %v969_v17 = vsel %vm944_vm2, %v16934_v30, %v968_v0  ;;  %v1095_v41 = vsel %vm1070_vm3, %v16935_v63, %v1094_v51  ;;  %v16939_v56 = vld [vmem:[#allocation77_spill] sm:$0xff] }
 0x269   : > { %v1221_v8 = vsel %vm1196_vm4, %v16936_v38, %v1220_v44  ;;  %v1483_v6 = vmul.f32 %v11827_v9, %v11817_v33  ;;  %v6457_v22 = vadd.f32 %v6415_v32, %v6332_v20  ;;  %v1509_v55 = vmul.f32 %v11839_v12, %v1458_v39  ;;  %v16942_v38 = vld [vmem:[#allocation62_spill] sm:$0xff] }
 0x26a   : > { %v884_v42 = vadd.f32 %v843_v50, %v758_v35  ;;  %v16937_v23 = vrot.slane %v11813_v10, 6  ;;  %v1759_v51 = vmul.f32 %v11866_v54, %v1458_v39  ;;  %v1884_v37 = vmul.f32 %v11878_v1, %v1458_v39  ;;  %v16940_v50 = vld [vmem:[#allocation75_spill] sm:$0xff] }
 0x26b   : > { %v2009_v44 = vmul.f32 %v11900_v31, %v1458_v39  ;;  %v12390_v58 = vadd.f32 %v6457_v22, %v5644_v15  ;;  %v1566_v60 = vrot.slane %v1509_v55, 1  ;;  %v1691_v20 = vrot.slane %v1634_v16, 2  ;;  %v16945_v22 = vld [vmem:[#allocation18_spill] sm:$0xff]  ;;  %v16946_v16 = vld [vmem:[#allocation65_spill] sm:$0xff]  ;;  %v16962_v31 = vld [vmem:[#allocation91_spill] sm:$0xff] }
 0x26c   : > { %v1347_v43 = vsel %vm1322_vm5, %v16937_v23, %v1346_v18  ;;  %v1010_v11 = vadd.f32 %v969_v17, %v884_v42  ;;  %v1816_v35 = vrot.slane %v1759_v51, 3  ;;  %v1941_v46 = vrot.slane %v1884_v37, 4  ;;  %v16944_v17 = vld [vmem:[#allocation20_spill] sm:$0xff] }
 0x26d   : > { %16938 = vst [vmem:[#allocation40_spill] sm:$0xff] %v12390_v58  ;;  %v2066_v32 = vrot.slane %v2009_v44, 5  ;;  %v2134_v0 = vmul.f32 %v16939_v56, %v1458_v39  ;;  %6545 = vadd.xlane.f32.xlu0 %v12390_v58  ;;  %v16941_v30 = vrot.slane %v16940_v50, 1  ;;  %v16943_v18 = vrot.slane %v16942_v38, 2  ;;  %v16948_v51 = vld [vmem:[#allocation76_spill] sm:$0xff]  ;;  %v16952_v38 = vld [vmem:[#allocation21_spill] sm:$0xff] }
 0x26e   : > { %v1136_v10 = vadd.f32 %v1095_v41, %v1010_v11  ;;  %v2328_v42 = vmul.f32 %v16945_v22, %v16944_v17  ;;  %v16947_v23 = vrot.slane %v16946_v16, 3  ;;  %v16949_v37 = vrot.slane %v16948_v51, 4  ;;  %v16950_v44 = vld [vmem:[#allocation24_spill] sm:$0xff]  ;;  %v16955_v16 = vld [vmem:[#allocation10_spill] sm:$0xff]  ;;  %v16957_v56 = vld [vmem:[#allocation19_spill] sm:$0xff] }
 0x26f   : > { %v1567_v63 = vsel %vm692_vm0, %v16941_v30, %v1566_v60  ;;  %v1692_v15 = vsel %vm818_vm1, %v16943_v18, %v1691_v20  ;;  %v16951_v11 = vrot.slane %v16950_v44, 5  ;;  %v2191_v30 = vrot.slane %v2134_v0, 6  ;;  %v16953_v18 = vld [vmem:[#allocation92_spill] sm:$0xff] }
 0x270   : > { %v1608_v55 = vadd.f32 %v1567_v63, %v1483_v6  ;;  %v1817_v39 = vsel %vm944_vm2, %v16947_v23, %v1816_v35  ;;  %v1942_v41 = vsel %vm1070_vm3, %v16949_v37, %v1941_v46  ;;  %v1262_v50 = vadd.f32 %v1221_v8, %v1136_v10  ;;  %v16954_v6 = vld [vmem:[#allocation78_spill] sm:$0xff]  ;;  %v16956_v35 = vld [vmem:[#allocation11_spill] sm:$0xff] }
 0x271   : > { %v2067_v60 = vsel %vm1196_vm4, %v16951_v11, %v2066_v32  ;;  %v2354_v20 = vmul.f32 %v16952_v38, %v2303_v2  ;;  %v2479_v52 = vmul.f32 %v16953_v18, %v2303_v2  ;;  %v2604_v63 = vmul.f32 %v16954_v6, %v2303_v2  ;;  %v3148_v38 = vld [vmem:[#allocation2 + $0xb8] sm:$0x3f]  ;;  %v16959_v18 = vld [vmem:[#allocation69_spill] sm:$0xff] }
 0x272   : > { %v1733_v58 = vadd.f32 %v1692_v15, %v1608_v55  ;;  %v2729_v22 = vmul.f32 %v16955_v16, %v2303_v2  ;;  %v2854_v23 = vmul.f32 %v16956_v35, %v2303_v2  ;;  %v1388_v51 = vadd.f32 %v1347_v43, %v1262_v50  ;;  %v16960_v55 = vld [vmem:[#allocation22_spill] sm:$0xff] }
 0x273   : > { %v16958_v46 = vrot.slane %v16957_v56, 6  ;;  %v2411_v44 = vrot.slane %v2354_v20, 1  ;;  %v2536_v32 = vrot.slane %v2479_v52, 2  ;;  %v2661_v0 = vrot.slane %v2604_v63, 3  ;;  %v16964_v56 = vld [vmem:[#allocation12_spill] sm:$0xff]  ;;  %v16965_v52 = vld [vmem:[#allocation79_spill] sm:$0xff] }
 0x274   : > { %v1858_v8 = vadd.f32 %v1817_v39, %v1733_v58  ;;  %v2786_v10 = vrot.slane %v2729_v22, 4  ;;  %v2911_v11 = vrot.slane %v2854_v23, 5  ;;  %v1420_v15 = vadd.f32 %v16959_v18, %v1388_v51  ;;  %v16967_v39 = vld [vmem:[#allocation25_spill] sm:$0xff]  ;;  %v16969_v51 = vld [vmem:[#allocation95_spill] sm:$0xff] }
 0x275   : > { %v2192_v37 = vsel %vm1322_vm5, %v16958_v46, %v2191_v30  ;;  %v16961_v6 = vrot.slane %v16960_v55, 1  ;;  %v16963_v35 = vrot.slane %v16962_v31, 2  ;;  %v2979_v50 = vmul.f32 %v16964_v56, %v2303_v2  ;;  %v16971_v31 = vld [vmem:[#allocation82_spill] sm:$0xff]  ;;  %v16974_v55 = vld [vmem:[#allocation31_spill] sm:$0xff] }
 0x276   : > { %v1983_v30 = vadd.f32 %v1942_v41, %v1858_v8  ;;  %v16966_v58 = vrot.slane %v16965_v52, 3  ;;  %v16968_v63 = vrot.slane %v16967_v39, 4  ;;  %v16970_v46 = vrot.slane %v16969_v51, 5  ;;  %v16975_v52 = vld [vmem:[#allocation81_spill] sm:$0xff] }
 0x277   : > { %v2412_v16 = vsel %vm692_vm0, %v16961_v6, %v2411_v44  ;;  %v2537_v43 = vsel %vm818_vm1, %v16963_v35, %v2536_v32  ;;  %v3036_v44 = vrot.slane %v2979_v50, 6  ;;  %v3173_v35 = vmul.f32 %v16971_v31, %v12024_v49  ;;  %v16972_v32 = vld [vmem:[#allocation23_spill] sm:$0xff] }
 0x278   : > { %v2453_v20 = vadd.f32 %v2412_v16, %v2328_v42  ;;  %v2662_v22 = vsel %vm944_vm2, %v16966_v58, %v2661_v0  ;;  %v2787_v23 = vsel %vm1070_vm3, %v16968_v63, %v2786_v10  ;;  %v2912_v6 = vsel %vm1196_vm4, %v16970_v46, %v2911_v11  ;;  %v16973_v16 = vld [vmem:[#allocation26_spill] sm:$0xff]  ;;  %v16977_v63 = vld [vmem:[#allocation27_spill] sm:$0xff]  ;;  %v16978_v11 = vld [vmem:[#allocation93_spill] sm:$0xff] }
 0x279   : > { %v3199_v2 = vmul.f32 %v16972_v32, %v3148_v38  ;;  %v2108_v41 = vadd.f32 %v2067_v60, %v1983_v30  ;;  %v3324_v8 = vmul.f32 %v16973_v16, %v3148_v38  ;;  %v3449_v0 = vmul.f32 %v16974_v55, %v3148_v38  ;;  %v16979_v32 = vld [vmem:[#allocation89_spill] sm:$0xff]  ;;  %v16981_v55 = vld [vmem:[#allocation48_spill] sm:$0xff] }
 0x27a   : > { %v2578_v42 = vadd.f32 %v2537_v43, %v2453_v20  ;;  %v16976_v58 = vrot.slane %v16975_v52, 6  ;;  %v3574_v51 = vmul.f32 %v16977_v63, %v3148_v38  ;;  %v3699_v50 = vmul.f32 %v16978_v11, %v3148_v38  ;;  %v3993_v52 = vld [vmem:[#allocation2 + $0xd0] sm:$0x3f] }
 0x27b   : > { %v3256_v39 = vrot.slane %v3199_v2, 1  ;;  %v2233_v46 = vadd.f32 %v2192_v37, %v2108_v41  ;;  %v3381_v31 = vrot.slane %v3324_v8, 2  ;;  %v3506_v49 = vrot.slane %v3449_v0, 3  ;;  %v16984_v37 = vld [vmem:[#allocation32_spill] sm:$0xff]  ;;  %v16988_v0 = vld [vmem:[#allocation94_spill] sm:$0xff] }
 0x27c   : > { %v3037_v10 = vsel %vm1322_vm5, %v16976_v58, %v3036_v44  ;;  %v2703_v56 = vadd.f32 %v2662_v22, %v2578_v42  ;;  %v16980_v60 = vrot.slane %v16979_v32, 1  ;;  %v3631_v30 = vrot.slane %v3574_v51, 4  ;;  %v16982_v58 = vld [vmem:[#allocation30_spill] sm:$0xff]  ;;  %v16986_v42 = vld [vmem:[#allocation83_spill] sm:$0xff] }
 0x27d   : > { %v3756_v20 = vrot.slane %v3699_v50, 5  ;;  %v3824_v16 = vmul.f32 %v16981_v55, %v3148_v38  ;;  %v2265_v18 = vadd.f32 %v2233_v46, %v1420_v15  ;;  %v16983_v63 = vrot.slane %v16982_v58, 2  ;;  %v16991_v50 = vld [vmem:[#allocation86_spill] sm:$0xff]  ;;  %v16995_v58 = vld [vmem:[#allocation45_spill] sm:$0xff] }
 0x27e   : > { %v3257_v43 = vsel %vm692_vm0, %v16980_v60, %v3256_v39  ;;  %v2828_v44 = vadd.f32 %v2787_v23, %v2703_v56  ;;  %v16985_v22 = vrot.slane %v16984_v37, 3  ;;  %v16987_v32 = vrot.slane %v16986_v42, 4  ;;  %v16990_v23 = vld [vmem:[#allocation85_spill] sm:$0xff]  ;;  %v16994_v60 = vld [vmem:[#allocation88_spill] sm:$0xff] }
 0x27f   : > { %v3298_v2 = vadd.f32 %v3257_v43, %v3173_v35  ;;  %v3382_v11 = vsel %vm818_vm1, %v16983_v63, %v3381_v31  ;;  %v16989_v39 = vrot.slane %v16988_v0, 5  ;;  %v3881_v51 = vrot.slane %v3824_v16, 6  ;;  %v16992_v63 = vld [vmem:[#allocation36_spill] sm:$0xff] }
 0x280   : > { %v3507_v41 = vsel %vm944_vm2, %v16985_v22, %v3506_v49  ;;  %v3632_v8 = vsel %vm1070_vm3, %v16987_v32, %v3631_v30  ;;  %v2953_v15 = vadd.f32 %v2912_v6, %v2828_v44  ;;  %v4018_v35 = vmul.f32 %v16990_v23, %v12129_v5  ;;  %v12474_v6 = vld [vmem:[%s15312_s1 + $0x25] ss:$0 sm:$0xff]  ;;  %v12480_v32 = vld [vmem:[%s15312_s1 + $0x26] ss:$0 sm:$0xff] }
 0x281   : > { %v3757_v38 = vsel %vm1196_vm4, %v16989_v39, %v3756_v20  ;;  %v3423_v56 = vadd.f32 %v3382_v11, %v3298_v2  ;;  %v4044_v31 = vmul.f32 %v16991_v50, %v3993_v52  ;;  %v16993_v46 = vrot.slane %v16992_v63, 6  ;;  %16996 = vst [vmem:[#allocation41_spill] sm:$0xff] %v12474_v6  ;;  %v16997_v39 = vld [vmem:[#allocation87_spill] sm:$0xff] }
 0x282   : > { %v4169_v43 = vmul.f32 %v16994_v60, %v3993_v52  ;;  %v4294_v30 = vmul.f32 %v16995_v58, %v3993_v52  ;;  %v4419_v37 = vmul.f32 %v12187_v28, %v3993_v52  ;;  %v3078_v22 = vadd.f32 %v3037_v10, %v2953_v15 }
 0x283   : > { %v3882_v49 = vsel %vm1322_vm5, %v16993_v46, %v3881_v51  ;;  %v3548_v20 = vadd.f32 %v3507_v41, %v3423_v56  ;;  %v4101_v16 = vrot.slane %v4044_v31, 1  ;;  %v4544_v11 = vmul.f32 %v12474_v6, %v3993_v52  ;;  %v4838_v31 = vld [vmem:[#allocation2 + $0xe8] sm:$0x3f]  ;;  %v16999_v46 = vld [vmem:[#allocation28_spill] sm:$0xff] }
 0x284   : > { %v4226_v44 = vrot.slane %v4169_v43, 2  ;;  %v4351_v2 = vrot.slane %v4294_v30, 3  ;;  %v4476_v42 = vrot.slane %v4419_v37, 4  ;;  %v4669_v0 = vmul.f32 %v12480_v32, %v3993_v52 }
 0x285   : > { %v3110_v10 = vadd.f32 %v3078_v22, %v2265_v18  ;;  %v3673_v41 = vadd.f32 %v3632_v8, %v3548_v20  ;;  %v16998_v51 = vrot.slane %v16997_v39, 1  ;;  %v4601_v56 = vrot.slane %v4544_v11, 5  ;;  %v12528_v39 = vld [vmem:[%s15312_s1 + $0x2c] ss:$0 sm:$0xff] }
 0x286   : > { %v17000_v43 = vrot.slane %v16999_v46, 2  ;;  %v17001_v37 = vrot.slane %v12182_v48, 3  ;;  %v17002_v28 = vrot.slane %v12193_v19, 4  ;;  %v17003_v8 = vrot.slane %v12210_v13, 5  ;;  %v12507_v19 = vld [vmem:[%s15312_s1 + $0x29] ss:$0 sm:$0xff] }
 0x287   : > { %v4102_v15 = vsel %vm692_vm0, %v16998_v51, %v4101_v16  ;;  %v3798_v52 = vadd.f32 %v3757_v38, %v3673_v41  ;;  %v4726_v20 = vrot.slane %v4669_v0, 6  ;;  %v8159_v16 = vld [vmem:[#allocation2 + $0xe0] sm:$0xff]  ;;  %17005 = vst [vmem:[#allocation46_spill] sm:$0xff] %v12507_v19  ;;  %v12513_v13 = vld [vmem:[%s15312_s1 + $0x2a] ss:$0 sm:$0xff]  ;;  %v17008_v0 = vrot.slane %v12219_v45, 6 }
 0x288   : > { %v4143_v63 = vadd.f32 %v4102_v15, %v4018_v35  ;;  %v4227_v30 = vsel %vm818_vm1, %v17000_v43, %v4226_v44  ;;  %v4352_v6 = vsel %vm944_vm2, %v17001_v37, %v4351_v2  ;;  %v4477_v18 = vsel %vm1070_vm3, %v17002_v28, %v4476_v42  ;;  %v12501_v35 = vld [vmem:[%s15312_s1 + $0x28] ss:$0 sm:$0xff]  ;;  %17006 = vst [vmem:[#allocation53_spill] sm:$0xff] %v12513_v13  ;;  %v12519_v44 = vld [vmem:[%s15312_s1 + $0x2b] ss:$0 sm:$0xff] }
 0x289   : > { %v4602_v22 = vsel %vm1196_vm4, %v17003_v8, %v4601_v56  ;;  %17004 = vst [vmem:[#allocation44_spill] sm:$0xff] %v12501_v35  ;;  %v4863_v48 = vmul.f32 %v8159_v16, %v12501_v35  ;;  %v4889_v28 = vmul.f32 %v12507_v19, %v4838_v31  ;;  %v5014_v38 = vmul.f32 %v12513_v13, %v4838_v31  ;;  %v12534_v15 = vld [vmem:[%s15312_s1 + $0x2d] ss:$0 sm:$0xff] }
 0x28a   : > { %v4268_v11 = vadd.f32 %v4227_v30, %v4143_v63  ;;  %17007 = vst [vmem:[#allocation55_spill] sm:$0xff] %v12519_v44  ;;  %v5139_v2 = vmul.f32 %v12519_v44, %v4838_v31  ;;  %v3923_v42 = vadd.f32 %v3882_v49, %v3798_v52  ;;  %v4727_v41 = vsel %vm1322_vm5, %v17008_v0, %v4726_v20  ;;  %v12540_v52 = vld [vmem:[%s15312_s1 + $0x2e] ss:$0 sm:$0xff]  ;;  %v5683_v20 = vld [vmem:[#allocation2 + $0x100] sm:$0x3f] }
 0x28b   : > { %17009 = vst [vmem:[#allocation59_spill] sm:$0xff] %v12528_v39  ;;  %v5264_v51 = vmul.f32 %v12528_v39, %v4838_v31  ;;  %17010 = vst [vmem:[#allocation63_spill] sm:$0xff] %v12534_v15  ;;  %v5389_v56 = vmul.f32 %v12534_v15, %v4838_v31  ;;  %v4946_v49 = vrot.slane %v4889_v28, 1  ;;  %v5071_v46 = vrot.slane %v5014_v38, 2 }
 0x28c   : > { %v4393_v63 = vadd.f32 %v4352_v6, %v4268_v11  ;;  %v5196_v45 = vrot.slane %v5139_v2, 3  ;;  %v3955_v43 = vadd.f32 %v3923_v42, %v3110_v10  ;;  %v5514_v8 = vmul.f32 %v12540_v52, %v4838_v31 }
 0x28d   : > { %v5321_v30 = vrot.slane %v5264_v51, 4  ;;  %v5446_v37 = vrot.slane %v5389_v56, 5  ;;  %v17011_v0 = vrot.slane %v12229_v57, 1  ;;  %v17012_v6 = vrot.slane %v12238_v61, 2  ;;  %v12561_v61 = vld [vmem:[%s15312_s1 + $0x30] ss:$0 sm:$0xff] }
 0x28e   : > { %v4518_v16 = vadd.f32 %v4477_v18, %v4393_v63  ;;  %v17013_v10 = vrot.slane %v12249_v3, 3  ;;  %v17014_v2 = vrot.slane %v12258_v40, 4  ;;  %v17015_v31 = vrot.slane %v12269_v36, 5  ;;  %17016 = vst [vmem:[#allocation51_spill] sm:$0xff] %v12561_v61  ;;  %v12568_v40 = vld [vmem:[%s15312_s1 + $0x31] ss:$0 sm:$0xff] }
 0x28f   : > { %v4947_v15 = vsel %vm692_vm0, %v17011_v0, %v4946_v49  ;;  %v5072_v11 = vsel %vm818_vm1, %v17012_v6, %v5071_v46  ;;  %v5571_v57 = vrot.slane %v5514_v8, 6  ;;  %v5708_v3 = vmul.f32 %v12561_v61, %v12282_v24  ;;  %17017 = vst [vmem:[#allocation33_spill] sm:$0xff] %v12568_v40  ;;  %v12574_v36 = vld [vmem:[%s15312_s1 + $0x32] ss:$0 sm:$0xff]  ;;  %v12583_v49 = vld [vmem:[%s15312_s1 + $0x33] ss:$0 sm:$0xff] }
 0x290   : > { %v5197_v28 = vsel %vm944_vm2, %v17013_v10, %v5196_v45  ;;  %v4988_v38 = vadd.f32 %v4947_v15, %v4863_v48  ;;  %v5322_v42 = vsel %vm1070_vm3, %v17014_v2, %v5321_v30  ;;  %v5447_v18 = vsel %vm1196_vm4, %v17015_v31, %v5446_v37  ;;  %17018 = vst [vmem:[#allocation39_spill] sm:$0xff] %v12574_v36  ;;  %v12589_v45 = vld [vmem:[%s15312_s1 + $0x34] ss:$0 sm:$0xff] }
 0x291   : > { %v4643_v51 = vadd.f32 %v4602_v22, %v4518_v16  ;;  %v5734_v48 = vmul.f32 %v12568_v40, %v5683_v20  ;;  %v5859_v22 = vmul.f32 %v12574_v36, %v5683_v20  ;;  %v17019_v56 = vrot.slane %v12280_v4, 6  ;;  %17020 = vst [vmem:[#allocation58_spill] sm:$0xff] %v12583_v49  ;;  %17021 = vst [vmem:[#allocation61_spill] sm:$0xff] %v12589_v45  ;;  %v12595_v4 = vld [vmem:[%s15312_s1 + $0x35] ss:$0 sm:$0xff] }
 0x292   : > { %v5113_v15 = vadd.f32 %v5072_v11, %v4988_v38  ;;  %v5984_v46 = vmul.f32 %v12583_v49, %v5683_v20  ;;  %v6109_v30 = vmul.f32 %v12589_v45, %v5683_v20  ;;  %v6234_v0 = vmul.f32 %v12595_v4, %v5683_v20  ;;  %v12601_v38 = vld [vmem:[%s15312_s1 + $0x36] ss:$0 sm:$0xff] }
 0x293   : > { %v5572_v63 = vsel %vm1322_vm5, %v17019_v56, %v5571_v57  ;;  %v4768_v37 = vadd.f32 %v4727_v41, %v4643_v51  ;;  %v5791_v8 = vrot.slane %v5734_v48, 1  ;;  %v5916_v16 = vrot.slane %v5859_v22, 2 }
 0x294   : > { %v5238_v6 = vadd.f32 %v5197_v28, %v5113_v15  ;;  %v6041_v11 = vrot.slane %v5984_v46, 3  ;;  %v6166_v10 = vrot.slane %v6109_v30, 4  ;;  %v6359_v2 = vmul.f32 %v12601_v38, %v5683_v20 }
 0x295   : > { %v4800_v41 = vadd.f32 %v4768_v37, %v3955_v43  ;;  %v17022_v31 = vrot.slane %v12298_v21, 1  ;;  %v17023_v51 = vrot.slane %v12304_v47, 2  ;;  %v6291_v22 = vrot.slane %v6234_v0, 5 }
 0x296   : > { %v5363_v28 = vadd.f32 %v5322_v42, %v5238_v6  ;;  %v17024_v56 = vrot.slane %v12315_v59, 3  ;;  %v17025_v30 = vrot.slane %v12321_v53, 4  ;;  %v17026_v43 = vrot.slane %v12338_v62, 5 }
 0x297   : > { %v5792_v57 = vsel %vm692_vm0, %v17022_v31, %v5791_v8  ;;  %v5917_v48 = vsel %vm818_vm1, %v17023_v51, %v5916_v16  ;;  %v6416_v37 = vrot.slane %v6359_v2, 6  ;;  %v17027_v8 = vld [vmem:[#allocation57_spill] sm:$0xff]  ;;  %v12625_v59 = vmul.f32 %v11742_v7, %v11817_v33 }
 0x298   : > { %v5833_v15 = vadd.f32 %v5792_v57, %v5708_v3  ;;  %v6042_v46 = vsel %vm944_vm2, %v17024_v56, %v6041_v11  ;;  %v6167_v20 = vsel %vm1070_vm3, %v17025_v30, %v6166_v10  ;;  %v6292_v21 = vsel %vm1196_vm4, %v17026_v43, %v6291_v22  ;;  %v17029_v51 = vld [vmem:[#allocation73_spill] sm:$0xff] }
 0x299   : > { %v633_v47 = vmul.f32 %v11736_v14, %v17027_v8  ;;  %v659_v42 = vmul.f32 %v11742_v7, %v17027_v8  ;;  %v5488_v3 = vadd.f32 %v5447_v18, %v5363_v28  ;;  %v785_v53 = vmul.f32 %v11752_v27, %v17027_v8 }
 0x29a   : > { %v5958_v16 = vadd.f32 %v5917_v48, %v5833_v15  ;;  %v17028_v62 = vrot.slane %v12347_v29, 6  ;;  %v12634_v14 = vmul.f32 %v11752_v27, %v11817_v33  ;;  %v911_v18 = vmul.f32 %v11765_v25, %v17027_v8 }
 0x29b   : > { %v718_v6 = vrot.slane %v659_v42, 1  ;;  %v5613_v11 = vadd.f32 %v5572_v63, %v5488_v3  ;;  %v15951_v7 = vrot.slane %v12625_v59, 1  ;;  %v844_v2 = vrot.slane %v785_v53, 2 }
 0x29c   : > { %v6417_v0 = vsel %vm1322_vm5, %v17028_v62, %v6416_v37  ;;  %v6083_v10 = vadd.f32 %v6042_v46, %v5958_v16  ;;  %v15949_v31 = vrot.slane %v12634_v14, 2  ;;  %v12642_v29 = vmul.f32 %v11765_v25, %v11817_v33 }
 0x29d   : > { %v970_v57 = vrot.slane %v911_v18, 3  ;;  %v1037_v48 = vmul.f32 %v17029_v51, %v17027_v8  ;;  %v5645_v27 = vadd.f32 %v5613_v11, %v4800_v41  ;;  %v720_v63 = vsel %vm692_vm0, %v718_v6, %v15951_v7 }
 0x29e   : > { %v6208_v22 = vadd.f32 %v6167_v20, %v6083_v10  ;;  %v12651_v28 = vmul.f32 %v17029_v51, %v11817_v33  ;;  %v759_v15 = vadd.f32 %v720_v63, %v633_v47  ;;  %v846_v25 = vsel %vm818_vm1, %v844_v2, %v15949_v31  ;;  %v17030_v20 = vld [vmem:[#allocation56_spill] sm:$0xff]  ;;  %v17031_v2 = vld [vmem:[#allocation17_spill] sm:$0xff] }
 0x29f   : > { %v15946_v56 = vrot.slane %v12642_v29, 3  ;;  %v1096_v46 = vrot.slane %v1037_v48, 4  ;;  %v1163_v43 = vmul.f32 %v17030_v20, %v17027_v8  ;;  %v12662_v37 = vmul.f32 %v17030_v20, %v11817_v33 }
 0x2a0   : > { %v6333_v30 = vadd.f32 %v6292_v21, %v6208_v22  ;;  %v15945_v41 = vrot.slane %v12651_v28, 4  ;;  %v885_v42 = vadd.f32 %v846_v25, %v759_v15  ;;  %v1289_v3 = vmul.f32 %v11808_v26, %v17027_v8 }
 0x2a1   : > { %v972_v47 = vsel %vm944_vm2, %v970_v57, %v15946_v56  ;;  %v12671_v21 = vmul.f32 %v11808_v26, %v11817_v33  ;;  %v1222_v62 = vrot.slane %v1163_v43, 5  ;;  %v15942_v6 = vrot.slane %v12662_v37, 5 }
 0x2a2   : > { %v6458_v16 = vadd.f32 %v6417_v0, %v6333_v30  ;;  %v1098_v53 = vsel %vm1070_vm3, %v1096_v46, %v15945_v41  ;;  %v1011_v18 = vadd.f32 %v972_v47, %v885_v42  ;;  %v1348_v11 = vrot.slane %v1289_v3, 6 }
 0x2a3   : > { %v15941_v10 = vrot.slane %v12671_v21, 6  ;;  %v1484_v57 = vmul.f32 %v11827_v9, %v17031_v2  ;;  %v1224_v26 = vsel %vm1196_vm4, %v1222_v62, %v15942_v6  ;;  %v1510_v33 = vmul.f32 %v11839_v12, %v17031_v2 }
 0x2a4   : > { %v12680_v8 = vadd.f32 %v6458_v16, %v5645_v27  ;;  %v12689_v0 = vmul.f32 %v11839_v12, %v16944_v17  ;;  %v1137_v51 = vadd.f32 %v1098_v53, %v1011_v18  ;;  %v1635_v9 = vmul.f32 %v11853_v34, %v17031_v2 }
 0x2a5   : > { %v1350_v48 = vsel %vm1322_vm5, %v1348_v11, %v15941_v10  ;;  %v12698_v27 = vmul.f32 %v11853_v34, %v16944_v17  ;;  %v1568_v22 = vrot.slane %v1510_v33, 1  ;;  %v1760_v12 = vmul.f32 %v11866_v54, %v17031_v2  ;;  %v17033_v11 = vld [vmem:[#allocation90_spill] sm:$0xff]  ;;  %v17034_v33 = vld [vmem:[#allocation69_spill] sm:$0xff] }
 0x2a6   : > { %17032 = vst [vmem:[#allocation64_spill] sm:$0xff] %v12680_v8  ;;  %6547 = vadd.xlane.f32.xlu1 %v12680_v8  ;;  %v15939_v63 = vrot.slane %v12689_v0, 1  ;;  %v12706_v15 = vmul.f32 %v11866_v54, %v16944_v17  ;;  %v1263_v25 = vadd.f32 %v1224_v26, %v1137_v51  ;;  %v1693_v46 = vrot.slane %v1635_v9, 2 }
 0x2a7   : > { %v15938_v30 = vrot.slane %v12698_v27, 2  ;;  %v1885_v34 = vmul.f32 %v11878_v1, %v17031_v2  ;;  %v1818_v43 = vrot.slane %v1760_v12, 3  ;;  %v12717_v47 = vmul.f32 %v11878_v1, %v16944_v17 }
 0x2a8   : > { %v1570_v20 = vsel %vm692_vm0, %v1568_v22, %v15939_v63  ;;  %v15937_v42 = vrot.slane %v12706_v15, 3  ;;  %v1389_v54 = vadd.f32 %v1350_v48, %v1263_v25  ;;  %v2010_v26 = vmul.f32 %v17033_v11, %v17031_v2  ;;  %v17035_v48 = vld [vmem:[#allocation77_spill] sm:$0xff] }
 0x2a9   : > { %v1609_v3 = vadd.f32 %v1570_v20, %v1484_v57  ;;  %v1695_v16 = vsel %vm818_vm1, %v1693_v46, %v15938_v30  ;;  %v1943_v53 = vrot.slane %v1885_v34, 4  ;;  %v15935_v18 = vrot.slane %v12717_v47, 4  ;;  %v17036_v34 = vld [vmem:[#allocation84_spill] sm:$0xff]  ;;  %v17037_v20 = vld [vmem:[#allocation18_spill] sm:$0xff] }
 0x2aa   : > { %v1820_v62 = vsel %vm944_vm2, %v1818_v43, %v15937_v42  ;;  %v12730_v1 = vmul.f32 %v17033_v11, %v16944_v17  ;;  %v1421_v57 = vadd.f32 %v17034_v33, %v1389_v54  ;;  %v2135_v9 = vmul.f32 %v17035_v48, %v17031_v2  ;;  %v17038_v2 = vld [vmem:[#allocation21_spill] sm:$0xff]  ;;  %v17039_v33 = vld [vmem:[#allocation74_spill] sm:$0xff] }
 0x2ab   : > { %v1734_v51 = vadd.f32 %v1695_v16, %v1609_v3  ;;  %v12737_v22 = vmul.f32 %v17035_v48, %v16944_v17  ;;  %v1945_v12 = vsel %vm1070_vm3, %v1943_v53, %v15935_v18  ;;  %v2068_v25 = vrot.slane %v2010_v26, 5  ;;  %v17040_v26 = vld [vmem:[#allocation92_spill] sm:$0xff]  ;;  %v17041_v18 = vld [vmem:[#allocation78_spill] sm:$0xff] }
 0x2ac   : > { %v15936_v46 = vrot.slane %v12730_v1, 5  ;;  %v2329_v43 = vmul.f32 %v17037_v20, %v17036_v34  ;;  %v2193_v54 = vrot.slane %v2135_v9, 6  ;;  %v2355_v16 = vmul.f32 %v17038_v2, %v17036_v34 }
 0x2ad   : > { %v1859_v11 = vadd.f32 %v1820_v62, %v1734_v51  ;;  %v15940_v3 = vrot.slane %v12737_v22, 6  ;;  %v12753_v53 = vmul.f32 %v17038_v2, %v17039_v33  ;;  %v2480_v48 = vmul.f32 %v17040_v26, %v17036_v34 }
 0x2ae   : > { %v2070_v17 = vsel %vm1196_vm4, %v2068_v25, %v15936_v46  ;;  %v12759_v62 = vmul.f32 %v17040_v26, %v17039_v33  ;;  %v2413_v20 = vrot.slane %v2355_v16, 1  ;;  %v2605_v25 = vmul.f32 %v17041_v18, %v17036_v34 }
 0x2af   : > { %v1984_v51 = vadd.f32 %v1945_v12, %v1859_v11  ;;  %v2195_v9 = vsel %vm1322_vm5, %v2193_v54, %v15940_v3  ;;  %v15943_v46 = vrot.slane %v12753_v53, 1  ;;  %v2538_v2 = vrot.slane %v2480_v48, 2  ;;  %v17042_v12 = vld [vmem:[#allocation10_spill] sm:$0xff] }
 0x2b0   : > { %v15944_v42 = vrot.slane %v12759_v62, 2  ;;  %v12770_v30 = vmul.f32 %v17041_v18, %v17039_v33  ;;  %v2663_v63 = vrot.slane %v2605_v25, 3  ;;  %v2730_v11 = vmul.f32 %v17042_v12, %v17036_v34 }
 0x2b1   : > { %v2109_v26 = vadd.f32 %v2070_v17, %v1984_v51  ;;  %v12776_v54 = vmul.f32 %v17042_v12, %v17039_v33  ;;  %v2415_v16 = vsel %vm692_vm0, %v2413_v20, %v15943_v46  ;;  %v17043_v17 = vld [vmem:[#allocation11_spill] sm:$0xff] }
 0x2b2   : > { %v2540_v48 = vsel %vm818_vm1, %v2538_v2, %v15944_v42  ;;  %v15947_v18 = vrot.slane %v12770_v30, 3  ;;  %v2855_v51 = vmul.f32 %v17043_v17, %v17036_v34  ;;  %v2454_v3 = vadd.f32 %v2415_v16, %v2329_v43  ;;  %v17044_v2 = vld [vmem:[#allocation12_spill] sm:$0xff]  ;;  %v17046_v16 = vld [vmem:[#allocation82_spill] sm:$0xff] }
 0x2b3   : > { %v2234_v25 = vadd.f32 %v2195_v9, %v2109_v26  ;;  %v2788_v10 = vrot.slane %v2730_v11, 4  ;;  %v15948_v6 = vrot.slane %v12776_v54, 4  ;;  %v12793_v20 = vmul.f32 %v17043_v17, %v17039_v33  ;;  %v17045_v11 = vld [vmem:[#allocation34_spill] sm:$0xff] }
 0x2b4   : > { %v2665_v12 = vsel %vm944_vm2, %v2663_v63, %v15947_v18  ;;  %v2913_v46 = vrot.slane %v2855_v51, 5  ;;  %v2980_v42 = vmul.f32 %v17044_v2, %v17036_v34  ;;  %v2579_v56 = vadd.f32 %v2540_v48, %v2454_v3  ;;  %v17047_v51 = vld [vmem:[#allocation23_spill] sm:$0xff] }
 0x2b5   : > { %v2266_v41 = vadd.f32 %v2234_v25, %v1421_v57  ;;  %v2790_v43 = vsel %vm1070_vm3, %v2788_v10, %v15948_v6  ;;  %v12802_v9 = vmul.f32 %v17044_v2, %v17039_v33  ;;  %v15950_v63 = vrot.slane %v12793_v20, 5  ;;  %v17049_v10 = vld [vmem:[#allocation26_spill] sm:$0xff] }
 0x2b6   : > { %v3038_v26 = vrot.slane %v2980_v42, 6  ;;  %v3174_v17 = vmul.f32 %v17046_v16, %v17045_v11  ;;  %v3200_v18 = vmul.f32 %v17047_v51, %v17045_v11  ;;  %v2704_v34 = vadd.f32 %v2665_v12, %v2579_v56  ;;  %v17050_v56 = vld [vmem:[#allocation31_spill] sm:$0xff] }
 0x2b7   : > { %v15952_v57 = vrot.slane %v12802_v9, 6  ;;  %v12812_v3 = vmul.f32 %v17047_v51, %v12129_v5  ;;  %v3325_v33 = vmul.f32 %v17049_v10, %v17045_v11  ;;  %v2915_v42 = vsel %vm1196_vm4, %v2913_v46, %v15950_v63 }
 0x2b8   : > { %v3258_v48 = vrot.slane %v3200_v18, 1  ;;  %v12821_v25 = vmul.f32 %v17049_v10, %v12129_v5  ;;  %v3450_v12 = vmul.f32 %v17050_v56, %v17045_v11  ;;  %v2829_v2 = vadd.f32 %v2790_v43, %v2704_v34  ;;  %v17051_v10 = vld [vmem:[#allocation27_spill] sm:$0xff]  ;;  %v17052_v34 = vld [vmem:[#allocation93_spill] sm:$0xff] }
 0x2b9   : > { %17048 = vst [vmem:[#allocation38_spill] sm:$0xff] %v12812_v3  ;;  %v3040_v16 = vsel %vm1322_vm5, %v3038_v26, %v15952_v57  ;;  %v15954_v51 = vrot.slane %v12812_v3, 1  ;;  %v3383_v6 = vrot.slane %v3325_v33, 2  ;;  %v12832_v46 = vmul.f32 %v17050_v56, %v12129_v5 }
 0x2ba   : > { %v15960_v31 = vrot.slane %v12821_v25, 2  ;;  %v3508_v18 = vrot.slane %v3450_v12, 3  ;;  %v3575_v63 = vmul.f32 %v17051_v10, %v17045_v11  ;;  %v2954_v7 = vadd.f32 %v2915_v42, %v2829_v2 }
 0x2bb   : > { %v3260_v43 = vsel %vm692_vm0, %v3258_v48, %v15954_v51  ;;  %v12841_v26 = vmul.f32 %v17051_v10, %v12129_v5  ;;  %v3700_v33 = vmul.f32 %v17052_v34, %v17045_v11  ;;  %v15959_v12 = vrot.slane %v12832_v46, 3  ;;  %v12854_v51 = vld [vmem:[#allocation2 + $0xd8] sm:$0xff] }
 0x2bc   : > { %v3299_v57 = vadd.f32 %v3260_v43, %v3174_v17  ;;  %v3385_v56 = vsel %vm818_vm1, %v3383_v6, %v15960_v31  ;;  %v3633_v8 = vrot.slane %v3575_v63, 4  ;;  %v3079_v42 = vadd.f32 %v3040_v16, %v2954_v7  ;;  %17053 = vst [vmem:[#allocation66_spill] sm:$0xff] %v12854_v51  ;;  %v12865_v63 = vld [vmem:[#allocation2 + $0xe0] sm:$0xff] }
 0x2bd   : > { %v15957_v2 = vrot.slane %v12841_v26, 4  ;;  %v12852_v48 = vmul.f32 %v17052_v34, %v12129_v5  ;;  %v3758_v10 = vrot.slane %v3700_v33, 5  ;;  %v3510_v17 = vsel %vm944_vm2, %v3508_v18, %v15959_v12 }
 0x2be   : > { %v3424_v3 = vadd.f32 %v3385_v56, %v3299_v57  ;;  %v3825_v6 = vmul.f32 %v16981_v55, %v17045_v11  ;;  %v12863_v7 = vmul.f32 %v16981_v55, %v12129_v5  ;;  %v3111_v16 = vadd.f32 %v3079_v42, %v2266_v41 }
 0x2bf   : > { %v3635_v43 = vsel %vm1070_vm3, %v3633_v8, %v15957_v2  ;;  %v15956_v57 = vrot.slane %v12852_v48, 5  ;;  %v4019_v34 = vmul.f32 %v16990_v23, %v12854_v51  ;;  %v4045_v5 = vmul.f32 %v16991_v50, %v12854_v51 }
 0x2c0   : > { %v3549_v18 = vadd.f32 %v3510_v17, %v3424_v3  ;;  %v3883_v33 = vrot.slane %v3825_v6, 6  ;;  %v15958_v11 = vrot.slane %v12863_v7, 6  ;;  %v12881_v41 = vmul.f32 %v16991_v50, %v12865_v63 }
 0x2c1   : > { %v3760_v55 = vsel %vm1196_vm4, %v3758_v10, %v15956_v57  ;;  %v4170_v8 = vmul.f32 %v16994_v60, %v12854_v51  ;;  %v12887_v23 = vmul.f32 %v16994_v60, %v12865_v63  ;;  %v4103_v42 = vrot.slane %v4045_v5, 1 }
 0x2c2   : > { %v3674_v3 = vadd.f32 %v3635_v43, %v3549_v18  ;;  %v3885_v56 = vsel %vm1322_vm5, %v3883_v33, %v15958_v11  ;;  %v4295_v10 = vmul.f32 %v16995_v58, %v12854_v51  ;;  %v15961_v17 = vrot.slane %v12881_v41, 1  ;;  %v17055_v43 = vld [vmem:[#allocation49_spill] sm:$0xff] }
 0x2c3   : > { %17054 = vst [vmem:[#allocation43_spill] sm:$0xff] %v12887_v23  ;;  %v4228_v50 = vrot.slane %v4170_v8, 2  ;;  %v15962_v6 = vrot.slane %v12887_v23, 2  ;;  %v12898_v57 = vmul.f32 %v16995_v58, %v12865_v63  ;;  %v4420_v18 = vmul.f32 %v17055_v43, %v12854_v51 }
 0x2c4   : > { %v3799_v60 = vadd.f32 %v3760_v55, %v3674_v3  ;;  %v4353_v2 = vrot.slane %v4295_v10, 3  ;;  %v12904_v33 = vmul.f32 %v17055_v43, %v12865_v63  ;;  %v4105_v5 = vsel %vm692_vm0, %v4103_v42, %v15961_v17  ;;  %v17056_v55 = vld [vmem:[#allocation41_spill] sm:$0xff] }
 0x2c5   : > { %v4230_v8 = vsel %vm818_vm1, %v4228_v50, %v15962_v6  ;;  %v15964_v58 = vrot.slane %v12898_v57, 3  ;;  %v4545_v3 = vmul.f32 %v17056_v55, %v12854_v51  ;;  %v4144_v11 = vadd.f32 %v4105_v5, %v4019_v34 }
 0x2c6   : > { %v3924_v10 = vadd.f32 %v3885_v56, %v3799_v60  ;;  %v4478_v12 = vrot.slane %v4420_v18, 4  ;;  %v15965_v31 = vrot.slane %v12904_v33, 4  ;;  %v12921_v42 = vmul.f32 %v17056_v55, %v12865_v63  ;;  %v17058_v18 = vld [vmem:[#allocation37_spill] sm:$0xff] }
 0x2c7   : > { %v4355_v43 = vsel %vm944_vm2, %v4353_v2, %v15964_v58  ;;  %v4603_v17 = vrot.slane %v4545_v3, 5  ;;  %v4670_v50 = vmul.f32 %v12480_v32, %v12854_v51  ;;  %v4269_v23 = vadd.f32 %v4230_v8, %v4144_v11 }
 0x2c8   : > { %v3956_v6 = vadd.f32 %v3924_v10, %v3111_v16  ;;  %v4480_v34 = vsel %vm1070_vm3, %v4478_v12, %v15965_v31  ;;  %v12930_v56 = vmul.f32 %v12480_v32, %v12865_v63  ;;  %v15970_v2 = vrot.slane %v12921_v42, 5 }
 0x2c9   : > { %v4728_v60 = vrot.slane %v4670_v50, 6  ;;  %v4864_v5 = vmul.f32 %v12501_v35, %v17058_v18  ;;  %v4890_v3 = vmul.f32 %v12507_v19, %v17058_v18  ;;  %v4394_v58 = vadd.f32 %v4355_v43, %v4269_v23 }
 0x2ca   : > { %17057 = vst [vmem:[#allocation47_spill] sm:$0xff] %v12930_v56  ;;  %v15972_v16 = vrot.slane %v12930_v56, 6  ;;  %v12940_v11 = vmul.f32 %v12507_v19, %v12282_v24  ;;  %v5015_v12 = vmul.f32 %v12513_v13, %v17058_v18  ;;  %v4605_v8 = vsel %vm1196_vm4, %v4603_v17, %v15970_v2 }
 0x2cb   : > { %v4948_v10 = vrot.slane %v4890_v3, 1  ;;  %v12949_v50 = vmul.f32 %v12513_v13, %v12282_v24  ;;  %v5140_v23 = vmul.f32 %v12519_v44, %v17058_v18  ;;  %v4519_v43 = vadd.f32 %v4480_v34, %v4394_v58 }
 0x2cc   : > { %17059 = vst [vmem:[#allocation50_spill] sm:$0xff] %v12940_v11  ;;  %v4730_v31 = vsel %vm1322_vm5, %v4728_v60, %v15972_v16  ;;  %v15975_v51 = vrot.slane %v12940_v11, 1  ;;  %v5073_v19 = vrot.slane %v5015_v12, 2  ;;  %v12960_v17 = vmul.f32 %v12519_v44, %v12282_v24  ;;  %v17060_v60 = vld [vmem:[#allocation63_spill] sm:$0xff]  ;;  %v12982_v11 = vld [vmem:[#allocation2 + $0x108] sm:$0xff] }
 0x2cd   : > { %v15981_v35 = vrot.slane %v12949_v50, 2  ;;  %v5198_v3 = vrot.slane %v5140_v23, 3  ;;  %v5265_v2 = vmul.f32 %v12528_v39, %v17058_v18  ;;  %v4644_v13 = vadd.f32 %v4605_v8, %v4519_v43  ;;  %17061 = vst [vmem:[#allocation42_spill] sm:$0xff] %v12982_v11 }
 0x2ce   : > { %v4950_v58 = vsel %vm692_vm0, %v4948_v10, %v15975_v51  ;;  %v12969_v34 = vmul.f32 %v12528_v39, %v12282_v24  ;;  %v5390_v12 = vmul.f32 %v17060_v60, %v17058_v18  ;;  %v15980_v56 = vrot.slane %v12960_v17, 3 }
 0x2cf   : > { %v4989_v16 = vadd.f32 %v4950_v58, %v4864_v5  ;;  %v5075_v23 = vsel %vm818_vm1, %v5073_v19, %v15981_v35  ;;  %v5323_v44 = vrot.slane %v5265_v2, 4  ;;  %v4769_v8 = vadd.f32 %v4730_v31, %v4644_v13  ;;  %v12993_v31 = vld [vmem:[#allocation2 + $0x110] sm:$0xff] }
 0x2d0   : > { %v15978_v43 = vrot.slane %v12969_v34, 4  ;;  %v12980_v10 = vmul.f32 %v17060_v60, %v12282_v24  ;;  %v5448_v51 = vrot.slane %v5390_v12, 5  ;;  %v5200_v5 = vsel %vm944_vm2, %v5198_v3, %v15980_v56 }
 0x2d1   : > { %v5114_v39 = vadd.f32 %v5075_v23, %v4989_v16  ;;  %v5515_v19 = vmul.f32 %v12540_v52, %v17058_v18  ;;  %v12991_v13 = vmul.f32 %v12540_v52, %v12282_v24  ;;  %v4801_v2 = vadd.f32 %v4769_v8, %v3956_v6 }
 0x2d2   : > { %v5325_v58 = vsel %vm1070_vm3, %v5323_v44, %v15978_v43  ;;  %v15979_v16 = vrot.slane %v12980_v10, 5  ;;  %v5709_v12 = vmul.f32 %v12561_v61, %v12982_v11  ;;  %v5735_v24 = vmul.f32 %v12568_v40, %v12982_v11 }
 0x2d3   : > { %v5239_v3 = vadd.f32 %v5200_v5, %v5114_v39  ;;  %v5573_v23 = vrot.slane %v5515_v19, 6  ;;  %v15985_v18 = vrot.slane %v12991_v13, 6  ;;  %v13009_v8 = vmul.f32 %v12568_v40, %v12993_v31 }
 0x2d4   : > { %v5450_v6 = vsel %vm1196_vm4, %v5448_v51, %v15979_v16  ;;  %v5860_v44 = vmul.f32 %v12574_v36, %v12982_v11  ;;  %v13015_v39 = vmul.f32 %v12574_v36, %v12993_v31  ;;  %v5793_v43 = vrot.slane %v5735_v24, 1 }
 0x2d5   : > { %17062 = vst [vmem:[#allocation54_spill] sm:$0xff] %v13009_v8  ;;  %v5364_v5 = vadd.f32 %v5325_v58, %v5239_v3  ;;  %v5575_v19 = vsel %vm1322_vm5, %v5573_v23, %v15985_v18  ;;  %v5985_v51 = vmul.f32 %v12583_v49, %v12982_v11  ;;  %v15990_v16 = vrot.slane %v13009_v8, 1 }
 0x2d6   : > { %17063 = vst [vmem:[#allocation15_spill] sm:$0xff] %v13015_v39  ;;  %v5918_v56 = vrot.slane %v5860_v44, 2  ;;  %v15989_v35 = vrot.slane %v13015_v39, 2  ;;  %v13026_v40 = vmul.f32 %v12583_v49, %v12993_v31  ;;  %v6110_v58 = vmul.f32 %v12589_v45, %v12982_v11 }
 0x2d7   : > { %v5489_v36 = vadd.f32 %v5450_v6, %v5364_v5  ;;  %v6043_v61 = vrot.slane %v5985_v51, 3  ;;  %v13032_v3 = vmul.f32 %v12589_v45, %v12993_v31  ;;  %v5795_v23 = vsel %vm692_vm0, %v5793_v43, %v15990_v16  ;;  %v611_v45 = vld [vmem:[#allocation2 + $0x88] sm:$0x3f] }
 0x2d8   : > { %17064 = vst [vmem:[#allocation16_spill] sm:$0xff] %v13026_v40  ;;  %v5920_v24 = vsel %vm818_vm1, %v5918_v56, %v15989_v35  ;;  %v15993_v44 = vrot.slane %v13026_v40, 3  ;;  %v6235_v6 = vmul.f32 %v12595_v4, %v12982_v11  ;;  %v5834_v51 = vadd.f32 %v5795_v23, %v5709_v12  ;;  %v8174_v23 = vld [vmem:[#allocation2 + $0x80] sm:$0xff] }
 0x2d9   : > { %17065 = vst [vmem:[#allocation70_spill] sm:$0xff] %v13032_v3  ;;  %v5614_v5 = vadd.f32 %v5575_v19, %v5489_v36  ;;  %v6168_v18 = vrot.slane %v6110_v58, 4  ;;  %v15992_v49 = vrot.slane %v13032_v3, 4  ;;  %v13049_v43 = vmul.f32 %v12595_v4, %v12993_v31  ;;  %v13064_v58 = vld [vmem:[%s15312_s1] ss:$0 sm:$0xff] }
 0x2da   : > { %v6045_v8 = vsel %vm944_vm2, %v6043_v61, %v15993_v44  ;;  %v6293_v56 = vrot.slane %v6235_v6, 5  ;;  %v6360_v35 = vmul.f32 %v12601_v38, %v12982_v11  ;;  %v5959_v39 = vadd.f32 %v5920_v24, %v5834_v51  ;;  %17068 = vst [vmem:[#allocation68_spill] sm:$0xff] %v13064_v58  ;;  %v13070_v24 = vld [vmem:[%s15312_s1 + $0x1] ss:$0 sm:$0xff]  ;;  %v13092_v44 = vld [vmem:[%s15312_s1 + $0x4] ss:$0 sm:$0xff] }
 0x2db   : > { %17066 = vst [vmem:[#allocation52_spill] sm:$0xff] %v13049_v43  ;;  %v5646_v16 = vadd.f32 %v5614_v5, %v4801_v2  ;;  %v6170_v36 = vsel %vm1070_vm3, %v6168_v18, %v15992_v49  ;;  %v13058_v12 = vmul.f32 %v12601_v38, %v12993_v31  ;;  %v16002_v61 = vrot.slane %v13049_v43, 5  ;;  %17069 = vst [vmem:[#allocation75_spill] sm:$0xff] %v13070_v24  ;;  %v13098_v11 = vld [vmem:[%s15312_s1 + $0x5] ss:$0 sm:$0xff] }
 0x2dc   : > { %v6418_v19 = vrot.slane %v6360_v35, 6  ;;  %v634_v2 = vmul.f32 %v8174_v23, %v13064_v58  ;;  %v661_v18 = vmul.f32 %v13070_v24, %v611_v45  ;;  %v6084_v6 = vadd.f32 %v6045_v8, %v5959_v39  ;;  %v13077_v35 = vld [vmem:[%s15312_s1 + $0x2] ss:$0 sm:$0xff]  ;;  %v13083_v23 = vld [vmem:[%s15312_s1 + $0x3] ss:$0 sm:$0xff]  ;;  %17072 = vst [vmem:[#allocation65_spill] sm:$0xff] %v13092_v44 }
 0x2dd   : > { %17067 = vst [vmem:[#allocation13_spill] sm:$0xff] %v13058_v12  ;;  %17070 = vst [vmem:[#allocation62_spill] sm:$0xff] %v13077_v35  ;;  %v787_v51 = vmul.f32 %v13077_v35, %v611_v45  ;;  %v913_v49 = vmul.f32 %v13083_v23, %v611_v45  ;;  %v6295_v8 = vsel %vm1196_vm4, %v6293_v56, %v16002_v61  ;;  %v17074_v24 = vrot.slane %v13058_v12, 6  ;;  %v13110_v40 = vld [vmem:[%s15312_s1 + $0x6] ss:$0 sm:$0xff] }
 0x2de   : > { %17071 = vst [vmem:[#allocation20_spill] sm:$0xff] %v13083_v23  ;;  %v721_v39 = vrot.slane %v661_v18, 1  ;;  %v1039_v5 = vmul.f32 %v13092_v44, %v611_v45  ;;  %17073 = vst [vmem:[#allocation76_spill] sm:$0xff] %v13098_v11  ;;  %v1165_v35 = vmul.f32 %v13098_v11, %v611_v45  ;;  %v6209_v23 = vadd.f32 %v6170_v36, %v6084_v6  ;;  %v1461_v36 = vld [vmem:[#allocation2 + $0xa0] sm:$0x3f] }
 0x2df   : > { %v6420_v56 = vsel %vm1322_vm5, %v6418_v19, %v17074_v24  ;;  %v847_v18 = vrot.slane %v787_v51, 2  ;;  %v973_v61 = vrot.slane %v913_v49, 3  ;;  %v17075_v58 = vrot.slane %v12625_v59, 1 }
 0x2e0   : > { %v1099_v3 = vrot.slane %v1039_v5, 4  ;;  %v1225_v44 = vrot.slane %v1165_v35, 5  ;;  %v1291_v11 = vmul.f32 %v13110_v40, %v611_v45  ;;  %v6334_v6 = vadd.f32 %v6295_v8, %v6209_v23 }
 0x2e1   : > { %v722_v43 = vsel %vm692_vm0, %v17075_v58, %v721_v39  ;;  %v17076_v19 = vrot.slane %v12634_v14, 2  ;;  %v17077_v59 = vrot.slane %v12642_v29, 3  ;;  %v17078_v24 = vrot.slane %v12651_v28, 4  ;;  %v8182_v14 = vld [vmem:[#allocation2 + $0x98] sm:$0xff]  ;;  %v13134_v28 = vld [vmem:[%s15312_s1 + $0x9] ss:$0 sm:$0xff] }
 0x2e2   : > { %v760_v12 = vadd.f32 %v722_v43, %v634_v2  ;;  %v17079_v35 = vrot.slane %v12662_v37, 5  ;;  %v1351_v45 = vrot.slane %v1291_v11, 6  ;;  %v13128_v43 = vld [vmem:[%s15312_s1 + $0x8] ss:$0 sm:$0xff]  ;;  %v6459_v29 = vadd.f32 %v6420_v56, %v6334_v6  ;;  %v13140_v11 = vld [vmem:[%s15312_s1 + $0xa] ss:$0 sm:$0xff] }
 0x2e3   : > { %v848_v49 = vsel %vm818_vm1, %v17076_v19, %v847_v18  ;;  %v974_v58 = vsel %vm944_vm2, %v17077_v59, %v973_v61  ;;  %v1100_v5 = vsel %vm1070_vm3, %v17078_v24, %v1099_v3  ;;  %v1485_v2 = vmul.f32 %v8182_v14, %v13128_v43  ;;  %v13155_v39 = vld [vmem:[%s15312_s1 + $0xc] ss:$0 sm:$0xff]  ;;  %v13169_v14 = vld [vmem:[%s15312_s1 + $0xe] ss:$0 sm:$0xff] }
 0x2e4   : > { %v1226_v51 = vsel %vm1196_vm4, %v17079_v35, %v1225_v44  ;;  %v886_v23 = vadd.f32 %v848_v49, %v760_v12  ;;  %v1512_v37 = vmul.f32 %v13134_v28, %v1461_v36  ;;  %v1637_v3 = vmul.f32 %v13140_v11, %v1461_v36  ;;  %v13149_v12 = vld [vmem:[%s15312_s1 + $0xb] ss:$0 sm:$0xff]  ;;  %17082 = vst [vmem:[#allocation19_spill] sm:$0xff] %v13155_v39 }
 0x2e5   : > { %v17080_v44 = vrot.slane %v12671_v21, 6  ;;  %17081 = vst [vmem:[#allocation24_spill] sm:$0xff] %v13149_v12  ;;  %v1762_v8 = vmul.f32 %v13149_v12, %v1461_v36  ;;  %v1887_v56 = vmul.f32 %v13155_v39, %v1461_v36  ;;  %v13161_v21 = vld [vmem:[%s15312_s1 + $0xd] ss:$0 sm:$0xff]  ;;  %v13164_v6 = vadd.f32 %v6459_v29, %v5646_v16  ;;  %v2306_v39 = vld [vmem:[#allocation2 + $0xb8] sm:$0x3f] }
 0x2e6   : > { %v2012_v18 = vmul.f32 %v13161_v21, %v1461_v36  ;;  %v1012_v19 = vadd.f32 %v974_v58, %v886_v23  ;;  %v1571_v49 = vrot.slane %v1512_v37, 1  ;;  %v1696_v59 = vrot.slane %v1637_v3, 2  ;;  %v13182_v37 = vld [vmem:[%s15312_s1 + $0x10] ss:$0 sm:$0xff] }
 0x2e7   : > { %v1352_v61 = vsel %vm1322_vm5, %v17080_v44, %v1351_v45  ;;  %17083 = vst [vmem:[#allocation22_spill] sm:$0xff] %v13164_v6  ;;  %v1821_v24 = vrot.slane %v1762_v8, 3  ;;  %v1946_v35 = vrot.slane %v1887_v56, 4  ;;  %v2137_v44 = vmul.f32 %v13169_v14, %v1461_v36  ;;  %6549 = vadd.xlane.f32.xlu0 %v13164_v6  ;;  %v8190_v3 = vld [vmem:[#allocation2 + $0xb0] sm:$0xff] }
 0x2e8   : > { %v2071_v45 = vrot.slane %v2012_v18, 5  ;;  %v1138_v12 = vadd.f32 %v1100_v5, %v1012_v19  ;;  %v17084_v16 = vrot.slane %v12689_v0, 1  ;;  %v17085_v29 = vrot.slane %v12698_v27, 2 }
 0x2e9   : > { %v2330_v36 = vmul.f32 %v8190_v3, %v13182_v37  ;;  %v17086_v56 = vrot.slane %v12706_v15, 3  ;;  %v17087_v0 = vrot.slane %v12717_v47, 4  ;;  %v17088_v27 = vrot.slane %v12730_v1, 5  ;;  %v13203_v15 = vld [vmem:[%s15312_s1 + $0x12] ss:$0 sm:$0xff] }
 0x2ea   : > { %v1572_v58 = vsel %vm692_vm0, %v17084_v16, %v1571_v49  ;;  %v1697_v23 = vsel %vm818_vm1, %v17085_v29, %v1696_v59  ;;  %v1264_v49 = vadd.f32 %v1226_v51, %v1138_v12  ;;  %v2196_v59 = vrot.slane %v2137_v44, 6  ;;  %v13197_v16 = vld [vmem:[%s15312_s1 + $0x11] ss:$0 sm:$0xff]  ;;  %17089 = vst [vmem:[#allocation91_spill] sm:$0xff] %v13203_v15  ;;  %v13209_v1 = vld [vmem:[%s15312_s1 + $0x13] ss:$0 sm:$0xff] }
 0x2eb   : > { %v1610_v8 = vadd.f32 %v1572_v58, %v1485_v2  ;;  %v1822_v5 = vsel %vm944_vm2, %v17086_v56, %v1821_v24  ;;  %v1947_v18 = vsel %vm1070_vm3, %v17087_v0, %v1946_v35  ;;  %v2072_v19 = vsel %vm1196_vm4, %v17088_v27, %v2071_v45  ;;  %17090 = vst [vmem:[#allocation79_spill] sm:$0xff] %v13209_v1  ;;  %v13215_v12 = vld [vmem:[%s15312_s1 + $0x14] ss:$0 sm:$0xff]  ;;  %v13221_v45 = vld [vmem:[%s15312_s1 + $0x15] ss:$0 sm:$0xff] }
 0x2ec   : > { %v2357_v2 = vmul.f32 %v13197_v16, %v2306_v39  ;;  %v2482_v47 = vmul.f32 %v13203_v15, %v2306_v39  ;;  %v2607_v51 = vmul.f32 %v13209_v1, %v2306_v39  ;;  %17091 = vst [vmem:[#allocation25_spill] sm:$0xff] %v13215_v12  ;;  %v2732_v35 = vmul.f32 %v13215_v12, %v2306_v39  ;;  %v3151_v1 = vld [vmem:[#allocation2 + $0xd0] sm:$0x3f]  ;;  %v13230_v12 = vld [vmem:[%s15313_s2] ss:$0 sm:$0xff] }
 0x2ed   : > { %v1735_v24 = vadd.f32 %v1697_v23, %v1610_v8  ;;  %v2857_v44 = vmul.f32 %v13221_v45, %v2306_v39  ;;  %v1390_v58 = vadd.f32 %v1352_v61, %v1264_v49  ;;  %v17092_v29 = vrot.slane %v12737_v22, 6  ;;  %17093 = vst [vmem:[#allocation95_spill] sm:$0xff] %v13230_v12 }
 0x2ee   : > { %v2416_v3 = vrot.slane %v2357_v2, 1  ;;  %v2541_v8 = vrot.slane %v2482_v47, 2  ;;  %v2666_v0 = vrot.slane %v2607_v51, 3  ;;  %v2791_v27 = vrot.slane %v2732_v35, 4 }
 0x2ef   : > { %v2197_v23 = vsel %vm1322_vm5, %v17092_v29, %v2196_v59  ;;  %v1860_v56 = vadd.f32 %v1822_v5, %v1735_v24  ;;  %v2916_v6 = vrot.slane %v2857_v44, 5  ;;  %v1422_v15 = vadd.f32 %v13230_v12, %v1390_v58  ;;  %v13242_v5 = vld [vmem:[%s15312_s1 + $0x16] ss:$0 sm:$0xff] }
 0x2f0   : > { %v17094_v61 = vrot.slane %v12753_v53, 1  ;;  %v17095_v49 = vrot.slane %v12759_v62, 2  ;;  %v2982_v2 = vmul.f32 %v13242_v5, %v2306_v39  ;;  %v17096_v51 = vrot.slane %v12770_v30, 3  ;;  %v8199_v39 = vld [vmem:[#allocation2 + $0xc8] sm:$0xff]  ;;  %v13263_v30 = vld [vmem:[%s15312_s1 + $0x19] ss:$0 sm:$0xff] }
 0x2f1   : > { %v1985_v47 = vadd.f32 %v1947_v18, %v1860_v56  ;;  %v17097_v53 = vrot.slane %v12776_v54, 4  ;;  %v17098_v62 = vrot.slane %v12793_v20, 5  ;;  %17100 = vst [vmem:[#allocation89_spill] sm:$0xff] %v13263_v30  ;;  %v3202_v54 = vmul.f32 %v13263_v30, %v3151_v1  ;;  %v13275_v56 = vld [vmem:[%s15312_s1 + $0x1b] ss:$0 sm:$0xff] }
 0x2f2   : > { %v2417_v22 = vsel %vm692_vm0, %v17094_v61, %v2416_v3  ;;  %v2542_v59 = vsel %vm818_vm1, %v17095_v49, %v2541_v8  ;;  %v2667_v35 = vsel %vm944_vm2, %v17096_v51, %v2666_v0  ;;  %v3041_v29 = vrot.slane %v2982_v2, 6  ;;  %v13257_v3 = vld [vmem:[%s15312_s1 + $0x18] ss:$0 sm:$0xff]  ;;  %17102 = vst [vmem:[#allocation30_spill] sm:$0xff] %v13275_v56 }
 0x2f3   : > { %v2455_v24 = vadd.f32 %v2417_v22, %v2330_v36  ;;  %v2792_v44 = vsel %vm1070_vm3, %v17097_v53, %v2791_v27  ;;  %v2917_v58 = vsel %vm1196_vm4, %v17098_v62, %v2916_v6  ;;  %17099 = vst [vmem:[#allocation81_spill] sm:$0xff] %v13257_v3  ;;  %v3175_v36 = vmul.f32 %v8199_v39, %v13257_v3  ;;  %v13269_v6 = vld [vmem:[%s15312_s1 + $0x1a] ss:$0 sm:$0xff]  ;;  %v13284_v22 = vld [vmem:[%s15312_s1 + $0x1c] ss:$0 sm:$0xff]  ;;  %v17106_v53 = vld [vmem:[#allocation38_spill] sm:$0xff] }
 0x2f4   : > { %v2110_v18 = vadd.f32 %v2072_v19, %v1985_v47  ;;  %17101 = vst [vmem:[#allocation48_spill] sm:$0xff] %v13269_v6  ;;  %v3327_v8 = vmul.f32 %v13269_v6, %v3151_v1  ;;  %v3452_v0 = vmul.f32 %v13275_v56, %v3151_v1  ;;  %v17103_v27 = vrot.slane %v12802_v9, 6  ;;  %17104 = vst [vmem:[#allocation32_spill] sm:$0xff] %v13284_v22  ;;  %v3996_v56 = vld [vmem:[#allocation2 + $0xe8] sm:$0x3f] }
 0x2f5   : > { %v2580_v20 = vadd.f32 %v2542_v59, %v2455_v24  ;;  %v3261_v19 = vrot.slane %v3202_v54, 1  ;;  %v3577_v49 = vmul.f32 %v13284_v22, %v3151_v1  ;;  %v13290_v59 = vld [vmem:[%s15312_s1 + $0x1d] ss:$0 sm:$0xff]  ;;  %v17107_v62 = vrot.slane %v17106_v53, 1 }
 0x2f6   : > { %v3042_v61 = vsel %vm1322_vm5, %v17103_v27, %v3041_v29  ;;  %17105 = vst [vmem:[#allocation83_spill] sm:$0xff] %v13290_v59  ;;  %v3702_v2 = vmul.f32 %v13290_v59, %v3151_v1  ;;  %v2235_v47 = vadd.f32 %v2197_v23, %v2110_v18  ;;  %v3386_v9 = vrot.slane %v3327_v8, 2  ;;  %v13299_v27 = vld [vmem:[%s15312_s1 + $0x1e] ss:$0 sm:$0xff] }
 0x2f7   : > { %v2705_v24 = vadd.f32 %v2667_v35, %v2580_v20  ;;  %v3511_v51 = vrot.slane %v3452_v0, 3  ;;  %v3262_v29 = vsel %vm692_vm0, %v17107_v62, %v3261_v19  ;;  %v3636_v39 = vrot.slane %v3577_v49, 4 }
 0x2f8   : > { %v3761_v54 = vrot.slane %v3702_v2, 5  ;;  %v3827_v22 = vmul.f32 %v13299_v27, %v3151_v1  ;;  %v2267_v6 = vadd.f32 %v2235_v47, %v1422_v15  ;;  %v3300_v23 = vadd.f32 %v3262_v29, %v3175_v36  ;;  %v13339_v47 = vld [vmem:[%s15312_s1 + $0x23] ss:$0 sm:$0xff] }
 0x2f9   : > { %v2830_v59 = vadd.f32 %v2792_v44, %v2705_v24  ;;  %v17108_v35 = vrot.slane %v12821_v25, 2  ;;  %v17109_v20 = vrot.slane %v12832_v46, 3  ;;  %v17110_v0 = vrot.slane %v12841_v26, 4  ;;  %v13317_v25 = vld [vmem:[%s15312_s1 + $0x20] ss:$0 sm:$0xff]  ;;  %17116 = vst [vmem:[#allocation36_spill] sm:$0xff] %v13339_v47 }
 0x2fa   : > { %v17111_v49 = vrot.slane %v12852_v48, 5  ;;  %v3886_v2 = vrot.slane %v3827_v22, 6  ;;  %17112 = vst [vmem:[#allocation94_spill] sm:$0xff] %v13317_v25  ;;  %v4020_v46 = vmul.f32 %v13317_v25, %v12865_v63  ;;  %v13324_v26 = vld [vmem:[%s15312_s1 + $0x21] ss:$0 sm:$0xff]  ;;  %v17114_v36 = vrot.slane %v12863_v7, 6 }
 0x2fb   : > { %v3387_v18 = vsel %vm818_vm1, %v17108_v35, %v3386_v9  ;;  %v3512_v8 = vsel %vm944_vm2, %v17109_v20, %v3511_v51  ;;  %v3637_v19 = vsel %vm1070_vm3, %v17110_v0, %v3636_v39  ;;  %v2955_v15 = vadd.f32 %v2917_v58, %v2830_v59  ;;  %17113 = vst [vmem:[#allocation85_spill] sm:$0xff] %v13324_v26  ;;  %v13333_v22 = vld [vmem:[%s15312_s1 + $0x22] ss:$0 sm:$0xff]  ;;  %v13345_v7 = vld [vmem:[%s15312_s1 + $0x24] ss:$0 sm:$0xff] }
 0x2fc   : > { %v3762_v1 = vsel %vm1196_vm4, %v17111_v49, %v3761_v54  ;;  %v3425_v44 = vadd.f32 %v3387_v18, %v3300_v23  ;;  %v4047_v48 = vmul.f32 %v13324_v26, %v3996_v56  ;;  %v3887_v58 = vsel %vm1322_vm5, %v17114_v36, %v3886_v2  ;;  %17115 = vst [vmem:[#allocation86_spill] sm:$0xff] %v13333_v22  ;;  %v4841_v36 = vld [vmem:[#allocation2 + $0x100] sm:$0x3f] }
 0x2fd   : > { %v4172_v59 = vmul.f32 %v13333_v22, %v3996_v56  ;;  %v4297_v24 = vmul.f32 %v13339_v47, %v3996_v56  ;;  %17117 = vst [vmem:[#allocation88_spill] sm:$0xff] %v13345_v7  ;;  %v4422_v9 = vmul.f32 %v13345_v7, %v3996_v56  ;;  %v3080_v51 = vadd.f32 %v3042_v61, %v2955_v15  ;;  %v17119_v7 = vld [vmem:[#allocation43_spill] sm:$0xff] }
 0x2fe   : > { %v3550_v53 = vadd.f32 %v3512_v8, %v3425_v44  ;;  %v4106_v62 = vrot.slane %v4047_v48, 1  ;;  %v4547_v29 = vmul.f32 %v17056_v55, %v3996_v56  ;;  %v4672_v35 = vmul.f32 %v12480_v32, %v3996_v56  ;;  %v8211_v48 = vld [vmem:[#allocation2 + $0xf8] sm:$0xff] }
 0x2ff   : > { %v4231_v39 = vrot.slane %v4172_v59, 2  ;;  %v4356_v54 = vrot.slane %v4297_v24, 3  ;;  %v4481_v23 = vrot.slane %v4422_v9, 4  ;;  %v3112_v18 = vadd.f32 %v3080_v51, %v2267_v6  ;;  %v17126_v51 = vld [vmem:[#allocation53_spill] sm:$0xff] }
 0x300   : > { %v3675_v20 = vadd.f32 %v3637_v19, %v3550_v53  ;;  %v17118_v0 = vrot.slane %v12881_v41, 1  ;;  %v4606_v2 = vrot.slane %v4547_v29, 5  ;;  %v17120_v61 = vrot.slane %v17119_v7, 2  ;;  %v17125_v7 = vld [vmem:[#allocation46_spill] sm:$0xff]  ;;  %v17127_v53 = vld [vmem:[#allocation55_spill] sm:$0xff] }
 0x301   : > { %v17121_v55 = vrot.slane %v12898_v57, 3  ;;  %v17122_v44 = vrot.slane %v12904_v33, 4  ;;  %v17123_v41 = vrot.slane %v12921_v42, 5  ;;  %v4731_v19 = vrot.slane %v4672_v35, 6  ;;  %v17128_v33 = vld [vmem:[#allocation47_spill] sm:$0xff] }
 0x302   : > { %v4107_v49 = vsel %vm692_vm0, %v17118_v0, %v4106_v62  ;;  %v4232_v8 = vsel %vm818_vm1, %v17120_v61, %v4231_v39  ;;  %v3800_v6 = vadd.f32 %v3762_v1, %v3675_v20  ;;  %v4892_v9 = vmul.f32 %v17125_v7, %v4841_v36 }
 0x303   : > { %v4145_v47 = vadd.f32 %v4107_v49, %v4020_v46  ;;  %v4357_v15 = vsel %vm944_vm2, %v17121_v55, %v4356_v54  ;;  %v4482_v32 = vsel %vm1070_vm3, %v17122_v44, %v4481_v23  ;;  %v4607_v56 = vsel %vm1196_vm4, %v17123_v41, %v4606_v2  ;;  %v17124_v46 = vld [vmem:[#allocation44_spill] sm:$0xff]  ;;  %v17130_v54 = vld [vmem:[#allocation59_spill] sm:$0xff] }
 0x304   : > { %v4865_v59 = vmul.f32 %v8211_v48, %v17124_v46  ;;  %v5017_v57 = vmul.f32 %v17126_v51, %v4841_v36  ;;  %v5142_v62 = vmul.f32 %v17127_v53, %v4841_v36  ;;  %v3925_v29 = vadd.f32 %v3887_v58, %v3800_v6  ;;  %v5686_v55 = vld [vmem:[#allocation2 + $0x118] sm:$0x3f]  ;;  %v17131_v58 = vld [vmem:[#allocation50_spill] sm:$0xff]  ;;  %v17138_v51 = vld [vmem:[#allocation33_spill] sm:$0xff] }
 0x305   : > { %v4270_v24 = vadd.f32 %v4232_v8, %v4145_v47  ;;  %v17129_v39 = vrot.slane %v17128_v33, 6  ;;  %v5267_v42 = vmul.f32 %v17130_v54, %v4841_v36  ;;  %v5392_v23 = vmul.f32 %v17060_v60, %v4841_v36  ;;  %v17139_v53 = vld [vmem:[#allocation39_spill] sm:$0xff] }
 0x306   : > { %v4951_v20 = vrot.slane %v4892_v9, 1  ;;  %v5076_v0 = vrot.slane %v5017_v57, 2  ;;  %v5201_v49 = vrot.slane %v5142_v62, 3  ;;  %v3957_v47 = vadd.f32 %v3925_v29, %v3112_v18  ;;  %v17137_v9 = vld [vmem:[#allocation51_spill] sm:$0xff]  ;;  %v17141_v29 = vld [vmem:[#allocation58_spill] sm:$0xff] }
 0x307   : > { %v4732_v1 = vsel %vm1322_vm5, %v17129_v39, %v4731_v19  ;;  %v4395_v35 = vadd.f32 %v4357_v15, %v4270_v24  ;;  %v5326_v2 = vrot.slane %v5267_v42, 4  ;;  %v5451_v61 = vrot.slane %v5392_v23, 5  ;;  %v17142_v39 = vld [vmem:[#allocation61_spill] sm:$0xff] }
 0x308   : > { %v5517_v8 = vmul.f32 %v12540_v52, %v4841_v36  ;;  %v17132_v6 = vrot.slane %v17131_v58, 1  ;;  %v17133_v19 = vrot.slane %v12949_v50, 2  ;;  %v17134_v60 = vrot.slane %v12960_v17, 3  ;;  %v17145_v58 = vld [vmem:[#allocation15_spill] sm:$0xff] }
 0x309   : > { %v4520_v44 = vadd.f32 %v4482_v32, %v4395_v35  ;;  %v17135_v18 = vrot.slane %v12969_v34, 4  ;;  %v17136_v52 = vrot.slane %v12980_v10, 5  ;;  %v5710_v50 = vmul.f32 %v17137_v9, %v12993_v31  ;;  %v17153_v9 = vld [vmem:[#allocation68_spill] sm:$0xff] }
 0x30a   : > { %v4952_v41 = vsel %vm692_vm0, %v17132_v6, %v4951_v20  ;;  %v5077_v48 = vsel %vm818_vm1, %v17133_v19, %v5076_v0  ;;  %v5202_v15 = vsel %vm944_vm2, %v17134_v60, %v5201_v49  ;;  %v5576_v32 = vrot.slane %v5517_v8, 6  ;;  %v17143_v8 = vld [vmem:[#allocation54_spill] sm:$0xff]  ;;  %v13407_v19 = vld [vmem:[#allocation2 + $0x98] sm:$0xff]  ;;  %v17147_v60 = vld [vmem:[#allocation16_spill] sm:$0xff] }
 0x30b   : > { %v4990_v46 = vadd.f32 %v4952_v41, %v4865_v59  ;;  %v5327_v24 = vsel %vm1070_vm3, %v17135_v18, %v5326_v2  ;;  %v5452_v36 = vsel %vm1196_vm4, %v17136_v52, %v5451_v61  ;;  %v4645_v7 = vadd.f32 %v4607_v56, %v4520_v44  ;;  %v612_v2 = vld [vmem:[#allocation2 + $0x90] sm:$0xff]  ;;  %v17151_v18 = vld [vmem:[#allocation52_spill] sm:$0xff] }
 0x30c   : > { %v5737_v57 = vmul.f32 %v17138_v51, %v5686_v55  ;;  %v5862_v17 = vmul.f32 %v17139_v53, %v5686_v55  ;;  %v17140_v59 = vrot.slane %v12991_v13, 6  ;;  %v5987_v33 = vmul.f32 %v17141_v29, %v5686_v55  ;;  %v17156_v29 = vld [vmem:[#allocation13_spill] sm:$0xff] }
 0x30d   : > { %v5115_v62 = vadd.f32 %v5077_v48, %v4990_v46  ;;  %v6112_v10 = vmul.f32 %v17142_v39, %v5686_v55  ;;  %v4770_v54 = vadd.f32 %v4732_v1, %v4645_v7  ;;  %v6237_v56 = vmul.f32 %v12595_v4, %v5686_v55 }
 0x30e   : > { %v5577_v34 = vsel %vm1322_vm5, %v17140_v59, %v5576_v32  ;;  %v5796_v42 = vrot.slane %v5737_v57, 1  ;;  %v5921_v23 = vrot.slane %v5862_v17, 2  ;;  %v6046_v20 = vrot.slane %v5987_v33, 3  ;;  %v17154_v57 = vld [vmem:[#allocation75_spill] sm:$0xff] }
 0x30f   : > { %v5240_v35 = vadd.f32 %v5202_v15, %v5115_v62  ;;  %v6171_v0 = vrot.slane %v6112_v10, 4  ;;  %v6362_v49 = vmul.f32 %v12601_v38, %v5686_v55  ;;  %v4802_v61 = vadd.f32 %v4770_v54, %v3957_v47  ;;  %v17149_v38 = vld [vmem:[#allocation70_spill] sm:$0xff] }
 0x310   : > { %v17144_v13 = vrot.slane %v17143_v8, 1  ;;  %v17146_v6 = vrot.slane %v17145_v58, 2  ;;  %v6296_v1 = vrot.slane %v6237_v56, 5  ;;  %v17148_v15 = vrot.slane %v17147_v60, 3  ;;  %v17155_v62 = vld [vmem:[#allocation62_spill] sm:$0xff] }
 0x311   : > { %v5365_v48 = vadd.f32 %v5327_v24, %v5240_v35  ;;  %v17150_v55 = vrot.slane %v17149_v38, 4  ;;  %v17152_v52 = vrot.slane %v17151_v18, 5  ;;  %v6421_v7 = vrot.slane %v6362_v49, 6 }
 0x312   : > { %v5797_v44 = vsel %vm692_vm0, %v17144_v13, %v5796_v42  ;;  %v5922_v41 = vsel %vm818_vm1, %v17146_v6, %v5921_v23  ;;  %v6047_v46 = vsel %vm944_vm2, %v17148_v15, %v6046_v20  ;;  %v635_v51 = vmul.f32 %v17153_v9, %v612_v2  ;;  %v17158_v42 = vld [vmem:[#allocation20_spill] sm:$0xff]  ;;  %v17159_v13 = vld [vmem:[#allocation65_spill] sm:$0xff] }
 0x313   : > { %v5835_v4 = vadd.f32 %v5797_v44, %v5710_v50  ;;  %v6172_v47 = vsel %vm1070_vm3, %v17150_v55, %v6171_v0  ;;  %v6297_v32 = vsel %vm1196_vm4, %v17152_v52, %v6296_v1  ;;  %v662_v53 = vmul.f32 %v17154_v57, %v612_v2 }
 0x314   : > { %v5490_v17 = vadd.f32 %v5452_v36, %v5365_v48  ;;  %v13422_v50 = vmul.f32 %v17154_v57, %v13407_v19  ;;  %v788_v59 = vmul.f32 %v17155_v62, %v612_v2  ;;  %v17157_v33 = vrot.slane %v17156_v29, 6 }
 0x315   : > { %v5960_v24 = vadd.f32 %v5922_v41, %v5835_v4  ;;  %v723_v10 = vrot.slane %v662_v53, 1  ;;  %v13430_v54 = vmul.f32 %v17155_v62, %v13407_v19  ;;  %v914_v23 = vmul.f32 %v17158_v42, %v612_v2 }
 0x316   : > { %v6422_v39 = vsel %vm1322_vm5, %v17157_v33, %v6421_v7  ;;  %v5615_v56 = vadd.f32 %v5577_v34, %v5490_v17  ;;  %v16046_v35 = vrot.slane %v13422_v50, 1  ;;  %v849_v20 = vrot.slane %v788_v59, 2 }
 0x317   : > { %v6085_v36 = vadd.f32 %v6047_v46, %v5960_v24  ;;  %v16044_v0 = vrot.slane %v13430_v54, 2  ;;  %v13437_v49 = vmul.f32 %v17158_v42, %v13407_v19  ;;  %v975_v8 = vrot.slane %v914_v23, 3  ;;  %v17160_v46 = vld [vmem:[#allocation76_spill] sm:$0xff] }
 0x318   : > { %v1040_v44 = vmul.f32 %v17159_v13, %v612_v2  ;;  %v5647_v58 = vadd.f32 %v5615_v56, %v4802_v61  ;;  %v725_v41 = vsel %vm692_vm0, %v723_v10, %v16046_v35  ;;  %v13445_v34 = vmul.f32 %v17159_v13, %v13407_v19 }
 0x319   : > { %v6210_v6 = vadd.f32 %v6172_v47, %v6085_v36  ;;  %v761_v1 = vadd.f32 %v725_v41, %v635_v51  ;;  %v851_v48 = vsel %vm818_vm1, %v849_v20, %v16044_v0  ;;  %v16043_v4 = vrot.slane %v13437_v49, 3  ;;  %v13467_v51 = vld [vmem:[#allocation2 + $0xb0] sm:$0xff]  ;;  %v17170_v0 = vld [vmem:[#allocation79_spill] sm:$0xff] }
 0x31a   : > { %v1101_v60 = vrot.slane %v1040_v44, 4  ;;  %v16041_v61 = vrot.slane %v13445_v34, 4  ;;  %v1166_v38 = vmul.f32 %v17160_v46, %v612_v2  ;;  %v13455_v55 = vmul.f32 %v17160_v46, %v13407_v19 }
 0x31b   : > { %v6335_v15 = vadd.f32 %v6297_v32, %v6210_v6  ;;  %v887_v47 = vadd.f32 %v851_v48, %v761_v1  ;;  %v977_v18 = vsel %vm944_vm2, %v975_v8, %v16043_v4  ;;  %v1292_v52 = vmul.f32 %v13110_v40, %v612_v2  ;;  %v13465_v32 = vld [vmem:[#allocation2 + $0xa8] sm:$0xff]  ;;  %v17163_v1 = vld [vmem:[#allocation24_spill] sm:$0xff] }
 0x31c   : > { %v13463_v7 = vmul.f32 %v13110_v40, %v13407_v19  ;;  %17161 = vst [vmem:[#allocation45_spill] sm:$0xff] %v13465_v32  ;;  %v1103_v17 = vsel %vm1070_vm3, %v1101_v60, %v16041_v61  ;;  %v1227_v24 = vrot.slane %v1166_v38, 5  ;;  %v16040_v59 = vrot.slane %v13455_v55, 5 }
 0x31d   : > { %v6460_v53 = vadd.f32 %v6422_v39, %v6335_v15  ;;  %v1013_v29 = vadd.f32 %v977_v18, %v887_v47  ;;  %v1353_v33 = vrot.slane %v1292_v52, 6  ;;  %v1486_v10 = vmul.f32 %v13128_v43, %v13465_v32  ;;  %v17164_v18 = vld [vmem:[#allocation19_spill] sm:$0xff] }
 0x31e   : > { %v16039_v2 = vrot.slane %v13463_v7, 6  ;;  %v1229_v39 = vsel %vm1196_vm4, %v1227_v24, %v16040_v59  ;;  %v1513_v56 = vmul.f32 %v13134_v28, %v13465_v32  ;;  %v13485_v36 = vmul.f32 %v13134_v28, %v13467_v51 }
 0x31f   : > { %v13476_v23 = vadd.f32 %v6460_v53, %v5647_v58  ;;  %v1139_v20 = vadd.f32 %v1103_v17, %v1013_v29  ;;  %v1638_v44 = vmul.f32 %v13140_v11, %v13465_v32  ;;  %v13494_v58 = vmul.f32 %v13140_v11, %v13467_v51 }
 0x320   : > { %v1355_v8 = vsel %vm1322_vm5, %v1353_v33, %v16039_v2  ;;  %v1573_v6 = vrot.slane %v1513_v56, 1  ;;  %v16036_v41 = vrot.slane %v13485_v36, 1  ;;  %v1763_v48 = vmul.f32 %v17163_v1, %v13465_v32 }
 0x321   : > { %17162 = vst [vmem:[#allocation87_spill] sm:$0xff] %v13476_v23  ;;  %6551 = vadd.xlane.f32.xlu1 %v13476_v23  ;;  %v13502_v60 = vmul.f32 %v17163_v1, %v13467_v51  ;;  %v1265_v15 = vadd.f32 %v1229_v39, %v1139_v20  ;;  %v1698_v38 = vrot.slane %v1638_v44, 2  ;;  %v16038_v47 = vrot.slane %v13494_v58, 2 }
 0x322   : > { %v1888_v52 = vmul.f32 %v17164_v18, %v13465_v32  ;;  %v1575_v53 = vsel %vm692_vm0, %v1573_v6, %v16036_v41  ;;  %v1823_v17 = vrot.slane %v1763_v48, 3  ;;  %v13513_v29 = vmul.f32 %v17164_v18, %v13467_v51 }
 0x323   : > { %v16037_v24 = vrot.slane %v13502_v60, 3  ;;  %v1391_v33 = vadd.f32 %v1355_v8, %v1265_v15  ;;  %v1611_v56 = vadd.f32 %v1575_v53, %v1486_v10  ;;  %v1700_v39 = vsel %vm818_vm1, %v1698_v38, %v16038_v47  ;;  %v13528_v8 = vld [vmem:[#allocation2 + $0xc0] sm:$0xff]  ;;  %v13537_v53 = vld [vmem:[#allocation2 + $0xc8] sm:$0xff] }
 0x324   : > { %v1948_v20 = vrot.slane %v1888_v52, 4  ;;  %v16042_v6 = vrot.slane %v13513_v29, 4  ;;  %v2013_v48 = vmul.f32 %v13161_v21, %v13465_v32  ;;  %v13526_v41 = vmul.f32 %v13161_v21, %v13467_v51  ;;  %17165 = vst [vmem:[#allocation28_spill] sm:$0xff] %v13528_v8 }
 0x325   : > { %v1825_v44 = vsel %vm944_vm2, %v1823_v17, %v16037_v24  ;;  %v1423_v10 = vadd.f32 %v13230_v12, %v1391_v33  ;;  %v1736_v15 = vadd.f32 %v1700_v39, %v1611_v56  ;;  %v2138_v38 = vmul.f32 %v13169_v14, %v13465_v32 }
 0x326   : > { %v13535_v52 = vmul.f32 %v13169_v14, %v13467_v51  ;;  %v1950_v17 = vsel %vm1070_vm3, %v1948_v20, %v16042_v6  ;;  %v2073_v24 = vrot.slane %v2013_v48, 5  ;;  %v16045_v47 = vrot.slane %v13526_v41, 5  ;;  %v17168_v48 = vld [vmem:[#allocation91_spill] sm:$0xff] }
 0x327   : > { %v2331_v33 = vmul.f32 %v13182_v37, %v13528_v8  ;;  %v1861_v56 = vadd.f32 %v1825_v44, %v1736_v15  ;;  %v2198_v39 = vrot.slane %v2138_v38, 6  ;;  %v2358_v59 = vmul.f32 %v13197_v16, %v13528_v8 }
 0x328   : > { %17166 = vst [vmem:[#allocation57_spill] sm:$0xff] %v13535_v52  ;;  %v16052_v2 = vrot.slane %v13535_v52, 6  ;;  %v2075_v61 = vsel %vm1196_vm4, %v2073_v24, %v16045_v47  ;;  %v13553_v20 = vmul.f32 %v13197_v16, %v13537_v53  ;;  %v2483_v6 = vmul.f32 %v17168_v48, %v13528_v8 }
 0x329   : > { %v13559_v44 = vmul.f32 %v17168_v48, %v13537_v53  ;;  %v1986_v15 = vadd.f32 %v1950_v17, %v1861_v56  ;;  %v2418_v4 = vrot.slane %v2358_v59, 1  ;;  %v2608_v24 = vmul.f32 %v17170_v0, %v13528_v8  ;;  %v17172_v17 = vld [vmem:[#allocation25_spill] sm:$0xff] }
 0x32a   : > { %17167 = vst [vmem:[#allocation73_spill] sm:$0xff] %v13553_v20  ;;  %v2200_v38 = vsel %vm1322_vm5, %v2198_v39, %v16052_v2  ;;  %v16056_v47 = vrot.slane %v13553_v20, 1  ;;  %v2543_v35 = vrot.slane %v2483_v6, 2  ;;  %v13570_v32 = vmul.f32 %v17170_v0, %v13537_v53 }
 0x32b   : > { %17169 = vst [vmem:[#allocation56_spill] sm:$0xff] %v13559_v44  ;;  %v16057_v23 = vrot.slane %v13559_v44, 2  ;;  %v2111_v12 = vadd.f32 %v2075_v61, %v1986_v15  ;;  %v2668_v48 = vrot.slane %v2608_v24, 3  ;;  %v2733_v56 = vmul.f32 %v17172_v17, %v13528_v8 }
 0x32c   : > { %17171 = vst [vmem:[#allocation17_spill] sm:$0xff] %v13570_v32  ;;  %v13576_v59 = vmul.f32 %v17172_v17, %v13537_v53  ;;  %v2420_v39 = vsel %vm692_vm0, %v2418_v4, %v16056_v47  ;;  %v16059_v2 = vrot.slane %v13570_v32, 3  ;;  %v2858_v61 = vmul.f32 %v13221_v45, %v13528_v8 }
 0x32d   : > { %v2545_v6 = vsel %vm818_vm1, %v2543_v35, %v16057_v23  ;;  %v2236_v15 = vadd.f32 %v2200_v38, %v2111_v12  ;;  %v2456_v24 = vadd.f32 %v2420_v39, %v2331_v33  ;;  %v2793_v52 = vrot.slane %v2733_v56, 4  ;;  %v17176_v56 = vld [vmem:[#allocation66_spill] sm:$0xff] }
 0x32e   : > { %17173 = vst [vmem:[#allocation90_spill] sm:$0xff] %v13576_v59  ;;  %v16060_v0 = vrot.slane %v13576_v59, 4  ;;  %v2670_v20 = vsel %vm944_vm2, %v2668_v48, %v16059_v2  ;;  %v13593_v4 = vmul.f32 %v13221_v45, %v13537_v53  ;;  %v2918_v47 = vrot.slane %v2858_v61, 5 }
 0x32f   : > { %v2983_v35 = vmul.f32 %v13242_v5, %v13528_v8  ;;  %v2268_v23 = vadd.f32 %v2236_v15, %v1423_v10  ;;  %v2581_v44 = vadd.f32 %v2545_v6, %v2456_v24  ;;  %v13602_v33 = vmul.f32 %v13242_v5, %v13537_v53 }
 0x330   : > { %17174 = vst [vmem:[#allocation69_spill] sm:$0xff] %v13593_v4  ;;  %v2795_v12 = vsel %vm1070_vm3, %v2793_v52, %v16060_v0  ;;  %v16067_v48 = vrot.slane %v13593_v4, 5  ;;  %v3176_v39 = vmul.f32 %v13257_v3, %v17176_v56  ;;  %v3203_v61 = vmul.f32 %v13263_v30, %v17176_v56  ;;  %v17178_v52 = vld [vmem:[#allocation48_spill] sm:$0xff] }
 0x331   : > { %17175 = vst [vmem:[#allocation77_spill] sm:$0xff] %v13602_v33  ;;  %v3043_v38 = vrot.slane %v2983_v35, 6  ;;  %v2706_v2 = vadd.f32 %v2670_v20, %v2581_v44  ;;  %v13612_v6 = vmul.f32 %v13263_v30, %v12865_v63  ;;  %v3328_v15 = vmul.f32 %v17178_v52, %v17176_v56  ;;  %v17179_v20 = vld [vmem:[#allocation30_spill] sm:$0xff] }
 0x332   : > { %v2920_v24 = vsel %vm1196_vm4, %v2918_v47, %v16067_v48  ;;  %v3263_v35 = vrot.slane %v3203_v61, 1  ;;  %v13621_v0 = vmul.f32 %v17178_v52, %v12865_v63  ;;  %v3453_v44 = vmul.f32 %v17179_v20, %v17176_v56  ;;  %v17181_v48 = vld [vmem:[#allocation32_spill] sm:$0xff] }
 0x333   : > { %17177 = vst [vmem:[#allocation84_spill] sm:$0xff] %v13612_v6  ;;  %v2831_v10 = vadd.f32 %v2795_v12, %v2706_v2  ;;  %v17180_v8 = vrot.slane %v13602_v33, 6  ;;  %v16072_v3 = vrot.slane %v13612_v6, 1  ;;  %v3388_v59 = vrot.slane %v3328_v15, 2  ;;  %v17182_v12 = vld [vmem:[#allocation83_spill] sm:$0xff]  ;;  %v13654_v6 = vld [vmem:[#allocation2 + $0xf0] sm:$0xff] }
 0x334   : > { %v16078_v4 = vrot.slane %v13621_v0, 2  ;;  %v13632_v47 = vmul.f32 %v17179_v20, %v12865_v63  ;;  %v3513_v61 = vrot.slane %v3453_v44, 3  ;;  %v3578_v52 = vmul.f32 %v17181_v48, %v17176_v56  ;;  %17184 = vst [vmem:[#allocation21_spill] sm:$0xff] %v13654_v6 }
 0x335   : > { %v3045_v30 = vsel %vm1322_vm5, %v3043_v38, %v17180_v8  ;;  %v2956_v32 = vadd.f32 %v2920_v24, %v2831_v10  ;;  %v3265_v2 = vsel %vm692_vm0, %v3263_v35, %v16072_v3  ;;  %v13641_v8 = vmul.f32 %v17181_v48, %v12865_v63 }
 0x336   : > { %v3703_v38 = vmul.f32 %v17182_v12, %v17176_v56  ;;  %v3301_v15 = vadd.f32 %v3265_v2, %v3176_v39  ;;  %v3390_v44 = vsel %vm818_vm1, %v3388_v59, %v16078_v4  ;;  %v16076_v33 = vrot.slane %v13632_v47, 3 }
 0x337   : > { %v3638_v20 = vrot.slane %v3578_v52, 4  ;;  %v3081_v10 = vadd.f32 %v3045_v30, %v2956_v32  ;;  %v16075_v24 = vrot.slane %v13641_v8, 4  ;;  %v13652_v35 = vmul.f32 %v17182_v12, %v12865_v63  ;;  %v13665_v32 = vld [vmem:[#allocation2 + $0xf8] sm:$0xff] }
 0x338   : > { %v3763_v3 = vrot.slane %v3703_v38, 5  ;;  %v3426_v48 = vadd.f32 %v3390_v44, %v3301_v15  ;;  %v3515_v39 = vsel %vm944_vm2, %v3513_v61, %v16076_v33  ;;  %v3828_v59 = vmul.f32 %v13299_v27, %v17176_v56  ;;  %17186 = vst [vmem:[#allocation92_spill] sm:$0xff] %v13665_v32  ;;  %v17189_v33 = vld [vmem:[#allocation36_spill] sm:$0xff] }
 0x339   : > { %17183 = vst [vmem:[#allocation18_spill] sm:$0xff] %v13652_v35  ;;  %v13663_v30 = vmul.f32 %v13299_v27, %v12865_v63  ;;  %v3113_v52 = vadd.f32 %v3081_v10, %v2268_v23  ;;  %v3640_v2 = vsel %vm1070_vm3, %v3638_v20, %v16075_v24  ;;  %v16077_v38 = vrot.slane %v13652_v35, 5 }
 0x33a   : > { %v4021_v15 = vmul.f32 %v13317_v25, %v13654_v6  ;;  %v3551_v61 = vadd.f32 %v3515_v39, %v3426_v48  ;;  %v3888_v44 = vrot.slane %v3828_v59, 6  ;;  %v4048_v63 = vmul.f32 %v13324_v26, %v13654_v6 }
 0x33b   : > { %17185 = vst [vmem:[#allocation74_spill] sm:$0xff] %v13663_v30  ;;  %v16083_v56 = vrot.slane %v13663_v30, 6  ;;  %v3765_v23 = vsel %vm1196_vm4, %v3763_v3, %v16077_v38  ;;  %v13681_v10 = vmul.f32 %v13324_v26, %v13665_v32  ;;  %v4173_v20 = vmul.f32 %v13333_v22, %v13654_v6  ;;  %v13822_v30 = vld [vmem:[#allocation2 + $0x120] sm:$0xff] }
 0x33c   : > { %v13687_v48 = vmul.f32 %v13333_v22, %v13665_v32  ;;  %v3676_v39 = vadd.f32 %v3640_v2, %v3551_v61  ;;  %v4108_v24 = vrot.slane %v4048_v63, 1  ;;  %v4298_v3 = vmul.f32 %v17189_v33, %v13654_v6  ;;  %v17191_v2 = vld [vmem:[#allocation88_spill] sm:$0xff]  ;;  %17211 = vst [vmem:[#allocation46_spill] sm:$0xff] %v13822_v30 }
 0x33d   : > { %17187 = vst [vmem:[#allocation78_spill] sm:$0xff] %v13681_v10  ;;  %v3890_v59 = vsel %vm1322_vm5, %v3888_v44, %v16083_v56  ;;  %v16088_v38 = vrot.slane %v13681_v10, 1  ;;  %v4233_v4 = vrot.slane %v4173_v20, 2  ;;  %v13698_v25 = vmul.f32 %v17189_v33, %v13665_v32 }
 0x33e   : > { %17188 = vst [vmem:[#allocation10_spill] sm:$0xff] %v13687_v48  ;;  %v16087_v26 = vrot.slane %v13687_v48, 2  ;;  %v3801_v22 = vadd.f32 %v3765_v23, %v3676_v39  ;;  %v4358_v35 = vrot.slane %v4298_v3, 3  ;;  %v4423_v61 = vmul.f32 %v17191_v2, %v13654_v6  ;;  %v13716_v23 = vld [vmem:[%s15312_s1 + $0x25] ss:$0 sm:$0xff] }
 0x33f   : > { %17190 = vst [vmem:[#allocation11_spill] sm:$0xff] %v13698_v25  ;;  %v13704_v44 = vmul.f32 %v17191_v2, %v13665_v32  ;;  %v4110_v63 = vsel %vm692_vm0, %v4108_v24, %v16088_v38  ;;  %v16089_v56 = vrot.slane %v13698_v25, 3  ;;  %17193 = vst [vmem:[#allocation34_spill] sm:$0xff] %v13716_v23  ;;  %v4548_v39 = vmul.f32 %v13716_v23, %v13654_v6  ;;  %v13731_v38 = vld [vmem:[%s15312_s1 + $0x26] ss:$0 sm:$0xff]  ;;  %v17198_v25 = vld [vmem:[#allocation42_spill] sm:$0xff] }
 0x340   : > { %v4235_v20 = vsel %vm818_vm1, %v4233_v4, %v16087_v26  ;;  %v3926_v3 = vadd.f32 %v3890_v59, %v3801_v22  ;;  %v4146_v2 = vadd.f32 %v4110_v63, %v4021_v15  ;;  %v4483_v33 = vrot.slane %v4423_v61, 4  ;;  %17195 = vst [vmem:[#allocation23_spill] sm:$0xff] %v13731_v38 }
 0x341   : > { %17192 = vst [vmem:[#allocation12_spill] sm:$0xff] %v13704_v44  ;;  %v16091_v10 = vrot.slane %v13704_v44, 4  ;;  %v4360_v24 = vsel %vm944_vm2, %v4358_v35, %v16089_v56  ;;  %v13726_v4 = vmul.f32 %v13716_v23, %v13665_v32  ;;  %v4608_v26 = vrot.slane %v4548_v39, 5  ;;  %v13746_v56 = vld [vmem:[%s15312_s1 + $0x28] ss:$0 sm:$0xff] }
 0x342   : > { %v4673_v22 = vmul.f32 %v13731_v38, %v13654_v6  ;;  %v3958_v15 = vadd.f32 %v3926_v3, %v3113_v52  ;;  %v4271_v59 = vadd.f32 %v4235_v20, %v4146_v2  ;;  %v13740_v35 = vmul.f32 %v13731_v38, %v13665_v32  ;;  %17197 = vst [vmem:[#allocation31_spill] sm:$0xff] %v13746_v56  ;;  %v13753_v2 = vld [vmem:[%s15312_s1 + $0x29] ss:$0 sm:$0xff]  ;;  %v13795_v23 = vld [vmem:[%s15312_s1 + $0x2c] ss:$0 sm:$0xff] }
 0x343   : > { %17194 = vst [vmem:[#allocation82_spill] sm:$0xff] %v13726_v4  ;;  %v4485_v61 = vsel %vm1070_vm3, %v4483_v33, %v16091_v10  ;;  %v4866_v52 = vmul.f32 %v13746_v56, %v17198_v25  ;;  %17199 = vst [vmem:[#allocation27_spill] sm:$0xff] %v13753_v2  ;;  %v4893_v33 = vmul.f32 %v13753_v2, %v17198_v25  ;;  %v13765_v10 = vld [vmem:[%s15312_s1 + $0x2a] ss:$0 sm:$0xff]  ;;  %v17202_v6 = vrot.slane %v13726_v4, 5 }
 0x344   : > { %17196 = vst [vmem:[#allocation26_spill] sm:$0xff] %v13740_v35  ;;  %v4733_v39 = vrot.slane %v4673_v22, 6  ;;  %v4396_v20 = vadd.f32 %v4360_v24, %v4271_v59  ;;  %v13760_v22 = vmul.f32 %v13753_v2, %v12993_v31  ;;  %17201 = vst [vmem:[#allocation49_spill] sm:$0xff] %v13765_v10  ;;  %v5018_v63 = vmul.f32 %v13765_v10, %v17198_v25  ;;  %v13779_v59 = vld [vmem:[%s15312_s1 + $0x2b] ss:$0 sm:$0xff] }
 0x345   : > { %v4610_v56 = vsel %vm1196_vm4, %v4608_v26, %v17202_v6  ;;  %v4953_v44 = vrot.slane %v4893_v33, 1  ;;  %v13774_v24 = vmul.f32 %v13765_v10, %v12993_v31  ;;  %17204 = vst [vmem:[#allocation37_spill] sm:$0xff] %v13779_v59  ;;  %v5143_v3 = vmul.f32 %v13779_v59, %v17198_v25  ;;  %17207 = vst [vmem:[#allocation38_spill] sm:$0xff] %v13795_v23 }
 0x346   : > { %17200 = vst [vmem:[#allocation93_spill] sm:$0xff] %v13760_v22  ;;  %v4521_v2 = vadd.f32 %v4485_v61, %v4396_v20  ;;  %v17205_v48 = vrot.slane %v13740_v35, 6  ;;  %v16108_v26 = vrot.slane %v13760_v22, 1  ;;  %v5078_v6 = vrot.slane %v5018_v63, 2 }
 0x347   : > { %17203 = vst [vmem:[#allocation41_spill] sm:$0xff] %v13774_v24  ;;  %v13790_v10 = vmul.f32 %v13779_v59, %v12993_v31  ;;  %v5203_v38 = vrot.slane %v5143_v3, 3  ;;  %v5268_v61 = vmul.f32 %v13795_v23, %v17198_v25  ;;  %v13804_v63 = vmul.f32 %v13795_v23, %v12993_v31 }
 0x348   : > { %v4735_v4 = vsel %vm1322_vm5, %v4733_v39, %v17205_v48  ;;  %v4646_v20 = vadd.f32 %v4610_v56, %v4521_v2  ;;  %v4955_v48 = vsel %vm692_vm0, %v4953_v44, %v16108_v26  ;;  %v13809_v39 = vld [vmem:[%s15312_s1 + $0x2d] ss:$0 sm:$0xff]  ;;  %v17209_v35 = vrot.slane %v13774_v24, 2 }
 0x349   : > { %17206 = vst [vmem:[#allocation63_spill] sm:$0xff] %v13790_v10  ;;  %17208 = vst [vmem:[#allocation43_spill] sm:$0xff] %v13804_v63  ;;  %v5393_v3 = vmul.f32 %v13809_v39, %v17198_v25  ;;  %v4991_v33 = vadd.f32 %v4955_v48, %v4866_v52  ;;  %v16118_v2 = vrot.slane %v13790_v10, 3  ;;  %v5328_v44 = vrot.slane %v5268_v61, 4  ;;  %v13838_v61 = vld [vmem:[#allocation2 + $0x128] sm:$0xff] }
 0x34a   : > { %v5080_v56 = vsel %vm818_vm1, %v5078_v6, %v17209_v35  ;;  %v4771_v26 = vadd.f32 %v4735_v4, %v4646_v20  ;;  %v16117_v22 = vrot.slane %v13804_v63, 4  ;;  %v13820_v23 = vmul.f32 %v13809_v39, %v12993_v31  ;;  %v13830_v35 = vld [vmem:[%s15312_s1 + $0x2e] ss:$0 sm:$0xff]  ;;  %v13847_v48 = vld [vmem:[%s15312_s1 + $0x30] ss:$0 sm:$0xff] }
 0x34b   : > { %v5453_v59 = vrot.slane %v5393_v3, 5  ;;  %v5116_v32 = vadd.f32 %v5080_v56, %v4991_v33  ;;  %v5205_v52 = vsel %vm944_vm2, %v5203_v38, %v16118_v2  ;;  %v5518_v4 = vmul.f32 %v13830_v35, %v17198_v25  ;;  %17213 = vst [vmem:[#allocation55_spill] sm:$0xff] %v13847_v48 }
 0x34c   : > { %17210 = vst [vmem:[#allocation44_spill] sm:$0xff] %v13820_v23  ;;  %v13836_v6 = vmul.f32 %v13830_v35, %v12993_v31  ;;  %v4803_v20 = vadd.f32 %v4771_v26, %v3958_v15  ;;  %v5330_v33 = vsel %vm1070_vm3, %v5328_v44, %v16117_v22  ;;  %v16119_v38 = vrot.slane %v13820_v23, 5  ;;  %v13855_v15 = vld [vmem:[%s15312_s1 + $0x31] ss:$0 sm:$0xff] }
 0x34d   : > { %v5711_v25 = vmul.f32 %v13847_v48, %v13822_v30  ;;  %v5241_v3 = vadd.f32 %v5205_v52, %v5116_v32  ;;  %v5578_v31 = vrot.slane %v5518_v4, 6  ;;  %17214 = vst [vmem:[#allocation47_spill] sm:$0xff] %v13855_v15  ;;  %v5738_v26 = vmul.f32 %v13855_v15, %v13822_v30  ;;  %v13869_v32 = vld [vmem:[%s15312_s1 + $0x32] ss:$0 sm:$0xff] }
 0x34e   : > { %17212 = vst [vmem:[#allocation53_spill] sm:$0xff] %v13836_v6  ;;  %v16128_v56 = vrot.slane %v13836_v6, 6  ;;  %v5455_v44 = vsel %vm1196_vm4, %v5453_v59, %v16119_v38  ;;  %v13864_v22 = vmul.f32 %v13855_v15, %v13838_v61  ;;  %17216 = vst [vmem:[#allocation50_spill] sm:$0xff] %v13869_v32  ;;  %v5863_v52 = vmul.f32 %v13869_v32, %v13822_v30  ;;  %v13883_v15 = vld [vmem:[%s15312_s1 + $0x33] ss:$0 sm:$0xff] }
 0x34f   : > { %v13875_v4 = vmul.f32 %v13869_v32, %v13838_v61  ;;  %v5366_v2 = vadd.f32 %v5330_v33, %v5241_v3  ;;  %v5798_v38 = vrot.slane %v5738_v26, 1  ;;  %17218 = vst [vmem:[#allocation33_spill] sm:$0xff] %v13883_v15  ;;  %v5988_v48 = vmul.f32 %v13883_v15, %v13822_v30  ;;  %v13896_v26 = vld [vmem:[%s15312_s1 + $0x34] ss:$0 sm:$0xff] }
 0x350   : > { %17215 = vst [vmem:[#allocation59_spill] sm:$0xff] %v13864_v22  ;;  %v5580_v59 = vsel %vm1322_vm5, %v5578_v31, %v16128_v56  ;;  %v5923_v63 = vrot.slane %v5863_v52, 2  ;;  %v13891_v33 = vmul.f32 %v13883_v15, %v13838_v61  ;;  %17220 = vst [vmem:[#allocation58_spill] sm:$0xff] %v13896_v26  ;;  %v6113_v56 = vmul.f32 %v13896_v26, %v13822_v30 }
 0x351   : > { %17217 = vst [vmem:[#allocation51_spill] sm:$0xff] %v13875_v4  ;;  %v5491_v3 = vadd.f32 %v5455_v44, %v5366_v2  ;;  %v6048_v31 = vrot.slane %v5988_v48, 3  ;;  %v13902_v23 = vmul.f32 %v13896_v26, %v13838_v61  ;;  %v17221_v52 = vrot.slane %v13864_v22, 1  ;;  %v13914_v44 = vld [vmem:[%s15312_s1 + $0x35] ss:$0 sm:$0xff] }
 0x352   : > { %17219 = vst [vmem:[#allocation39_spill] sm:$0xff] %v13891_v33  ;;  %v17222_v15 = vrot.slane %v13875_v4, 2  ;;  %v16138_v48 = vrot.slane %v13891_v33, 3  ;;  %17223 = vst [vmem:[#allocation61_spill] sm:$0xff] %v13914_v44  ;;  %v6238_v6 = vmul.f32 %v13914_v44, %v13822_v30  ;;  %v6173_v24 = vrot.slane %v6113_v56, 4 }
 0x353   : > { %v5800_v32 = vsel %vm692_vm0, %v5798_v38, %v17221_v52  ;;  %v5616_v26 = vadd.f32 %v5580_v59, %v5491_v3  ;;  %v16142_v22 = vrot.slane %v13902_v23, 4  ;;  %v614_v38 = vld [vmem:[#allocation2 + $0xa0] sm:$0x3f]  ;;  %v13929_v4 = vld [vmem:[%s15312_s1 + $0x36] ss:$0 sm:$0xff] }
 0x354   : > { %v5925_v2 = vsel %vm818_vm1, %v5923_v63, %v17222_v15  ;;  %v5836_v10 = vadd.f32 %v5800_v32, %v5711_v25  ;;  %v6050_v63 = vsel %vm944_vm2, %v6048_v31, %v16138_v48  ;;  %v13924_v15 = vmul.f32 %v13914_v44, %v13838_v61 }
 0x355   : > { %v6298_v52 = vrot.slane %v6238_v6, 5  ;;  %v6363_v25 = vmul.f32 %v13929_v4, %v13822_v30  ;;  %v5648_v56 = vadd.f32 %v5616_v26, %v4803_v20  ;;  %v6175_v59 = vsel %vm1070_vm3, %v6173_v24, %v16142_v22 }
 0x356   : > { %v5961_v32 = vadd.f32 %v5925_v2, %v5836_v10  ;;  %v13938_v3 = vmul.f32 %v13929_v4, %v13838_v61  ;;  %v16145_v6 = vrot.slane %v13924_v15, 5  ;;  %v636_v48 = vmul.f32 %v17153_v9, %v13407_v19 }
 0x357   : > { %v6423_v31 = vrot.slane %v6363_v25, 6  ;;  %v664_v33 = vmul.f32 %v17154_v57, %v614_v38  ;;  %v790_v10 = vmul.f32 %v17155_v62, %v614_v38  ;;  %v916_v26 = vmul.f32 %v17158_v42, %v614_v38 }
 0x358   : > { %v6086_v44 = vadd.f32 %v6050_v63, %v5961_v32  ;;  %v6424_v20 = vrot.slane %v13938_v3, 6  ;;  %v6300_v24 = vsel %vm1196_vm4, %v6298_v52, %v16145_v6  ;;  %v1042_v22 = vmul.f32 %v17159_v13, %v614_v38 }
 0x359   : > { %v726_v2 = vrot.slane %v664_v33, 1  ;;  %v1168_v25 = vmul.f32 %v17160_v46, %v614_v38  ;;  %v852_v9 = vrot.slane %v790_v10, 2  ;;  %v978_v57 = vrot.slane %v916_v26, 3  ;;  %v1464_v33 = vld [vmem:[#allocation2 + $0xb8] sm:$0x3f] }
 0x35a   : > { %v6211_v30 = vadd.f32 %v6175_v59, %v6086_v44  ;;  %v6425_v19 = vsel %vm1322_vm5, %v6423_v31, %v6424_v20  ;;  %v17224_v62 = vrot.slane %v13422_v50, 1  ;;  %v1104_v63 = vrot.slane %v1042_v22, 4 }
 0x35b   : > { %v1230_v32 = vrot.slane %v1168_v25, 5  ;;  %v1294_v52 = vmul.f32 %v13110_v40, %v614_v38  ;;  %v17225_v46 = vrot.slane %v13430_v54, 2  ;;  %v17226_v59 = vrot.slane %v13437_v49, 3 }
 0x35c   : > { %v727_v42 = vsel %vm692_vm0, %v17224_v62, %v726_v2  ;;  %v6336_v6 = vadd.f32 %v6300_v24, %v6211_v30  ;;  %v17227_v10 = vrot.slane %v13445_v34, 4  ;;  %v17228_v22 = vrot.slane %v13455_v55, 5 }
 0x35d   : > { %v762_v13 = vadd.f32 %v727_v42, %v636_v48  ;;  %v853_v44 = vsel %vm818_vm1, %v17225_v46, %v852_v9  ;;  %v979_v31 = vsel %vm944_vm2, %v17226_v59, %v978_v57  ;;  %v1356_v40 = vrot.slane %v1294_v52, 6  ;;  %v2309_v42 = vld [vmem:[#allocation2 + $0xd0] sm:$0x3f] }
 0x35e   : > { %v1105_v50 = vsel %vm1070_vm3, %v17227_v10, %v1104_v63  ;;  %v1231_v26 = vsel %vm1196_vm4, %v17228_v22, %v1230_v32  ;;  %v1487_v30 = vmul.f32 %v13128_v43, %v13467_v51  ;;  %v6461_v48 = vadd.f32 %v6425_v19, %v6336_v6 }
 0x35f   : > { %v888_v54 = vadd.f32 %v853_v44, %v762_v13  ;;  %v1515_v38 = vmul.f32 %v13134_v28, %v1464_v33  ;;  %v1640_v49 = vmul.f32 %v13140_v11, %v1464_v33  ;;  %v17229_v24 = vrot.slane %v13463_v7, 6 }
 0x360   : > { %v1765_v2 = vmul.f32 %v17163_v1, %v1464_v33  ;;  %v1890_v55 = vmul.f32 %v17164_v18, %v1464_v33  ;;  %v2015_v25 = vmul.f32 %v13161_v21, %v1464_v33  ;;  %v13981_v9 = vadd.f32 %v6461_v48, %v5648_v56 }
 0x361   : > { %v1357_v34 = vsel %vm1322_vm5, %v17229_v24, %v1356_v40  ;;  %v1014_v57 = vadd.f32 %v979_v31, %v888_v54  ;;  %v1576_v43 = vrot.slane %v1515_v38, 1  ;;  %v1701_v6 = vrot.slane %v1640_v49, 2  ;;  %v17236_v31 = vld [vmem:[#allocation91_spill] sm:$0xff] }
 0x362   : > { %17230 = vst [vmem:[#allocation54_spill] sm:$0xff] %v13981_v9  ;;  %v1826_v19 = vrot.slane %v1765_v2, 3  ;;  %v1951_v62 = vrot.slane %v1890_v55, 4  ;;  %v2076_v28 = vrot.slane %v2015_v25, 5  ;;  %v2140_v11 = vmul.f32 %v13169_v14, %v1464_v33  ;;  %6553 = vadd.xlane.f32.xlu0 %v13981_v9  ;;  %v3154_v2 = vld [vmem:[#allocation2 + $0xe8] sm:$0x3f] }
 0x363   : > { %v1140_v7 = vadd.f32 %v1105_v50, %v1014_v57  ;;  %v17231_v1 = vrot.slane %v13485_v36, 1  ;;  %v17232_v21 = vrot.slane %v13494_v58, 2  ;;  %v2332_v63 = vmul.f32 %v13182_v37, %v13537_v53  ;;  %v17237_v50 = vld [vmem:[#allocation79_spill] sm:$0xff]  ;;  %v17241_v57 = vld [vmem:[#allocation73_spill] sm:$0xff]  ;;  %v14360_v9 = vld [vmem:[%s15312_s1 + $0x13] ss:$0 sm:$0xff] }
 0x364   : > { %v17233_v52 = vrot.slane %v13502_v60, 3  ;;  %v17234_v33 = vrot.slane %v13513_v29, 4  ;;  %v17235_v36 = vrot.slane %v13526_v41, 5  ;;  %v2201_v58 = vrot.slane %v2140_v11, 6  ;;  %v17240_v55 = vld [vmem:[#allocation95_spill] sm:$0xff]  ;;  %v17245_v11 = vld [vmem:[#allocation17_spill] sm:$0xff] }
 0x365   : > { %v1577_v18 = vsel %vm692_vm0, %v17231_v1, %v1576_v43  ;;  %v1702_v56 = vsel %vm818_vm1, %v17232_v21, %v1701_v6  ;;  %v1266_v44 = vadd.f32 %v1231_v26, %v1140_v7  ;;  %v2360_v59 = vmul.f32 %v13197_v16, %v2309_v42  ;;  %v17243_v6 = vld [vmem:[#allocation56_spill] sm:$0xff]  ;;  %17334 = vst [vmem:[#allocation25_spill] sm:$0xff] %v14360_v9 }
 0x366   : > { %v1612_v32 = vadd.f32 %v1577_v18, %v1487_v30  ;;  %v1827_v14 = vsel %vm944_vm2, %v17233_v52, %v1826_v19  ;;  %v1952_v13 = vsel %vm1070_vm3, %v17234_v33, %v1951_v62  ;;  %v2077_v46 = vsel %vm1196_vm4, %v17235_v36, %v2076_v28  ;;  %v17238_v30 = vld [vmem:[#allocation57_spill] sm:$0xff]  ;;  %v17247_v18 = vld [vmem:[#allocation90_spill] sm:$0xff]  ;;  %v8228_v36 = vld [vmem:[#allocation2 + $0xe0] sm:$0xff] }
 0x367   : > { %v2485_v10 = vmul.f32 %v17236_v31, %v2309_v42  ;;  %v2610_v22 = vmul.f32 %v17237_v50, %v2309_v42  ;;  %v2735_v60 = vmul.f32 %v17172_v17, %v2309_v42  ;;  %v2860_v40 = vmul.f32 %v13221_v45, %v2309_v42  ;;  %v17255_v50 = vld [vmem:[#allocation77_spill] sm:$0xff] }
 0x368   : > { %v1737_v37 = vadd.f32 %v1702_v56, %v1612_v32  ;;  %v1392_v29 = vadd.f32 %v1357_v34, %v1266_v44  ;;  %v17239_v48 = vrot.slane %v17238_v30, 6  ;;  %v2421_v54 = vrot.slane %v2360_v59, 1  ;;  %v17249_v32 = vld [vmem:[#allocation69_spill] sm:$0xff] }
 0x369   : > { %v2546_v38 = vrot.slane %v2485_v10, 2  ;;  %v2671_v49 = vrot.slane %v2610_v22, 3  ;;  %v2796_v24 = vrot.slane %v2735_v60, 4  ;;  %v2921_v16 = vrot.slane %v2860_v40, 5  ;;  %v17251_v44 = vld [vmem:[#allocation81_spill] sm:$0xff]  ;;  %v17254_v10 = vld [vmem:[#allocation30_spill] sm:$0xff] }
 0x36a   : > { %v2202_v41 = vsel %vm1322_vm5, %v17239_v48, %v2201_v58  ;;  %v1862_v26 = vadd.f32 %v1827_v14, %v1737_v37  ;;  %v1424_v25 = vadd.f32 %v17240_v55, %v1392_v29  ;;  %v17242_v43 = vrot.slane %v17241_v57, 1  ;;  %v17252_v59 = vld [vmem:[#allocation89_spill] sm:$0xff]  ;;  %v17257_v29 = vld [vmem:[#allocation32_spill] sm:$0xff] }
 0x36b   : > { %v17244_v45 = vrot.slane %v17243_v6, 2  ;;  %v2985_v19 = vmul.f32 %v13242_v5, %v2309_v42  ;;  %v17246_v7 = vrot.slane %v17245_v11, 3  ;;  %v17248_v21 = vrot.slane %v17247_v18, 4 }
 0x36c   : > { %v2422_v17 = vsel %vm692_vm0, %v17242_v43, %v2421_v54  ;;  %v1987_v62 = vadd.f32 %v1952_v13, %v1862_v26  ;;  %v17250_v52 = vrot.slane %v17249_v32, 5  ;;  %v3177_v58 = vmul.f32 %v8228_v36, %v17251_v44  ;;  %v17253_v13 = vld [vmem:[#allocation48_spill] sm:$0xff]  ;;  %v17267_v32 = vld [vmem:[#allocation85_spill] sm:$0xff]  ;;  %v17270_v44 = vld [vmem:[#allocation86_spill] sm:$0xff] }
 0x36d   : > { %v2547_v34 = vsel %vm818_vm1, %v17244_v45, %v2546_v38  ;;  %v2457_v28 = vadd.f32 %v2422_v17, %v2332_v63  ;;  %v2672_v1 = vsel %vm944_vm2, %v17246_v7, %v2671_v49  ;;  %v2797_v56 = vsel %vm1070_vm3, %v17248_v21, %v2796_v24  ;;  %v17258_v24 = vld [vmem:[#allocation84_spill] sm:$0xff]  ;;  %v17263_v7 = vld [vmem:[#allocation18_spill] sm:$0xff] }
 0x36e   : > { %v2922_v14 = vsel %vm1196_vm4, %v17250_v52, %v2921_v16  ;;  %v3046_v33 = vrot.slane %v2985_v19, 6  ;;  %v3205_v5 = vmul.f32 %v17252_v59, %v3154_v2  ;;  %v2112_v42 = vadd.f32 %v2077_v46, %v1987_v62  ;;  %v3999_v17 = vld [vmem:[#allocation2 + $0x100] sm:$0x3f] }
 0x36f   : > { %v2582_v63 = vadd.f32 %v2547_v34, %v2457_v28  ;;  %v3330_v31 = vmul.f32 %v17253_v13, %v3154_v2  ;;  %v3455_v37 = vmul.f32 %v17254_v10, %v3154_v2  ;;  %v17256_v22 = vrot.slane %v17255_v50, 6  ;;  %v17265_v21 = vld [vmem:[#allocation92_spill] sm:$0xff] }
 0x370   : > { %v3266_v40 = vrot.slane %v3205_v5, 1  ;;  %v3580_v30 = vmul.f32 %v17257_v29, %v3154_v2  ;;  %v3705_v48 = vmul.f32 %v17182_v12, %v3154_v2  ;;  %v2237_v54 = vadd.f32 %v2202_v41, %v2112_v42  ;;  %v17272_v5 = vld [vmem:[#allocation88_spill] sm:$0xff] }
 0x371   : > { %v3047_v60 = vsel %vm1322_vm5, %v17256_v22, %v3046_v33  ;;  %v2707_v38 = vadd.f32 %v2672_v1, %v2582_v63  ;;  %v3391_v26 = vrot.slane %v3330_v31, 2  ;;  %v3516_v49 = vrot.slane %v3455_v37, 3  ;;  %v17268_v33 = vld [vmem:[#allocation74_spill] sm:$0xff] }
 0x372   : > { %v17259_v46 = vrot.slane %v17258_v24, 1  ;;  %v3641_v55 = vrot.slane %v3580_v30, 4  ;;  %v3766_v57 = vrot.slane %v3705_v48, 5  ;;  %v3830_v43 = vmul.f32 %v13299_v27, %v3154_v2  ;;  %v4844_v24 = vld [vmem:[#allocation2 + $0x118] sm:$0x3f] }
 0x373   : > { %v2269_v6 = vadd.f32 %v2237_v54, %v1424_v25  ;;  %v2832_v45 = vadd.f32 %v2797_v56, %v2707_v38  ;;  %v17260_v19 = vrot.slane %v13621_v0, 2  ;;  %v17261_v41 = vrot.slane %v13632_v47, 3  ;;  %v17266_v56 = vld [vmem:[#allocation94_spill] sm:$0xff] }
 0x374   : > { %v3267_v16 = vsel %vm692_vm0, %v17259_v46, %v3266_v40  ;;  %v17262_v28 = vrot.slane %v13641_v8, 4  ;;  %v17264_v1 = vrot.slane %v17263_v7, 5  ;;  %v3891_v2 = vrot.slane %v3830_v43, 6  ;;  %v17274_v40 = vld [vmem:[#allocation23_spill] sm:$0xff]  ;;  %v17275_v54 = vld [vmem:[#allocation78_spill] sm:$0xff] }
 0x375   : > { %v3302_v34 = vadd.f32 %v3267_v16, %v3177_v58  ;;  %v3392_v12 = vsel %vm818_vm1, %v17260_v19, %v3391_v26  ;;  %v3517_v62 = vsel %vm944_vm2, %v17261_v41, %v3516_v49  ;;  %v2957_v25 = vadd.f32 %v2922_v14, %v2832_v45  ;;  %v17271_v58 = vld [vmem:[#allocation36_spill] sm:$0xff]  ;;  %v17273_v14 = vld [vmem:[#allocation34_spill] sm:$0xff]  ;;  %v17285_v7 = vld [vmem:[#allocation31_spill] sm:$0xff] }
 0x376   : > { %v3642_v11 = vsel %vm1070_vm3, %v17262_v28, %v3641_v55  ;;  %v3767_v27 = vsel %vm1196_vm4, %v17264_v1, %v3766_v57  ;;  %v4022_v0 = vmul.f32 %v17266_v56, %v17265_v21  ;;  %v4050_v52 = vmul.f32 %v17267_v32, %v3999_v17  ;;  %v17277_v16 = vld [vmem:[#allocation10_spill] sm:$0xff]  ;;  %v17279_v57 = vld [vmem:[#allocation11_spill] sm:$0xff]  ;;  %v17287_v56 = vld [vmem:[#allocation49_spill] sm:$0xff] }
 0x377   : > { %v3427_v18 = vadd.f32 %v3392_v12, %v3302_v34  ;;  %v17269_v47 = vrot.slane %v17268_v33, 6  ;;  %v4175_v8 = vmul.f32 %v17270_v44, %v3999_v17  ;;  %v4300_v59 = vmul.f32 %v17271_v58, %v3999_v17  ;;  %v17281_v34 = vld [vmem:[#allocation12_spill] sm:$0xff]  ;;  %v17283_v12 = vld [vmem:[#allocation82_spill] sm:$0xff]  ;;  %v17288_v32 = vld [vmem:[#allocation37_spill] sm:$0xff] }
 0x378   : > { %v4425_v42 = vmul.f32 %v17272_v5, %v3999_v17  ;;  %v3082_v63 = vadd.f32 %v3047_v60, %v2957_v25  ;;  %v4111_v31 = vrot.slane %v4050_v52, 1  ;;  %v4550_v10 = vmul.f32 %v17273_v14, %v3999_v17  ;;  %v17286_v25 = vld [vmem:[#allocation27_spill] sm:$0xff] }
 0x379   : > { %v3892_v36 = vsel %vm1322_vm5, %v17269_v47, %v3891_v2  ;;  %v3552_v13 = vadd.f32 %v3517_v62, %v3427_v18  ;;  %v4236_v37 = vrot.slane %v4175_v8, 2  ;;  %v4361_v50 = vrot.slane %v4300_v59, 3  ;;  %v17289_v47 = vld [vmem:[#allocation26_spill] sm:$0xff] }
 0x37a   : > { %v4486_v22 = vrot.slane %v4425_v42, 4  ;;  %v4675_v29 = vmul.f32 %v17274_v40, %v3999_v17  ;;  %v3114_v30 = vadd.f32 %v3082_v63, %v2269_v6  ;;  %v17276_v38 = vrot.slane %v17275_v54, 1  ;;  %v17291_v8 = vld [vmem:[#allocation38_spill] sm:$0xff] }
 0x37b   : > { %v3677_v48 = vadd.f32 %v3642_v11, %v3552_v13  ;;  %v4611_v49 = vrot.slane %v4550_v10, 5  ;;  %v17278_v60 = vrot.slane %v17277_v16, 2  ;;  %v17280_v43 = vrot.slane %v17279_v57, 3  ;;  %v8229_v11 = vld [vmem:[#allocation2 + $0x110] sm:$0xff] }
 0x37c   : > { %v4112_v26 = vsel %vm692_vm0, %v17276_v38, %v4111_v31  ;;  %v17282_v19 = vrot.slane %v17281_v34, 4  ;;  %v17284_v41 = vrot.slane %v17283_v12, 5  ;;  %v4736_v28 = vrot.slane %v4675_v29, 6  ;;  %v17294_v38 = vld [vmem:[#allocation41_spill] sm:$0xff] }
 0x37d   : > { %v4147_v46 = vadd.f32 %v4112_v26, %v4022_v0  ;;  %v4237_v55 = vsel %vm818_vm1, %v17278_v60, %v4236_v37  ;;  %v4362_v45 = vsel %vm944_vm2, %v17280_v43, %v4361_v50  ;;  %v3802_v6 = vadd.f32 %v3767_v27, %v3677_v48 }
 0x37e   : > { %v4487_v17 = vsel %vm1070_vm3, %v17282_v19, %v4486_v22  ;;  %v4612_v62 = vsel %vm1196_vm4, %v17284_v41, %v4611_v49  ;;  %v4867_v1 = vmul.f32 %v8229_v11, %v17285_v7  ;;  %v4895_v18 = vmul.f32 %v17286_v25, %v4844_v24  ;;  %v5689_v22 = vld [vmem:[#allocation2 + $0x130] sm:$0x3f]  ;;  %v17303_v41 = vld [vmem:[#allocation47_spill] sm:$0xff] }
 0x37f   : > { %v4272_v2 = vadd.f32 %v4237_v55, %v4147_v46  ;;  %v5020_v0 = vmul.f32 %v17287_v56, %v4844_v24  ;;  %v5145_v52 = vmul.f32 %v17288_v32, %v4844_v24  ;;  %v3927_v33 = vadd.f32 %v3892_v36, %v3802_v6  ;;  %v17292_v36 = vld [vmem:[#allocation93_spill] sm:$0xff]  ;;  %v17296_v46 = vld [vmem:[#allocation63_spill] sm:$0xff]  ;;  %v17304_v11 = vld [vmem:[#allocation50_spill] sm:$0xff] }
 0x380   : > { %v17290_v44 = vrot.slane %v17289_v47, 6  ;;  %v5270_v58 = vmul.f32 %v17291_v8, %v4844_v24  ;;  %v5395_v59 = vmul.f32 %v13809_v39, %v4844_v24  ;;  %v4956_v42 = vrot.slane %v4895_v18, 1  ;;  %v17302_v6 = vld [vmem:[#allocation55_spill] sm:$0xff] }
 0x381   : > { %v4397_v5 = vadd.f32 %v4362_v45, %v4272_v2  ;;  %v5081_v63 = vrot.slane %v5020_v0, 2  ;;  %v5206_v13 = vrot.slane %v5145_v52, 3  ;;  %v3959_v31 = vadd.f32 %v3927_v33, %v3114_v30  ;;  %v17298_v30 = vld [vmem:[#allocation43_spill] sm:$0xff]  ;;  %v17305_v0 = vld [vmem:[#allocation53_spill] sm:$0xff] }
 0x382   : > { %v4737_v27 = vsel %vm1322_vm5, %v17290_v44, %v4736_v28  ;;  %v5331_v10 = vrot.slane %v5270_v58, 4  ;;  %v5456_v37 = vrot.slane %v5395_v59, 5  ;;  %v5520_v50 = vmul.f32 %v13830_v35, %v4844_v24  ;;  %v17300_v24 = vld [vmem:[#allocation44_spill] sm:$0xff]  ;;  %v17307_v33 = vld [vmem:[#allocation33_spill] sm:$0xff]  ;;  %v17308_v44 = vld [vmem:[#allocation58_spill] sm:$0xff] }
 0x383   : > { %v4522_v29 = vadd.f32 %v4487_v17, %v4397_v5  ;;  %v17293_v48 = vrot.slane %v17292_v36, 1  ;;  %v17295_v26 = vrot.slane %v17294_v38, 2  ;;  %v17297_v16 = vrot.slane %v17296_v46, 3  ;;  %v17310_v36 = vld [vmem:[#allocation59_spill] sm:$0xff] }
 0x384   : > { %v17299_v57 = vrot.slane %v17298_v30, 4  ;;  %v17301_v45 = vrot.slane %v17300_v24, 5  ;;  %v5581_v19 = vrot.slane %v5520_v50, 6  ;;  %v5712_v12 = vmul.f32 %v17302_v6, %v13838_v61  ;;  %v17312_v38 = vld [vmem:[#allocation51_spill] sm:$0xff] }
 0x385   : > { %v4957_v54 = vsel %vm692_vm0, %v17293_v48, %v4956_v42  ;;  %v5082_v49 = vsel %vm818_vm1, %v17295_v26, %v5081_v63  ;;  %v5207_v60 = vsel %vm944_vm2, %v17297_v16, %v5206_v13  ;;  %v4647_v17 = vadd.f32 %v4612_v62, %v4522_v29  ;;  %v17309_v62 = vld [vmem:[#allocation61_spill] sm:$0xff] }
 0x386   : > { %v4992_v55 = vadd.f32 %v4957_v54, %v4867_v1  ;;  %v5332_v43 = vsel %vm1070_vm3, %v17299_v57, %v5331_v10  ;;  %v5457_v34 = vsel %vm1196_vm4, %v17301_v45, %v5456_v37  ;;  %v5740_v28 = vmul.f32 %v17303_v41, %v5689_v22 }
 0x387   : > { %v5865_v2 = vmul.f32 %v17304_v11, %v5689_v22  ;;  %v17306_v1 = vrot.slane %v17305_v0, 6  ;;  %v5990_v47 = vmul.f32 %v17307_v33, %v5689_v22  ;;  %v6115_v58 = vmul.f32 %v17308_v44, %v5689_v22 }
 0x388   : > { %v5117_v18 = vadd.f32 %v5082_v49, %v4992_v55  ;;  %v4772_v59 = vadd.f32 %v4737_v27, %v4647_v17  ;;  %v5801_v5 = vrot.slane %v5740_v28, 1  ;;  %v6240_v63 = vmul.f32 %v17309_v62, %v5689_v22  ;;  %v17314_v55 = vld [vmem:[#allocation39_spill] sm:$0xff] }
 0x389   : > { %v5582_v52 = vsel %vm1322_vm5, %v17306_v1, %v5581_v19  ;;  %v5926_v42 = vrot.slane %v5865_v2, 2  ;;  %v6051_v10 = vrot.slane %v5990_v47, 3  ;;  %v6176_v37 = vrot.slane %v6115_v58, 4  ;;  %v14132_v19 = vld [vmem:[%s15312_s1] ss:$0 sm:$0xff] }
 0x38a   : > { %v5242_v13 = vadd.f32 %v5207_v60, %v5117_v18  ;;  %v6365_v50 = vmul.f32 %v13929_v4, %v5689_v22  ;;  %v4804_v29 = vadd.f32 %v4772_v59, %v3959_v31  ;;  %v17311_v48 = vrot.slane %v17310_v36, 1  ;;  %v14150_v18 = vld [vmem:[%s15312_s1 + $0x2] ss:$0 sm:$0xff]  ;;  %v14164_v58 = vld [vmem:[%s15312_s1 + $0x3] ss:$0 sm:$0xff] }
 0x38b   : > { %v17313_v26 = vrot.slane %v17312_v38, 2  ;;  %v6301_v46 = vrot.slane %v6240_v63, 5  ;;  %v17315_v30 = vrot.slane %v17314_v55, 3  ;;  %v17316_v57 = vrot.slane %v13902_v23, 4 }
 0x38c   : > { %v5802_v54 = vsel %vm692_vm0, %v17311_v48, %v5801_v5  ;;  %v5367_v27 = vadd.f32 %v5332_v43, %v5242_v13  ;;  %v17317_v31 = vrot.slane %v13924_v15, 5  ;;  %v6426_v45 = vrot.slane %v6365_v50, 6  ;;  %v17318_v43 = vld [vmem:[#allocation45_spill] sm:$0xff] }
 0x38d   : > { %v5927_v49 = vsel %vm818_vm1, %v17313_v26, %v5926_v42  ;;  %v5837_v16 = vadd.f32 %v5802_v54, %v5712_v12  ;;  %v6052_v60 = vsel %vm944_vm2, %v17315_v30, %v6051_v10  ;;  %v6177_v22 = vsel %vm1070_vm3, %v17316_v57, %v6176_v37  ;;  %v14139_v12 = vld [vmem:[%s15312_s1 + $0x1] ss:$0 sm:$0xff]  ;;  %v14177_v37 = vld [vmem:[%s15312_s1 + $0x4] ss:$0 sm:$0xff] }
 0x38e   : > { %v6302_v24 = vsel %vm1196_vm4, %v17317_v31, %v6301_v46  ;;  %v637_v17 = vmul.f32 %v14132_v19, %v17318_v43  ;;  %v665_v23 = vmul.f32 %v14139_v12, %v17318_v43  ;;  %v5492_v15 = vadd.f32 %v5457_v34, %v5367_v27 }
 0x38f   : > { %v5962_v28 = vadd.f32 %v5927_v49, %v5837_v16  ;;  %v14145_v2 = vmul.f32 %v14139_v12, %v13467_v51  ;;  %v791_v0 = vmul.f32 %v14150_v18, %v17318_v43  ;;  %v6427_v1 = vsel %vm1322_vm5, %v6424_v20, %v6426_v45  ;;  %v14196_v16 = vld [vmem:[%s15312_s1 + $0x5] ss:$0 sm:$0xff] }
 0x390   : > { %v728_v47 = vrot.slane %v665_v23, 1  ;;  %v14159_v34 = vmul.f32 %v14150_v18, %v13467_v51  ;;  %v917_v59 = vmul.f32 %v14164_v58, %v17318_v43  ;;  %v5617_v5 = vadd.f32 %v5582_v52, %v5492_v15 }
 0x391   : > { %v6087_v42 = vadd.f32 %v6052_v60, %v5962_v28  ;;  %v16154_v63 = vrot.slane %v14145_v2, 1  ;;  %v854_v3 = vrot.slane %v791_v0, 2  ;;  %v14172_v13 = vmul.f32 %v14164_v58, %v13467_v51 }
 0x392   : > { %v16153_v20 = vrot.slane %v14159_v34, 2  ;;  %v980_v10 = vrot.slane %v917_v59, 3  ;;  %v1043_v50 = vmul.f32 %v14177_v37, %v17318_v43  ;;  %v5649_v52 = vadd.f32 %v5617_v5, %v4804_v29  ;;  %v17319_v59 = vld [vmem:[#allocation28_spill] sm:$0xff] }
 0x393   : > { %v6212_v36 = vadd.f32 %v6177_v22, %v6087_v42  ;;  %v730_v48 = vsel %vm692_vm0, %v728_v47, %v16154_v63  ;;  %v14186_v54 = vmul.f32 %v14177_v37, %v13467_v51  ;;  %v16152_v49 = vrot.slane %v14172_v13, 3  ;;  %v14210_v22 = vld [vmem:[%s15312_s1 + $0x6] ss:$0 sm:$0xff]  ;;  %v14238_v42 = vld [vmem:[%s15312_s1 + $0x9] ss:$0 sm:$0xff] }
 0x394   : > { %v763_v38 = vadd.f32 %v730_v48, %v637_v17  ;;  %v856_v26 = vsel %vm818_vm1, %v854_v3, %v16153_v20  ;;  %v1106_v46 = vrot.slane %v1043_v50, 4  ;;  %v1169_v55 = vmul.f32 %v14196_v16, %v17318_v43  ;;  %v14334_v63 = vld [vmem:[%s15312_s1 + $0x11] ss:$0 sm:$0xff] }
 0x395   : > { %v6337_v27 = vadd.f32 %v6302_v24, %v6212_v36  ;;  %v16148_v29 = vrot.slane %v14186_v54, 4  ;;  %v14202_v30 = vmul.f32 %v14196_v16, %v13467_v51  ;;  %v982_v57 = vsel %vm944_vm2, %v980_v10, %v16152_v49  ;;  %v14252_v36 = vld [vmem:[%s15312_s1 + $0xa] ss:$0 sm:$0xff]  ;;  %17329 = vst [vmem:[#allocation65_spill] sm:$0xff] %v14334_v63 }
 0x396   : > { %v889_v60 = vadd.f32 %v856_v26, %v763_v38  ;;  %v1295_v31 = vmul.f32 %v14210_v22, %v17318_v43  ;;  %v14216_v24 = vmul.f32 %v14210_v22, %v13467_v51  ;;  %v1232_v23 = vrot.slane %v1169_v55, 5  ;;  %v14226_v43 = vld [vmem:[%s15312_s1 + $0x8] ss:$0 sm:$0xff] }
 0x397   : > { %v6462_v45 = vadd.f32 %v6427_v1, %v6337_v27  ;;  %v1108_v17 = vsel %vm1070_vm3, %v1106_v46, %v16148_v29  ;;  %v16147_v15 = vrot.slane %v14202_v30, 5  ;;  %v1488_v51 = vmul.f32 %v14226_v43, %v17319_v59  ;;  %v14265_v27 = vld [vmem:[%s15312_s1 + $0xb] ss:$0 sm:$0xff] }
 0x398   : > { %v1015_v28 = vadd.f32 %v982_v57, %v889_v60  ;;  %v1358_v0 = vrot.slane %v1295_v31, 6  ;;  %v16146_v47 = vrot.slane %v14216_v24, 6  ;;  %v1516_v3 = vmul.f32 %v14238_v42, %v17319_v59 }
 0x399   : > { %v14230_v1 = vadd.f32 %v6462_v45, %v5649_v52  ;;  %v1234_v5 = vsel %vm1196_vm4, %v1232_v23, %v16147_v15  ;;  %v14244_v10 = vmul.f32 %v14238_v42, %v13537_v53  ;;  %v1641_v48 = vmul.f32 %v14252_v36, %v17319_v59 }
 0x39a   : > { %v1141_v50 = vadd.f32 %v1108_v17, %v1015_v28  ;;  %v1360_v52 = vsel %vm1322_vm5, %v1358_v0, %v16146_v47  ;;  %v14258_v38 = vmul.f32 %v14252_v36, %v13537_v53  ;;  %v1578_v26 = vrot.slane %v1516_v3, 1  ;;  %v14277_v17 = vld [vmem:[%s15312_s1 + $0xc] ss:$0 sm:$0xff] }
 0x39b   : > { %17320 = vst [vmem:[#allocation15_spill] sm:$0xff] %v14230_v1  ;;  %17321 = vst [vmem:[#allocation16_spill] sm:$0xff] %v14244_v10  ;;  %6555 = vadd.xlane.f32.xlu1 %v14230_v1  ;;  %v16151_v46 = vrot.slane %v14244_v10, 1  ;;  %v1766_v55 = vmul.f32 %v14265_v27, %v17319_v59  ;;  %v14271_v60 = vmul.f32 %v14265_v27, %v13537_v53  ;;  %v1703_v31 = vrot.slane %v1641_v48, 2 }
 0x39c   : > { %17322 = vst [vmem:[#allocation70_spill] sm:$0xff] %v14258_v38  ;;  %v1267_v57 = vadd.f32 %v1234_v5, %v1141_v50  ;;  %v16150_v45 = vrot.slane %v14258_v38, 2  ;;  %v1891_v23 = vmul.f32 %v14277_v17, %v17319_v59  ;;  %v14287_v5 = vmul.f32 %v14277_v17, %v13537_v53  ;;  %v4000_v38 = vld [vmem:[#allocation2 + $0x108] sm:$0xff] }
 0x39d   : > { %17323 = vst [vmem:[#allocation52_spill] sm:$0xff] %v14271_v60  ;;  %v1580_v28 = vsel %vm692_vm0, %v1578_v26, %v16151_v46  ;;  %v1828_v0 = vrot.slane %v1766_v55, 3  ;;  %v16149_v3 = vrot.slane %v14271_v60, 3  ;;  %v14299_v26 = vld [vmem:[%s15312_s1 + $0xd] ss:$0 sm:$0xff]  ;;  %v14318_v46 = vld [vmem:[#allocation2 + $0xe0] sm:$0xff] }
 0x39e   : > { %17324 = vst [vmem:[#allocation68_spill] sm:$0xff] %v14287_v5  ;;  %v1613_v50 = vadd.f32 %v1580_v28, %v1488_v51  ;;  %v1705_v48 = vsel %vm818_vm1, %v1703_v31, %v16150_v45  ;;  %v1953_v47 = vrot.slane %v1891_v23, 4  ;;  %v16155_v29 = vrot.slane %v14287_v5, 4  ;;  %v2310_v31 = vld [vmem:[#allocation2 + $0xd8] sm:$0xff]  ;;  %17327 = vst [vmem:[#allocation13_spill] sm:$0xff] %v14318_v46 }
 0x39f   : > { %v1830_v15 = vsel %vm944_vm2, %v1828_v0, %v16149_v3  ;;  %v2016_v55 = vmul.f32 %v14299_v26, %v17319_v59  ;;  %v14305_v51 = vmul.f32 %v14299_v26, %v13537_v53  ;;  %v1393_v23 = vadd.f32 %v1360_v52, %v1267_v57  ;;  %v14310_v0 = vld [vmem:[%s15312_s1 + $0xe] ss:$0 sm:$0xff]  ;;  %v14409_v60 = vld [vmem:[%s15312_s1 + $0x16] ss:$0 sm:$0xff] }
 0x3a0   : > { %v1738_v28 = vadd.f32 %v1705_v48, %v1613_v50  ;;  %v2141_v3 = vmul.f32 %v14310_v0, %v17319_v59  ;;  %v14316_v45 = vmul.f32 %v14310_v0, %v13537_v53  ;;  %v1955_v49 = vsel %vm1070_vm3, %v1953_v47, %v16155_v29  ;;  %v14327_v50 = vld [vmem:[%s15312_s1 + $0x10] ss:$0 sm:$0xff]  ;;  %17341 = vst [vmem:[#allocation95_spill] sm:$0xff] %v14409_v60 }
 0x3a1   : > { %17325 = vst [vmem:[#allocation75_spill] sm:$0xff] %v14305_v51  ;;  %v2078_v52 = vrot.slane %v2016_v55, 5  ;;  %v16157_v57 = vrot.slane %v14305_v51, 5  ;;  %17328 = vst [vmem:[#allocation20_spill] sm:$0xff] %v14327_v50  ;;  %v2333_v59 = vmul.f32 %v14327_v50, %v2310_v31  ;;  %v2361_v47 = vmul.f32 %v14334_v63, %v2310_v31 }
 0x3a2   : > { %17326 = vst [vmem:[#allocation62_spill] sm:$0xff] %v14316_v45  ;;  %v1863_v48 = vadd.f32 %v1830_v15, %v1738_v28  ;;  %v2203_v20 = vrot.slane %v2141_v3, 6  ;;  %v14342_v29 = vmul.f32 %v14334_v63, %v14318_v46  ;;  %v14347_v15 = vld [vmem:[%s15312_s1 + $0x12] ss:$0 sm:$0xff]  ;;  %v17333_v1 = vrot.slane %v14316_v45, 6 }
 0x3a3   : > { %v2080_v55 = vsel %vm1196_vm4, %v2078_v52, %v16157_v57  ;;  %17331 = vst [vmem:[#allocation24_spill] sm:$0xff] %v14347_v15  ;;  %v2486_v3 = vmul.f32 %v14347_v15, %v2310_v31  ;;  %v14352_v28 = vmul.f32 %v14347_v15, %v14318_v46  ;;  %v2423_v57 = vrot.slane %v2361_v47, 1 }
 0x3a4   : > { %17330 = vst [vmem:[#allocation76_spill] sm:$0xff] %v14342_v29  ;;  %v1988_v53 = vadd.f32 %v1955_v49, %v1863_v48  ;;  %v2205_v52 = vsel %vm1322_vm5, %v2203_v20, %v17333_v1  ;;  %v2611_v51 = vmul.f32 %v14360_v9, %v2310_v31  ;;  %v16166_v63 = vrot.slane %v14342_v29, 1  ;;  %v14372_v20 = vld [vmem:[%s15312_s1 + $0x14] ss:$0 sm:$0xff] }
 0x3a5   : > { %17332 = vst [vmem:[#allocation19_spill] sm:$0xff] %v14352_v28  ;;  %v2548_v50 = vrot.slane %v2486_v3, 2  ;;  %v16168_v5 = vrot.slane %v14352_v28, 2  ;;  %v14367_v49 = vmul.f32 %v14360_v9, %v14318_v46  ;;  %17336 = vst [vmem:[#allocation83_spill] sm:$0xff] %v14372_v20  ;;  %v2736_v1 = vmul.f32 %v14372_v20, %v2310_v31 }
 0x3a6   : > { %v2113_v48 = vadd.f32 %v2080_v55, %v1988_v53  ;;  %v2673_v45 = vrot.slane %v2611_v51, 3  ;;  %v14377_v47 = vmul.f32 %v14372_v20, %v14318_v46  ;;  %v2425_v3 = vsel %vm692_vm0, %v2423_v57, %v16166_v63  ;;  %v14389_v55 = vld [vmem:[%s15312_s1 + $0x15] ss:$0 sm:$0xff]  ;;  %v14395_v20 = vld [vmem:[%s15313_s2] ss:$0 sm:$0xff] }
 0x3a7   : > { %17335 = vst [vmem:[#allocation66_spill] sm:$0xff] %v14367_v49  ;;  %v2550_v53 = vsel %vm818_vm1, %v2548_v50, %v16168_v5  ;;  %v16172_v51 = vrot.slane %v14367_v49, 3  ;;  %17338 = vst [vmem:[#allocation91_spill] sm:$0xff] %v14389_v55  ;;  %v2861_v9 = vmul.f32 %v14389_v55, %v2310_v31  ;;  %v1425_v57 = vadd.f32 %v14395_v20, %v1393_v23  ;;  %v14423_v49 = vld [vmem:[%s15312_s1 + $0x18] ss:$0 sm:$0xff] }
 0x3a8   : > { %17337 = vst [vmem:[#allocation42_spill] sm:$0xff] %v14377_v47  ;;  %17339 = vst [vmem:[#allocation79_spill] sm:$0xff] %v14395_v20  ;;  %v2458_v63 = vadd.f32 %v2425_v3, %v2333_v59  ;;  %v2798_v28 = vrot.slane %v2736_v1, 4  ;;  %v16175_v50 = vrot.slane %v14377_v47, 4  ;;  %v14404_v29 = vmul.f32 %v14389_v55, %v14318_v46  ;;  %v17344_v20 = vld [vmem:[#allocation21_spill] sm:$0xff] }
 0x3a9   : > { %v2675_v5 = vsel %vm944_vm2, %v2673_v45, %v16172_v51  ;;  %v2923_v15 = vrot.slane %v2861_v9, 5  ;;  %v2986_v23 = vmul.f32 %v14409_v60, %v2310_v31  ;;  %v2238_v59 = vadd.f32 %v2205_v52, %v2113_v48  ;;  %17343 = vst [vmem:[#allocation56_spill] sm:$0xff] %v14423_v49 }
 0x3aa   : > { %17340 = vst [vmem:[#allocation57_spill] sm:$0xff] %v14404_v29  ;;  %v2583_v1 = vadd.f32 %v2550_v53, %v2458_v63  ;;  %v2800_v3 = vsel %vm1070_vm3, %v2798_v28, %v16175_v50  ;;  %v14417_v45 = vmul.f32 %v14409_v60, %v14318_v46  ;;  %v16181_v51 = vrot.slane %v14404_v29, 5  ;;  %v14430_v63 = vld [vmem:[%s15312_s1 + $0x19] ss:$0 sm:$0xff]  ;;  %v14472_v46 = vld [vmem:[%s15312_s1 + $0x1c] ss:$0 sm:$0xff] }
 0x3ab   : > { %v3048_v9 = vrot.slane %v2986_v23, 6  ;;  %v3178_v31 = vmul.f32 %v14423_v49, %v17344_v20  ;;  %17345 = vst [vmem:[#allocation17_spill] sm:$0xff] %v14430_v63  ;;  %v3206_v28 = vmul.f32 %v14430_v63, %v17344_v20  ;;  %v14437_v53 = vmul.f32 %v14430_v63, %v17265_v21  ;;  %v14442_v23 = vld [vmem:[%s15312_s1 + $0x1a] ss:$0 sm:$0xff]  ;;  %17352 = vst [vmem:[#allocation30_spill] sm:$0xff] %v14472_v46 }
 0x3ac   : > { %17342 = vst [vmem:[#allocation73_spill] sm:$0xff] %v14417_v45  ;;  %v2708_v52 = vadd.f32 %v2675_v5, %v2583_v1  ;;  %17347 = vst [vmem:[#allocation69_spill] sm:$0xff] %v14442_v23  ;;  %v3331_v50 = vmul.f32 %v14442_v23, %v17344_v20  ;;  %v2925_v49 = vsel %vm1196_vm4, %v2923_v15, %v16181_v51  ;;  %v14456_v1 = vld [vmem:[%s15312_s1 + $0x1b] ss:$0 sm:$0xff]  ;;  %v17350_v60 = vrot.slane %v14417_v45, 6 }
 0x3ad   : > { %17346 = vst [vmem:[#allocation90_spill] sm:$0xff] %v14437_v53  ;;  %v3268_v47 = vrot.slane %v3206_v28, 1  ;;  %v14451_v5 = vmul.f32 %v14442_v23, %v17265_v21  ;;  %17349 = vst [vmem:[#allocation89_spill] sm:$0xff] %v14456_v1  ;;  %v3456_v48 = vmul.f32 %v14456_v1, %v17344_v20  ;;  %v16186_v15 = vrot.slane %v14437_v53, 1 }
 0x3ae   : > { %v2833_v63 = vadd.f32 %v2800_v3, %v2708_v52  ;;  %v3050_v29 = vsel %vm1322_vm5, %v3048_v9, %v17350_v60  ;;  %v3393_v28 = vrot.slane %v3331_v50, 2  ;;  %v14467_v23 = vmul.f32 %v14456_v1, %v17265_v21  ;;  %v14486_v9 = vld [vmem:[%s15312_s1 + $0x1d] ss:$0 sm:$0xff] }
 0x3af   : > { %17348 = vst [vmem:[#allocation81_spill] sm:$0xff] %v14451_v5  ;;  %v3518_v55 = vrot.slane %v3456_v48, 3  ;;  %v3581_v3 = vmul.f32 %v14472_v46, %v17344_v20  ;;  %v3270_v60 = vsel %vm692_vm0, %v3268_v47, %v16186_v15  ;;  %v14481_v50 = vmul.f32 %v14472_v46, %v17265_v21 }
 0x3b0   : > { %17351 = vst [vmem:[#allocation48_spill] sm:$0xff] %v14467_v23  ;;  %v2958_v52 = vadd.f32 %v2925_v49, %v2833_v63  ;;  %v3706_v48 = vmul.f32 %v14486_v9, %v17344_v20  ;;  %v3303_v51 = vadd.f32 %v3270_v60, %v3178_v31  ;;  %v17354_v45 = vrot.slane %v14451_v5, 2  ;;  %v14522_v60 = vld [vmem:[%s15312_s1 + $0x20] ss:$0 sm:$0xff] }
 0x3b1   : > { %17353 = vst [vmem:[#allocation77_spill] sm:$0xff] %v14481_v50  ;;  %v16193_v63 = vrot.slane %v14467_v23, 3  ;;  %v3643_v47 = vrot.slane %v3581_v3, 4  ;;  %v2270_v15 = vadd.f32 %v2238_v59, %v1425_v57  ;;  %v16192_v53 = vrot.slane %v14481_v50, 4  ;;  %17358 = vst [vmem:[#allocation92_spill] sm:$0xff] %v14522_v60 }
 0x3b2   : > { %v3395_v49 = vsel %vm818_vm1, %v3393_v28, %v17354_v45  ;;  %v14497_v46 = vmul.f32 %v14486_v9, %v17265_v21  ;;  %v3768_v1 = vrot.slane %v3706_v48, 5  ;;  %v14505_v45 = vld [vmem:[%s15312_s1 + $0x1e] ss:$0 sm:$0xff]  ;;  %v14513_v28 = vld [vmem:[#allocation2 + $0x110] sm:$0xff]  ;;  %v3083_v3 = vadd.f32 %v3050_v29, %v2958_v52  ;;  %v14529_v29 = vld [vmem:[%s15312_s1 + $0x21] ss:$0 sm:$0xff] }
 0x3b3   : > { %v3428_v10 = vadd.f32 %v3395_v49, %v3303_v51  ;;  %v3520_v31 = vsel %vm944_vm2, %v3518_v55, %v16193_v63  ;;  %17356 = vst [vmem:[#allocation84_spill] sm:$0xff] %v14505_v45  ;;  %v3831_v57 = vmul.f32 %v14505_v45, %v17344_v20  ;;  %v14511_v59 = vmul.f32 %v14505_v45, %v17265_v21 }
 0x3b4   : > { %17355 = vst [vmem:[#allocation32_spill] sm:$0xff] %v14497_v46  ;;  %v3645_v51 = vsel %vm1070_vm3, %v3643_v47, %v16192_v53  ;;  %v16194_v55 = vrot.slane %v14497_v46, 5  ;;  %v4023_v20 = vmul.f32 %v14522_v60, %v4000_v38  ;;  %17359 = vst [vmem:[#allocation94_spill] sm:$0xff] %v14529_v29  ;;  %v4051_v52 = vmul.f32 %v14529_v29, %v4000_v38  ;;  %v14555_v60 = vld [vmem:[%s15312_s1 + $0x23] ss:$0 sm:$0xff] }
 0x3b5   : > { %17357 = vst [vmem:[#allocation18_spill] sm:$0xff] %v14511_v59  ;;  %v3553_v48 = vadd.f32 %v3520_v31, %v3428_v10  ;;  %v3893_v49 = vrot.slane %v3831_v57, 6  ;;  %v16201_v21 = vrot.slane %v14511_v59, 6  ;;  %v14537_v53 = vmul.f32 %v14529_v29, %v14513_v28  ;;  %v14542_v10 = vld [vmem:[%s15312_s1 + $0x22] ss:$0 sm:$0xff]  ;;  %17362 = vst [vmem:[#allocation86_spill] sm:$0xff] %v14555_v60 }
 0x3b6   : > { %v3770_v47 = vsel %vm1196_vm4, %v3768_v1, %v16194_v55  ;;  %17360 = vst [vmem:[#allocation85_spill] sm:$0xff] %v14542_v10  ;;  %v4176_v31 = vmul.f32 %v14542_v10, %v4000_v38  ;;  %v14547_v57 = vmul.f32 %v14542_v10, %v14513_v28  ;;  %v4113_v55 = vrot.slane %v4051_v52, 1 }
 0x3b7   : > { %v3678_v63 = vadd.f32 %v3645_v51, %v3553_v48  ;;  %v3895_v1 = vsel %vm1322_vm5, %v3893_v49, %v16201_v21  ;;  %v4301_v29 = vmul.f32 %v14555_v60, %v4000_v38  ;;  %v16207_v46 = vrot.slane %v14537_v53, 1  ;;  %v14567_v49 = vld [vmem:[%s15312_s1 + $0x24] ss:$0 sm:$0xff] }
 0x3b8   : > { %17361 = vst [vmem:[#allocation74_spill] sm:$0xff] %v14547_v57  ;;  %v4238_v50 = vrot.slane %v4176_v31, 2  ;;  %v16208_v23 = vrot.slane %v14547_v57, 2  ;;  %v14562_v51 = vmul.f32 %v14555_v60, %v14513_v28  ;;  %17363 = vst [vmem:[#allocation36_spill] sm:$0xff] %v14567_v49  ;;  %v4426_v52 = vmul.f32 %v14567_v49, %v4000_v38 }
 0x3b9   : > { %v3803_v48 = vadd.f32 %v3770_v47, %v3678_v63  ;;  %v4363_v59 = vrot.slane %v4301_v29, 3  ;;  %v14572_v21 = vmul.f32 %v14567_v49, %v14513_v28  ;;  %v4115_v31 = vsel %vm692_vm0, %v4113_v55, %v16207_v46 }
 0x3ba   : > { %v4240_v63 = vsel %vm818_vm1, %v4238_v50, %v16208_v23  ;;  %v4364_v29 = vrot.slane %v14562_v51, 3  ;;  %v4551_v47 = vmul.f32 %v17273_v14, %v4000_v38  ;;  %v3115_v60 = vadd.f32 %v3083_v3, %v2270_v15  ;;  %v8271_v51 = vld [vmem:[%s15312_s1 + $0x2b] ss:$0 sm:$0xff] }
 0x3bb   : > { %v4148_v10 = vadd.f32 %v4115_v31, %v4023_v20  ;;  %v4488_v5 = vrot.slane %v4426_v52, 4  ;;  %v16213_v45 = vrot.slane %v14572_v21, 4  ;;  %v14588_v55 = vmul.f32 %v17273_v14, %v14513_v28  ;;  %v17364_v52 = vld [vmem:[#allocation46_spill] sm:$0xff] }
 0x3bc   : > { %v4365_v49 = vsel %vm944_vm2, %v4363_v59, %v4364_v29  ;;  %v4613_v46 = vrot.slane %v4551_v47, 5  ;;  %v4676_v50 = vmul.f32 %v17274_v40, %v4000_v38  ;;  %v3928_v23 = vadd.f32 %v3895_v1, %v3803_v48 }
 0x3bd   : > { %v4273_v57 = vadd.f32 %v4240_v63, %v4148_v10  ;;  %v4490_v15 = vsel %vm1070_vm3, %v4488_v5, %v16213_v45  ;;  %v14596_v3 = vmul.f32 %v17274_v40, %v14513_v28  ;;  %v16210_v20 = vrot.slane %v14588_v55, 5 }
 0x3be   : > { %v4738_v59 = vrot.slane %v4676_v50, 6  ;;  %v4868_v14 = vmul.f32 %v17285_v7, %v17364_v52  ;;  %v4896_v31 = vmul.f32 %v17286_v25, %v17364_v52  ;;  %v14606_v1 = vmul.f32 %v17286_v25, %v13838_v61 }
 0x3bf   : > { %v4398_v38 = vadd.f32 %v4365_v49, %v4273_v57  ;;  %v16211_v10 = vrot.slane %v14596_v3, 6  ;;  %v5021_v40 = vmul.f32 %v17287_v56, %v17364_v52  ;;  %v4615_v5 = vsel %vm1196_vm4, %v4613_v46, %v16210_v20 }
 0x3c0   : > { %v4958_v48 = vrot.slane %v4896_v31, 1  ;;  %v14615_v7 = vmul.f32 %v17287_v56, %v13838_v61  ;;  %v5146_v57 = vmul.f32 %v17288_v32, %v17364_v52  ;;  %v16212_v63 = vrot.slane %v14606_v1, 1 }
 0x3c1   : > { %v4523_v49 = vadd.f32 %v4490_v15, %v4398_v38  ;;  %v4740_v25 = vsel %vm1322_vm5, %v4738_v59, %v16211_v10  ;;  %v5083_v47 = vrot.slane %v5021_v40, 2  ;;  %v14626_v46 = vmul.f32 %v17288_v32, %v13838_v61 }
 0x3c2   : > { %v16220_v50 = vrot.slane %v14615_v7, 2  ;;  %v5208_v31 = vrot.slane %v5146_v57, 3  ;;  %v5271_v56 = vmul.f32 %v17291_v8, %v17364_v52  ;;  %v4960_v15 = vsel %vm692_vm0, %v4958_v48, %v16212_v63  ;;  %v5690_v63 = vld [vmem:[#allocation2 + $0x138] sm:$0xff] }
 0x3c3   : > { %v4648_v20 = vadd.f32 %v4615_v5, %v4523_v49  ;;  %v14635_v59 = vmul.f32 %v17291_v8, %v13838_v61  ;;  %v5396_v38 = vmul.f32 %v13809_v39, %v17364_v52  ;;  %v4993_v40 = vadd.f32 %v4960_v15, %v4868_v14 }
 0x3c4   : > { %v5085_v32 = vsel %vm818_vm1, %v5083_v47, %v16220_v50  ;;  %v16217_v57 = vrot.slane %v14626_v46, 3  ;;  %v5333_v10 = vrot.slane %v5271_v56, 4  ;;  %v3960_v5 = vadd.f32 %v3928_v23, %v3115_v60  ;;  %v14657_v23 = vld [vmem:[#allocation2 + $0x140] sm:$0xff] }
 0x3c5   : > { %v16215_v49 = vrot.slane %v14635_v59, 4  ;;  %v14646_v48 = vmul.f32 %v13809_v39, %v13838_v61  ;;  %v5458_v8 = vrot.slane %v5396_v38, 5  ;;  %v5118_v45 = vadd.f32 %v5085_v32, %v4993_v40 }
 0x3c6   : > { %v5210_v14 = vsel %vm944_vm2, %v5208_v31, %v16217_v57  ;;  %v5521_v47 = vmul.f32 %v13830_v35, %v17364_v52  ;;  %v14655_v56 = vmul.f32 %v13830_v35, %v13838_v61  ;;  %v4773_v60 = vadd.f32 %v4740_v25, %v4648_v20  ;;  %v617_v57 = vld [vmem:[#allocation2 + $0xb8] sm:$0x3f] }
 0x3c7   : > { %v5335_v39 = vsel %vm1070_vm3, %v5333_v10, %v16215_v49  ;;  %v16214_v15 = vrot.slane %v14646_v48, 5  ;;  %v5713_v38 = vmul.f32 %v17302_v6, %v5690_v63  ;;  %v5243_v40 = vadd.f32 %v5210_v14, %v5118_v45 }
 0x3c8   : > { %v5583_v31 = vrot.slane %v5521_v47, 6  ;;  %v16216_v32 = vrot.slane %v14655_v56, 6  ;;  %v5741_v52 = vmul.f32 %v17303_v41, %v5690_v63  ;;  %v14671_v61 = vmul.f32 %v17303_v41, %v14657_v23 }
 0x3c9   : > { %v5460_v35 = vsel %vm1196_vm4, %v5458_v8, %v16214_v15  ;;  %v5866_v20 = vmul.f32 %v17304_v11, %v5690_v63  ;;  %v14676_v10 = vmul.f32 %v17304_v11, %v14657_v23  ;;  %v5368_v6 = vadd.f32 %v5335_v39, %v5243_v40 }
 0x3ca   : > { %v5585_v45 = vsel %vm1322_vm5, %v5583_v31, %v16216_v32  ;;  %v5803_v25 = vrot.slane %v5741_v52, 1  ;;  %v5991_v14 = vmul.f32 %v17307_v33, %v5690_v63  ;;  %v16218_v8 = vrot.slane %v14671_v61, 1 }
 0x3cb   : > { %v5928_v47 = vrot.slane %v5866_v20, 2  ;;  %v16219_v41 = vrot.slane %v14676_v10, 2  ;;  %v14686_v15 = vmul.f32 %v17307_v33, %v14657_v23  ;;  %v5493_v49 = vadd.f32 %v5460_v35, %v5368_v6 }
 0x3cc   : > { %v6053_v11 = vrot.slane %v5991_v14, 3  ;;  %v6116_v39 = vmul.f32 %v17308_v44, %v5690_v63  ;;  %v14691_v40 = vmul.f32 %v17308_v44, %v14657_v23  ;;  %v5805_v31 = vsel %vm692_vm0, %v5803_v25, %v16218_v8 }
 0x3cd   : > { %v5930_v52 = vsel %vm818_vm1, %v5928_v47, %v16219_v41  ;;  %v6054_v20 = vrot.slane %v14686_v15, 3  ;;  %v6241_v33 = vmul.f32 %v17309_v62, %v5690_v63  ;;  %v4805_v35 = vadd.f32 %v4773_v60, %v3960_v5 }
 0x3ce   : > { %v5838_v6 = vadd.f32 %v5805_v31, %v5713_v38  ;;  %v6178_v14 = vrot.slane %v6116_v39, 4  ;;  %v16222_v32 = vrot.slane %v14691_v40, 4  ;;  %v14707_v25 = vmul.f32 %v17309_v62, %v14657_v23  ;;  %v8264_v39 = vld [vmem:[#allocation2 + $0xb0] sm:$0xff] }
 0x3cf   : > { %v6055_v44 = vsel %vm944_vm2, %v6053_v11, %v6054_v20  ;;  %v6303_v8 = vrot.slane %v6241_v33, 5  ;;  %v6366_v47 = vmul.f32 %v13929_v4, %v5690_v63  ;;  %v5618_v41 = vadd.f32 %v5585_v45, %v5493_v49 }
 0x3d0   : > { %v5963_v50 = vadd.f32 %v5930_v52, %v5838_v6  ;;  %v6180_v5 = vsel %vm1070_vm3, %v6178_v14, %v16222_v32  ;;  %v14715_v60 = vmul.f32 %v13929_v4, %v14657_v23  ;;  %v16221_v38 = vrot.slane %v14707_v25, 5 }
 0x3d1   : > { %v6428_v11 = vrot.slane %v6366_v47, 6  ;;  %v638_v62 = vmul.f32 %v8264_v39, %v14132_v19  ;;  %v667_v31 = vmul.f32 %v14139_v12, %v617_v57  ;;  %v793_v49 = vmul.f32 %v14150_v18, %v617_v57 }
 0x3d2   : > { %v6088_v33 = vadd.f32 %v6055_v44, %v5963_v50  ;;  %v6429_v63 = vrot.slane %v14715_v60, 6  ;;  %v919_v45 = vmul.f32 %v14164_v58, %v617_v57  ;;  %v6305_v4 = vsel %vm1196_vm4, %v6303_v8, %v16221_v38 }
 0x3d3   : > { %v731_v52 = vrot.slane %v667_v31, 1  ;;  %v1045_v6 = vmul.f32 %v14177_v37, %v617_v57  ;;  %v1171_v14 = vmul.f32 %v14196_v16, %v617_v57  ;;  %v857_v12 = vrot.slane %v793_v49, 2  ;;  %v1467_v31 = vld [vmem:[#allocation2 + $0xd0] sm:$0x3f] }
 0x3d4   : > { %v6213_v47 = vadd.f32 %v6180_v5, %v6088_v33  ;;  %v6430_v19 = vsel %vm1322_vm5, %v6428_v11, %v6429_v63  ;;  %v983_v50 = vrot.slane %v919_v45, 3  ;;  %v17365_v18 = vrot.slane %v14145_v2, 1 }
 0x3d5   : > { %v1109_v44 = vrot.slane %v1045_v6, 4  ;;  %v1235_v39 = vrot.slane %v1171_v14, 5  ;;  %v1297_v8 = vmul.f32 %v14210_v22, %v617_v57  ;;  %v5650_v38 = vadd.f32 %v5618_v41, %v4805_v35 }
 0x3d6   : > { %v732_v58 = vsel %vm692_vm0, %v17365_v18, %v731_v52  ;;  %v6338_v37 = vadd.f32 %v6305_v4, %v6213_v47  ;;  %v17366_v16 = vrot.slane %v14159_v34, 2  ;;  %v17367_v11 = vrot.slane %v14172_v13, 3  ;;  %v8265_v4 = vld [vmem:[#allocation2 + $0xc8] sm:$0xff] }
 0x3d7   : > { %v764_v32 = vadd.f32 %v732_v58, %v638_v62  ;;  %v17368_v2 = vrot.slane %v14186_v54, 4  ;;  %v17369_v45 = vrot.slane %v14202_v30, 5  ;;  %v1361_v57 = vrot.slane %v1297_v8, 6  ;;  %v17375_v8 = vld [vmem:[#allocation52_spill] sm:$0xff] }
 0x3d8   : > { %v858_v5 = vsel %vm818_vm1, %v17366_v16, %v857_v12  ;;  %v984_v33 = vsel %vm944_vm2, %v17367_v11, %v983_v50  ;;  %v6463_v41 = vadd.f32 %v6430_v19, %v6338_v37  ;;  %v1518_v62 = vmul.f32 %v14238_v42, %v1467_v31  ;;  %v17379_v11 = vld [vmem:[#allocation13_spill] sm:$0xff] }
 0x3d9   : > { %v1110_v49 = vsel %vm1070_vm3, %v17368_v2, %v1109_v44  ;;  %v1236_v22 = vsel %vm1196_vm4, %v17369_v45, %v1235_v39  ;;  %v890_v35 = vadd.f32 %v858_v5, %v764_v32  ;;  %v1643_v34 = vmul.f32 %v14252_v36, %v1467_v31  ;;  %v17377_v5 = vld [vmem:[#allocation68_spill] sm:$0xff] }
 0x3da   : > { %v1489_v13 = vmul.f32 %v8265_v4, %v14226_v43  ;;  %v1768_v52 = vmul.f32 %v14265_v27, %v1467_v31  ;;  %v1893_v54 = vmul.f32 %v14277_v17, %v1467_v31  ;;  %v2018_v6 = vmul.f32 %v14299_v26, %v1467_v31  ;;  %v2312_v43 = vld [vmem:[#allocation2 + $0xe8] sm:$0x3f]  ;;  %v17371_v17 = vld [vmem:[#allocation16_spill] sm:$0xff] }
 0x3db   : > { %v14753_v14 = vadd.f32 %v6463_v41, %v5650_v38  ;;  %v1016_v30 = vadd.f32 %v984_v33, %v890_v35  ;;  %v1581_v47 = vrot.slane %v1518_v62, 1  ;;  %v1706_v12 = vrot.slane %v1643_v34, 2  ;;  %v17373_v38 = vld [vmem:[#allocation70_spill] sm:$0xff]  ;;  %v17380_v33 = vld [vmem:[#allocation20_spill] sm:$0xff]  ;;  %v17383_v4 = vld [vmem:[#allocation25_spill] sm:$0xff] }
 0x3dc   : > { %v17370_v32 = vrot.slane %v14216_v24, 6  ;;  %v1831_v19 = vrot.slane %v1768_v52, 3  ;;  %v1956_v36 = vrot.slane %v1893_v54, 4  ;;  %v2143_v50 = vmul.f32 %v14310_v0, %v1467_v31  ;;  %v17382_v35 = vld [vmem:[#allocation24_spill] sm:$0xff]  ;;  %v17384_v52 = vld [vmem:[#allocation83_spill] sm:$0xff] }
 0x3dd   : > { %6557 = vadd.xlane.f32.xlu0 %v14753_v14  ;;  %v1142_v27 = vadd.f32 %v1110_v49, %v1016_v30  ;;  %v17372_v18 = vrot.slane %v17371_v17, 1  ;;  %v17374_v58 = vrot.slane %v17373_v38, 2  ;;  %v2081_v39 = vrot.slane %v2018_v6, 5  ;;  %v17385_v6 = vld [vmem:[#allocation91_spill] sm:$0xff] }
 0x3de   : > { %v1362_v42 = vsel %vm1322_vm5, %v17370_v32, %v1361_v57  ;;  %v17376_v37 = vrot.slane %v17375_v8, 3  ;;  %v17378_v0 = vrot.slane %v17377_v5, 4  ;;  %v2334_v2 = vmul.f32 %v17380_v33, %v17379_v11  ;;  %v17381_v57 = vld [vmem:[#allocation65_spill] sm:$0xff]  ;;  %v17395_v33 = vld [vmem:[#allocation79_spill] sm:$0xff] }
 0x3df   : > { %v1582_v26 = vsel %vm692_vm0, %v17372_v18, %v1581_v47  ;;  %v1707_v44 = vsel %vm818_vm1, %v17374_v58, %v1706_v12  ;;  %v1268_v49 = vadd.f32 %v1236_v22, %v1142_v27  ;;  %v2206_v45 = vrot.slane %v2143_v50, 6  ;;  %v17386_v12 = vld [vmem:[#allocation75_spill] sm:$0xff]  ;;  %v17388_v50 = vld [vmem:[#allocation62_spill] sm:$0xff]  ;;  %v3157_v58 = vld [vmem:[#allocation2 + $0x100] sm:$0x3f] }
 0x3e0   : > { %v1614_v24 = vadd.f32 %v1582_v26, %v1489_v13  ;;  %v1832_v16 = vsel %vm944_vm2, %v17376_v37, %v1831_v19  ;;  %v1957_v31 = vsel %vm1070_vm3, %v17378_v0, %v1956_v36  ;;  %v2363_v41 = vmul.f32 %v17381_v57, %v2312_v43  ;;  %v17392_v37 = vld [vmem:[#allocation19_spill] sm:$0xff] }
 0x3e1   : > { %v2488_v62 = vmul.f32 %v17382_v35, %v2312_v43  ;;  %v2613_v13 = vmul.f32 %v17383_v4, %v2312_v43  ;;  %v2738_v54 = vmul.f32 %v17384_v52, %v2312_v43  ;;  %v2863_v30 = vmul.f32 %v17385_v6, %v2312_v43  ;;  %v8266_v52 = vld [vmem:[#allocation2 + $0xf8] sm:$0xff] }
 0x3e2   : > { %v1739_v34 = vadd.f32 %v1707_v44, %v1614_v24  ;;  %v1394_v47 = vadd.f32 %v1362_v42, %v1268_v49  ;;  %v17387_v32 = vrot.slane %v17386_v12, 5  ;;  %v2426_v36 = vrot.slane %v2363_v41, 1  ;;  %v17390_v44 = vld [vmem:[#allocation76_spill] sm:$0xff]  ;;  %v17396_v41 = vld [vmem:[#allocation66_spill] sm:$0xff]  ;;  %v17401_v12 = vld [vmem:[#allocation17_spill] sm:$0xff] }
 0x3e3   : > { %v2551_v17 = vrot.slane %v2488_v62, 2  ;;  %v17389_v27 = vrot.slane %v17388_v50, 6  ;;  %v2676_v26 = vrot.slane %v2613_v13, 3  ;;  %v2801_v38 = vrot.slane %v2738_v54, 4  ;;  %v17398_v62 = vld [vmem:[#allocation42_spill] sm:$0xff]  ;;  %v17400_v54 = vld [vmem:[#allocation56_spill] sm:$0xff] }
 0x3e4   : > { %v2082_v19 = vsel %vm1196_vm4, %v17387_v32, %v2081_v39  ;;  %v1864_v22 = vadd.f32 %v1832_v16, %v1739_v34  ;;  %v17391_v24 = vrot.slane %v17390_v44, 1  ;;  %v17393_v42 = vrot.slane %v17392_v37, 2  ;;  %v17394_v39 = vld [vmem:[#allocation95_spill] sm:$0xff] }
 0x3e5   : > { %v2207_v18 = vsel %vm1322_vm5, %v17389_v27, %v2206_v45  ;;  %v2926_v0 = vrot.slane %v2863_v30, 5  ;;  %v2988_v11 = vmul.f32 %v17394_v39, %v2312_v43  ;;  %v1426_v16 = vadd.f32 %v17395_v33, %v1394_v47  ;;  %v17407_v39 = vld [vmem:[#allocation90_spill] sm:$0xff] }
 0x3e6   : > { %v2427_v8 = vsel %vm692_vm0, %v17391_v24, %v2426_v36  ;;  %v2552_v5 = vsel %vm818_vm1, %v17393_v42, %v2551_v17  ;;  %v1989_v49 = vadd.f32 %v1957_v31, %v1864_v22  ;;  %v17397_v45 = vrot.slane %v17396_v41, 3  ;;  %v17402_v36 = vld [vmem:[#allocation69_spill] sm:$0xff]  ;;  %v4002_v41 = vld [vmem:[#allocation2 + $0x118] sm:$0x3f] }
 0x3e7   : > { %v2459_v57 = vadd.f32 %v2427_v8, %v2334_v2  ;;  %v17399_v34 = vrot.slane %v17398_v62, 4  ;;  %v3051_v13 = vrot.slane %v2988_v11, 6  ;;  %v3179_v6 = vmul.f32 %v8266_v52, %v17400_v54  ;;  %v17403_v31 = vld [vmem:[#allocation89_spill] sm:$0xff] }
 0x3e8   : > { %v2677_v35 = vsel %vm944_vm2, %v17397_v45, %v2676_v26  ;;  %v3208_v30 = vmul.f32 %v17401_v12, %v3157_v58  ;;  %v2114_v32 = vadd.f32 %v2082_v19, %v1989_v49  ;;  %v3333_v47 = vmul.f32 %v17402_v36, %v3157_v58  ;;  %v17404_v17 = vld [vmem:[#allocation57_spill] sm:$0xff]  ;;  %v17406_v26 = vld [vmem:[#allocation30_spill] sm:$0xff]  ;;  %v17409_v49 = vld [vmem:[#allocation84_spill] sm:$0xff] }
 0x3e9   : > { %v2802_v4 = vsel %vm1070_vm3, %v17399_v34, %v2801_v38  ;;  %v2584_v43 = vadd.f32 %v2552_v5, %v2459_v57  ;;  %v3458_v2 = vmul.f32 %v17403_v31, %v3157_v58  ;;  %v17405_v22 = vrot.slane %v17404_v17, 5  ;;  %v17414_v12 = vld [vmem:[#allocation48_spill] sm:$0xff] }
 0x3ea   : > { %v3271_v27 = vrot.slane %v3208_v30, 1  ;;  %v3583_v44 = vmul.f32 %v17406_v26, %v3157_v58  ;;  %v3708_v38 = vmul.f32 %v14486_v9, %v3157_v58  ;;  %v2239_v24 = vadd.f32 %v2207_v18, %v2114_v32  ;;  %v17412_v9 = vld [vmem:[#allocation81_spill] sm:$0xff] }
 0x3eb   : > { %v2927_v50 = vsel %vm1196_vm4, %v17405_v22, %v2926_v0  ;;  %v2709_v8 = vadd.f32 %v2677_v35, %v2584_v43  ;;  %v3396_v37 = vrot.slane %v3333_v47, 2  ;;  %v3521_v42 = vrot.slane %v3458_v2, 3  ;;  %v17410_v0 = vld [vmem:[#allocation73_spill] sm:$0xff]  ;;  %v17418_v47 = vld [vmem:[#allocation32_spill] sm:$0xff]  ;;  %v14827_v2 = vpop.xlane.xlu0 %6529  ;;  %v17420_v22 = vld [vmem:[#allocation94_spill] sm:$0xff] }
 0x3ec   : > { %v17408_v19 = vrot.slane %v17407_v39, 1  ;;  %v3646_v11 = vrot.slane %v3583_v44, 4  ;;  %v3771_v33 = vrot.slane %v3708_v38, 5  ;;  %v3833_v57 = vmul.f32 %v17409_v49, %v3157_v58  ;;  %v17416_v43 = vld [vmem:[#allocation77_spill] sm:$0xff] }
 0x3ed   : > { %v2834_v45 = vadd.f32 %v2802_v4, %v2709_v8  ;;  %v17411_v62 = vrot.slane %v17410_v0, 6  ;;  %v17413_v18 = vrot.slane %v17412_v9, 2  ;;  %v2271_v54 = vadd.f32 %v2239_v24, %v1426_v16  ;;  %v17421_v16 = vld [vmem:[#allocation92_spill] sm:$0xff]  ;;  %v17422_v44 = vld [vmem:[#allocation85_spill] sm:$0xff]  ;;  %v17423_v24 = vld [vmem:[#allocation86_spill] sm:$0xff] }
 0x3ee   : > { %v3272_v5 = vsel %vm692_vm0, %v17408_v19, %v3271_v27  ;;  %v17415_v30 = vrot.slane %v17414_v12, 3  ;;  %v17417_v36 = vrot.slane %v17416_v43, 4  ;;  %v17419_v4 = vrot.slane %v17418_v47, 5 }
 0x3ef   : > { %v3052_v34 = vsel %vm1322_vm5, %v17411_v62, %v3051_v13  ;;  %v3304_v52 = vadd.f32 %v3272_v5, %v3179_v6  ;;  %v3397_v35 = vsel %vm818_vm1, %v17413_v18, %v3396_v37  ;;  %v2959_v13 = vadd.f32 %v2927_v50, %v2834_v45  ;;  %v17424_v37 = vld [vmem:[#allocation36_spill] sm:$0xff]  ;;  %v17425_v62 = vld [vmem:[#allocation18_spill] sm:$0xff] }
 0x3f0   : > { %v3522_v32 = vsel %vm944_vm2, %v17415_v30, %v3521_v42  ;;  %v3647_v58 = vsel %vm1070_vm3, %v17417_v36, %v3646_v11  ;;  %v3772_v31 = vsel %vm1196_vm4, %v17419_v4, %v3771_v33  ;;  %v3896_v17 = vrot.slane %v3833_v57, 6  ;;  %v8267_v50 = vld [vmem:[%s15312_s1 + $0x25] ss:$0 sm:$0xff]  ;;  %v14850_v4 = vpop.xlane.xlu0 %6531 }
 0x3f1   : > { %v3429_v6 = vadd.f32 %v3397_v35, %v3304_v52  ;;  %v4053_v27 = vmul.f32 %v17420_v22, %v4002_v41  ;;  %v4024_v26 = vmul.f32 %v17421_v16, %v14513_v28  ;;  %v4178_v38 = vmul.f32 %v17422_v44, %v4002_v41  ;;  %v8268_v28 = vld [vmem:[%s15312_s1 + $0x26] ss:$0 sm:$0xff]  ;;  %v4847_v35 = vld [vmem:[#allocation2 + $0x130] sm:$0x3f]  ;;  %v8272_v16 = vld [vmem:[%s15312_s1 + $0x28] ss:$0 sm:$0xff] }
 0x3f2   : > { %v4303_v8 = vmul.f32 %v17423_v24, %v4002_v41  ;;  %v4428_v42 = vmul.f32 %v17424_v37, %v4002_v41  ;;  %v3084_v39 = vadd.f32 %v3052_v34, %v2959_v13  ;;  %v4553_v11 = vmul.f32 %v8267_v50, %v4002_v41 }
 0x3f3   : > { %v3554_v19 = vadd.f32 %v3522_v32, %v3429_v6  ;;  %v4116_v5 = vrot.slane %v4053_v27, 1  ;;  %v4241_v33 = vrot.slane %v4178_v38, 2  ;;  %v4678_v45 = vmul.f32 %v8268_v28, %v4002_v41  ;;  %v17428_v32 = vld [vmem:[#allocation74_spill] sm:$0xff]  ;;  %v8270_v27 = vld [vmem:[%s15312_s1 + $0x2a] ss:$0 sm:$0xff] }
 0x3f4   : > { %v4366_v49 = vrot.slane %v4303_v8, 3  ;;  %v4491_v57 = vrot.slane %v4428_v42, 4  ;;  %v17426_v52 = vrot.slane %v17425_v62, 6  ;;  %v17427_v9 = vrot.slane %v14537_v53, 1  ;;  %v8274_v38 = vld [vmem:[%s15312_s1 + $0x2c] ss:$0 sm:$0xff]  ;;  %v6534_v42 = vpop.xlane.xlu1 %6533 }
 0x3f5   : > { %v3679_v0 = vadd.f32 %v3647_v58, %v3554_v19  ;;  %v3116_v12 = vadd.f32 %v3084_v39, %v2271_v54  ;;  %v17429_v43 = vrot.slane %v17428_v32, 2  ;;  %v4616_v47 = vrot.slane %v4553_v11, 5  ;;  %v8269_v54 = vld [vmem:[%s15312_s1 + $0x29] ss:$0 sm:$0xff]  ;;  %v8275_v8 = vld [vmem:[%s15312_s1 + $0x2d] ss:$0 sm:$0xff] }
 0x3f6   : > { %v3897_v34 = vsel %vm1322_vm5, %v17426_v52, %v3896_v17  ;;  %v4117_v18 = vsel %vm692_vm0, %v17427_v9, %v4116_v5  ;;  %v4367_v58 = vsel %vm944_vm2, %v4364_v29, %v4366_v49  ;;  %v17430_v13 = vrot.slane %v14572_v21, 4  ;;  %v8276_v28 = vld [vmem:[%s15312_s1 + $0x2e] ss:$0 sm:$0xff] }
 0x3f7   : > { %v4149_v30 = vadd.f32 %v4117_v18, %v4024_v26  ;;  %v4242_v36 = vsel %vm818_vm1, %v17429_v43, %v4241_v33  ;;  %v3804_v41 = vadd.f32 %v3772_v31, %v3679_v0  ;;  %v4741_v6 = vrot.slane %v4678_v45, 6  ;;  %v8273_v26 = vld [vmem:[#allocation2 + $0x128] sm:$0xff] }
 0x3f8   : > { %v4492_v53 = vsel %vm1070_vm3, %v17430_v13, %v4491_v57  ;;  %v4898_v22 = vmul.f32 %v8269_v54, %v4847_v35  ;;  %v5023_v31 = vmul.f32 %v8270_v27, %v4847_v35  ;;  %v5148_v29 = vmul.f32 %v8271_v51, %v4847_v35  ;;  %v5692_v0 = vld [vmem:[#allocation2 + $0x148] sm:$0x3f]  ;;  %v8281_v54 = vld [vmem:[%s15312_s1 + $0x34] ss:$0 sm:$0xff]  ;;  %v6536_v27 = vpop.xlane.xlu1 %6535 }
 0x3f9   : > { %v4274_v17 = vadd.f32 %v4242_v36, %v4149_v30  ;;  %v3929_v21 = vadd.f32 %v3897_v34, %v3804_v41  ;;  %v4869_v44 = vmul.f32 %v8273_v26, %v8272_v16  ;;  %v5273_v24 = vmul.f32 %v8274_v38, %v4847_v35  ;;  %v6538_v30 = vpop.xlane.xlu0 %6537 }
 0x3fa   : > { %v5398_v37 = vmul.f32 %v8275_v8, %v4847_v35  ;;  %v4961_v19 = vrot.slane %v4898_v22, 1  ;;  %v5086_v5 = vrot.slane %v5023_v31, 2  ;;  %v5211_v50 = vrot.slane %v5148_v29, 3  ;;  %v8283_v8 = vld [vmem:[%s15312_s1 + $0x36] ss:$0 sm:$0xff] }
 0x3fb   : > { %v4399_v39 = vadd.f32 %v4367_v58, %v4274_v17  ;;  %v17431_v11 = vrot.slane %v14588_v55, 5  ;;  %v17432_v49 = vrot.slane %v14596_v3, 6  ;;  %v5523_v45 = vmul.f32 %v8276_v28, %v4847_v35 }
 0x3fc   : > { %v17433_v52 = vrot.slane %v14606_v1, 1  ;;  %v17434_v9 = vrot.slane %v14615_v7, 2  ;;  %v5336_v18 = vrot.slane %v5273_v24, 4  ;;  %v3961_v3 = vadd.f32 %v3929_v21, %v3116_v12  ;;  %v8277_v1 = vld [vmem:[%s15312_s1 + $0x31] ss:$0 sm:$0xff] }
 0x3fd   : > { %v4617_v33 = vsel %vm1196_vm4, %v17431_v11, %v4616_v47  ;;  %v4742_v57 = vsel %vm1322_vm5, %v17432_v49, %v4741_v6  ;;  %v4524_v62 = vadd.f32 %v4492_v53, %v4399_v39  ;;  %v17435_v43 = vrot.slane %v14626_v46, 3  ;;  %v8278_v7 = vld [vmem:[%s15312_s1 + $0x32] ss:$0 sm:$0xff]  ;;  %v8279_v46 = vld [vmem:[%s15312_s1 + $0x30] ss:$0 sm:$0xff] }
 0x3fe   : > { %v4962_v34 = vsel %vm692_vm0, %v17433_v52, %v4961_v19  ;;  %v5087_v55 = vsel %vm818_vm1, %v17434_v9, %v5086_v5  ;;  %v5461_v47 = vrot.slane %v5398_v37, 5  ;;  %v5586_v41 = vrot.slane %v5523_v45, 6  ;;  %v8280_v6 = vld [vmem:[%s15312_s1 + $0x33] ss:$0 sm:$0xff]  ;;  %v6540_v9 = vpop.xlane.xlu1 %6539 }
 0x3ff   : > { %v4994_v32 = vadd.f32 %v4962_v34, %v4869_v44  ;;  %v5212_v36 = vsel %vm944_vm2, %v17435_v43, %v5211_v50  ;;  %v4649_v35 = vadd.f32 %v4617_v33, %v4524_v62  ;;  %v5743_v58 = vmul.f32 %v8277_v1, %v5692_v0  ;;  %v6542_v33 = vpop.xlane.xlu0 %6541 }
 0x400   : > { %v5868_v13 = vmul.f32 %v8278_v7, %v5692_v0  ;;  %v5714_v12 = vmul.f32 %v8279_v46, %v14657_v23  ;;  %v5993_v17 = vmul.f32 %v8280_v6, %v5692_v0  ;;  %v6118_v22 = vmul.f32 %v8281_v54, %v5692_v0  ;;  %v8282_v23 = vld [vmem:[%s15312_s1 + $0x35] ss:$0 sm:$0xff] }
 0x401   : > { %v5119_v53 = vadd.f32 %v5087_v55, %v4994_v32  ;;  %v17436_v31 = vrot.slane %v14635_v59, 4  ;;  %v5806_v29 = vrot.slane %v5743_v58, 1  ;;  %v6243_v16 = vmul.f32 %v8282_v23, %v5692_v0 }
 0x402   : > { %v5931_v21 = vrot.slane %v5868_v13, 2  ;;  %v17437_v44 = vrot.slane %v14646_v48, 5  ;;  %v6056_v24 = vrot.slane %v5993_v17, 3  ;;  %v6368_v59 = vmul.f32 %v8283_v8, %v5692_v0  ;;  %v17446_v17 = vld [vmem:[#allocation80_spill] sm:$0xff]  ;;  %v6544_v60 = vpop.xlane.xlu1 %6543 }
 0x403   : > { %v5337_v51 = vsel %vm1070_vm3, %v17436_v31, %v5336_v18  ;;  %v5244_v26 = vadd.f32 %v5212_v36, %v5119_v53  ;;  %v4774_v37 = vadd.f32 %v4742_v57, %v4649_v35  ;;  %v17438_v39 = vrot.slane %v14671_v61, 1  ;;  %v17443_v35 = vld [vmem:[#allocation14_spill] sm:$0xff]  ;;  %v6546_v58 = vpop.xlane.xlu0 %6545  ;;  %v17445_v53 = vld [vmem:[#allocation35_spill] sm:$0xff] }
 0x404   : > { %v5462_v38 = vsel %vm1196_vm4, %v17437_v44, %v5461_v47  ;;  %v17439_v5 = vrot.slane %v14676_v10, 2  ;;  %v6181_v11 = vrot.slane %v6118_v22, 4  ;;  %v17440_v49 = vrot.slane %v14655_v56, 6  ;;  %v17442_v47 = vld [vmem:[#allocation71_spill] sm:$0xff] }
 0x405   : > { %v5807_v19 = vsel %vm692_vm0, %v17438_v39, %v5806_v29  ;;  %v5369_v48 = vadd.f32 %v5337_v51, %v5244_v26  ;;  %v6057_v57 = vsel %vm944_vm2, %v6054_v20, %v6056_v24  ;;  %v6306_v0 = vrot.slane %v6243_v16, 5  ;;  %v17448_v26 = vld [vmem:[#allocation72_spill] sm:$0xff] }
 0x406   : > { %v5932_v50 = vsel %vm818_vm1, %v17439_v5, %v5931_v21  ;;  %v5587_v28 = vsel %vm1322_vm5, %v17440_v49, %v5586_v41  ;;  %v5839_v45 = vadd.f32 %v5807_v19, %v5714_v12  ;;  %v6561_v61 = vmul.f32 0.25, %v14827_v2 }
 0x407   : > { %v6563_v62 = vmul.f32 0.25, %v6534_v42  ;;  %v5494_v52 = vadd.f32 %v5462_v38, %v5369_v48  ;;  %v6431_v34 = vrot.slane %v6368_v59, 6  ;;  %v4806_v55 = vadd.f32 %v4774_v37, %v3961_v3  ;;  %v6550_v23 = vpop.xlane.xlu0 %6549  ;;  %v6548_v59 = vpop.xlane.xlu1 %6547  ;;  %v17449_v37 = vld [vmem:[#allocation29_spill] sm:$0xff] }
 0x408   : > { %v5964_v10 = vadd.f32 %v5932_v50, %v5839_v45  ;;  %v17441_v18 = vrot.slane %v14691_v40, 4  ;;  %v6562_v32 = vmul.f32 0.25, %v14850_v4  ;;  %v6593_v43 = vlaneseq }
 0x409   : > { %v5619_v36 = vadd.f32 %v5587_v28, %v5494_v52  ;;  %v6577_v20 = vsub.f32 %v17442_v47, %v6561_v61  ;;  %v6579_v41 = vsub.f32 %v17443_v35, %v6563_v62  ;;  %v17444_v2 = vrot.slane %v14707_v25, 5 }
 0x40a   : > { %v6182_v56 = vsel %vm1070_vm3, %v17441_v18, %v6181_v11  ;;  %v6089_v15 = vadd.f32 %v6057_v57, %v5964_v10  ;;  %v14944_v1 = vand.u32 127, %v6593_v43  ;;  %v6565_v3 = vmul.f32 0.25, %v6538_v30  ;;  %v17450_v11 = vld [vmem:[#allocation40_spill] sm:$0xff]  ;;  %v17452_v10 = vld [vmem:[#allocation22_spill] sm:$0xff] }
 0x40b   : > { %v6307_v42 = vsel %vm1196_vm4, %v17444_v2, %v6306_v0  ;;  %v6432_v4 = vsel %vm1322_vm5, %v6429_v63, %v6431_v34  ;;  %v6564_v7 = vmul.f32 0.25, %v6536_v27  ;;  %v5651_v13 = vadd.f32 %v5619_v36, %v4806_v55  ;;  %v17447_v27 = vld [vmem:[#allocation67_spill] sm:$0xff]  ;;  %v6554_v28 = vpop.xlane.xlu0 %6553  ;;  %v17451_v57 = vld [vmem:[#allocation60_spill] sm:$0xff] }
 0x40c   : > { %v6214_v40 = vadd.f32 %v6182_v56, %v6089_v15  ;;  %v6578_v46 = vsub.f32 %v17445_v53, %v6562_v32  ;;  %vm6595_vm6 = vcmp.lt.s32.totalorder %v14944_v1, 4  ;;  %v6567_v12 = vmul.f32 0.25, %v6542_v33  ;;  %v17453_v32 = vld [vmem:[#allocation64_spill] sm:$0xff] }
 0x40d   : > { %v14953_v25 = vsel %vm6595_vm6, %v6577_v20, 0.0  ;;  %v6581_v30 = vsub.f32 %v17446_v17, %v6565_v3  ;;  %v14958_v54 = vsel %vm6595_vm6, %v6579_v41, 0.0  ;;  %v6580_v31 = vsub.f32 %v17447_v27, %v6564_v7  ;;  %v17454_v20 = vld [vmem:[#allocation54_spill] sm:$0xff]  ;;  %v6809_v27 = vld [vmem:[%s15316_s5 + $0x28] sm:$0xff] }
 0x40e   : > { %v6339_v6 = vadd.f32 %v6307_v42, %v6214_v40  ;;  %v6614_v63 = vmul.f32 %v14953_v25, %v14953_v25  ;;  %v6566_v51 = vmul.f32 0.25, %v6540_v9  ;;  %v6616_v29 = vmul.f32 %v14958_v54, %v14958_v54  ;;  %v6552_v9 = vpop.xlane.xlu1 %6551  ;;  %v17455_v42 = vld [vmem:[#allocation87_spill] sm:$0xff]  ;;  %v6806_v17 = vld [vmem:[%s15316_s5 + $0x10] sm:$0xff] }
 0x40f   : > { %v14967_v21 = vsel %vm6595_vm6, %v6578_v46, 0.0  ;;  %v6583_v44 = vsub.f32 %v17448_v26, %v6567_v12  ;;  %v14974_v38 = vsel %vm6595_vm6, %v6581_v30, 0.0  ;;  %v6569_v24 = vmul.f32 0.25, %v6546_v58  ;;  %v6804_v12 = vld [vmem:[%s15316_s5] sm:$0xff] }
 0x410   : > { %v6464_v22 = vadd.f32 %v6432_v4, %v6339_v6  ;;  %6630 = vadd.xlane.f32.xlu0 %v6614_v63  ;;  %v6615_v8 = vmul.f32 %v14967_v21, %v14967_v21  ;;  %v6582_v39 = vsub.f32 %v17449_v37, %v6566_v51  ;;  %v6568_v19 = vmul.f32 0.25, %v6544_v60  ;;  %v6805_v6 = vld [vmem:[%s15316_s5 + $0x8] sm:$0xff]  ;;  %v6807_v60 = vld [vmem:[%s15316_s5 + $0x18] sm:$0xff]  ;;  %v6810_v51 = vld [vmem:[%s15316_s5 + $0x30] sm:$0xff] }
 0x411   : > { %v14982_v5 = vsel %vm6595_vm6, %v6580_v31, 0.0  ;;  %v6618_v50 = vmul.f32 %v14974_v38, %v14974_v38  ;;  %v6585_v33 = vsub.f32 %v17450_v11, %v6569_v24  ;;  %v14989_v48 = vsel %vm6595_vm6, %v6583_v44, 0.0  ;;  %v6812_v24 = vld [vmem:[%s15316_s5 + $0x40] sm:$0xff]  ;;  %v6814_v11 = vld [vmem:[%s15316_s5 + $0x50] sm:$0xff] }
 0x412   : > { %v14969_v16 = vadd.f32 %v6464_v22, %v5651_v13  ;;  %v6571_v49 = vmul.f32 0.25, %v6550_v23  ;;  %v6617_v45 = vmul.f32 %v14982_v5, %v14982_v5  ;;  %v6584_v0 = vsub.f32 %v17451_v57, %v6568_v19  ;;  %v6808_v22 = vld [vmem:[%s15316_s5 + $0x20] sm:$0xff] }
 0x413   : > { %v6570_v61 = vmul.f32 0.25, %v6548_v59  ;;  %v14996_v62 = vsel %vm6595_vm6, %v6582_v39, 0.0  ;;  %v6620_v52 = vmul.f32 %v14989_v48, %v14989_v48  ;;  %v15003_v55 = vsel %vm6595_vm6, %v6585_v33, 0.0  ;;  %v17456_v59 = vld [vmem:[#allocation15_spill] sm:$0xff] }
 0x414   : > { %6559 = vadd.xlane.f32.xlu1 %v14969_v16  ;;  %6634 = vadd.xlane.f32.xlu0 %v6616_v29  ;;  %v6587_v34 = vsub.f32 %v17452_v10, %v6571_v49  ;;  %v6573_v18 = vmul.f32 0.25, %v6554_v28  ;;  %v6619_v56 = vmul.f32 %v14996_v62, %v14996_v62  ;;  %v6572_v36 = vmul.f32 0.25, %v6552_v9  ;;  %v6811_v29 = vld [vmem:[%s15316_s5 + $0x38] sm:$0xff]  ;;  %v6816_v28 = vld [vmem:[%s15316_s5 + $0x60] sm:$0xff] }
 0x415   : > { %v6586_v43 = vsub.f32 %v17453_v32, %v6570_v61  ;;  %v15010_v15 = vsel %vm6595_vm6, %v6584_v0, 0.0  ;;  %v6622_v47 = vmul.f32 %v15003_v55, %v15003_v55  ;;  %v7841_v30 = vpack.c.bf16 %v6805_v6, %v6804_v12  ;;  %v6815_v33 = vld [vmem:[%s15316_s5 + $0x58] sm:$0xff]  ;;  %v6818_v0 = vld [vmem:[%s15316_s5 + $0x70] sm:$0xff] }
 0x416   : > { %v6589_v35 = vsub.f32 %v17454_v20, %v6573_v18  ;;  %v15017_v41 = vsel %vm6595_vm6, %v6587_v34, 0.0  ;;  %v6621_v2 = vmul.f32 %v15010_v15, %v15010_v15  ;;  %v6588_v3 = vsub.f32 %v17455_v42, %v6572_v36  ;;  %v6819_v61 = vld [vmem:[%s15316_s5 + $0x78] sm:$0xff] }
 0x417   : > { %v15024_v58 = vsel %vm6595_vm6, %v6586_v43, 0.0  ;;  %v6624_v40 = vmul.f32 %v15017_v41, %v15017_v41  ;;  %v7845_v63 = vpack.c.bf16 %v6807_v60, %v6806_v17  ;;  %7842 = vmatprep.subr.bf16.mxu0 %v7841_v30  ;;  %v7849_v31 = vpack.c.bf16 %v6809_v27, %v6808_v22 }
 0x418   : > { %6632 = vadd.xlane.f32.xlu1 %v6615_v8  ;;  %6638 = vadd.xlane.f32.xlu0 %v6618_v50  ;;  %v15030_v4 = vsel %vm6595_vm6, %v6589_v35, 0.0  ;;  %v6623_v7 = vmul.f32 %v15024_v58, %v15024_v58  ;;  %v15036_v13 = vsel %vm6595_vm6, %v6588_v3, 0.0  ;;  %v7853_v44 = vpack.c.bf16 %v6811_v29, %v6810_v51  ;;  %v6813_v8 = vld [vmem:[%s15316_s5 + $0x48] sm:$0xff]  ;;  %v15114_v51 = vld [vmem:[%s15314_s3] ss:$0 sm:$0xff] }
 0x419   : > { %v6626_v53 = vmul.f32 %v15030_v4, %v15030_v4  ;;  %v6625_v46 = vmul.f32 %v15036_v13, %v15036_v13  ;;  %7844 = vmatpush3.bf16.msra.mxu0 %v7841_v30  ;;  %v7857_v19 = vpack.c.bf16 %v6813_v8, %v6812_v24  ;;  %v7861_v49 = vpack.c.bf16 %v6815_v33, %v6814_v11  ;;  %v15120_v24 = vld [vmem:[%s15315_s4] ss:$0 sm:$0xff] }
 0x41a   : > { %7846 = vmatprep.subr.bf16.mxu0 %v7845_v63 }
 0x41c   : > { %6636 = vadd.xlane.f32.xlu1 %v6617_v45  ;;  %6642 = vadd.xlane.f32.xlu0 %v6620_v52  ;;  %v6817_v45 = vld [vmem:[%s15316_s5 + $0x68] sm:$0xff]  ;;  %v7869_v52 = vpack.c.bf16 %v6819_v61, %v6818_v0 }
 0x41d   : > { %7848 = vmatpush3.bf16.msra.mxu0 %v7845_v63  ;;  %v7865_v57 = vpack.c.bf16 %v6817_v45, %v6816_v28 }
 0x41e   : > { %7850 = vmatprep.subr.bf16.mxu0 %v7849_v31 }
 0x420   : > { %6640 = vadd.xlane.f32.xlu1 %v6619_v56  ;;  %6646 = vadd.xlane.f32.xlu0 %v6622_v47 }
 0x421   : > { %7852 = vmatpush3.bf16.msra.mxu0 %v7849_v31 }
 0x422   : > { %7854 = vmatprep.subr.bf16.mxu0 %v7853_v44 }
 0x424   : > { %6644 = vadd.xlane.f32.xlu1 %v6621_v2  ;;  %6650 = vadd.xlane.f32.xlu0 %v6624_v40 }
 0x425   : > { %7856 = vmatpush3.bf16.msra.mxu0 %v7853_v44 }
 0x426   : > { %7858 = vmatprep.subr.bf16.mxu0 %v7857_v19 }
 0x428   : > { %6648 = vadd.xlane.f32.xlu1 %v6623_v7  ;;  %6654 = vadd.xlane.f32.xlu0 %v6626_v53  ;;  %v6556_v23 = vpop.xlane.xlu1 %6555 }
 0x429   : > { %v6574_v26 = vmul.f32 0.25, %v6556_v23  ;;  %7860 = vmatpush3.bf16.msra.mxu0 %v7857_v19 }
 0x42a   : > { %7862 = vmatprep.subr.bf16.mxu0 %v7861_v49 }
 0x42b   : > { %v6590_v37 = vsub.f32 %v17456_v59, %v6574_v26 }
 0x42c   : > { %6652 = vadd.xlane.f32.xlu1 %v6625_v46 }
 0x42d   : > { %v15075_v39 = vsel %vm6595_vm6, %v6590_v37, 0.0  ;;  %7864 = vmatpush3.bf16.msra.mxu0 %v7861_v49 }
 0x42e   : > { %v6627_v50 = vmul.f32 %v15075_v39, %v15075_v39  ;;  %7866 = vmatprep.subr.bf16.mxu0 %v7865_v57 }
 0x430   : > { %6656 = vadd.xlane.f32.xlu1 %v6627_v50 }
 0x431   : > { %7868 = vmatpush3.bf16.msra.mxu0 %v7865_v57 }
 0x432   : > { %7870 = vmatprep.subr.bf16.mxu0 %v7869_v52 }
 0x435   : > { %7872 = vmatpush3.bf16.msra.mxu0 %v7869_v52 }
 0x46a   : > { %v6558_v10 = vpop.xlane.xlu0 %6557 }
 0x46b   : > { %v6575_v34 = vmul.f32 0.25, %v6558_v10 }
 0x46d   : > { %v6591_v9 = vsub.f32 %v14753_v14, %v6575_v34 }
 0x46f   : > { %v15100_v18 = vsel %vm6595_vm6, %v6591_v9, 0.0 }
 0x470   : > { %v6628_v56 = vmul.f32 %v15100_v18, %v15100_v18 }
 0x472   : > { %6658 = vadd.xlane.f32.xlu0 %v6628_v56 }
 0x49d   : > { %v6631_v32 = vpop.xlane.xlu0 %6630 }
 0x49e   : > { %v6662_v43 = vmul.f32 0.25, %v6631_v32 }
 0x4a0   : > { %v6678_v47 = vadd.f32 1e-06, %v6662_v43 }
 0x4a1   : > { %v6560_v36 = vpop.xlane.xlu1 %6559  ;;  %v6635_v35 = vpop.xlane.xlu0 %6634 }
 0x4a2   : > { %v6576_v20 = vmul.f32 0.25, %v6560_v36  ;;  %7945 = vrsqrt.f32 %v6678_v47  ;;  %v6664_v2 = vmul.f32 0.25, %v6635_v35 }
 0x4a4   : > { %v6592_v42 = vsub.f32 %v14969_v16, %v6576_v20  ;;  %v6680_v14 = vadd.f32 1e-06, %v6664_v2 }
 0x4a5   : > { %v6633_v3 = vpop.xlane.xlu1 %6632  ;;  %v6639_v53 = vpop.xlane.xlu0 %6638 }
 0x4a6   : > { %v15107_v40 = vsel %vm6595_vm6, %v6592_v42, 0.0  ;;  %v6663_v7 = vmul.f32 0.25, %v6633_v3  ;;  %7947 = vrsqrt.f32 %v6680_v14  ;;  %v6666_v12 = vmul.f32 0.25, %v6639_v53 }
 0x4a7   : > { %v6629_v46 = vmul.f32 %v15107_v40, %v15107_v40 }
 0x4a8   : > { %v6679_v6 = vadd.f32 1e-06, %v6663_v7  ;;  %v6682_v30 = vadd.f32 1e-06, %v6666_v12 }
 0x4a9   : > { %6660 = vadd.xlane.f32.xlu1 %v6629_v46  ;;  %v6637_v17 = vpop.xlane.xlu1 %6636  ;;  %v6643_v16 = vpop.xlane.xlu0 %6642 }
 0x4aa   : > { %7949 = vrsqrt.f32 %v6679_v6  ;;  %v6665_v60 = vmul.f32 0.25, %v6637_v17  ;;  %v6668_v63 = vmul.f32 0.25, %v6643_v16 }
 0x4ab   : > { %7951 = vrsqrt.f32 %v6682_v30 }
 0x4ac   : > { %v6681_v22 = vadd.f32 1e-06, %v6665_v60  ;;  %v7946_v1 = vpop.eup %7945  ;;  %v6684_v31 = vadd.f32 1e-06, %v6668_v63 }
 0x4ad   : > { %v6641_v27 = vpop.xlane.xlu1 %6640  ;;  %v6647_v23 = vpop.xlane.xlu0 %6646  ;;  %v6710_v26 = vmul.f32 %v7946_v1, %v14953_v25 }
 0x4ae   : > { %7953 = vrsqrt.f32 %v6681_v22  ;;  %v6667_v29 = vmul.f32 0.25, %v6641_v27  ;;  %v6670_v44 = vmul.f32 0.25, %v6647_v23 }
 0x4af   : > { %7955 = vrsqrt.f32 %v6684_v31  ;;  %v6733_v59 = vmul.f32 %v15114_v51, %v6710_v26 }
 0x4b0   : > { %v6683_v8 = vadd.f32 1e-06, %v6667_v29  ;;  %v7948_v37 = vpop.eup %7947  ;;  %v6686_v50 = vadd.f32 1e-06, %v6670_v44 }
 0x4b1   : > { %v6645_v19 = vpop.xlane.xlu1 %6644  ;;  %v6651_v33 = vpop.xlane.xlu0 %6650  ;;  %v6756_v49 = vadd.f32 %v15120_v24, %v6733_v59  ;;  %v6712_v25 = vmul.f32 %v7948_v37, %v14958_v54 }
 0x4b2   : > { %7957 = vrsqrt.f32 %v6683_v8  ;;  %v6669_v11 = vmul.f32 0.25, %v6645_v19  ;;  %v6672_v28 = vmul.f32 0.25, %v6651_v33 }
 0x4b3   : > { %7959 = vrsqrt.f32 %v6686_v50  ;;  %7761 = vmatprep.mubr.f32.mxu0 %v6756_v49  ;;  %v6735_v0 = vmul.f32 %v15114_v51, %v6712_v25 }
 0x4b4   : > { %v7950_v45 = vpop.eup %7949  ;;  %v6685_v57 = vadd.f32 1e-06, %v6669_v11  ;;  %v6688_v10 = vadd.f32 1e-06, %v6672_v28 }
 0x4b5   : > { %v7952_v61 = vpop.eup %7951  ;;  %v6649_v52 = vpop.xlane.xlu1 %6648  ;;  %v6711_v34 = vmul.f32 %v7950_v45, %v14967_v21  ;;  %v6758_v20 = vadd.f32 %v15120_v24, %v6735_v0  ;;  %v7053_v0 = vld [vmem:[%s15318_s7 + $0x8] sm:$0xff] }
 0x4b6   : > { %7961 = vrsqrt.f32 %v6685_v57  ;;  %v6671_v9 = vmul.f32 0.25, %v6649_v52  ;;  %v6655_v56 = vpop.xlane.xlu0 %6654  ;;  %v6714_v32 = vmul.f32 %v7952_v61, %v14974_v38  ;;  %v7052_v57 = vld [vmem:[%s15318_s7] sm:$0xff]  ;;  %v7054_v61 = vld [vmem:[%s15318_s7 + $0x10] sm:$0xff] }
 0x4b7   : > { %7963 = vrsqrt.f32 %v6688_v10  ;;  %v6674_v43 = vmul.f32 0.25, %v6655_v56  ;;  %v6734_v54 = vmul.f32 %v15114_v51, %v6711_v34  ;;  %v7873_v52 = vpack.c.bf16 %v7053_v0, %v7052_v57  ;;  %v7055_v10 = vld [vmem:[%s15318_s7 + $0x18] sm:$0xff]  ;;  %v7057_v56 = vld [vmem:[%s15318_s7 + $0x28] sm:$0xff] }
 0x4b8   : > { %v7954_v36 = vpop.eup %7953  ;;  %v6687_v47 = vadd.f32 1e-06, %v6671_v9  ;;  %v6737_v35 = vmul.f32 %v15114_v51, %v6714_v32  ;;  %v7877_v34 = vpack.c.bf16 %v7055_v10, %v7054_v61  ;;  %v7056_v9 = vld [vmem:[%s15318_s7 + $0x20] sm:$0xff] }
 0x4b9   : > { %v7956_v2 = vpop.eup %7955  ;;  %v6653_v42 = vpop.xlane.xlu1 %6652  ;;  %v6690_v3 = vadd.f32 1e-06, %v6674_v43  ;;  %v6757_v21 = vadd.f32 %v15120_v24, %v6734_v54  ;;  %v6713_v14 = vmul.f32 %v7954_v36, %v14982_v5  ;;  %7874 = vmatprep.subr.bf16.mxu1 %v7873_v52  ;;  %v7881_v32 = vpack.c.bf16 %v7057_v56, %v7056_v9 }
 0x4ba   : > { %7965 = vrsqrt.f32 %v6687_v47  ;;  %v6673_v7 = vmul.f32 0.25, %v6653_v42  ;;  %v6716_v38 = vmul.f32 %v7956_v2, %v14989_v48  ;;  %v6760_v6 = vadd.f32 %v15120_v24, %v6737_v35  ;;  %7876 = vmatpush3.bf16.msra.mxu1 %v7873_v52 }
 0x4bb   : > { %7967 = vrsqrt.f32 %v6690_v3  ;;  %7762 = vmatmul.mubr.f32.vlgmr.msra.gmra.mrb[0].mxu0 %v6757_v21  ;;  %v6736_v53 = vmul.f32 %v15114_v51, %v6713_v14  ;;  %7878 = vmatprep.subr.bf16.mxu1 %v7877_v34 }
 0x4bc   : > { %v7958_v46 = vpop.eup %7957  ;;  %v6689_v12 = vadd.f32 1e-06, %v6673_v7  ;;  %7764 = vmatprep.mubr.f32.mxu0 %v6758_v20  ;;  %v6739_v17 = vmul.f32 %v15114_v51, %v6716_v38  ;;  %v7059_v7 = vld [vmem:[%s15318_s7 + $0x38] sm:$0xff] }
 0x4bd   : > { %v7960_v30 = vpop.eup %7959  ;;  %v6759_v60 = vadd.f32 %v15120_v24, %v6736_v53  ;;  %v6715_v5 = vmul.f32 %v7958_v46, %v14996_v62  ;;  %v6657_v19 = vpop.xlane.xlu1 %6656  ;;  %v7061_v53 = vld [vmem:[%s15318_s7 + $0x48] sm:$0xff] }
 0x4be   : > { %7969 = vrsqrt.f32 %v6689_v12  ;;  %v6718_v16 = vmul.f32 %v7960_v30, %v15003_v55  ;;  %v6762_v22 = vadd.f32 %v15120_v24, %v6739_v17  ;;  %7880 = vmatpush3.bf16.msra.mxu1 %v7877_v34  ;;  %v7062_v12 = vld [vmem:[%s15318_s7 + $0x50] sm:$0xff]  ;;  %v7064_v30 = vld [vmem:[%s15318_s7 + $0x60] sm:$0xff] }
 0x4bf   : > { %7765 = vmatmul.mubr.f32.gmra.mrb[2].mxu0 %v6759_v60  ;;  %v6738_v48 = vmul.f32 %v15114_v51, %v6715_v5  ;;  %7882 = vmatprep.subr.bf16.mxu1 %v7881_v32  ;;  %v7065_v60 = vld [vmem:[%s15318_s7 + $0x68] sm:$0xff] }
 0x4c0   : > { %v7962_v63 = vpop.eup %7961  ;;  %7767 = vmatprep.mubr.f32.mxu0 %v6760_v6  ;;  %v6741_v1 = vmul.f32 %v15114_v51, %v6718_v16  ;;  %v7063_v6 = vld [vmem:[%s15318_s7 + $0x58] sm:$0xff]  ;;  %v7897_v5 = vpack.c.bf16 %v7065_v60, %v7064_v30  ;;  %v7066_v16 = vld [vmem:[%s15318_s7 + $0x70] sm:$0xff] }
 0x4c1   : > { %v7964_v27 = vpop.eup %7963  ;;  %v6761_v31 = vadd.f32 %v15120_v24, %v6738_v48  ;;  %v6717_v29 = vmul.f32 %v7962_v63, %v15010_v15  ;;  %v6675_v15 = vmul.f32 0.25, %v6657_v19  ;;  %v7893_v17 = vpack.c.bf16 %v7063_v6, %v7062_v12  ;;  %v7067_v48 = vld [vmem:[%s15318_s7 + $0x78] sm:$0xff] }
 0x4c2   : > { %v6720_v23 = vmul.f32 %v7964_v27, %v15017_v41  ;;  %v6764_v26 = vadd.f32 %v15120_v24, %v6741_v1  ;;  %7884 = vmatpush3.bf16.msra.mxu1 %v7881_v32  ;;  %v7901_v63 = vpack.c.bf16 %v7067_v48, %v7066_v16 }
 0x4c3   : > { %7768 = vmatmul.mubr.f32.gmra.mrb[4].mxu0 %v6761_v31  ;;  %v6740_v62 = vmul.f32 %v15114_v51, %v6717_v29  ;;  %v6691_v25 = vadd.f32 1e-06, %v6675_v15 }
 0x4c4   : > { %v7966_v55 = vpop.eup %7965  ;;  %7770 = vmatprep.mubr.f32.mxu0 %v6762_v22  ;;  %v6743_v44 = vmul.f32 %v15114_v51, %v6720_v23 }
 0x4c5   : > { %v7968_v8 = vpop.eup %7967  ;;  %v6763_v59 = vadd.f32 %v15120_v24, %v6740_v62  ;;  %v6719_v37 = vmul.f32 %v7966_v55, %v15024_v58  ;;  %7971 = vrsqrt.f32 %v6691_v25  ;;  %v15220_v55 = vld [vmem:[%s15317_s6] ss:$0 sm:$0xff] }
 0x4c6   : > { %v6722_v50 = vmul.f32 %v7968_v8, %v15030_v4  ;;  %v6766_v33 = vadd.f32 %v15120_v24, %v6743_v44 }
 0x4c7   : > { %7771 = vmatmul.mubr.f32.gmra.mrb[6].mxu0 %v6763_v59  ;;  %v6742_v41 = vmul.f32 %v15114_v51, %v6719_v37 }
 0x4c8   : > { %v7970_v11 = vpop.eup %7969  ;;  %7773 = vmatprep.mubr.f32.mxu0 %v6764_v26  ;;  %v6745_v49 = vmul.f32 %v15114_v51, %v6722_v50 }
 0x4c9   : > { %v6765_v28 = vadd.f32 %v15120_v24, %v6742_v41  ;;  %v6721_v45 = vmul.f32 %v7970_v11, %v15036_v13 }
 0x4ca   : > { %v6768_v4 = vadd.f32 %v15120_v24, %v6745_v49 }
 0x4cb   : > { %7774 = vmatmul.mubr.f32.gmra.mrb[8].mxu0 %v6765_v28  ;;  %v6744_v58 = vmul.f32 %v15114_v51, %v6721_v45 }
 0x4cc   : > { %7776 = vmatprep.mubr.f32.mxu0 %v6766_v33 }
 0x4cd   : > { %v6767_v13 = vadd.f32 %v15120_v24, %v6744_v58 }
 0x4cf   : > { %7777 = vmatmul.mubr.f32.gmra.mrb[10].mxu0 %v6767_v13  ;;  %v7972_v43 = vpop.eup %7971 }
 0x4d0   : > { %7779 = vmatprep.mubr.f32.mxu0 %v6768_v4  ;;  %v6723_v54 = vmul.f32 %v7972_v43, %v15075_v39  ;;  %v7058_v39 = vld [vmem:[%s15318_s7 + $0x30] sm:$0xff] }
 0x4d1   : > { %v7885_v38 = vpack.c.bf16 %v7059_v7, %v7058_v39 }
 0x4d2   : > { %v6746_v36 = vmul.f32 %v15114_v51, %v6723_v54 }
 0x4d3   : > { %7886 = vmatprep.subr.bf16.mxu1 %v7885_v38 }
 0x4d4   : > { %v6769_v47 = vadd.f32 %v15120_v24, %v6746_v36  ;;  %7888 = vmatpush3.bf16.msra.mxu1 %v7885_v38 }
 0x4d6   : > { %7780 = vmatmul.mubr.f32.gmra.mrb[12].mxu0 %v6769_v47 }
 0x4ff   : > { %v6659_v20 = vpop.xlane.xlu0 %6658 }
 0x500   : > { %v6676_v35 = vmul.f32 0.25, %v6659_v20 }
 0x502   : > { %v6692_v2 = vadd.f32 1e-06, %v6676_v35 }
 0x504   : > { %7973 = vrsqrt.f32 %v6692_v2 }
 0x50e   : > { %v7974_v42 = vpop.eup %7973 }
 0x50f   : > { %v6724_v3 = vmul.f32 %v7974_v42, %v15100_v18  ;;  %v7060_v18 = vld [vmem:[%s15318_s7 + $0x40] sm:$0xff] }
 0x510   : > { %v7889_v46 = vpack.c.bf16 %v7061_v53, %v7060_v18 }
 0x511   : > { %v6747_v21 = vmul.f32 %v15114_v51, %v6724_v3 }
 0x512   : > { %7890 = vmatprep.subr.bf16.mxu1 %v7889_v46 }
 0x513   : > { %v6770_v14 = vadd.f32 %v15120_v24, %v6747_v21  ;;  %7892 = vmatpush3.bf16.msra.mxu1 %v7889_v46 }
 0x514   : > { %7894 = vmatprep.subr.bf16.mxu1 %v7893_v17 }
 0x515   : > { %7782 = vmatprep.mubr.f32.mxu0 %v6770_v14 }
 0x517   : > { %7896 = vmatpush3.bf16.msra.mxu1 %v7893_v17 }
 0x518   : > { %7898 = vmatprep.subr.bf16.mxu1 %v7897_v5 }
 0x51b   : > { %7900 = vmatpush3.bf16.msra.mxu1 %v7897_v5 }
 0x51c   : > { %7902 = vmatprep.subr.bf16.mxu1 %v7901_v63 }
 0x51f   : > { %7904 = vmatpush3.bf16.msra.mxu1 %v7901_v63 }
 0x536   : > { %v6661_v22 = vpop.xlane.xlu1 %6660 }
 0x537   : > { %v6677_v1 = vmul.f32 0.25, %v6661_v22 }
 0x539   : > { %v6693_v27 = vadd.f32 1e-06, %v6677_v1 }
 0x53b   : > { %7975 = vrsqrt.f32 %v6693_v27 }
 0x545   : > { %v7976_v31 = vpop.eup %7975 }
 0x546   : > { %v6725_v29 = vmul.f32 %v7976_v31, %v15107_v40 }
 0x548   : > { %v6748_v23 = vmul.f32 %v15114_v51, %v6725_v29 }
 0x54a   : > { %v6771_v62 = vadd.f32 %v15120_v24, %v6748_v23 }
 0x54c   : > { %7783 = vmatmul.mubr.f32.gmra.mrb[14].mxu0 %v6771_v62 }
 0x58e   : > { %v7763_v26 = vpop.f32.mrb[0].mxu0 }
 0x58f   : > { %v6899_v44 = vadd.f32 %v7763_v26, %v15220_v55  ;;  %v6893_v8 = vpop.f32.mrb[1].mxu0 }
 0x590   : > { %v6894_v59 = vadd.f32 %v15220_v55, %v6893_v8 }
 0x591   : > { %v6989_v37 = vmul.f32 0.70710677, %v6899_v44  ;;  %v6973_v36 = vmul.f32 0.5, %v6899_v44 }
 0x592   : > { %v6988_v19 = vmul.f32 0.70710677, %v6894_v59  ;;  %v7766_v50 = vpop.f32.mrb[2].mxu0  ;;  %v6972_v43 = vmul.f32 0.5, %v6894_v59 }
 0x593   : > { %7977 = verf.f32 %v6989_v37  ;;  %v6909_v40 = vadd.f32 %v7766_v50, %v15220_v55  ;;  %v6903_v51 = vpop.f32.mrb[3].mxu0 }
 0x594   : > { %7979 = verf.f32 %v6988_v19  ;;  %v6904_v24 = vadd.f32 %v15220_v55, %v6903_v51 }
 0x595   : > { %v6991_v15 = vmul.f32 0.70710677, %v6909_v40  ;;  %v6975_v46 = vmul.f32 0.5, %v6909_v40 }
 0x596   : > { %v6990_v41 = vmul.f32 0.70710677, %v6904_v24  ;;  %v7769_v11 = vpop.f32.mrb[4].mxu0  ;;  %v6974_v7 = vmul.f32 0.5, %v6904_v24 }
 0x597   : > { %7981 = verf.f32 %v6991_v15  ;;  %v6919_v33 = vadd.f32 %v7769_v11, %v15220_v55  ;;  %v6913_v49 = vpop.f32.mrb[5].mxu0 }
 0x598   : > { %7983 = verf.f32 %v6990_v41  ;;  %v6914_v25 = vadd.f32 %v15220_v55, %v6913_v49 }
 0x599   : > { %v6993_v28 = vmul.f32 0.70710677, %v6919_v33  ;;  %v6977_v1 = vmul.f32 0.5, %v6919_v33 }
 0x59a   : > { %v6992_v45 = vmul.f32 0.70710677, %v6914_v25  ;;  %v7772_v58 = vpop.f32.mrb[6].mxu0  ;;  %v6976_v63 = vmul.f32 0.5, %v6914_v25 }
 0x59b   : > { %7985 = verf.f32 %v6993_v28  ;;  %v6929_v4 = vadd.f32 %v7772_v58, %v15220_v55  ;;  %v6923_v57 = vpop.f32.mrb[7].mxu0 }
 0x59c   : > { %7987 = verf.f32 %v6992_v45  ;;  %v6924_v0 = vadd.f32 %v15220_v55, %v6923_v57 }
 0x59d   : > { %v7978_v61 = vpop.eup %7977  ;;  %v6995_v13 = vmul.f32 0.70710677, %v6929_v4  ;;  %v6979_v8 = vmul.f32 0.5, %v6929_v4 }
 0x59e   : > { %v7980_v52 = vpop.eup %7979  ;;  %v7021_v10 = vadd.f32 1.0, %v7978_v61  ;;  %v6994_v34 = vmul.f32 0.70710677, %v6924_v0  ;;  %v7775_v9 = vpop.f32.mrb[8].mxu0  ;;  %v6978_v26 = vmul.f32 0.5, %v6924_v0 }
 0x59f   : > { %7989 = verf.f32 %v6995_v13  ;;  %v6939_v56 = vadd.f32 %v7775_v9, %v15220_v55  ;;  %v6933_v32 = vpop.f32.mrb[9].mxu0  ;;  %v7020_v54 = vadd.f32 1.0, %v7980_v52 }
 0x5a0   : > { %7991 = verf.f32 %v6994_v34  ;;  %v6934_v47 = vadd.f32 %v15220_v55, %v6933_v32  ;;  %v7037_v39 = vmul.f32 %v7021_v10, %v6973_v36 }
 0x5a1   : > { %v7982_v20 = vpop.eup %7981  ;;  %v6997_v35 = vmul.f32 0.70710677, %v6939_v56  ;;  %v7036_v2 = vmul.f32 %v7020_v54, %v6972_v43  ;;  %v6981_v41 = vmul.f32 0.5, %v6939_v56 }
 0x5a2   : > { %v7984_v42 = vpop.eup %7983  ;;  %v7023_v3 = vadd.f32 1.0, %v7982_v20  ;;  %v6996_v21 = vmul.f32 0.70710677, %v6934_v47  ;;  %v7778_v14 = vpop.f32.mrb[10].mxu0  ;;  %v6980_v51 = vmul.f32 0.5, %v6934_v47 }
 0x5a3   : > { %v7022_v38 = vadd.f32 1.0, %v7984_v42  ;;  %7993 = verf.f32 %v6997_v35  ;;  %v6949_v18 = vadd.f32 %v7778_v14, %v15220_v55  ;;  %v6943_v53 = vpop.f32.mrb[11].mxu0  ;;  %7817 = vmatprep.mubr.f32.mxu1 %v7036_v2 }
 0x5a4   : > { %7995 = verf.f32 %v6996_v21  ;;  %v6944_v12 = vadd.f32 %v15220_v55, %v6943_v53  ;;  %7818 = vmatmul.mubr.f32.vlgmr.msra.gmra.mrb[0].mxu1 %v7037_v39  ;;  %v7039_v48 = vmul.f32 %v7023_v3, %v6975_v46 }
 0x5a5   : > { %v7986_v6 = vpop.eup %7985  ;;  %v6999_v17 = vmul.f32 0.70710677, %v6949_v18  ;;  %v7038_v30 = vmul.f32 %v7022_v38, %v6974_v7  ;;  %v6983_v52 = vmul.f32 0.5, %v6949_v18 }
 0x5a6   : > { %v7988_v60 = vpop.eup %7987  ;;  %v7025_v5 = vadd.f32 1.0, %v7986_v6  ;;  %v6998_v16 = vmul.f32 0.70710677, %v6944_v12  ;;  %v6982_v0 = vmul.f32 0.5, %v6944_v12 }
 0x5a7   : > { %v7024_v22 = vadd.f32 1.0, %v7988_v60  ;;  %7997 = verf.f32 %v6999_v17  ;;  %7820 = vmatprep.mubr.f32.mxu1 %v7038_v30  ;;  %v15241_v17 = vld [vmem:[%s15319_s8] ss:$0 sm:$0xff] }
 0x5a8   : > { %7999 = verf.f32 %v6998_v16  ;;  %7821 = vmatmul.mubr.f32.gmra.mrb[2].mxu1 %v7039_v48  ;;  %v7041_v62 = vmul.f32 %v7025_v5, %v6977_v1  ;;  %v15246_v30 = vld [vmem:[%s15320_s9] ss:$0 sm:$0xff]  ;;  %v7289_v16 = vld [vmem:[#allocation2 + $0x53] sm:$0xff] }
 0x5a9   : > { %v7990_v27 = vpop.eup %7989  ;;  %v7040_v31 = vmul.f32 %v7024_v22, %v6976_v63  ;;  %v7781_v15 = vpop.f32.mrb[12].mxu0  ;;  %v7288_v22 = vld [vmem:[#allocation2 + $0x4b] sm:$0xff] }
 0x5aa   : > { %v7992_v29 = vpop.eup %7991  ;;  %v7027_v23 = vadd.f32 1.0, %v7990_v27  ;;  %v6959_v11 = vadd.f32 %v7781_v15, %v15220_v55  ;;  %v6953_v33 = vpop.f32.mrb[13].mxu0  ;;  %v7293_v15 = vld [vmem:[#allocation2 + $0x83] sm:$0xff] }
 0x5ab   : > { %v7026_v44 = vadd.f32 1.0, %v7992_v29  ;;  %7823 = vmatprep.mubr.f32.mxu1 %v7040_v31  ;;  %v6954_v25 = vadd.f32 %v15220_v55, %v6953_v33  ;;  %v7292_v33 = vld [vmem:[#allocation2 + $0x7b] sm:$0xff] }
 0x5ac   : > { %7824 = vmatmul.mubr.f32.gmra.mrb[4].mxu1 %v7041_v62  ;;  %v7043_v40 = vmul.f32 %v7027_v23, %v6979_v8  ;;  %v7001_v4 = vmul.f32 0.70710677, %v6959_v11  ;;  %v6985_v36 = vmul.f32 0.5, %v6959_v11 }
 0x5ad   : > { %v7994_v59 = vpop.eup %7993  ;;  %v7042_v37 = vmul.f32 %v7026_v44, %v6978_v26  ;;  %v7000_v13 = vmul.f32 0.70710677, %v6954_v25  ;;  %v6984_v43 = vmul.f32 0.5, %v6954_v25  ;;  %v7291_v26 = vld [vmem:[#allocation2 + $0x6b] sm:$0xff] }
 0x5ae   : > { %v7996_v19 = vpop.eup %7995  ;;  %v7029_v50 = vadd.f32 1.0, %v7994_v59  ;;  %8001 = verf.f32 %v7001_v4  ;;  %v7290_v59 = vld [vmem:[#allocation2 + $0x63] sm:$0xff] }
 0x5af   : > { %v7028_v24 = vadd.f32 1.0, %v7996_v19  ;;  %7826 = vmatprep.mubr.f32.mxu1 %v7042_v37  ;;  %8003 = verf.f32 %v7000_v13  ;;  %v7294_v13 = vld [vmem:[#allocation2 + $0x93] sm:$0xff] }
 0x5b0   : > { %7827 = vmatmul.mubr.f32.gmra.mrb[6].mxu1 %v7043_v40  ;;  %v7045_v57 = vmul.f32 %v7029_v50, %v6981_v41 }
 0x5b1   : > { %v7998_v49 = vpop.eup %7997  ;;  %v7044_v28 = vmul.f32 %v7028_v24, %v6980_v51 }
 0x5b2   : > { %v8000_v45 = vpop.eup %7999  ;;  %v7031_v58 = vadd.f32 1.0, %v7998_v49 }
 0x5b3   : > { %v7030_v61 = vadd.f32 1.0, %v8000_v45  ;;  %7829 = vmatprep.mubr.f32.mxu1 %v7044_v28 }
 0x5b4   : > { %7830 = vmatmul.mubr.f32.gmra.mrb[8].mxu1 %v7045_v57  ;;  %v7047_v34 = vmul.f32 %v7031_v58, %v6983_v52  ;;  %v7295_v57 = vld [vmem:[#allocation2 + $0x9b] sm:$0xff] }
 0x5b5   : > { %v7046_v10 = vmul.f32 %v7030_v61, %v6982_v0 }
 0x5b7   : > { %7832 = vmatprep.mubr.f32.mxu1 %v7046_v10 }
 0x5b8   : > { %7833 = vmatmul.mubr.f32.gmra.mrb[10].mxu1 %v7047_v34  ;;  %v8002_v9 = vpop.eup %8001 }
 0x5b9   : > { %v8004_v56 = vpop.eup %8003  ;;  %v7033_v32 = vadd.f32 1.0, %v8002_v9 }
 0x5ba   : > { %v7032_v54 = vadd.f32 1.0, %v8004_v56 }
 0x5bb   : > { %v7049_v20 = vmul.f32 %v7033_v32, %v6985_v36 }
 0x5bc   : > { %v7048_v47 = vmul.f32 %v7032_v54, %v6984_v43  ;;  %v7297_v43 = vld [vmem:[#allocation2 + $0xb3] sm:$0xff] }
 0x5be   : > { %7835 = vmatprep.mubr.f32.mxu1 %v7048_v47  ;;  %v7296_v47 = vld [vmem:[#allocation2 + $0xab] sm:$0xff] }
 0x5bf   : > { %7836 = vmatmul.mubr.f32.gmra.mrb[12].mxu1 %v7049_v20 }
 0x61f   : > { %v7784_v35 = vpop.f32.mrb[14].mxu0 }
 0x620   : > { %v6969_v2 = vadd.f32 %v7784_v35, %v15220_v55  ;;  %v6963_v42 = vpop.f32.mrb[15].mxu0 }
 0x621   : > { %v6964_v3 = vadd.f32 %v15220_v55, %v6963_v42 }
 0x622   : > { %v7003_v21 = vmul.f32 0.70710677, %v6969_v2  ;;  %v6987_v46 = vmul.f32 0.5, %v6969_v2 }
 0x623   : > { %v7002_v14 = vmul.f32 0.70710677, %v6964_v3  ;;  %v6986_v18 = vmul.f32 0.5, %v6964_v3 }
 0x624   : > { %8005 = verf.f32 %v7003_v21 }
 0x625   : > { %8007 = verf.f32 %v7002_v14  ;;  %v7299_v14 = vld [vmem:[#allocation2 + $0xcb] sm:$0xff] }
 0x62e   : > { %v8006_v39 = vpop.eup %8005 }
 0x62f   : > { %v8008_v7 = vpop.eup %8007  ;;  %v7035_v38 = vadd.f32 1.0, %v8006_v39 }
 0x630   : > { %v7034_v53 = vadd.f32 1.0, %v8008_v7 }
 0x631   : > { %v7051_v6 = vmul.f32 %v7035_v38, %v6987_v46  ;;  %v7298_v38 = vld [vmem:[#allocation2 + $0xc3] sm:$0xff] }
 0x632   : > { %v7050_v12 = vmul.f32 %v7034_v53, %v6986_v18 }
 0x634   : > { %7838 = vmatprep.mubr.f32.mxu1 %v7050_v12 }
 0x635   : > { %7839 = vmatmul.mubr.f32.gmra.mrb[14].mxu1 %v7051_v6 }
 0x677   : > { %v7819_v55 = vpop.f32.mrb[0].mxu1 }
 0x678   : > { %v7329_v60 = vadd.f32 %v7819_v55, %v15241_v17  ;;  %v7134_v5 = vpop.f32.mrb[1].mxu1 }
 0x679   : > { %v7328_v48 = vadd.f32 %v15241_v17, %v7134_v5 }
 0x67a   : > { %v7351_v63 = vmul.f32 %v15246_v30, %v7329_v60  ;;  %v7301_v60 = vld [vmem:[#allocation2 + $0xe3] sm:$0xff] }
 0x67b   : > { %v7350_v1 = vmul.f32 %v15246_v30, %v7328_v48  ;;  %v7822_v27 = vpop.f32.mrb[2].mxu1  ;;  %v7300_v48 = vld [vmem:[#allocation2 + $0xdb] sm:$0xff] }
 0x67c   : > { %v7367_v31 = vadd.f32 %v7351_v63, %v7289_v16  ;;  %v7331_v29 = vadd.f32 %v7822_v27, %v15241_v17  ;;  %v7144_v23 = vpop.f32.mrb[3].mxu1 }
 0x67d   : > { %v7366_v62 = vadd.f32 %v7350_v1, %v7288_v22  ;;  %v7330_v44 = vadd.f32 %v15241_v17, %v7144_v23  ;;  %v7303_v23 = vld [vmem:[#allocation2 + $0xfb] sm:$0xff] }
 0x67e   : > { %7383 = vst [vmem:[%s8414_s30 + $0x8] sm:$0xff] %v7367_v31  ;;  %v7353_v8 = vmul.f32 %v15246_v30, %v7331_v29 }
 0x67f   : > { %7382 = vst [vmem:[%s8414_s30] sm:$0xff] %v7366_v62  ;;  %v7352_v37 = vmul.f32 %v15246_v30, %v7330_v44  ;;  %v7825_v19 = vpop.f32.mrb[4].mxu1  ;;  %v7302_v44 = vld [vmem:[#allocation2 + $0xf3] sm:$0xff] }
 0x680   : > { %v7369_v50 = vadd.f32 %v7353_v8, %v7291_v26  ;;  %v7333_v40 = vadd.f32 %v7825_v19, %v15241_v17  ;;  %v7154_v51 = vpop.f32.mrb[5].mxu1 }
 0x681   : > { %v7368_v24 = vadd.f32 %v7352_v37, %v7290_v59  ;;  %v7332_v41 = vadd.f32 %v15241_v17, %v7154_v51 }
 0x682   : > { %7385 = vst [vmem:[%s8414_s30 + $0x18] sm:$0xff] %v7369_v50  ;;  %v7355_v11 = vmul.f32 %v15246_v30, %v7333_v40 }
 0x683   : > { %7384 = vst [vmem:[%s8414_s30 + $0x10] sm:$0xff] %v7368_v24  ;;  %v7354_v49 = vmul.f32 %v15246_v30, %v7332_v41  ;;  %v7828_v25 = vpop.f32.mrb[6].mxu1 }
 0x684   : > { %v7371_v28 = vadd.f32 %v7355_v11, %v7293_v15  ;;  %v7335_v45 = vadd.f32 %v7828_v25, %v15241_v17  ;;  %v7164_v58 = vpop.f32.mrb[7].mxu1 }
 0x685   : > { %v7370_v4 = vadd.f32 %v7354_v49, %v7292_v33  ;;  %v7334_v0 = vadd.f32 %v15241_v17, %v7164_v58 }
 0x686   : > { %7387 = vst [vmem:[%s8414_s30 + $0x28] sm:$0xff] %v7371_v28  ;;  %v7357_v61 = vmul.f32 %v15246_v30, %v7335_v45 }
 0x687   : > { %7386 = vst [vmem:[%s8414_s30 + $0x20] sm:$0xff] %v7370_v4  ;;  %v7356_v52 = vmul.f32 %v15246_v30, %v7334_v0  ;;  %v7831_v10 = vpop.f32.mrb[8].mxu1 }
 0x688   : > { %v7373_v34 = vadd.f32 %v7357_v61, %v7295_v57  ;;  %v7337_v9 = vadd.f32 %v7831_v10, %v15241_v17  ;;  %v7174_v56 = vpop.f32.mrb[9].mxu1 }
 0x689   : > { %v7372_v32 = vadd.f32 %v7356_v52, %v7294_v13  ;;  %v7336_v54 = vadd.f32 %v15241_v17, %v7174_v56 }
 0x68a   : > { %7389 = vst [vmem:[%s8414_s30 + $0x38] sm:$0xff] %v7373_v34  ;;  %v7359_v36 = vmul.f32 %v15246_v30, %v7337_v9 }
 0x68b   : > { %7388 = vst [vmem:[%s8414_s30 + $0x30] sm:$0xff] %v7372_v32  ;;  %v7358_v20 = vmul.f32 %v15246_v30, %v7336_v54  ;;  %v7834_v35 = vpop.f32.mrb[10].mxu1 }
 0x68c   : > { %v7375_v2 = vadd.f32 %v7359_v36, %v7297_v43  ;;  %v7339_v42 = vadd.f32 %v7834_v35, %v15241_v17  ;;  %v7184_v3 = vpop.f32.mrb[11].mxu1 }
 0x68d   : > { %v7374_v21 = vadd.f32 %v7358_v20, %v7296_v47  ;;  %v7338_v39 = vadd.f32 %v15241_v17, %v7184_v3 }
 0x68e   : > { %7391 = vst [vmem:[%s8414_s30 + $0x48] sm:$0xff] %v7375_v2  ;;  %v7361_v7 = vmul.f32 %v15246_v30, %v7339_v42 }
 0x68f   : > { %7390 = vst [vmem:[%s8414_s30 + $0x40] sm:$0xff] %v7374_v21  ;;  %v7360_v18 = vmul.f32 %v15246_v30, %v7338_v39 }
 0x690   : > { %v7377_v53 = vadd.f32 %v7361_v7, %v7299_v14 }
 0x691   : > { %v7376_v46 = vadd.f32 %v7360_v18, %v7298_v38 }
 0x692   : > { %7393 = vst [vmem:[%s8414_s30 + $0x58] sm:$0xff] %v7377_v53  ;;  %v7837_v12 = vpop.f32.mrb[12].mxu1 }
 0x693   : > { %7392 = vst [vmem:[%s8414_s30 + $0x50] sm:$0xff] %v7376_v46  ;;  %v7341_v6 = vadd.f32 %v7837_v12, %v15241_v17  ;;  %v7194_v55 = vpop.f32.mrb[13].mxu1 }
 0x694   : > { %v7340_v5 = vadd.f32 %v15241_v17, %v7194_v55 }
 0x695   : > { %v7363_v16 = vmul.f32 %v15246_v30, %v7341_v6 }
 0x696   : > { %v7362_v63 = vmul.f32 %v15246_v30, %v7340_v5 }
 0x697   : > { %v7379_v22 = vadd.f32 %v7363_v16, %v7301_v60 }
 0x698   : > { %v7378_v1 = vadd.f32 %v7362_v63, %v7300_v48 }
 0x699   : > { %7395 = vst [vmem:[%s8414_s30 + $0x68] sm:$0xff] %v7379_v22 }
 0x69a   : > { %7394 = vst [vmem:[%s8414_s30 + $0x60] sm:$0xff] %v7378_v1 }
 0x708   : > { %v7840_v27 = vpop.f32.mrb[14].mxu1 }
 0x709   : > { %v7343_v31 = vadd.f32 %v7840_v27, %v15241_v17  ;;  %v7204_v29 = vpop.f32.mrb[15].mxu1 }
 0x70a   : > { %v7342_v62 = vadd.f32 %v15241_v17, %v7204_v29 }
 0x70b   : > { %v7365_v26 = vmul.f32 %v15246_v30, %v7343_v31 }
 0x70c   : > { %v7364_v8 = vmul.f32 %v15246_v30, %v7342_v62 }
 0x70d   : > { %v7381_v59 = vadd.f32 %v7365_v26, %v7303_v23 }
 0x70e   : > { %v7380_v37 = vadd.f32 %v7364_v8, %v7302_v44 }
 0x70f   : > { %7397 = vst [vmem:[%s8414_s30 + $0x78] sm:$0xff] %v7381_v59 }
 0x710   : > { %7396 = vst [vmem:[%s8414_s30 + $0x70] sm:$0xff] %v7380_v37 }
 0x711 PF: > { %s20_s17 = sadd.s32 1, %s8324_s17   ;;  %s17457_s12 = sld [smem:[#allocation9_spill]] }
 0x712   : > { %p17_p7 = scmp.ge.s32.totalorder %s20_s17, 6   ;;  %s17458_s13 = smov %s8316_s15 }
 0x713   : > { %s17459_s14 = smov %s8320_s16  ;;  %s17460_s15 = smov %s17463_s18 }
 0x714   :  { %19 = sbr.rel (!%p17_p7) target bundleno = 3 (0x3), region = 173 }
 0x717   : > { %s17461_s16 = smov %s17457_s12 }
 0x71b   :  { %7428 = vsyncmov [#allocation6] }
 0x71e   :  { %s7429_s30 = vpop.sfrf %7428 }
 0x71f   :  { %p7664_p8 = scmp.ne.s32.totalorder %s7429_s30, 0 }
 0x721   :  { %7433 = shalt.err (%p7664_p8)  }

</bundles_post_ra>
